<compile_context>
chip_gen: v6e
topology: v6e:2x2x1
jax: 0.10.0
libtpu: 0.0.40
codegen_flags: <defaults>
</compile_context>

<pallas_src>
import functools
import math

import numpy as np
import jax
import jax.numpy as jnp
from jax.experimental import pallas as pl
from jax.experimental.pallas import tpu as pltpu

# ----------------------------- configuration --------------------------------
VOCAB = 50
MAX_TOKEN = 16
NUM_BLOCKS = 2
NUM_HEADS = 4
DIM = 32
IN_FEATURES = 32
OUT_FEATURES = 16
OUT_PAD = 128          # final projection padded to a full lane width (dense stores)
B = 2
S_ENC = 8
S_DEC = 8
NEG_INF = -1e9

_WEIGHT_KEYS = (
    "e_qkv_w", "e_qkv_b", "e_o_w", "e_o_b",
    "e_ffn_w1", "e_ffn_b1", "e_ffn_w2", "e_ffn_b2",
    "e_ln_g", "e_ln_b",
    "d_qkv_w", "d_qkv_b", "d_o_w", "d_o_b",
    "d_cq_w", "d_cq_b", "d_ckv_w", "d_ckv_b", "d_co_w", "d_co_b",
    "d_ffn_w1", "d_ffn_b1", "d_ffn_w2", "d_ffn_b2",
    "d_ln_g", "d_ln_b",
    "lin1_w", "lin1_b", "lin2_w", "lin2_b",
)


# ------------------------------ fused Pallas kernel --------------------------
def _fused_transformer_kernel(
    # per-batch-group activations / masks
    x_enc_ref, x_dec_ref, enc_bias_ref, dec_bias_ref,
    # encoder weights (stacked over blocks)
    e_qkv_w_ref, e_qkv_b_ref, e_o_w_ref, e_o_b_ref,
    e_ffn_w1_ref, e_ffn_b1_ref, e_ffn_w2_ref, e_ffn_b2_ref,
    e_ln_g_ref, e_ln_b_ref,
    # decoder self-attention
    d_qkv_w_ref, d_qkv_b_ref, d_o_w_ref, d_o_b_ref,
    # decoder cross-attention
    d_cq_w_ref, d_cq_b_ref, d_ckv_w_ref, d_ckv_b_ref, d_co_w_ref, d_co_b_ref,
    # decoder FFN / LayerNorm
    d_ffn_w1_ref, d_ffn_b1_ref, d_ffn_w2_ref, d_ffn_b2_ref,
    d_ln_g_ref, d_ln_b_ref,
    # output head
    lin1_w_ref, lin1_b_ref, lin2_w_ref, lin2_b_ref,
    # output
    out_ref,
    *, num_heads, num_blocks, bb, s_enc, s_dec):
  f32, bf16 = jnp.float32, jnp.bfloat16
  D = x_enc_ref.shape[-1]
  Dh = D // num_heads

  def mm(x_bf, w):
    # bf16 operands on the MXU, f32 accumulation.
    return jnp.dot(x_bf, w, preferred_element_type=f32)

  def row(ref, i):
    # flat lane-dense parameter table -> one [1, width] row (static sublane slice)
    return ref[i:i + 1]

  def layernorm(x, g, b, eps=1e-5):
    mu = jnp.mean(x, axis=-1, keepdims=True)
    var = jnp.mean(jnp.square(x - mu), axis=-1, keepdims=True)
    return (x - mu) * jax.lax.rsqrt(var + eps) * g + b

  def attend(q3, k3, v3, bias, sq):
    # q3/k3/v3: bf16 [bb, s, D]; heads are static lane slices (no head transpose —
    # Mosaic does not lower a [B,S,H,Dh]->[B,H,S,Dh] transpose).
    heads = []
    for h in range(num_heads):
      lo = h * Dh
      sc = jnp.einsum('bqd,bkd->bqk', q3[:, :, lo:lo + Dh], k3[:, :, lo:lo + Dh],
                      preferred_element_type=f32)
      if bias is not None:                     # cross-attn skips the add entirely
        sc = sc + bias
      sc = sc - jnp.max(sc, axis=-1, keepdims=True)
      p = jnp.exp(sc)                          # softmax stays f32 on the VPU/EUP
      p = p / jnp.sum(p, axis=-1, keepdims=True)
      heads.append(jnp.einsum('bqk,bkd->bqd', p.astype(bf16), v3[:, :, lo:lo + Dh],
                              preferred_element_type=f32))
    # lane-dense [bb*sq, D]; single bf16 cast feeding the output projection
    return jnp.concatenate(heads, axis=-1).reshape(bb * sq, D).astype(bf16)

  def self_attn(x_bf, w_qkv_ref, b_qkv_ref, w_o_ref, b_o_ref, blk, bias, seq):
    # fused Q|K|V projection: one [D, 3D] matmul, one bias add, one bf16 cast
    qkv = mm(x_bf, w_qkv_ref[blk]) + row(b_qkv_ref, blk)         # [bb*seq, 3D] f32
    qkv3 = qkv.reshape(bb, seq, 3 * D).astype(bf16)              # tile-aligned reshape
    o = attend(qkv3[:, :, :D], qkv3[:, :, D:2 * D], qkv3[:, :, 2 * D:], bias, seq)
    return mm(o, w_o_ref[blk]) + row(b_o_ref, blk)

  def ffn(x_bf, w1_ref, b1_ref, w2_ref, b2_ref, blk):
    h = jnp.maximum(mm(x_bf, w1_ref[blk]) + row(b1_ref, blk), 0.0).astype(bf16)
    return mm(h, w2_ref[blk]) + row(b2_ref, blk)

  # ------------------------------- encoder ---------------------------------
  x = x_enc_ref[...]                                             # f32 residual stream
  x_bf = x.astype(bf16)                                          # bf16 shadow (matmuls)
  enc_bias = enc_bias_ref[...]
  for blk in range(num_blocks):
    a = self_attn(x_bf, e_qkv_w_ref, e_qkv_b_ref, e_o_w_ref, e_o_b_ref,
                  blk, enc_bias, s_enc)
    x = layernorm(x + a, row(e_ln_g_ref, 2 * blk), row(e_ln_b_ref, 2 * blk))
    x_bf = x.astype(bf16)
    f = ffn(x_bf, e_ffn_w1_ref, e_ffn_b1_ref, e_ffn_w2_ref, e_ffn_b2_ref, blk)
    x = layernorm(x + f, row(e_ln_g_ref, 2 * blk + 1), row(e_ln_b_ref, 2 * blk + 1))
    x_bf = x.astype(bf16)
  enc_bf = x_bf

  # Cross-attention K/V for ALL decoder blocks in ONE [D, NB*2D]=[32,128] matmul.
  ckv3 = (mm(enc_bf, d_ckv_w_ref[...]) + d_ckv_b_ref[...]) \
      .reshape(bb, s_enc, num_blocks * 2 * D).astype(bf16)

  # ------------------------------- decoder ---------------------------------
  y = x_dec_ref[...]
  y_bf = y.astype(bf16)
  dec_bias = dec_bias_ref[...]
  for blk in range(num_blocks):
    sa = self_attn(y_bf, d_qkv_w_ref, d_qkv_b_ref, d_o_w_ref, d_o_b_ref,
                   blk, dec_bias, s_dec)
    y = layernorm(y + sa, row(d_ln_g_ref, 3 * blk), row(d_ln_b_ref, 3 * blk))
    y_bf = y.astype(bf16)
    # TODO(synk): Decoder source not provided; the torch forward only passes the
    # decoder pad mask + look-ahead mask to the decoder, so cross-attention runs
    # unmasked over the encoder keys here.
    q3 = (mm(y_bf, d_cq_w_ref[blk]) + row(d_cq_b_ref, blk)) \
        .reshape(bb, s_dec, D).astype(bf16)
    base = blk * 2 * D
    oc = attend(q3, ckv3[:, :, base:base + D], ckv3[:, :, base + D:base + 2 * D],
                None, s_dec)
    ca = mm(oc, d_co_w_ref[blk]) + row(d_co_b_ref, blk)
    y = layernorm(y + ca, row(d_ln_g_ref, 3 * blk + 1), row(d_ln_b_ref, 3 * blk + 1))
    y_bf = y.astype(bf16)
    f = ffn(y_bf, d_ffn_w1_ref, d_ffn_b1_ref, d_ffn_w2_ref, d_ffn_b2_ref, blk)
    y = layernorm(y + f, row(d_ln_g_ref, 3 * blk + 2), row(d_ln_b_ref, 3 * blk + 2))
    y_bf = y.astype(bf16)

  # --------------------- output head: relu(linear) x 2 ---------------------
  # lin2 columns are zero-padded to 128 lanes -> the final store is a dense vst;
  # the wrapper slices back to OUT_FEATURES.
  h = jnp.maximum(mm(y_bf, lin1_w_ref[...]) + lin1_b_ref[...], 0.0).astype(bf16)
  o = jnp.maximum(mm(h, lin2_w_ref[...]) + lin2_b_ref[...], 0.0)
  out_ref[...] = o.astype(out_ref.dtype)


# ------------------------------ pallas_call wrapper ---------------------------
def _full_spec(shape):
  nd = len(shape)
  return pl.BlockSpec(shape, lambda b: (0,) * nd)


def _batch_grid_size(batch):
  # v7x has 2 TensorCores per chip: shard the (fully independent) batch across them.
  # On single-TC chips (v5e/v6e) keep one grid step so the latency-bound work is
  # not serialized per batch element.
  try:
    kind = jax.devices()[0].device_kind.lower()
  except Exception:
    return 1
  if "v7" in kind and batch % 2 == 0:
    return 2
  return 1


def _call_fused(packed, x_enc, x_dec, enc_bias, dec_bias):
  Bq, S, _ = enc_bias.shape
  T = dec_bias.shape[1]
  grid_b = _batch_grid_size(Bq)
  bb = Bq // grid_b

  weights = [packed[k] for k in _WEIGHT_KEYS]
  kernel = functools.partial(
      _fused_transformer_kernel,
      num_heads=NUM_HEADS, num_blocks=NUM_BLOCKS, bb=bb, s_enc=S, s_dec=T)

  in_specs = [
      pl.BlockSpec((bb * S, DIM), lambda b: (b, 0)),       # x_enc
      pl.BlockSpec((bb * T, DIM), lambda b: (b, 0)),       # x_dec
      pl.BlockSpec((bb, S, S), lambda b: (b, 0, 0)),       # enc_bias
      pl.BlockSpec((bb, T, T), lambda b: (b, 0, 0)),       # dec_bias
  ] + [_full_spec(w.shape) for w in weights]               # weights: VMEM-resident
  out_spec = pl.BlockSpec((bb * T, OUT_PAD), lambda b: (b, 0))

  return pl.pallas_call(
      kernel,
      grid=(grid_b,),
      in_specs=in_specs,
      out_specs=out_spec,
      out_shape=jax.ShapeDtypeStruct((Bq * T, OUT_PAD), jnp.float32),
      compiler_params=pltpu.CompilerParams(dimension_semantics=("parallel",)),
  )(x_enc, x_dec, enc_bias, dec_bias, *weights)


# ------------------------------- forward pass ---------------------------------
def transformer_forward(packed, tokens_enc, tokens_dec, training_status=False):
  del training_status  # dropout is a no-op in eval mode
  Bq, S = tokens_enc.shape
  T = tokens_dec.shape[1]
  scale_emb = jnp.sqrt(jnp.float32(DIM))

  # embedding gather + positional encoding: tiny XLA producers feeding the kernel
  x_enc = (packed["enc_emb"][tokens_enc] * scale_emb
           + packed["pe"][:S][None, :, :]).reshape(Bq * S, DIM).astype(jnp.float32)
  x_dec = (packed["dec_emb"][tokens_dec] * scale_emb
           + packed["pe"][:T][None, :, :]).reshape(Bq * T, DIM).astype(jnp.float32)

  # masks (same semantics as the PyTorch forward)
  pad_enc = tokens_enc != 0
  enc_bias = jnp.broadcast_to(jnp.where(pad_enc[:, None, :], 0.0, NEG_INF),
                              (Bq, S, S)).astype(jnp.float32)
  pad_dec = tokens_dec != 0
  causal = jnp.tril(jnp.ones((T, T), jnp.float32))     # triu().transpose() in torch
  keep = causal[None, :, :] * pad_dec[:, None, :].astype(jnp.float32)
  dec_bias = jnp.where(keep > 0, 0.0, NEG_INF).astype(jnp.float32)

  out = _call_fused(packed, x_enc, x_dec, enc_bias, dec_bias)
  return out[:, :OUT_FEATURES].reshape(Bq, T, OUT_FEATURES)


transformer_forward_jit = jax.jit(transformer_forward)


# ------------------------------ parameter handling -----------------------------
def sinusoidal_pe(max_len, dim):
  pos = np.arange(max_len)[:, None].astype(np.float32)
  i = np.arange(dim)[None, :].astype(np.float32)
  angle = pos / np.power(10000.0, (2.0 * np.floor(i / 2.0)) / dim)
  pe = np.zeros((max_len, dim), np.float32)
  pe[:, 0::2] = np.sin(angle[:, 0::2])
  pe[:, 1::2] = np.cos(angle[:, 1::2])
  return jnp.asarray(pe)


def init_params(seed=42):
  key = jax.random.PRNGKey(seed)
  keys = iter(jax.random.split(key, 512))

  def dense(din, dout):
    w = jax.random.normal(next(keys), (din, dout), jnp.float32) * 0.02
    b = jnp.zeros((dout,), jnp.float32)
    return w, b

  def attn_params():
    p = {}
    for n in ("q", "k", "v", "o"):
      w, b = dense(DIM, DIM)
      p["w" + n], p["b" + n] = w, b
    return p

  def ffn_params():
    w1, b1 = dense(DIM, 2 * DIM)
    w2, b2 = dense(2 * DIM, DIM)
    return {"w1": w1, "b1": b1, "w2": w2, "b2": b2}

  def ln():
    return jnp.ones((DIM,), jnp.float32), jnp.zeros((DIM,), jnp.float32)

  enc_blocks, dec_blocks = [], []
  for _ in range(NUM_BLOCKS):
    g1, b1 = ln(); g2, b2 = ln()
    enc_blocks.append({"attn": attn_params(), "ffn": ffn_params(),
                       "ln1_g": g1, "ln1_b": b1, "ln2_g": g2, "ln2_b": b2})
  for _ in range(NUM_BLOCKS):
    g1, b1 = ln(); g2, b2 = ln(); g3, b3 = ln()
    dec_blocks.append({"self_attn": attn_params(), "cross_attn": attn_params(),
                       "ffn": ffn_params(),
                       "ln1_g": g1, "ln1_b": b1, "ln2_g": g2, "ln2_b": b2,
                       "ln3_g": g3, "ln3_b": b3})

  lin1_w, lin1_b = dense(DIM, IN_FEATURES)
  lin2_w, lin2_b = dense(IN_FEATURES, OUT_FEATURES)

  return {
      "enc_emb": jax.random.normal(next(keys), (VOCAB, DIM), jnp.float32) * 0.02,
      "dec_emb": jax.random.normal(next(keys), (VOCAB, DIM), jnp.float32) * 0.02,
      "pe": sinusoidal_pe(MAX_TOKEN, DIM),
      "enc_blocks": enc_blocks,
      "dec_blocks": dec_blocks,
      "lin1_w": lin1_w, "lin1_b": lin1_b,
      "lin2_w": lin2_w, "lin2_b": lin2_b,
  }


def pack_params(p):
  """Pack weights into a few MXU/VMEM-friendly arrays.

  * Q|K|V fused per self-attention block: [NB, D, 3D] bf16 weight, [NB, 3D] f32 bias.
  * Cross-attention K|V concatenated across blocks: [D, NB*2D]=[32,128] bf16.
  * 1/sqrt(Dh) folded into the query projection (weight + bias).
  * Biases / LayerNorm params stored as flat lane-dense rows ([NB, width], [NB*k, D]).
  * lin2 weight/bias zero-padded to 128 output lanes (dense final store).
  """
  scale = 1.0 / math.sqrt(DIM // NUM_HEADS)
  bf16, f32 = jnp.bfloat16, jnp.float32

  def self_attn_stack(blocks, key):
    wqkv, bqkv, wo, bo = [], [], [], []
    for blk in blocks:
      a = blk[key]
      wqkv.append(jnp.concatenate([a["wq"] * scale, a["wk"], a["wv"]], axis=1))
      bqkv.append(jnp.concatenate([a["bq"] * scale, a["bk"], a["bv"]], axis=0))
      wo.append(a["wo"]); bo.append(a["bo"])
    return (jnp.stack(wqkv).astype(bf16),            # [NB, D, 3D]
            jnp.stack(bqkv).astype(f32),             # [NB, 3D]
            jnp.stack(wo).astype(bf16),              # [NB, D, D]
            jnp.stack(bo).astype(f32))               # [NB, D]

  def cross_attn_stack(blocks):
    wq, bq, wo, bo, wkv, bkv = [], [], [], [], [], []
    for blk in blocks:
      a = blk["cross_attn"]
      wq.append(a["wq"] * scale); bq.append(a["bq"] * scale)
      wo.append(a["wo"]); bo.append(a["bo"])
      wkv.append(jnp.concatenate([a["wk"], a["wv"]], axis=1))     # [D, 2D]
      bkv.append(jnp.concatenate([a["bk"], a["bv"]], axis=0))     # [2D]
    return (jnp.stack(wq).astype(bf16),                           # [NB, D, D]
            jnp.stack(bq).astype(f32),                            # [NB, D]
            jnp.concatenate(wkv, axis=1).astype(bf16),            # [D, NB*2D]
            jnp.concatenate(bkv, axis=0).reshape(1, -1).astype(f32),  # [1, NB*2D]
            jnp.stack(wo).astype(bf16),                           # [NB, D, D]
            jnp.stack(bo).astype(f32))                            # [NB, D]

  def ffn_stack(blocks):
    return (jnp.stack([b["ffn"]["w1"] for b in blocks]).astype(bf16),   # [NB, D, 2D]
            jnp.stack([b["ffn"]["b1"] for b in blocks]).astype(f32),    # [NB, 2D]
            jnp.stack([b["ffn"]["w2"] for b in blocks]).astype(bf16),   # [NB, 2D, D]
            jnp.stack([b["ffn"]["b2"] for b in blocks]).astype(f32))    # [NB, D]

  def ln_stack(blocks, names):
    g = jnp.stack([b[n + "_g"] for b in blocks for n in names])         # [NB*k, D]
    bb_ = jnp.stack([b[n + "_b"] for b in blocks for n in names])
    return g.astype(f32), bb_.astype(f32)

  e_qkv_w, e_qkv_b, e_o_w, e_o_b = self_attn_stack(p["enc_blocks"], "attn")
  e_ffn_w1, e_ffn_b1, e_ffn_w2, e_ffn_b2 = ffn_stack(p["enc_blocks"])
  e_ln_g, e_ln_b = ln_stack(p["enc_blocks"], ("ln1", "ln2"))

  d_qkv_w, d_qkv_b, d_o_w, d_o_b = self_attn_stack(p["dec_blocks"], "self_attn")
  d_cq_w, d_cq_b, d_ckv_w, d_ckv_b, d_co_w, d_co_b = cross_attn_stack(p["dec_blocks"])
  d_ffn_w1, d_ffn_b1, d_ffn_w2, d_ffn_b2 = ffn_stack(p["dec_blocks"])
  d_ln_g, d_ln_b = ln_stack(p["dec_blocks"], ("ln1", "ln2", "ln3"))

  lin2_w_pad = jnp.zeros((IN_FEATURES, OUT_PAD), f32).at[:, :OUT_FEATURES].set(p["lin2_w"])
  lin2_b_pad = jnp.zeros((1, OUT_PAD), f32).at[:, :OUT_FEATURES].set(
      p["lin2_b"].reshape(1, OUT_FEATURES))

  return {
      "enc_emb": p["enc_emb"], "dec_emb": p["dec_emb"], "pe": p["pe"],
      "e_qkv_w": e_qkv_w, "e_qkv_b": e_qkv_b, "e_o_w": e_o_w, "e_o_b": e_o_b,
      "e_ffn_w1": e_ffn_w1, "e_ffn_b1": e_ffn_b1,
      "e_ffn_w2": e_ffn_w2, "e_ffn_b2": e_ffn_b2,
      "e_ln_g": e_ln_g, "e_ln_b": e_ln_b,
      "d_qkv_w": d_qkv_w, "d_qkv_b": d_qkv_b, "d_o_w": d_o_w, "d_o_b": d_o_b,
      "d_cq_w": d_cq_w, "d_cq_b": d_cq_b, "d_ckv_w": d_ckv_w, "d_ckv_b": d_ckv_b,
      "d_co_w": d_co_w, "d_co_b": d_co_b,
      "d_ffn_w1": d_ffn_w1, "d_ffn_b1": d_ffn_b1,
      "d_ffn_w2": d_ffn_w2, "d_ffn_b2": d_ffn_b2,
      "d_ln_g": d_ln_g, "d_ln_b": d_ln_b,
      "lin1_w": p["lin1_w"].astype(bf16),
      "lin1_b": p["lin1_b"].reshape(1, IN_FEATURES).astype(f32),
      "lin2_w": lin2_w_pad.astype(bf16),
      "lin2_b": lin2_b_pad.astype(f32),
  }


# ----------------------------------- main -------------------------------------
if __name__ == "__main__":
  params = init_params(42)
  packed = pack_params(params)

  key = jax.random.PRNGKey(0)
  k1, k2 = jax.random.split(key)
  tok_enc = jax.random.randint(k1, (B, S_ENC), 1, VOCAB).astype(jnp.int32)
  tok_dec = jax.random.randint(k2, (B, S_DEC), 1, VOCAB).astype(jnp.int32)
  # introduce some padding (token id 0) so the pad masks are exercised
  tok_enc = tok_enc.at[:, -2:].set(0)
  tok_dec = tok_dec.at[:, -1:].set(0)

  out = transformer_forward_jit(packed, tok_enc, tok_dec)
  out = jax.block_until_ready(out)
  assert out.shape == (B, S_DEC, OUT_FEATURES), out.shape
  assert bool(jnp.all(jnp.isfinite(out)))
  print("KERNEL_OK")
</pallas_src>

<mosaic_0001>
module attributes {stable_mosaic.version = 11 : i64} {
  func.func @_fused_transformer_kernel(%arg0: i32, %arg1: memref<16x32xf32, #tpu.memory_space<vmem>>, %arg2: memref<16x32xf32, #tpu.memory_space<vmem>>, %arg3: memref<2x8x8xf32, #tpu.memory_space<vmem>>, %arg4: memref<2x8x8xf32, #tpu.memory_space<vmem>>, %arg5: memref<2x32x96xbf16, #tpu.memory_space<vmem>>, %arg6: memref<2x96xf32, #tpu.memory_space<vmem>>, %arg7: memref<2x32x32xbf16, #tpu.memory_space<vmem>>, %arg8: memref<2x32xf32, #tpu.memory_space<vmem>>, %arg9: memref<2x32x64xbf16, #tpu.memory_space<vmem>>, %arg10: memref<2x64xf32, #tpu.memory_space<vmem>>, %arg11: memref<2x64x32xbf16, #tpu.memory_space<vmem>>, %arg12: memref<2x32xf32, #tpu.memory_space<vmem>>, %arg13: memref<4x32xf32, #tpu.memory_space<vmem>>, %arg14: memref<4x32xf32, #tpu.memory_space<vmem>>, %arg15: memref<2x32x96xbf16, #tpu.memory_space<vmem>>, %arg16: memref<2x96xf32, #tpu.memory_space<vmem>>, %arg17: memref<2x32x32xbf16, #tpu.memory_space<vmem>>, %arg18: memref<2x32xf32, #tpu.memory_space<vmem>>, %arg19: memref<2x32x32xbf16, #tpu.memory_space<vmem>>, %arg20: memref<2x32xf32, #tpu.memory_space<vmem>>, %arg21: memref<32x128xbf16, #tpu.memory_space<vmem>>, %arg22: memref<1x128xf32, #tpu.memory_space<vmem>>, %arg23: memref<2x32x32xbf16, #tpu.memory_space<vmem>>, %arg24: memref<2x32xf32, #tpu.memory_space<vmem>>, %arg25: memref<2x32x64xbf16, #tpu.memory_space<vmem>>, %arg26: memref<2x64xf32, #tpu.memory_space<vmem>>, %arg27: memref<2x64x32xbf16, #tpu.memory_space<vmem>>, %arg28: memref<2x32xf32, #tpu.memory_space<vmem>>, %arg29: memref<6x32xf32, #tpu.memory_space<vmem>>, %arg30: memref<6x32xf32, #tpu.memory_space<vmem>>, %arg31: memref<32x32xbf16, #tpu.memory_space<vmem>>, %arg32: memref<1x32xf32, #tpu.memory_space<vmem>>, %arg33: memref<32x128xbf16, #tpu.memory_space<vmem>>, %arg34: memref<1x128xf32, #tpu.memory_space<vmem>>, %arg35: memref<16x128xf32, #tpu.memory_space<vmem>>) attributes {dimension_semantics = [#tpu.dimension_semantics<parallel>], iteration_bounds = array<i64: 1>, scalar_prefetch = 0 : i64, scratch_operands = 0 : i64, tpu.core_type = #tpu.core_type<tc>, window_params = [{transform_indices = @transform_0, window_bounds = array<i64: 16, 32>}, {transform_indices = @transform_1, window_bounds = array<i64: 16, 32>}, {transform_indices = @transform_2, window_bounds = array<i64: 2, 8, 8>}, {transform_indices = @transform_3, window_bounds = array<i64: 2, 8, 8>}, {pipeline_mode = #tpu.pipeline_mode<synchronous>, transform_indices = @transform_4, window_bounds = array<i64: 2, 32, 96>}, {pipeline_mode = #tpu.pipeline_mode<synchronous>, transform_indices = @transform_5, window_bounds = array<i64: 2, 96>}, {pipeline_mode = #tpu.pipeline_mode<synchronous>, transform_indices = @transform_6, window_bounds = array<i64: 2, 32, 32>}, {pipeline_mode = #tpu.pipeline_mode<synchronous>, transform_indices = @transform_7, window_bounds = array<i64: 2, 32>}, {pipeline_mode = #tpu.pipeline_mode<synchronous>, transform_indices = @transform_8, window_bounds = array<i64: 2, 32, 64>}, {pipeline_mode = #tpu.pipeline_mode<synchronous>, transform_indices = @transform_9, window_bounds = array<i64: 2, 64>}, {pipeline_mode = #tpu.pipeline_mode<synchronous>, transform_indices = @transform_10, window_bounds = array<i64: 2, 64, 32>}, {pipeline_mode = #tpu.pipeline_mode<synchronous>, transform_indices = @transform_11, window_bounds = array<i64: 2, 32>}, {pipeline_mode = #tpu.pipeline_mode<synchronous>, transform_indices = @transform_12, window_bounds = array<i64: 4, 32>}, {pipeline_mode = #tpu.pipeline_mode<synchronous>, transform_indices = @transform_13, window_bounds = array<i64: 4, 32>}, {pipeline_mode = #tpu.pipeline_mode<synchronous>, transform_indices = @transform_14, window_bounds = array<i64: 2, 32, 96>}, {pipeline_mode = #tpu.pipeline_mode<synchronous>, transform_indices = @transform_15, window_bounds = array<i64: 2, 96>}, {pipeline_mode = #tpu.pipeline_mode<synchronous>, transform_indices = @transform_16, window_bounds = array<i64: 2, 32, 32>}, {pipeline_mode = #tpu.pipeline_mode<synchronous>, transform_indices = @transform_17, window_bounds = array<i64: 2, 32>}, {pipeline_mode = #tpu.pipeline_mode<synchronous>, transform_indices = @transform_18, window_bounds = array<i64: 2, 32, 32>}, {pipeline_mode = #tpu.pipeline_mode<synchronous>, transform_indices = @transform_19, window_bounds = array<i64: 2, 32>}, {pipeline_mode = #tpu.pipeline_mode<synchronous>, transform_indices = @transform_20, window_bounds = array<i64: 32, 128>}, {pipeline_mode = #tpu.pipeline_mode<synchronous>, transform_indices = @transform_21, window_bounds = array<i64: 1, 128>}, {pipeline_mode = #tpu.pipeline_mode<synchronous>, transform_indices = @transform_22, window_bounds = array<i64: 2, 32, 32>}, {pipeline_mode = #tpu.pipeline_mode<synchronous>, transform_indices = @transform_23, window_bounds = array<i64: 2, 32>}, {pipeline_mode = #tpu.pipeline_mode<synchronous>, transform_indices = @transform_24, window_bounds = array<i64: 2, 32, 64>}, {pipeline_mode = #tpu.pipeline_mode<synchronous>, transform_indices = @transform_25, window_bounds = array<i64: 2, 64>}, {pipeline_mode = #tpu.pipeline_mode<synchronous>, transform_indices = @transform_26, window_bounds = array<i64: 2, 64, 32>}, {pipeline_mode = #tpu.pipeline_mode<synchronous>, transform_indices = @transform_27, window_bounds = array<i64: 2, 32>}, {pipeline_mode = #tpu.pipeline_mode<synchronous>, transform_indices = @transform_28, window_bounds = array<i64: 6, 32>}, {pipeline_mode = #tpu.pipeline_mode<synchronous>, transform_indices = @transform_29, window_bounds = array<i64: 6, 32>}, {pipeline_mode = #tpu.pipeline_mode<synchronous>, transform_indices = @transform_30, window_bounds = array<i64: 32, 32>}, {pipeline_mode = #tpu.pipeline_mode<synchronous>, transform_indices = @transform_31, window_bounds = array<i64: 1, 32>}, {pipeline_mode = #tpu.pipeline_mode<synchronous>, transform_indices = @transform_32, window_bounds = array<i64: 32, 128>}, {pipeline_mode = #tpu.pipeline_mode<synchronous>, transform_indices = @transform_33, window_bounds = array<i64: 1, 128>}, {transform_indices = @transform_34, window_bounds = array<i64: 16, 128>}]} {
    %c0 = arith.constant 0 : index
    %c0_0 = arith.constant 0 : index
    %0 = vector.load %arg1[%c0, %c0_0] : memref<16x32xf32, #tpu.memory_space<vmem>>, vector<16x32xf32>
    %1 = arith.truncf %0 : vector<16x32xf32> to vector<16x32xbf16>
    %c0_1 = arith.constant 0 : index
    %c0_2 = arith.constant 0 : index
    %c0_3 = arith.constant 0 : index
    %2 = vector.load %arg3[%c0_1, %c0_2, %c0_3] : memref<2x8x8xf32, #tpu.memory_space<vmem>>, vector<2x8x8xf32>
    %c0_4 = arith.constant 0 : index
    %c0_5 = arith.constant 0 : index
    %c0_6 = arith.constant 0 : index
    %3 = vector.load %arg5[%c0_4, %c0_5, %c0_6] : memref<2x32x96xbf16, #tpu.memory_space<vmem>>, vector<1x32x96xbf16>
    %4 = vector.shape_cast %3 : vector<1x32x96xbf16> to vector<32x96xbf16>
    %cst = arith.constant dense<0.000000e+00> : vector<16x96xf32>
    %5 = tpu.matmul %1, %4, %cst {dimension_numbers = #tpu.dot_dimension_numbers<[1], [0], [0], [1], [0, 0, 1, 1], [], []>} : vector<16x32xbf16>, vector<32x96xbf16>, vector<16x96xf32> -> vector<16x96xf32>
    %c0_7 = arith.constant 0 : index
    %c0_8 = arith.constant 0 : index
    %6 = vector.load %arg6[%c0_7, %c0_8] : memref<2x96xf32, #tpu.memory_space<vmem>>, vector<1x96xf32>
    %7 = vector.broadcast %6 : vector<1x96xf32> to vector<16x96xf32>
    %8 = arith.addf %5, %7 : vector<16x96xf32>
    %9 = vector.shape_cast %8 : vector<16x96xf32> to vector<2x8x96xf32>
    %10 = arith.truncf %9 : vector<2x8x96xf32> to vector<2x8x96xbf16>
    %11 = vector.extract_strided_slice %10 {offsets = [0, 0, 0], sizes = [2, 8, 32], strides = [1, 1, 1]} : vector<2x8x96xbf16> to vector<2x8x32xbf16>
    %12 = vector.extract_strided_slice %10 {offsets = [0, 0, 32], sizes = [2, 8, 32], strides = [1, 1, 1]} : vector<2x8x96xbf16> to vector<2x8x32xbf16>
    %13 = vector.extract_strided_slice %10 {offsets = [0, 0, 64], sizes = [2, 8, 32], strides = [1, 1, 1]} : vector<2x8x96xbf16> to vector<2x8x32xbf16>
    %14 = vector.extract_strided_slice %11 {offsets = [0, 0, 0], sizes = [2, 8, 8], strides = [1, 1, 1]} : vector<2x8x32xbf16> to vector<2x8x8xbf16>
    %15 = vector.extract_strided_slice %12 {offsets = [0, 0, 0], sizes = [2, 8, 8], strides = [1, 1, 1]} : vector<2x8x32xbf16> to vector<2x8x8xbf16>
    "tpu.trace_start"() <{level = 10 : i32, message = "bqd,bkd->bqk"}> : () -> ()
    %cst_9 = arith.constant dense<0.000000e+00> : vector<2x8x8xf32>
    %16 = tpu.matmul %14, %15, %cst_9 {dimension_numbers = #tpu.dot_dimension_numbers<[2], [2], [1], [1], [0, 0, 0, 1, 1, 1], [0], [0]>} : vector<2x8x8xbf16>, vector<2x8x8xbf16>, vector<2x8x8xf32> -> vector<2x8x8xf32>
    "tpu.trace_stop"() : () -> ()
    %17 = arith.addf %16, %2 : vector<2x8x8xf32>
    %cst_10 = arith.constant dense<0xFF800000> : vector<2x8xf32>
    %18 = vector.multi_reduction <maximumf>, %17, %cst_10 [2] : vector<2x8x8xf32> to vector<2x8xf32>
    %19 = vector.shape_cast %18 : vector<2x8xf32> to vector<2x8x1xf32>
    %20 = vector.broadcast %19 : vector<2x8x1xf32> to vector<2x8x8xf32>
    %21 = arith.subf %17, %20 : vector<2x8x8xf32>
    %22 = math.exp %21 : vector<2x8x8xf32>
    %cst_11 = arith.constant dense<0.000000e+00> : vector<2x8xf32>
    %23 = vector.multi_reduction <add>, %22, %cst_11 [2] : vector<2x8x8xf32> to vector<2x8xf32>
    %24 = vector.shape_cast %23 : vector<2x8xf32> to vector<2x8x1xf32>
    %25 = vector.broadcast %24 : vector<2x8x1xf32> to vector<2x8x8xf32>
    %26 = arith.divf %22, %25 : vector<2x8x8xf32>
    %27 = arith.truncf %26 : vector<2x8x8xf32> to vector<2x8x8xbf16>
    %28 = vector.extract_strided_slice %13 {offsets = [0, 0, 0], sizes = [2, 8, 8], strides = [1, 1, 1]} : vector<2x8x32xbf16> to vector<2x8x8xbf16>
    "tpu.trace_start"() <{level = 10 : i32, message = "bqk,bkd->bqd"}> : () -> ()
    %cst_12 = arith.constant dense<0.000000e+00> : vector<2x8x8xf32>
    %29 = tpu.matmul %27, %28, %cst_12 {dimension_numbers = #tpu.dot_dimension_numbers<[2], [1], [1], [2], [0, 0, 0, 1, 1, 2], [0], [0]>} : vector<2x8x8xbf16>, vector<2x8x8xbf16>, vector<2x8x8xf32> -> vector<2x8x8xf32>
    "tpu.trace_stop"() : () -> ()
    %30 = vector.extract_strided_slice %11 {offsets = [0, 0, 8], sizes = [2, 8, 8], strides = [1, 1, 1]} : vector<2x8x32xbf16> to vector<2x8x8xbf16>
    %31 = vector.extract_strided_slice %12 {offsets = [0, 0, 8], sizes = [2, 8, 8], strides = [1, 1, 1]} : vector<2x8x32xbf16> to vector<2x8x8xbf16>
    "tpu.trace_start"() <{level = 10 : i32, message = "bqd,bkd->bqk"}> : () -> ()
    %cst_13 = arith.constant dense<0.000000e+00> : vector<2x8x8xf32>
    %32 = tpu.matmul %30, %31, %cst_13 {dimension_numbers = #tpu.dot_dimension_numbers<[2], [2], [1], [1], [0, 0, 0, 1, 1, 1], [0], [0]>} : vector<2x8x8xbf16>, vector<2x8x8xbf16>, vector<2x8x8xf32> -> vector<2x8x8xf32>
    "tpu.trace_stop"() : () -> ()
    %33 = arith.addf %32, %2 : vector<2x8x8xf32>
    %cst_14 = arith.constant dense<0xFF800000> : vector<2x8xf32>
    %34 = vector.multi_reduction <maximumf>, %33, %cst_14 [2] : vector<2x8x8xf32> to vector<2x8xf32>
    %35 = vector.shape_cast %34 : vector<2x8xf32> to vector<2x8x1xf32>
    %36 = vector.broadcast %35 : vector<2x8x1xf32> to vector<2x8x8xf32>
    %37 = arith.subf %33, %36 : vector<2x8x8xf32>
    %38 = math.exp %37 : vector<2x8x8xf32>
    %cst_15 = arith.constant dense<0.000000e+00> : vector<2x8xf32>
    %39 = vector.multi_reduction <add>, %38, %cst_15 [2] : vector<2x8x8xf32> to vector<2x8xf32>
    %40 = vector.shape_cast %39 : vector<2x8xf32> to vector<2x8x1xf32>
    %41 = vector.broadcast %40 : vector<2x8x1xf32> to vector<2x8x8xf32>
    %42 = arith.divf %38, %41 : vector<2x8x8xf32>
    %43 = arith.truncf %42 : vector<2x8x8xf32> to vector<2x8x8xbf16>
    %44 = vector.extract_strided_slice %13 {offsets = [0, 0, 8], sizes = [2, 8, 8], strides = [1, 1, 1]} : vector<2x8x32xbf16> to vector<2x8x8xbf16>
    "tpu.trace_start"() <{level = 10 : i32, message = "bqk,bkd->bqd"}> : () -> ()
    %cst_16 = arith.constant dense<0.000000e+00> : vector<2x8x8xf32>
    %45 = tpu.matmul %43, %44, %cst_16 {dimension_numbers = #tpu.dot_dimension_numbers<[2], [1], [1], [2], [0, 0, 0, 1, 1, 2], [0], [0]>} : vector<2x8x8xbf16>, vector<2x8x8xbf16>, vector<2x8x8xf32> -> vector<2x8x8xf32>
    "tpu.trace_stop"() : () -> ()
    %46 = vector.extract_strided_slice %11 {offsets = [0, 0, 16], sizes = [2, 8, 8], strides = [1, 1, 1]} : vector<2x8x32xbf16> to vector<2x8x8xbf16>
    %47 = vector.extract_strided_slice %12 {offsets = [0, 0, 16], sizes = [2, 8, 8], strides = [1, 1, 1]} : vector<2x8x32xbf16> to vector<2x8x8xbf16>
    "tpu.trace_start"() <{level = 10 : i32, message = "bqd,bkd->bqk"}> : () -> ()
    %cst_17 = arith.constant dense<0.000000e+00> : vector<2x8x8xf32>
    %48 = tpu.matmul %46, %47, %cst_17 {dimension_numbers = #tpu.dot_dimension_numbers<[2], [2], [1], [1], [0, 0, 0, 1, 1, 1], [0], [0]>} : vector<2x8x8xbf16>, vector<2x8x8xbf16>, vector<2x8x8xf32> -> vector<2x8x8xf32>
    "tpu.trace_stop"() : () -> ()
    %49 = arith.addf %48, %2 : vector<2x8x8xf32>
    %cst_18 = arith.constant dense<0xFF800000> : vector<2x8xf32>
    %50 = vector.multi_reduction <maximumf>, %49, %cst_18 [2] : vector<2x8x8xf32> to vector<2x8xf32>
    %51 = vector.shape_cast %50 : vector<2x8xf32> to vector<2x8x1xf32>
    %52 = vector.broadcast %51 : vector<2x8x1xf32> to vector<2x8x8xf32>
    %53 = arith.subf %49, %52 : vector<2x8x8xf32>
    %54 = math.exp %53 : vector<2x8x8xf32>
    %cst_19 = arith.constant dense<0.000000e+00> : vector<2x8xf32>
    %55 = vector.multi_reduction <add>, %54, %cst_19 [2] : vector<2x8x8xf32> to vector<2x8xf32>
    %56 = vector.shape_cast %55 : vector<2x8xf32> to vector<2x8x1xf32>
    %57 = vector.broadcast %56 : vector<2x8x1xf32> to vector<2x8x8xf32>
    %58 = arith.divf %54, %57 : vector<2x8x8xf32>
    %59 = arith.truncf %58 : vector<2x8x8xf32> to vector<2x8x8xbf16>
    %60 = vector.extract_strided_slice %13 {offsets = [0, 0, 16], sizes = [2, 8, 8], strides = [1, 1, 1]} : vector<2x8x32xbf16> to vector<2x8x8xbf16>
    "tpu.trace_start"() <{level = 10 : i32, message = "bqk,bkd->bqd"}> : () -> ()
    %cst_20 = arith.constant dense<0.000000e+00> : vector<2x8x8xf32>
    %61 = tpu.matmul %59, %60, %cst_20 {dimension_numbers = #tpu.dot_dimension_numbers<[2], [1], [1], [2], [0, 0, 0, 1, 1, 2], [0], [0]>} : vector<2x8x8xbf16>, vector<2x8x8xbf16>, vector<2x8x8xf32> -> vector<2x8x8xf32>
    "tpu.trace_stop"() : () -> ()
    %62 = vector.extract_strided_slice %11 {offsets = [0, 0, 24], sizes = [2, 8, 8], strides = [1, 1, 1]} : vector<2x8x32xbf16> to vector<2x8x8xbf16>
    %63 = vector.extract_strided_slice %12 {offsets = [0, 0, 24], sizes = [2, 8, 8], strides = [1, 1, 1]} : vector<2x8x32xbf16> to vector<2x8x8xbf16>
    "tpu.trace_start"() <{level = 10 : i32, message = "bqd,bkd->bqk"}> : () -> ()
    %cst_21 = arith.constant dense<0.000000e+00> : vector<2x8x8xf32>
    %64 = tpu.matmul %62, %63, %cst_21 {dimension_numbers = #tpu.dot_dimension_numbers<[2], [2], [1], [1], [0, 0, 0, 1, 1, 1], [0], [0]>} : vector<2x8x8xbf16>, vector<2x8x8xbf16>, vector<2x8x8xf32> -> vector<2x8x8xf32>
    "tpu.trace_stop"() : () -> ()
    %65 = arith.addf %64, %2 : vector<2x8x8xf32>
    %cst_22 = arith.constant dense<0xFF800000> : vector<2x8xf32>
    %66 = vector.multi_reduction <maximumf>, %65, %cst_22 [2] : vector<2x8x8xf32> to vector<2x8xf32>
    %67 = vector.shape_cast %66 : vector<2x8xf32> to vector<2x8x1xf32>
    %68 = vector.broadcast %67 : vector<2x8x1xf32> to vector<2x8x8xf32>
    %69 = arith.subf %65, %68 : vector<2x8x8xf32>
    %70 = math.exp %69 : vector<2x8x8xf32>
    %cst_23 = arith.constant dense<0.000000e+00> : vector<2x8xf32>
    %71 = vector.multi_reduction <add>, %70, %cst_23 [2] : vector<2x8x8xf32> to vector<2x8xf32>
    %72 = vector.shape_cast %71 : vector<2x8xf32> to vector<2x8x1xf32>
    %73 = vector.broadcast %72 : vector<2x8x1xf32> to vector<2x8x8xf32>
    %74 = arith.divf %70, %73 : vector<2x8x8xf32>
    %75 = arith.truncf %74 : vector<2x8x8xf32> to vector<2x8x8xbf16>
    %76 = vector.extract_strided_slice %13 {offsets = [0, 0, 24], sizes = [2, 8, 8], strides = [1, 1, 1]} : vector<2x8x32xbf16> to vector<2x8x8xbf16>
    "tpu.trace_start"() <{level = 10 : i32, message = "bqk,bkd->bqd"}> : () -> ()
    %cst_24 = arith.constant dense<0.000000e+00> : vector<2x8x8xf32>
    %77 = tpu.matmul %75, %76, %cst_24 {dimension_numbers = #tpu.dot_dimension_numbers<[2], [1], [1], [2], [0, 0, 0, 1, 1, 2], [0], [0]>} : vector<2x8x8xbf16>, vector<2x8x8xbf16>, vector<2x8x8xf32> -> vector<2x8x8xf32>
    "tpu.trace_stop"() : () -> ()
    %78 = tpu.concatenate %29, %45, %61, %77 in 2 : vector<2x8x8xf32>, vector<2x8x8xf32>, vector<2x8x8xf32>, vector<2x8x8xf32> -> vector<2x8x32xf32>
    %79 = vector.shape_cast %78 : vector<2x8x32xf32> to vector<16x32xf32>
    %80 = arith.truncf %79 : vector<16x32xf32> to vector<16x32xbf16>
    %c0_25 = arith.constant 0 : index
    %c0_26 = arith.constant 0 : index
    %c0_27 = arith.constant 0 : index
    %81 = vector.load %arg7[%c0_25, %c0_26, %c0_27] : memref<2x32x32xbf16, #tpu.memory_space<vmem>>, vector<1x32x32xbf16>
    %82 = vector.shape_cast %81 : vector<1x32x32xbf16> to vector<32x32xbf16>
    %cst_28 = arith.constant dense<0.000000e+00> : vector<16x32xf32>
    %83 = tpu.matmul %80, %82, %cst_28 {dimension_numbers = #tpu.dot_dimension_numbers<[1], [0], [0], [1], [0, 0, 1, 1], [], []>} : vector<16x32xbf16>, vector<32x32xbf16>, vector<16x32xf32> -> vector<16x32xf32>
    %c0_29 = arith.constant 0 : index
    %c0_30 = arith.constant 0 : index
    %84 = vector.load %arg8[%c0_29, %c0_30] : memref<2x32xf32, #tpu.memory_space<vmem>>, vector<1x32xf32>
    %85 = vector.broadcast %84 : vector<1x32xf32> to vector<16x32xf32>
    %86 = arith.addf %83, %85 : vector<16x32xf32>
    %87 = arith.addf %0, %86 : vector<16x32xf32>
    %c0_31 = arith.constant 0 : index
    %c0_32 = arith.constant 0 : index
    %88 = vector.load %arg13[%c0_31, %c0_32] : memref<4x32xf32, #tpu.memory_space<vmem>>, vector<1x32xf32>
    %c0_33 = arith.constant 0 : index
    %c0_34 = arith.constant 0 : index
    %89 = vector.load %arg14[%c0_33, %c0_34] : memref<4x32xf32, #tpu.memory_space<vmem>>, vector<1x32xf32>
    %cst_35 = arith.constant dense<0.000000e+00> : vector<16xf32>
    %90 = vector.multi_reduction <add>, %87, %cst_35 [1] : vector<16x32xf32> to vector<16xf32>
    %91 = vector.shape_cast %90 : vector<16xf32> to vector<16x1xf32>
    %cst_36 = arith.constant 3.200000e+01 : f32
    %92 = vector.broadcast %cst_36 : f32 to vector<16x1xf32>
    %93 = arith.divf %91, %92 : vector<16x1xf32>
    %94 = vector.broadcast %93 : vector<16x1xf32> to vector<16x32xf32>
    %95 = arith.subf %87, %94 : vector<16x32xf32>
    %96 = arith.mulf %95, %95 : vector<16x32xf32>
    %cst_37 = arith.constant dense<0.000000e+00> : vector<16xf32>
    %97 = vector.multi_reduction <add>, %96, %cst_37 [1] : vector<16x32xf32> to vector<16xf32>
    %98 = vector.shape_cast %97 : vector<16xf32> to vector<16x1xf32>
    %cst_38 = arith.constant 3.200000e+01 : f32
    %99 = vector.broadcast %cst_38 : f32 to vector<16x1xf32>
    %100 = arith.divf %98, %99 : vector<16x1xf32>
    %101 = vector.broadcast %93 : vector<16x1xf32> to vector<16x32xf32>
    %102 = arith.subf %87, %101 : vector<16x32xf32>
    %cst_39 = arith.constant 9.99999974E-6 : f32
    %103 = vector.broadcast %cst_39 : f32 to vector<16x1xf32>
    %104 = arith.addf %100, %103 : vector<16x1xf32>
    %105 = math.rsqrt %104 : vector<16x1xf32>
    %106 = vector.broadcast %105 : vector<16x1xf32> to vector<16x32xf32>
    %107 = arith.mulf %102, %106 : vector<16x32xf32>
    %108 = vector.broadcast %88 : vector<1x32xf32> to vector<16x32xf32>
    %109 = arith.mulf %107, %108 : vector<16x32xf32>
    %110 = vector.broadcast %89 : vector<1x32xf32> to vector<16x32xf32>
    %111 = arith.addf %109, %110 : vector<16x32xf32>
    %112 = arith.truncf %111 : vector<16x32xf32> to vector<16x32xbf16>
    %c0_40 = arith.constant 0 : index
    %c0_41 = arith.constant 0 : index
    %c0_42 = arith.constant 0 : index
    %113 = vector.load %arg9[%c0_40, %c0_41, %c0_42] : memref<2x32x64xbf16, #tpu.memory_space<vmem>>, vector<1x32x64xbf16>
    %114 = vector.shape_cast %113 : vector<1x32x64xbf16> to vector<32x64xbf16>
    %cst_43 = arith.constant dense<0.000000e+00> : vector<16x64xf32>
    %115 = tpu.matmul %112, %114, %cst_43 {dimension_numbers = #tpu.dot_dimension_numbers<[1], [0], [0], [1], [0, 0, 1, 1], [], []>} : vector<16x32xbf16>, vector<32x64xbf16>, vector<16x64xf32> -> vector<16x64xf32>
    %c0_44 = arith.constant 0 : index
    %c0_45 = arith.constant 0 : index
    %116 = vector.load %arg10[%c0_44, %c0_45] : memref<2x64xf32, #tpu.memory_space<vmem>>, vector<1x64xf32>
    %117 = vector.broadcast %116 : vector<1x64xf32> to vector<16x64xf32>
    %118 = arith.addf %115, %117 : vector<16x64xf32>
    %cst_46 = arith.constant 0.000000e+00 : f32
    %119 = vector.broadcast %cst_46 : f32 to vector<16x64xf32>
    %120 = arith.maximumf %118, %119 : vector<16x64xf32>
    %121 = arith.truncf %120 : vector<16x64xf32> to vector<16x64xbf16>
    %c0_47 = arith.constant 0 : index
    %c0_48 = arith.constant 0 : index
    %c0_49 = arith.constant 0 : index
    %122 = vector.load %arg11[%c0_47, %c0_48, %c0_49] : memref<2x64x32xbf16, #tpu.memory_space<vmem>>, vector<1x64x32xbf16>
    %123 = vector.shape_cast %122 : vector<1x64x32xbf16> to vector<64x32xbf16>
    %cst_50 = arith.constant dense<0.000000e+00> : vector<16x32xf32>
    %124 = tpu.matmul %121, %123, %cst_50 {dimension_numbers = #tpu.dot_dimension_numbers<[1], [0], [0], [1], [0, 0, 1, 1], [], []>} : vector<16x64xbf16>, vector<64x32xbf16>, vector<16x32xf32> -> vector<16x32xf32>
    %c0_51 = arith.constant 0 : index
    %c0_52 = arith.constant 0 : index
    %125 = vector.load %arg12[%c0_51, %c0_52] : memref<2x32xf32, #tpu.memory_space<vmem>>, vector<1x32xf32>
    %126 = vector.broadcast %125 : vector<1x32xf32> to vector<16x32xf32>
    %127 = arith.addf %124, %126 : vector<16x32xf32>
    %128 = arith.addf %111, %127 : vector<16x32xf32>
    %c1 = arith.constant 1 : index
    %c0_53 = arith.constant 0 : index
    %129 = vector.load %arg13[%c1, %c0_53] : memref<4x32xf32, #tpu.memory_space<vmem>>, vector<1x32xf32>
    %c1_54 = arith.constant 1 : index
    %c0_55 = arith.constant 0 : index
    %130 = vector.load %arg14[%c1_54, %c0_55] : memref<4x32xf32, #tpu.memory_space<vmem>>, vector<1x32xf32>
    %cst_56 = arith.constant dense<0.000000e+00> : vector<16xf32>
    %131 = vector.multi_reduction <add>, %128, %cst_56 [1] : vector<16x32xf32> to vector<16xf32>
    %132 = vector.shape_cast %131 : vector<16xf32> to vector<16x1xf32>
    %cst_57 = arith.constant 3.200000e+01 : f32
    %133 = vector.broadcast %cst_57 : f32 to vector<16x1xf32>
    %134 = arith.divf %132, %133 : vector<16x1xf32>
    %135 = vector.broadcast %134 : vector<16x1xf32> to vector<16x32xf32>
    %136 = arith.subf %128, %135 : vector<16x32xf32>
    %137 = arith.mulf %136, %136 : vector<16x32xf32>
    %cst_58 = arith.constant dense<0.000000e+00> : vector<16xf32>
    %138 = vector.multi_reduction <add>, %137, %cst_58 [1] : vector<16x32xf32> to vector<16xf32>
    %139 = vector.shape_cast %138 : vector<16xf32> to vector<16x1xf32>
    %cst_59 = arith.constant 3.200000e+01 : f32
    %140 = vector.broadcast %cst_59 : f32 to vector<16x1xf32>
    %141 = arith.divf %139, %140 : vector<16x1xf32>
    %142 = vector.broadcast %134 : vector<16x1xf32> to vector<16x32xf32>
    %143 = arith.subf %128, %142 : vector<16x32xf32>
    %cst_60 = arith.constant 9.99999974E-6 : f32
    %144 = vector.broadcast %cst_60 : f32 to vector<16x1xf32>
    %145 = arith.addf %141, %144 : vector<16x1xf32>
    %146 = math.rsqrt %145 : vector<16x1xf32>
    %147 = vector.broadcast %146 : vector<16x1xf32> to vector<16x32xf32>
    %148 = arith.mulf %143, %147 : vector<16x32xf32>
    %149 = vector.broadcast %129 : vector<1x32xf32> to vector<16x32xf32>
    %150 = arith.mulf %148, %149 : vector<16x32xf32>
    %151 = vector.broadcast %130 : vector<1x32xf32> to vector<16x32xf32>
    %152 = arith.addf %150, %151 : vector<16x32xf32>
    %153 = arith.truncf %152 : vector<16x32xf32> to vector<16x32xbf16>
    %c1_61 = arith.constant 1 : index
    %c0_62 = arith.constant 0 : index
    %c0_63 = arith.constant 0 : index
    %154 = vector.load %arg5[%c1_61, %c0_62, %c0_63] : memref<2x32x96xbf16, #tpu.memory_space<vmem>>, vector<1x32x96xbf16>
    %155 = vector.shape_cast %154 : vector<1x32x96xbf16> to vector<32x96xbf16>
    %cst_64 = arith.constant dense<0.000000e+00> : vector<16x96xf32>
    %156 = tpu.matmul %153, %155, %cst_64 {dimension_numbers = #tpu.dot_dimension_numbers<[1], [0], [0], [1], [0, 0, 1, 1], [], []>} : vector<16x32xbf16>, vector<32x96xbf16>, vector<16x96xf32> -> vector<16x96xf32>
    %c1_65 = arith.constant 1 : index
    %c0_66 = arith.constant 0 : index
    %157 = vector.load %arg6[%c1_65, %c0_66] : memref<2x96xf32, #tpu.memory_space<vmem>>, vector<1x96xf32>
    %158 = vector.broadcast %157 : vector<1x96xf32> to vector<16x96xf32>
    %159 = arith.addf %156, %158 : vector<16x96xf32>
    %160 = vector.shape_cast %159 : vector<16x96xf32> to vector<2x8x96xf32>
    %161 = arith.truncf %160 : vector<2x8x96xf32> to vector<2x8x96xbf16>
    %162 = vector.extract_strided_slice %161 {offsets = [0, 0, 0], sizes = [2, 8, 32], strides = [1, 1, 1]} : vector<2x8x96xbf16> to vector<2x8x32xbf16>
    %163 = vector.extract_strided_slice %161 {offsets = [0, 0, 32], sizes = [2, 8, 32], strides = [1, 1, 1]} : vector<2x8x96xbf16> to vector<2x8x32xbf16>
    %164 = vector.extract_strided_slice %161 {offsets = [0, 0, 64], sizes = [2, 8, 32], strides = [1, 1, 1]} : vector<2x8x96xbf16> to vector<2x8x32xbf16>
    %165 = vector.extract_strided_slice %162 {offsets = [0, 0, 0], sizes = [2, 8, 8], strides = [1, 1, 1]} : vector<2x8x32xbf16> to vector<2x8x8xbf16>
    %166 = vector.extract_strided_slice %163 {offsets = [0, 0, 0], sizes = [2, 8, 8], strides = [1, 1, 1]} : vector<2x8x32xbf16> to vector<2x8x8xbf16>
    "tpu.trace_start"() <{level = 10 : i32, message = "bqd,bkd->bqk"}> : () -> ()
    %cst_67 = arith.constant dense<0.000000e+00> : vector<2x8x8xf32>
    %167 = tpu.matmul %165, %166, %cst_67 {dimension_numbers = #tpu.dot_dimension_numbers<[2], [2], [1], [1], [0, 0, 0, 1, 1, 1], [0], [0]>} : vector<2x8x8xbf16>, vector<2x8x8xbf16>, vector<2x8x8xf32> -> vector<2x8x8xf32>
    "tpu.trace_stop"() : () -> ()
    %168 = arith.addf %167, %2 : vector<2x8x8xf32>
    %cst_68 = arith.constant dense<0xFF800000> : vector<2x8xf32>
    %169 = vector.multi_reduction <maximumf>, %168, %cst_68 [2] : vector<2x8x8xf32> to vector<2x8xf32>
    %170 = vector.shape_cast %169 : vector<2x8xf32> to vector<2x8x1xf32>
    %171 = vector.broadcast %170 : vector<2x8x1xf32> to vector<2x8x8xf32>
    %172 = arith.subf %168, %171 : vector<2x8x8xf32>
    %173 = math.exp %172 : vector<2x8x8xf32>
    %cst_69 = arith.constant dense<0.000000e+00> : vector<2x8xf32>
    %174 = vector.multi_reduction <add>, %173, %cst_69 [2] : vector<2x8x8xf32> to vector<2x8xf32>
    %175 = vector.shape_cast %174 : vector<2x8xf32> to vector<2x8x1xf32>
    %176 = vector.broadcast %175 : vector<2x8x1xf32> to vector<2x8x8xf32>
    %177 = arith.divf %173, %176 : vector<2x8x8xf32>
    %178 = arith.truncf %177 : vector<2x8x8xf32> to vector<2x8x8xbf16>
    %179 = vector.extract_strided_slice %164 {offsets = [0, 0, 0], sizes = [2, 8, 8], strides = [1, 1, 1]} : vector<2x8x32xbf16> to vector<2x8x8xbf16>
    "tpu.trace_start"() <{level = 10 : i32, message = "bqk,bkd->bqd"}> : () -> ()
    %cst_70 = arith.constant dense<0.000000e+00> : vector<2x8x8xf32>
    %180 = tpu.matmul %178, %179, %cst_70 {dimension_numbers = #tpu.dot_dimension_numbers<[2], [1], [1], [2], [0, 0, 0, 1, 1, 2], [0], [0]>} : vector<2x8x8xbf16>, vector<2x8x8xbf16>, vector<2x8x8xf32> -> vector<2x8x8xf32>
    "tpu.trace_stop"() : () -> ()
    %181 = vector.extract_strided_slice %162 {offsets = [0, 0, 8], sizes = [2, 8, 8], strides = [1, 1, 1]} : vector<2x8x32xbf16> to vector<2x8x8xbf16>
    %182 = vector.extract_strided_slice %163 {offsets = [0, 0, 8], sizes = [2, 8, 8], strides = [1, 1, 1]} : vector<2x8x32xbf16> to vector<2x8x8xbf16>
    "tpu.trace_start"() <{level = 10 : i32, message = "bqd,bkd->bqk"}> : () -> ()
    %cst_71 = arith.constant dense<0.000000e+00> : vector<2x8x8xf32>
    %183 = tpu.matmul %181, %182, %cst_71 {dimension_numbers = #tpu.dot_dimension_numbers<[2], [2], [1], [1], [0, 0, 0, 1, 1, 1], [0], [0]>} : vector<2x8x8xbf16>, vector<2x8x8xbf16>, vector<2x8x8xf32> -> vector<2x8x8xf32>
    "tpu.trace_stop"() : () -> ()
    %184 = arith.addf %183, %2 : vector<2x8x8xf32>
    %cst_72 = arith.constant dense<0xFF800000> : vector<2x8xf32>
    %185 = vector.multi_reduction <maximumf>, %184, %cst_72 [2] : vector<2x8x8xf32> to vector<2x8xf32>
    %186 = vector.shape_cast %185 : vector<2x8xf32> to vector<2x8x1xf32>
    %187 = vector.broadcast %186 : vector<2x8x1xf32> to vector<2x8x8xf32>
    %188 = arith.subf %184, %187 : vector<2x8x8xf32>
    %189 = math.exp %188 : vector<2x8x8xf32>
    %cst_73 = arith.constant dense<0.000000e+00> : vector<2x8xf32>
    %190 = vector.multi_reduction <add>, %189, %cst_73 [2] : vector<2x8x8xf32> to vector<2x8xf32>
    %191 = vector.shape_cast %190 : vector<2x8xf32> to vector<2x8x1xf32>
    %192 = vector.broadcast %191 : vector<2x8x1xf32> to vector<2x8x8xf32>
    %193 = arith.divf %189, %192 : vector<2x8x8xf32>
    %194 = arith.truncf %193 : vector<2x8x8xf32> to vector<2x8x8xbf16>
    %195 = vector.extract_strided_slice %164 {offsets = [0, 0, 8], sizes = [2, 8, 8], strides = [1, 1, 1]} : vector<2x8x32xbf16> to vector<2x8x8xbf16>
    "tpu.trace_start"() <{level = 10 : i32, message = "bqk,bkd->bqd"}> : () -> ()
    %cst_74 = arith.constant dense<0.000000e+00> : vector<2x8x8xf32>
    %196 = tpu.matmul %194, %195, %cst_74 {dimension_numbers = #tpu.dot_dimension_numbers<[2], [1], [1], [2], [0, 0, 0, 1, 1, 2], [0], [0]>} : vector<2x8x8xbf16>, vector<2x8x8xbf16>, vector<2x8x8xf32> -> vector<2x8x8xf32>
    "tpu.trace_stop"() : () -> ()
    %197 = vector.extract_strided_slice %162 {offsets = [0, 0, 16], sizes = [2, 8, 8], strides = [1, 1, 1]} : vector<2x8x32xbf16> to vector<2x8x8xbf16>
    %198 = vector.extract_strided_slice %163 {offsets = [0, 0, 16], sizes = [2, 8, 8], strides = [1, 1, 1]} : vector<2x8x32xbf16> to vector<2x8x8xbf16>
    "tpu.trace_start"() <{level = 10 : i32, message = "bqd,bkd->bqk"}> : () -> ()
    %cst_75 = arith.constant dense<0.000000e+00> : vector<2x8x8xf32>
    %199 = tpu.matmul %197, %198, %cst_75 {dimension_numbers = #tpu.dot_dimension_numbers<[2], [2], [1], [1], [0, 0, 0, 1, 1, 1], [0], [0]>} : vector<2x8x8xbf16>, vector<2x8x8xbf16>, vector<2x8x8xf32> -> vector<2x8x8xf32>
    "tpu.trace_stop"() : () -> ()
    %200 = arith.addf %199, %2 : vector<2x8x8xf32>
    %cst_76 = arith.constant dense<0xFF800000> : vector<2x8xf32>
    %201 = vector.multi_reduction <maximumf>, %200, %cst_76 [2] : vector<2x8x8xf32> to vector<2x8xf32>
    %202 = vector.shape_cast %201 : vector<2x8xf32> to vector<2x8x1xf32>
    %203 = vector.broadcast %202 : vector<2x8x1xf32> to vector<2x8x8xf32>
    %204 = arith.subf %200, %203 : vector<2x8x8xf32>
    %205 = math.exp %204 : vector<2x8x8xf32>
    %cst_77 = arith.constant dense<0.000000e+00> : vector<2x8xf32>
    %206 = vector.multi_reduction <add>, %205, %cst_77 [2] : vector<2x8x8xf32> to vector<2x8xf32>
    %207 = vector.shape_cast %206 : vector<2x8xf32> to vector<2x8x1xf32>
    %208 = vector.broadcast %207 : vector<2x8x1xf32> to vector<2x8x8xf32>
    %209 = arith.divf %205, %208 : vector<2x8x8xf32>
    %210 = arith.truncf %209 : vector<2x8x8xf32> to vector<2x8x8xbf16>
    %211 = vector.extract_strided_slice %164 {offsets = [0, 0, 16], sizes = [2, 8, 8], strides = [1, 1, 1]} : vector<2x8x32xbf16> to vector<2x8x8xbf16>
    "tpu.trace_start"() <{level = 10 : i32, message = "bqk,bkd->bqd"}> : () -> ()
    %cst_78 = arith.constant dense<0.000000e+00> : vector<2x8x8xf32>
    %212 = tpu.matmul %210, %211, %cst_78 {dimension_numbers = #tpu.dot_dimension_numbers<[2], [1], [1], [2], [0, 0, 0, 1, 1, 2], [0], [0]>} : vector<2x8x8xbf16>, vector<2x8x8xbf16>, vector<2x8x8xf32> -> vector<2x8x8xf32>
    "tpu.trace_stop"() : () -> ()
    %213 = vector.extract_strided_slice %162 {offsets = [0, 0, 24], sizes = [2, 8, 8], strides = [1, 1, 1]} : vector<2x8x32xbf16> to vector<2x8x8xbf16>
    %214 = vector.extract_strided_slice %163 {offsets = [0, 0, 24], sizes = [2, 8, 8], strides = [1, 1, 1]} : vector<2x8x32xbf16> to vector<2x8x8xbf16>
    "tpu.trace_start"() <{level = 10 : i32, message = "bqd,bkd->bqk"}> : () -> ()
    %cst_79 = arith.constant dense<0.000000e+00> : vector<2x8x8xf32>
    %215 = tpu.matmul %213, %214, %cst_79 {dimension_numbers = #tpu.dot_dimension_numbers<[2], [2], [1], [1], [0, 0, 0, 1, 1, 1], [0], [0]>} : vector<2x8x8xbf16>, vector<2x8x8xbf16>, vector<2x8x8xf32> -> vector<2x8x8xf32>
    "tpu.trace_stop"() : () -> ()
    %216 = arith.addf %215, %2 : vector<2x8x8xf32>
    %cst_80 = arith.constant dense<0xFF800000> : vector<2x8xf32>
    %217 = vector.multi_reduction <maximumf>, %216, %cst_80 [2] : vector<2x8x8xf32> to vector<2x8xf32>
    %218 = vector.shape_cast %217 : vector<2x8xf32> to vector<2x8x1xf32>
    %219 = vector.broadcast %218 : vector<2x8x1xf32> to vector<2x8x8xf32>
    %220 = arith.subf %216, %219 : vector<2x8x8xf32>
    %221 = math.exp %220 : vector<2x8x8xf32>
    %cst_81 = arith.constant dense<0.000000e+00> : vector<2x8xf32>
    %222 = vector.multi_reduction <add>, %221, %cst_81 [2] : vector<2x8x8xf32> to vector<2x8xf32>
    %223 = vector.shape_cast %222 : vector<2x8xf32> to vector<2x8x1xf32>
    %224 = vector.broadcast %223 : vector<2x8x1xf32> to vector<2x8x8xf32>
    %225 = arith.divf %221, %224 : vector<2x8x8xf32>
    %226 = arith.truncf %225 : vector<2x8x8xf32> to vector<2x8x8xbf16>
    %227 = vector.extract_strided_slice %164 {offsets = [0, 0, 24], sizes = [2, 8, 8], strides = [1, 1, 1]} : vector<2x8x32xbf16> to vector<2x8x8xbf16>
    "tpu.trace_start"() <{level = 10 : i32, message = "bqk,bkd->bqd"}> : () -> ()
    %cst_82 = arith.constant dense<0.000000e+00> : vector<2x8x8xf32>
    %228 = tpu.matmul %226, %227, %cst_82 {dimension_numbers = #tpu.dot_dimension_numbers<[2], [1], [1], [2], [0, 0, 0, 1, 1, 2], [0], [0]>} : vector<2x8x8xbf16>, vector<2x8x8xbf16>, vector<2x8x8xf32> -> vector<2x8x8xf32>
    "tpu.trace_stop"() : () -> ()
    %229 = tpu.concatenate %180, %196, %212, %228 in 2 : vector<2x8x8xf32>, vector<2x8x8xf32>, vector<2x8x8xf32>, vector<2x8x8xf32> -> vector<2x8x32xf32>
    %230 = vector.shape_cast %229 : vector<2x8x32xf32> to vector<16x32xf32>
    %231 = arith.truncf %230 : vector<16x32xf32> to vector<16x32xbf16>
    %c1_83 = arith.constant 1 : index
    %c0_84 = arith.constant 0 : index
    %c0_85 = arith.constant 0 : index
    %232 = vector.load %arg7[%c1_83, %c0_84, %c0_85] : memref<2x32x32xbf16, #tpu.memory_space<vmem>>, vector<1x32x32xbf16>
    %233 = vector.shape_cast %232 : vector<1x32x32xbf16> to vector<32x32xbf16>
    %cst_86 = arith.constant dense<0.000000e+00> : vector<16x32xf32>
    %234 = tpu.matmul %231, %233, %cst_86 {dimension_numbers = #tpu.dot_dimension_numbers<[1], [0], [0], [1], [0, 0, 1, 1], [], []>} : vector<16x32xbf16>, vector<32x32xbf16>, vector<16x32xf32> -> vector<16x32xf32>
    %c1_87 = arith.constant 1 : index
    %c0_88 = arith.constant 0 : index
    %235 = vector.load %arg8[%c1_87, %c0_88] : memref<2x32xf32, #tpu.memory_space<vmem>>, vector<1x32xf32>
    %236 = vector.broadcast %235 : vector<1x32xf32> to vector<16x32xf32>
    %237 = arith.addf %234, %236 : vector<16x32xf32>
    %238 = arith.addf %152, %237 : vector<16x32xf32>
    %c2 = arith.constant 2 : index
    %c0_89 = arith.constant 0 : index
    %239 = vector.load %arg13[%c2, %c0_89] : memref<4x32xf32, #tpu.memory_space<vmem>>, vector<1x32xf32>
    %c2_90 = arith.constant 2 : index
    %c0_91 = arith.constant 0 : index
    %240 = vector.load %arg14[%c2_90, %c0_91] : memref<4x32xf32, #tpu.memory_space<vmem>>, vector<1x32xf32>
    %cst_92 = arith.constant dense<0.000000e+00> : vector<16xf32>
    %241 = vector.multi_reduction <add>, %238, %cst_92 [1] : vector<16x32xf32> to vector<16xf32>
    %242 = vector.shape_cast %241 : vector<16xf32> to vector<16x1xf32>
    %cst_93 = arith.constant 3.200000e+01 : f32
    %243 = vector.broadcast %cst_93 : f32 to vector<16x1xf32>
    %244 = arith.divf %242, %243 : vector<16x1xf32>
    %245 = vector.broadcast %244 : vector<16x1xf32> to vector<16x32xf32>
    %246 = arith.subf %238, %245 : vector<16x32xf32>
    %247 = arith.mulf %246, %246 : vector<16x32xf32>
    %cst_94 = arith.constant dense<0.000000e+00> : vector<16xf32>
    %248 = vector.multi_reduction <add>, %247, %cst_94 [1] : vector<16x32xf32> to vector<16xf32>
    %249 = vector.shape_cast %248 : vector<16xf32> to vector<16x1xf32>
    %cst_95 = arith.constant 3.200000e+01 : f32
    %250 = vector.broadcast %cst_95 : f32 to vector<16x1xf32>
    %251 = arith.divf %249, %250 : vector<16x1xf32>
    %252 = vector.broadcast %244 : vector<16x1xf32> to vector<16x32xf32>
    %253 = arith.subf %238, %252 : vector<16x32xf32>
    %cst_96 = arith.constant 9.99999974E-6 : f32
    %254 = vector.broadcast %cst_96 : f32 to vector<16x1xf32>
    %255 = arith.addf %251, %254 : vector<16x1xf32>
    %256 = math.rsqrt %255 : vector<16x1xf32>
    %257 = vector.broadcast %256 : vector<16x1xf32> to vector<16x32xf32>
    %258 = arith.mulf %253, %257 : vector<16x32xf32>
    %259 = vector.broadcast %239 : vector<1x32xf32> to vector<16x32xf32>
    %260 = arith.mulf %258, %259 : vector<16x32xf32>
    %261 = vector.broadcast %240 : vector<1x32xf32> to vector<16x32xf32>
    %262 = arith.addf %260, %261 : vector<16x32xf32>
    %263 = arith.truncf %262 : vector<16x32xf32> to vector<16x32xbf16>
    %c1_97 = arith.constant 1 : index
    %c0_98 = arith.constant 0 : index
    %c0_99 = arith.constant 0 : index
    %264 = vector.load %arg9[%c1_97, %c0_98, %c0_99] : memref<2x32x64xbf16, #tpu.memory_space<vmem>>, vector<1x32x64xbf16>
    %265 = vector.shape_cast %264 : vector<1x32x64xbf16> to vector<32x64xbf16>
    %cst_100 = arith.constant dense<0.000000e+00> : vector<16x64xf32>
    %266 = tpu.matmul %263, %265, %cst_100 {dimension_numbers = #tpu.dot_dimension_numbers<[1], [0], [0], [1], [0, 0, 1, 1], [], []>} : vector<16x32xbf16>, vector<32x64xbf16>, vector<16x64xf32> -> vector<16x64xf32>
    %c1_101 = arith.constant 1 : index
    %c0_102 = arith.constant 0 : index
    %267 = vector.load %arg10[%c1_101, %c0_102] : memref<2x64xf32, #tpu.memory_space<vmem>>, vector<1x64xf32>
    %268 = vector.broadcast %267 : vector<1x64xf32> to vector<16x64xf32>
    %269 = arith.addf %266, %268 : vector<16x64xf32>
    %cst_103 = arith.constant 0.000000e+00 : f32
    %270 = vector.broadcast %cst_103 : f32 to vector<16x64xf32>
    %271 = arith.maximumf %269, %270 : vector<16x64xf32>
    %272 = arith.truncf %271 : vector<16x64xf32> to vector<16x64xbf16>
    %c1_104 = arith.constant 1 : index
    %c0_105 = arith.constant 0 : index
    %c0_106 = arith.constant 0 : index
    %273 = vector.load %arg11[%c1_104, %c0_105, %c0_106] : memref<2x64x32xbf16, #tpu.memory_space<vmem>>, vector<1x64x32xbf16>
    %274 = vector.shape_cast %273 : vector<1x64x32xbf16> to vector<64x32xbf16>
    %cst_107 = arith.constant dense<0.000000e+00> : vector<16x32xf32>
    %275 = tpu.matmul %272, %274, %cst_107 {dimension_numbers = #tpu.dot_dimension_numbers<[1], [0], [0], [1], [0, 0, 1, 1], [], []>} : vector<16x64xbf16>, vector<64x32xbf16>, vector<16x32xf32> -> vector<16x32xf32>
    %c1_108 = arith.constant 1 : index
    %c0_109 = arith.constant 0 : index
    %276 = vector.load %arg12[%c1_108, %c0_109] : memref<2x32xf32, #tpu.memory_space<vmem>>, vector<1x32xf32>
    %277 = vector.broadcast %276 : vector<1x32xf32> to vector<16x32xf32>
    %278 = arith.addf %275, %277 : vector<16x32xf32>
    %279 = arith.addf %262, %278 : vector<16x32xf32>
    %c3 = arith.constant 3 : index
    %c0_110 = arith.constant 0 : index
    %280 = vector.load %arg13[%c3, %c0_110] : memref<4x32xf32, #tpu.memory_space<vmem>>, vector<1x32xf32>
    %c3_111 = arith.constant 3 : index
    %c0_112 = arith.constant 0 : index
    %281 = vector.load %arg14[%c3_111, %c0_112] : memref<4x32xf32, #tpu.memory_space<vmem>>, vector<1x32xf32>
    %cst_113 = arith.constant dense<0.000000e+00> : vector<16xf32>
    %282 = vector.multi_reduction <add>, %279, %cst_113 [1] : vector<16x32xf32> to vector<16xf32>
    %283 = vector.shape_cast %282 : vector<16xf32> to vector<16x1xf32>
    %cst_114 = arith.constant 3.200000e+01 : f32
    %284 = vector.broadcast %cst_114 : f32 to vector<16x1xf32>
    %285 = arith.divf %283, %284 : vector<16x1xf32>
    %286 = vector.broadcast %285 : vector<16x1xf32> to vector<16x32xf32>
    %287 = arith.subf %279, %286 : vector<16x32xf32>
    %288 = arith.mulf %287, %287 : vector<16x32xf32>
    %cst_115 = arith.constant dense<0.000000e+00> : vector<16xf32>
    %289 = vector.multi_reduction <add>, %288, %cst_115 [1] : vector<16x32xf32> to vector<16xf32>
    %290 = vector.shape_cast %289 : vector<16xf32> to vector<16x1xf32>
    %cst_116 = arith.constant 3.200000e+01 : f32
    %291 = vector.broadcast %cst_116 : f32 to vector<16x1xf32>
    %292 = arith.divf %290, %291 : vector<16x1xf32>
    %293 = vector.broadcast %285 : vector<16x1xf32> to vector<16x32xf32>
    %294 = arith.subf %279, %293 : vector<16x32xf32>
    %cst_117 = arith.constant 9.99999974E-6 : f32
    %295 = vector.broadcast %cst_117 : f32 to vector<16x1xf32>
    %296 = arith.addf %292, %295 : vector<16x1xf32>
    %297 = math.rsqrt %296 : vector<16x1xf32>
    %298 = vector.broadcast %297 : vector<16x1xf32> to vector<16x32xf32>
    %299 = arith.mulf %294, %298 : vector<16x32xf32>
    %300 = vector.broadcast %280 : vector<1x32xf32> to vector<16x32xf32>
    %301 = arith.mulf %299, %300 : vector<16x32xf32>
    %302 = vector.broadcast %281 : vector<1x32xf32> to vector<16x32xf32>
    %303 = arith.addf %301, %302 : vector<16x32xf32>
    %304 = arith.truncf %303 : vector<16x32xf32> to vector<16x32xbf16>
    %c0_118 = arith.constant 0 : index
    %c0_119 = arith.constant 0 : index
    %305 = vector.load %arg21[%c0_118, %c0_119] : memref<32x128xbf16, #tpu.memory_space<vmem>>, vector<32x128xbf16>
    %cst_120 = arith.constant dense<0.000000e+00> : vector<16x128xf32>
    %306 = tpu.matmul %304, %305, %cst_120 {dimension_numbers = #tpu.dot_dimension_numbers<[1], [0], [0], [1], [0, 0, 1, 1], [], []>} : vector<16x32xbf16>, vector<32x128xbf16>, vector<16x128xf32> -> vector<16x128xf32>
    %c0_121 = arith.constant 0 : index
    %c0_122 = arith.constant 0 : index
    %307 = vector.load %arg22[%c0_121, %c0_122] : memref<1x128xf32, #tpu.memory_space<vmem>>, vector<1x128xf32>
    %308 = vector.broadcast %307 : vector<1x128xf32> to vector<16x128xf32>
    %309 = arith.addf %306, %308 : vector<16x128xf32>
    %310 = vector.shape_cast %309 : vector<16x128xf32> to vector<2x8x128xf32>
    %311 = arith.truncf %310 : vector<2x8x128xf32> to vector<2x8x128xbf16>
    %c0_123 = arith.constant 0 : index
    %c0_124 = arith.constant 0 : index
    %312 = vector.load %arg2[%c0_123, %c0_124] : memref<16x32xf32, #tpu.memory_space<vmem>>, vector<16x32xf32>
    %313 = arith.truncf %312 : vector<16x32xf32> to vector<16x32xbf16>
    %c0_125 = arith.constant 0 : index
    %c0_126 = arith.constant 0 : index
    %c0_127 = arith.constant 0 : index
    %314 = vector.load %arg4[%c0_125, %c0_126, %c0_127] : memref<2x8x8xf32, #tpu.memory_space<vmem>>, vector<2x8x8xf32>
    %c0_128 = arith.constant 0 : index
    %c0_129 = arith.constant 0 : index
    %c0_130 = arith.constant 0 : index
    %315 = vector.load %arg15[%c0_128, %c0_129, %c0_130] : memref<2x32x96xbf16, #tpu.memory_space<vmem>>, vector<1x32x96xbf16>
    %316 = vector.shape_cast %315 : vector<1x32x96xbf16> to vector<32x96xbf16>
    %cst_131 = arith.constant dense<0.000000e+00> : vector<16x96xf32>
    %317 = tpu.matmul %313, %316, %cst_131 {dimension_numbers = #tpu.dot_dimension_numbers<[1], [0], [0], [1], [0, 0, 1, 1], [], []>} : vector<16x32xbf16>, vector<32x96xbf16>, vector<16x96xf32> -> vector<16x96xf32>
    %c0_132 = arith.constant 0 : index
    %c0_133 = arith.constant 0 : index
    %318 = vector.load %arg16[%c0_132, %c0_133] : memref<2x96xf32, #tpu.memory_space<vmem>>, vector<1x96xf32>
    %319 = vector.broadcast %318 : vector<1x96xf32> to vector<16x96xf32>
    %320 = arith.addf %317, %319 : vector<16x96xf32>
    %321 = vector.shape_cast %320 : vector<16x96xf32> to vector<2x8x96xf32>
    %322 = arith.truncf %321 : vector<2x8x96xf32> to vector<2x8x96xbf16>
    %323 = vector.extract_strided_slice %322 {offsets = [0, 0, 0], sizes = [2, 8, 32], strides = [1, 1, 1]} : vector<2x8x96xbf16> to vector<2x8x32xbf16>
    %324 = vector.extract_strided_slice %322 {offsets = [0, 0, 32], sizes = [2, 8, 32], strides = [1, 1, 1]} : vector<2x8x96xbf16> to vector<2x8x32xbf16>
    %325 = vector.extract_strided_slice %322 {offsets = [0, 0, 64], sizes = [2, 8, 32], strides = [1, 1, 1]} : vector<2x8x96xbf16> to vector<2x8x32xbf16>
    %326 = vector.extract_strided_slice %323 {offsets = [0, 0, 0], sizes = [2, 8, 8], strides = [1, 1, 1]} : vector<2x8x32xbf16> to vector<2x8x8xbf16>
    %327 = vector.extract_strided_slice %324 {offsets = [0, 0, 0], sizes = [2, 8, 8], strides = [1, 1, 1]} : vector<2x8x32xbf16> to vector<2x8x8xbf16>
    "tpu.trace_start"() <{level = 10 : i32, message = "bqd,bkd->bqk"}> : () -> ()
    %cst_134 = arith.constant dense<0.000000e+00> : vector<2x8x8xf32>
    %328 = tpu.matmul %326, %327, %cst_134 {dimension_numbers = #tpu.dot_dimension_numbers<[2], [2], [1], [1], [0, 0, 0, 1, 1, 1], [0], [0]>} : vector<2x8x8xbf16>, vector<2x8x8xbf16>, vector<2x8x8xf32> -> vector<2x8x8xf32>
    "tpu.trace_stop"() : () -> ()
    %329 = arith.addf %328, %314 : vector<2x8x8xf32>
    %cst_135 = arith.constant dense<0xFF800000> : vector<2x8xf32>
    %330 = vector.multi_reduction <maximumf>, %329, %cst_135 [2] : vector<2x8x8xf32> to vector<2x8xf32>
    %331 = vector.shape_cast %330 : vector<2x8xf32> to vector<2x8x1xf32>
    %332 = vector.broadcast %331 : vector<2x8x1xf32> to vector<2x8x8xf32>
    %333 = arith.subf %329, %332 : vector<2x8x8xf32>
    %334 = math.exp %333 : vector<2x8x8xf32>
    %cst_136 = arith.constant dense<0.000000e+00> : vector<2x8xf32>
    %335 = vector.multi_reduction <add>, %334, %cst_136 [2] : vector<2x8x8xf32> to vector<2x8xf32>
    %336 = vector.shape_cast %335 : vector<2x8xf32> to vector<2x8x1xf32>
    %337 = vector.broadcast %336 : vector<2x8x1xf32> to vector<2x8x8xf32>
    %338 = arith.divf %334, %337 : vector<2x8x8xf32>
    %339 = arith.truncf %338 : vector<2x8x8xf32> to vector<2x8x8xbf16>
    %340 = vector.extract_strided_slice %325 {offsets = [0, 0, 0], sizes = [2, 8, 8], strides = [1, 1, 1]} : vector<2x8x32xbf16> to vector<2x8x8xbf16>
    "tpu.trace_start"() <{level = 10 : i32, message = "bqk,bkd->bqd"}> : () -> ()
    %cst_137 = arith.constant dense<0.000000e+00> : vector<2x8x8xf32>
    %341 = tpu.matmul %339, %340, %cst_137 {dimension_numbers = #tpu.dot_dimension_numbers<[2], [1], [1], [2], [0, 0, 0, 1, 1, 2], [0], [0]>} : vector<2x8x8xbf16>, vector<2x8x8xbf16>, vector<2x8x8xf32> -> vector<2x8x8xf32>
    "tpu.trace_stop"() : () -> ()
    %342 = vector.extract_strided_slice %323 {offsets = [0, 0, 8], sizes = [2, 8, 8], strides = [1, 1, 1]} : vector<2x8x32xbf16> to vector<2x8x8xbf16>
    %343 = vector.extract_strided_slice %324 {offsets = [0, 0, 8], sizes = [2, 8, 8], strides = [1, 1, 1]} : vector<2x8x32xbf16> to vector<2x8x8xbf16>
    "tpu.trace_start"() <{level = 10 : i32, message = "bqd,bkd->bqk"}> : () -> ()
    %cst_138 = arith.constant dense<0.000000e+00> : vector<2x8x8xf32>
    %344 = tpu.matmul %342, %343, %cst_138 {dimension_numbers = #tpu.dot_dimension_numbers<[2], [2], [1], [1], [0, 0, 0, 1, 1, 1], [0], [0]>} : vector<2x8x8xbf16>, vector<2x8x8xbf16>, vector<2x8x8xf32> -> vector<2x8x8xf32>
    "tpu.trace_stop"() : () -> ()
    %345 = arith.addf %344, %314 : vector<2x8x8xf32>
    %cst_139 = arith.constant dense<0xFF800000> : vector<2x8xf32>
    %346 = vector.multi_reduction <maximumf>, %345, %cst_139 [2] : vector<2x8x8xf32> to vector<2x8xf32>
    %347 = vector.shape_cast %346 : vector<2x8xf32> to vector<2x8x1xf32>
    %348 = vector.broadcast %347 : vector<2x8x1xf32> to vector<2x8x8xf32>
    %349 = arith.subf %345, %348 : vector<2x8x8xf32>
    %350 = math.exp %349 : vector<2x8x8xf32>
    %cst_140 = arith.constant dense<0.000000e+00> : vector<2x8xf32>
    %351 = vector.multi_reduction <add>, %350, %cst_140 [2] : vector<2x8x8xf32> to vector<2x8xf32>
    %352 = vector.shape_cast %351 : vector<2x8xf32> to vector<2x8x1xf32>
    %353 = vector.broadcast %352 : vector<2x8x1xf32> to vector<2x8x8xf32>
    %354 = arith.divf %350, %353 : vector<2x8x8xf32>
    %355 = arith.truncf %354 : vector<2x8x8xf32> to vector<2x8x8xbf16>
    %356 = vector.extract_strided_slice %325 {offsets = [0, 0, 8], sizes = [2, 8, 8], strides = [1, 1, 1]} : vector<2x8x32xbf16> to vector<2x8x8xbf16>
    "tpu.trace_start"() <{level = 10 : i32, message = "bqk,bkd->bqd"}> : () -> ()
    %cst_141 = arith.constant dense<0.000000e+00> : vector<2x8x8xf32>
    %357 = tpu.matmul %355, %356, %cst_141 {dimension_numbers = #tpu.dot_dimension_numbers<[2], [1], [1], [2], [0, 0, 0, 1, 1, 2], [0], [0]>} : vector<2x8x8xbf16>, vector<2x8x8xbf16>, vector<2x8x8xf32> -> vector<2x8x8xf32>
    "tpu.trace_stop"() : () -> ()
    %358 = vector.extract_strided_slice %323 {offsets = [0, 0, 16], sizes = [2, 8, 8], strides = [1, 1, 1]} : vector<2x8x32xbf16> to vector<2x8x8xbf16>
    %359 = vector.extract_strided_slice %324 {offsets = [0, 0, 16], sizes = [2, 8, 8], strides = [1, 1, 1]} : vector<2x8x32xbf16> to vector<2x8x8xbf16>
    "tpu.trace_start"() <{level = 10 : i32, message = "bqd,bkd->bqk"}> : () -> ()
    %cst_142 = arith.constant dense<0.000000e+00> : vector<2x8x8xf32>
    %360 = tpu.matmul %358, %359, %cst_142 {dimension_numbers = #tpu.dot_dimension_numbers<[2], [2], [1], [1], [0, 0, 0, 1, 1, 1], [0], [0]>} : vector<2x8x8xbf16>, vector<2x8x8xbf16>, vector<2x8x8xf32> -> vector<2x8x8xf32>
    "tpu.trace_stop"() : () -> ()
    %361 = arith.addf %360, %314 : vector<2x8x8xf32>
    %cst_143 = arith.constant dense<0xFF800000> : vector<2x8xf32>
    %362 = vector.multi_reduction <maximumf>, %361, %cst_143 [2] : vector<2x8x8xf32> to vector<2x8xf32>
    %363 = vector.shape_cast %362 : vector<2x8xf32> to vector<2x8x1xf32>
    %364 = vector.broadcast %363 : vector<2x8x1xf32> to vector<2x8x8xf32>
    %365 = arith.subf %361, %364 : vector<2x8x8xf32>
    %366 = math.exp %365 : vector<2x8x8xf32>
    %cst_144 = arith.constant dense<0.000000e+00> : vector<2x8xf32>
    %367 = vector.multi_reduction <add>, %366, %cst_144 [2] : vector<2x8x8xf32> to vector<2x8xf32>
    %368 = vector.shape_cast %367 : vector<2x8xf32> to vector<2x8x1xf32>
    %369 = vector.broadcast %368 : vector<2x8x1xf32> to vector<2x8x8xf32>
    %370 = arith.divf %366, %369 : vector<2x8x8xf32>
    %371 = arith.truncf %370 : vector<2x8x8xf32> to vector<2x8x8xbf16>
    %372 = vector.extract_strided_slice %325 {offsets = [0, 0, 16], sizes = [2, 8, 8], strides = [1, 1, 1]} : vector<2x8x32xbf16> to vector<2x8x8xbf16>
    "tpu.trace_start"() <{level = 10 : i32, message = "bqk,bkd->bqd"}> : () -> ()
    %cst_145 = arith.constant dense<0.000000e+00> : vector<2x8x8xf32>
    %373 = tpu.matmul %371, %372, %cst_145 {dimension_numbers = #tpu.dot_dimension_numbers<[2], [1], [1], [2], [0, 0, 0, 1, 1, 2], [0], [0]>} : vector<2x8x8xbf16>, vector<2x8x8xbf16>, vector<2x8x8xf32> -> vector<2x8x8xf32>
    "tpu.trace_stop"() : () -> ()
    %374 = vector.extract_strided_slice %323 {offsets = [0, 0, 24], sizes = [2, 8, 8], strides = [1, 1, 1]} : vector<2x8x32xbf16> to vector<2x8x8xbf16>
    %375 = vector.extract_strided_slice %324 {offsets = [0, 0, 24], sizes = [2, 8, 8], strides = [1, 1, 1]} : vector<2x8x32xbf16> to vector<2x8x8xbf16>
    "tpu.trace_start"() <{level = 10 : i32, message = "bqd,bkd->bqk"}> : () -> ()
    %cst_146 = arith.constant dense<0.000000e+00> : vector<2x8x8xf32>
    %376 = tpu.matmul %374, %375, %cst_146 {dimension_numbers = #tpu.dot_dimension_numbers<[2], [2], [1], [1], [0, 0, 0, 1, 1, 1], [0], [0]>} : vector<2x8x8xbf16>, vector<2x8x8xbf16>, vector<2x8x8xf32> -> vector<2x8x8xf32>
    "tpu.trace_stop"() : () -> ()
    %377 = arith.addf %376, %314 : vector<2x8x8xf32>
    %cst_147 = arith.constant dense<0xFF800000> : vector<2x8xf32>
    %378 = vector.multi_reduction <maximumf>, %377, %cst_147 [2] : vector<2x8x8xf32> to vector<2x8xf32>
    %379 = vector.shape_cast %378 : vector<2x8xf32> to vector<2x8x1xf32>
    %380 = vector.broadcast %379 : vector<2x8x1xf32> to vector<2x8x8xf32>
    %381 = arith.subf %377, %380 : vector<2x8x8xf32>
    %382 = math.exp %381 : vector<2x8x8xf32>
    %cst_148 = arith.constant dense<0.000000e+00> : vector<2x8xf32>
    %383 = vector.multi_reduction <add>, %382, %cst_148 [2] : vector<2x8x8xf32> to vector<2x8xf32>
    %384 = vector.shape_cast %383 : vector<2x8xf32> to vector<2x8x1xf32>
    %385 = vector.broadcast %384 : vector<2x8x1xf32> to vector<2x8x8xf32>
    %386 = arith.divf %382, %385 : vector<2x8x8xf32>
    %387 = arith.truncf %386 : vector<2x8x8xf32> to vector<2x8x8xbf16>
    %388 = vector.extract_strided_slice %325 {offsets = [0, 0, 24], sizes = [2, 8, 8], strides = [1, 1, 1]} : vector<2x8x32xbf16> to vector<2x8x8xbf16>
    "tpu.trace_start"() <{level = 10 : i32, message = "bqk,bkd->bqd"}> : () -> ()
    %cst_149 = arith.constant dense<0.000000e+00> : vector<2x8x8xf32>
    %389 = tpu.matmul %387, %388, %cst_149 {dimension_numbers = #tpu.dot_dimension_numbers<[2], [1], [1], [2], [0, 0, 0, 1, 1, 2], [0], [0]>} : vector<2x8x8xbf16>, vector<2x8x8xbf16>, vector<2x8x8xf32> -> vector<2x8x8xf32>
    "tpu.trace_stop"() : () -> ()
    %390 = tpu.concatenate %341, %357, %373, %389 in 2 : vector<2x8x8xf32>, vector<2x8x8xf32>, vector<2x8x8xf32>, vector<2x8x8xf32> -> vector<2x8x32xf32>
    %391 = vector.shape_cast %390 : vector<2x8x32xf32> to vector<16x32xf32>
    %392 = arith.truncf %391 : vector<16x32xf32> to vector<16x32xbf16>
    %c0_150 = arith.constant 0 : index
    %c0_151 = arith.constant 0 : index
    %c0_152 = arith.constant 0 : index
    %393 = vector.load %arg17[%c0_150, %c0_151, %c0_152] : memref<2x32x32xbf16, #tpu.memory_space<vmem>>, vector<1x32x32xbf16>
    %394 = vector.shape_cast %393 : vector<1x32x32xbf16> to vector<32x32xbf16>
    %cst_153 = arith.constant dense<0.000000e+00> : vector<16x32xf32>
    %395 = tpu.matmul %392, %394, %cst_153 {dimension_numbers = #tpu.dot_dimension_numbers<[1], [0], [0], [1], [0, 0, 1, 1], [], []>} : vector<16x32xbf16>, vector<32x32xbf16>, vector<16x32xf32> -> vector<16x32xf32>
    %c0_154 = arith.constant 0 : index
    %c0_155 = arith.constant 0 : index
    %396 = vector.load %arg18[%c0_154, %c0_155] : memref<2x32xf32, #tpu.memory_space<vmem>>, vector<1x32xf32>
    %397 = vector.broadcast %396 : vector<1x32xf32> to vector<16x32xf32>
    %398 = arith.addf %395, %397 : vector<16x32xf32>
    %399 = arith.addf %312, %398 : vector<16x32xf32>
    %c0_156 = arith.constant 0 : index
    %c0_157 = arith.constant 0 : index
    %400 = vector.load %arg29[%c0_156, %c0_157] : memref<6x32xf32, #tpu.memory_space<vmem>>, vector<1x32xf32>
    %c0_158 = arith.constant 0 : index
    %c0_159 = arith.constant 0 : index
    %401 = vector.load %arg30[%c0_158, %c0_159] : memref<6x32xf32, #tpu.memory_space<vmem>>, vector<1x32xf32>
    %cst_160 = arith.constant dense<0.000000e+00> : vector<16xf32>
    %402 = vector.multi_reduction <add>, %399, %cst_160 [1] : vector<16x32xf32> to vector<16xf32>
    %403 = vector.shape_cast %402 : vector<16xf32> to vector<16x1xf32>
    %cst_161 = arith.constant 3.200000e+01 : f32
    %404 = vector.broadcast %cst_161 : f32 to vector<16x1xf32>
    %405 = arith.divf %403, %404 : vector<16x1xf32>
    %406 = vector.broadcast %405 : vector<16x1xf32> to vector<16x32xf32>
    %407 = arith.subf %399, %406 : vector<16x32xf32>
    %408 = arith.mulf %407, %407 : vector<16x32xf32>
    %cst_162 = arith.constant dense<0.000000e+00> : vector<16xf32>
    %409 = vector.multi_reduction <add>, %408, %cst_162 [1] : vector<16x32xf32> to vector<16xf32>
    %410 = vector.shape_cast %409 : vector<16xf32> to vector<16x1xf32>
    %cst_163 = arith.constant 3.200000e+01 : f32
    %411 = vector.broadcast %cst_163 : f32 to vector<16x1xf32>
    %412 = arith.divf %410, %411 : vector<16x1xf32>
    %413 = vector.broadcast %405 : vector<16x1xf32> to vector<16x32xf32>
    %414 = arith.subf %399, %413 : vector<16x32xf32>
    %cst_164 = arith.constant 9.99999974E-6 : f32
    %415 = vector.broadcast %cst_164 : f32 to vector<16x1xf32>
    %416 = arith.addf %412, %415 : vector<16x1xf32>
    %417 = math.rsqrt %416 : vector<16x1xf32>
    %418 = vector.broadcast %417 : vector<16x1xf32> to vector<16x32xf32>
    %419 = arith.mulf %414, %418 : vector<16x32xf32>
    %420 = vector.broadcast %400 : vector<1x32xf32> to vector<16x32xf32>
    %421 = arith.mulf %419, %420 : vector<16x32xf32>
    %422 = vector.broadcast %401 : vector<1x32xf32> to vector<16x32xf32>
    %423 = arith.addf %421, %422 : vector<16x32xf32>
    %424 = arith.truncf %423 : vector<16x32xf32> to vector<16x32xbf16>
    %c0_165 = arith.constant 0 : index
    %c0_166 = arith.constant 0 : index
    %c0_167 = arith.constant 0 : index
    %425 = vector.load %arg19[%c0_165, %c0_166, %c0_167] : memref<2x32x32xbf16, #tpu.memory_space<vmem>>, vector<1x32x32xbf16>
    %426 = vector.shape_cast %425 : vector<1x32x32xbf16> to vector<32x32xbf16>
    %cst_168 = arith.constant dense<0.000000e+00> : vector<16x32xf32>
    %427 = tpu.matmul %424, %426, %cst_168 {dimension_numbers = #tpu.dot_dimension_numbers<[1], [0], [0], [1], [0, 0, 1, 1], [], []>} : vector<16x32xbf16>, vector<32x32xbf16>, vector<16x32xf32> -> vector<16x32xf32>
    %c0_169 = arith.constant 0 : index
    %c0_170 = arith.constant 0 : index
    %428 = vector.load %arg20[%c0_169, %c0_170] : memref<2x32xf32, #tpu.memory_space<vmem>>, vector<1x32xf32>
    %429 = vector.broadcast %428 : vector<1x32xf32> to vector<16x32xf32>
    %430 = arith.addf %427, %429 : vector<16x32xf32>
    %431 = vector.shape_cast %430 : vector<16x32xf32> to vector<2x8x32xf32>
    %432 = arith.truncf %431 : vector<2x8x32xf32> to vector<2x8x32xbf16>
    %433 = vector.extract_strided_slice %311 {offsets = [0, 0, 0], sizes = [2, 8, 32], strides = [1, 1, 1]} : vector<2x8x128xbf16> to vector<2x8x32xbf16>
    %434 = vector.extract_strided_slice %311 {offsets = [0, 0, 32], sizes = [2, 8, 32], strides = [1, 1, 1]} : vector<2x8x128xbf16> to vector<2x8x32xbf16>
    %435 = vector.extract_strided_slice %432 {offsets = [0, 0, 0], sizes = [2, 8, 8], strides = [1, 1, 1]} : vector<2x8x32xbf16> to vector<2x8x8xbf16>
    %436 = vector.extract_strided_slice %433 {offsets = [0, 0, 0], sizes = [2, 8, 8], strides = [1, 1, 1]} : vector<2x8x32xbf16> to vector<2x8x8xbf16>
    "tpu.trace_start"() <{level = 10 : i32, message = "bqd,bkd->bqk"}> : () -> ()
    %cst_171 = arith.constant dense<0.000000e+00> : vector<2x8x8xf32>
    %437 = tpu.matmul %435, %436, %cst_171 {dimension_numbers = #tpu.dot_dimension_numbers<[2], [2], [1], [1], [0, 0, 0, 1, 1, 1], [0], [0]>} : vector<2x8x8xbf16>, vector<2x8x8xbf16>, vector<2x8x8xf32> -> vector<2x8x8xf32>
    "tpu.trace_stop"() : () -> ()
    %cst_172 = arith.constant dense<0xFF800000> : vector<2x8xf32>
    %438 = vector.multi_reduction <maximumf>, %437, %cst_172 [2] : vector<2x8x8xf32> to vector<2x8xf32>
    %439 = vector.shape_cast %438 : vector<2x8xf32> to vector<2x8x1xf32>
    %440 = vector.broadcast %439 : vector<2x8x1xf32> to vector<2x8x8xf32>
    %441 = arith.subf %437, %440 : vector<2x8x8xf32>
    %442 = math.exp %441 : vector<2x8x8xf32>
    %cst_173 = arith.constant dense<0.000000e+00> : vector<2x8xf32>
    %443 = vector.multi_reduction <add>, %442, %cst_173 [2] : vector<2x8x8xf32> to vector<2x8xf32>
    %444 = vector.shape_cast %443 : vector<2x8xf32> to vector<2x8x1xf32>
    %445 = vector.broadcast %444 : vector<2x8x1xf32> to vector<2x8x8xf32>
    %446 = arith.divf %442, %445 : vector<2x8x8xf32>
    %447 = arith.truncf %446 : vector<2x8x8xf32> to vector<2x8x8xbf16>
    %448 = vector.extract_strided_slice %434 {offsets = [0, 0, 0], sizes = [2, 8, 8], strides = [1, 1, 1]} : vector<2x8x32xbf16> to vector<2x8x8xbf16>
    "tpu.trace_start"() <{level = 10 : i32, message = "bqk,bkd->bqd"}> : () -> ()
    %cst_174 = arith.constant dense<0.000000e+00> : vector<2x8x8xf32>
    %449 = tpu.matmul %447, %448, %cst_174 {dimension_numbers = #tpu.dot_dimension_numbers<[2], [1], [1], [2], [0, 0, 0, 1, 1, 2], [0], [0]>} : vector<2x8x8xbf16>, vector<2x8x8xbf16>, vector<2x8x8xf32> -> vector<2x8x8xf32>
    "tpu.trace_stop"() : () -> ()
    %450 = vector.extract_strided_slice %432 {offsets = [0, 0, 8], sizes = [2, 8, 8], strides = [1, 1, 1]} : vector<2x8x32xbf16> to vector<2x8x8xbf16>
    %451 = vector.extract_strided_slice %433 {offsets = [0, 0, 8], sizes = [2, 8, 8], strides = [1, 1, 1]} : vector<2x8x32xbf16> to vector<2x8x8xbf16>
    "tpu.trace_start"() <{level = 10 : i32, message = "bqd,bkd->bqk"}> : () -> ()
    %cst_175 = arith.constant dense<0.000000e+00> : vector<2x8x8xf32>
    %452 = tpu.matmul %450, %451, %cst_175 {dimension_numbers = #tpu.dot_dimension_numbers<[2], [2], [1], [1], [0, 0, 0, 1, 1, 1], [0], [0]>} : vector<2x8x8xbf16>, vector<2x8x8xbf16>, vector<2x8x8xf32> -> vector<2x8x8xf32>
    "tpu.trace_stop"() : () -> ()
    %cst_176 = arith.constant dense<0xFF800000> : vector<2x8xf32>
    %453 = vector.multi_reduction <maximumf>, %452, %cst_176 [2] : vector<2x8x8xf32> to vector<2x8xf32>
    %454 = vector.shape_cast %453 : vector<2x8xf32> to vector<2x8x1xf32>
    %455 = vector.broadcast %454 : vector<2x8x1xf32> to vector<2x8x8xf32>
    %456 = arith.subf %452, %455 : vector<2x8x8xf32>
    %457 = math.exp %456 : vector<2x8x8xf32>
    %cst_177 = arith.constant dense<0.000000e+00> : vector<2x8xf32>
    %458 = vector.multi_reduction <add>, %457, %cst_177 [2] : vector<2x8x8xf32> to vector<2x8xf32>
    %459 = vector.shape_cast %458 : vector<2x8xf32> to vector<2x8x1xf32>
    %460 = vector.broadcast %459 : vector<2x8x1xf32> to vector<2x8x8xf32>
    %461 = arith.divf %457, %460 : vector<2x8x8xf32>
    %462 = arith.truncf %461 : vector<2x8x8xf32> to vector<2x8x8xbf16>
    %463 = vector.extract_strided_slice %434 {offsets = [0, 0, 8], sizes = [2, 8, 8], strides = [1, 1, 1]} : vector<2x8x32xbf16> to vector<2x8x8xbf16>
    "tpu.trace_start"() <{level = 10 : i32, message = "bqk,bkd->bqd"}> : () -> ()
    %cst_178 = arith.constant dense<0.000000e+00> : vector<2x8x8xf32>
    %464 = tpu.matmul %462, %463, %cst_178 {dimension_numbers = #tpu.dot_dimension_numbers<[2], [1], [1], [2], [0, 0, 0, 1, 1, 2], [0], [0]>} : vector<2x8x8xbf16>, vector<2x8x8xbf16>, vector<2x8x8xf32> -> vector<2x8x8xf32>
    "tpu.trace_stop"() : () -> ()
    %465 = vector.extract_strided_slice %432 {offsets = [0, 0, 16], sizes = [2, 8, 8], strides = [1, 1, 1]} : vector<2x8x32xbf16> to vector<2x8x8xbf16>
    %466 = vector.extract_strided_slice %433 {offsets = [0, 0, 16], sizes = [2, 8, 8], strides = [1, 1, 1]} : vector<2x8x32xbf16> to vector<2x8x8xbf16>
    "tpu.trace_start"() <{level = 10 : i32, message = "bqd,bkd->bqk"}> : () -> ()
    %cst_179 = arith.constant dense<0.000000e+00> : vector<2x8x8xf32>
    %467 = tpu.matmul %465, %466, %cst_179 {dimension_numbers = #tpu.dot_dimension_numbers<[2], [2], [1], [1], [0, 0, 0, 1, 1, 1], [0], [0]>} : vector<2x8x8xbf16>, vector<2x8x8xbf16>, vector<2x8x8xf32> -> vector<2x8x8xf32>
    "tpu.trace_stop"() : () -> ()
    %cst_180 = arith.constant dense<0xFF800000> : vector<2x8xf32>
    %468 = vector.multi_reduction <maximumf>, %467, %cst_180 [2] : vector<2x8x8xf32> to vector<2x8xf32>
    %469 = vector.shape_cast %468 : vector<2x8xf32> to vector<2x8x1xf32>
    %470 = vector.broadcast %469 : vector<2x8x1xf32> to vector<2x8x8xf32>
    %471 = arith.subf %467, %470 : vector<2x8x8xf32>
    %472 = math.exp %471 : vector<2x8x8xf32>
    %cst_181 = arith.constant dense<0.000000e+00> : vector<2x8xf32>
    %473 = vector.multi_reduction <add>, %472, %cst_181 [2] : vector<2x8x8xf32> to vector<2x8xf32>
    %474 = vector.shape_cast %473 : vector<2x8xf32> to vector<2x8x1xf32>
    %475 = vector.broadcast %474 : vector<2x8x1xf32> to vector<2x8x8xf32>
    %476 = arith.divf %472, %475 : vector<2x8x8xf32>
    %477 = arith.truncf %476 : vector<2x8x8xf32> to vector<2x8x8xbf16>
    %478 = vector.extract_strided_slice %434 {offsets = [0, 0, 16], sizes = [2, 8, 8], strides = [1, 1, 1]} : vector<2x8x32xbf16> to vector<2x8x8xbf16>
    "tpu.trace_start"() <{level = 10 : i32, message = "bqk,bkd->bqd"}> : () -> ()
    %cst_182 = arith.constant dense<0.000000e+00> : vector<2x8x8xf32>
    %479 = tpu.matmul %477, %478, %cst_182 {dimension_numbers = #tpu.dot_dimension_numbers<[2], [1], [1], [2], [0, 0, 0, 1, 1, 2], [0], [0]>} : vector<2x8x8xbf16>, vector<2x8x8xbf16>, vector<2x8x8xf32> -> vector<2x8x8xf32>
    "tpu.trace_stop"() : () -> ()
    %480 = vector.extract_strided_slice %432 {offsets = [0, 0, 24], sizes = [2, 8, 8], strides = [1, 1, 1]} : vector<2x8x32xbf16> to vector<2x8x8xbf16>
    %481 = vector.extract_strided_slice %433 {offsets = [0, 0, 24], sizes = [2, 8, 8], strides = [1, 1, 1]} : vector<2x8x32xbf16> to vector<2x8x8xbf16>
    "tpu.trace_start"() <{level = 10 : i32, message = "bqd,bkd->bqk"}> : () -> ()
    %cst_183 = arith.constant dense<0.000000e+00> : vector<2x8x8xf32>
    %482 = tpu.matmul %480, %481, %cst_183 {dimension_numbers = #tpu.dot_dimension_numbers<[2], [2], [1], [1], [0, 0, 0, 1, 1, 1], [0], [0]>} : vector<2x8x8xbf16>, vector<2x8x8xbf16>, vector<2x8x8xf32> -> vector<2x8x8xf32>
    "tpu.trace_stop"() : () -> ()
    %cst_184 = arith.constant dense<0xFF800000> : vector<2x8xf32>
    %483 = vector.multi_reduction <maximumf>, %482, %cst_184 [2] : vector<2x8x8xf32> to vector<2x8xf32>
    %484 = vector.shape_cast %483 : vector<2x8xf32> to vector<2x8x1xf32>
    %485 = vector.broadcast %484 : vector<2x8x1xf32> to vector<2x8x8xf32>
    %486 = arith.subf %482, %485 : vector<2x8x8xf32>
    %487 = math.exp %486 : vector<2x8x8xf32>
    %cst_185 = arith.constant dense<0.000000e+00> : vector<2x8xf32>
    %488 = vector.multi_reduction <add>, %487, %cst_185 [2] : vector<2x8x8xf32> to vector<2x8xf32>
    %489 = vector.shape_cast %488 : vector<2x8xf32> to vector<2x8x1xf32>
    %490 = vector.broadcast %489 : vector<2x8x1xf32> to vector<2x8x8xf32>
    %491 = arith.divf %487, %490 : vector<2x8x8xf32>
    %492 = arith.truncf %491 : vector<2x8x8xf32> to vector<2x8x8xbf16>
    %493 = vector.extract_strided_slice %434 {offsets = [0, 0, 24], sizes = [2, 8, 8], strides = [1, 1, 1]} : vector<2x8x32xbf16> to vector<2x8x8xbf16>
    "tpu.trace_start"() <{level = 10 : i32, message = "bqk,bkd->bqd"}> : () -> ()
    %cst_186 = arith.constant dense<0.000000e+00> : vector<2x8x8xf32>
    %494 = tpu.matmul %492, %493, %cst_186 {dimension_numbers = #tpu.dot_dimension_numbers<[2], [1], [1], [2], [0, 0, 0, 1, 1, 2], [0], [0]>} : vector<2x8x8xbf16>, vector<2x8x8xbf16>, vector<2x8x8xf32> -> vector<2x8x8xf32>
    "tpu.trace_stop"() : () -> ()
    %495 = tpu.concatenate %449, %464, %479, %494 in 2 : vector<2x8x8xf32>, vector<2x8x8xf32>, vector<2x8x8xf32>, vector<2x8x8xf32> -> vector<2x8x32xf32>
    %496 = vector.shape_cast %495 : vector<2x8x32xf32> to vector<16x32xf32>
    %497 = arith.truncf %496 : vector<16x32xf32> to vector<16x32xbf16>
    %c0_187 = arith.constant 0 : index
    %c0_188 = arith.constant 0 : index
    %c0_189 = arith.constant 0 : index
    %498 = vector.load %arg23[%c0_187, %c0_188, %c0_189] : memref<2x32x32xbf16, #tpu.memory_space<vmem>>, vector<1x32x32xbf16>
    %499 = vector.shape_cast %498 : vector<1x32x32xbf16> to vector<32x32xbf16>
    %cst_190 = arith.constant dense<0.000000e+00> : vector<16x32xf32>
    %500 = tpu.matmul %497, %499, %cst_190 {dimension_numbers = #tpu.dot_dimension_numbers<[1], [0], [0], [1], [0, 0, 1, 1], [], []>} : vector<16x32xbf16>, vector<32x32xbf16>, vector<16x32xf32> -> vector<16x32xf32>
    %c0_191 = arith.constant 0 : index
    %c0_192 = arith.constant 0 : index
    %501 = vector.load %arg24[%c0_191, %c0_192] : memref<2x32xf32, #tpu.memory_space<vmem>>, vector<1x32xf32>
    %502 = vector.broadcast %501 : vector<1x32xf32> to vector<16x32xf32>
    %503 = arith.addf %500, %502 : vector<16x32xf32>
    %504 = arith.addf %423, %503 : vector<16x32xf32>
    %c1_193 = arith.constant 1 : index
    %c0_194 = arith.constant 0 : index
    %505 = vector.load %arg29[%c1_193, %c0_194] : memref<6x32xf32, #tpu.memory_space<vmem>>, vector<1x32xf32>
    %c1_195 = arith.constant 1 : index
    %c0_196 = arith.constant 0 : index
    %506 = vector.load %arg30[%c1_195, %c0_196] : memref<6x32xf32, #tpu.memory_space<vmem>>, vector<1x32xf32>
    %cst_197 = arith.constant dense<0.000000e+00> : vector<16xf32>
    %507 = vector.multi_reduction <add>, %504, %cst_197 [1] : vector<16x32xf32> to vector<16xf32>
    %508 = vector.shape_cast %507 : vector<16xf32> to vector<16x1xf32>
    %cst_198 = arith.constant 3.200000e+01 : f32
    %509 = vector.broadcast %cst_198 : f32 to vector<16x1xf32>
    %510 = arith.divf %508, %509 : vector<16x1xf32>
    %511 = vector.broadcast %510 : vector<16x1xf32> to vector<16x32xf32>
    %512 = arith.subf %504, %511 : vector<16x32xf32>
    %513 = arith.mulf %512, %512 : vector<16x32xf32>
    %cst_199 = arith.constant dense<0.000000e+00> : vector<16xf32>
    %514 = vector.multi_reduction <add>, %513, %cst_199 [1] : vector<16x32xf32> to vector<16xf32>
    %515 = vector.shape_cast %514 : vector<16xf32> to vector<16x1xf32>
    %cst_200 = arith.constant 3.200000e+01 : f32
    %516 = vector.broadcast %cst_200 : f32 to vector<16x1xf32>
    %517 = arith.divf %515, %516 : vector<16x1xf32>
    %518 = vector.broadcast %510 : vector<16x1xf32> to vector<16x32xf32>
    %519 = arith.subf %504, %518 : vector<16x32xf32>
    %cst_201 = arith.constant 9.99999974E-6 : f32
    %520 = vector.broadcast %cst_201 : f32 to vector<16x1xf32>
    %521 = arith.addf %517, %520 : vector<16x1xf32>
    %522 = math.rsqrt %521 : vector<16x1xf32>
    %523 = vector.broadcast %522 : vector<16x1xf32> to vector<16x32xf32>
    %524 = arith.mulf %519, %523 : vector<16x32xf32>
    %525 = vector.broadcast %505 : vector<1x32xf32> to vector<16x32xf32>
    %526 = arith.mulf %524, %525 : vector<16x32xf32>
    %527 = vector.broadcast %506 : vector<1x32xf32> to vector<16x32xf32>
    %528 = arith.addf %526, %527 : vector<16x32xf32>
    %529 = arith.truncf %528 : vector<16x32xf32> to vector<16x32xbf16>
    %c0_202 = arith.constant 0 : index
    %c0_203 = arith.constant 0 : index
    %c0_204 = arith.constant 0 : index
    %530 = vector.load %arg25[%c0_202, %c0_203, %c0_204] : memref<2x32x64xbf16, #tpu.memory_space<vmem>>, vector<1x32x64xbf16>
    %531 = vector.shape_cast %530 : vector<1x32x64xbf16> to vector<32x64xbf16>
    %cst_205 = arith.constant dense<0.000000e+00> : vector<16x64xf32>
    %532 = tpu.matmul %529, %531, %cst_205 {dimension_numbers = #tpu.dot_dimension_numbers<[1], [0], [0], [1], [0, 0, 1, 1], [], []>} : vector<16x32xbf16>, vector<32x64xbf16>, vector<16x64xf32> -> vector<16x64xf32>
    %c0_206 = arith.constant 0 : index
    %c0_207 = arith.constant 0 : index
    %533 = vector.load %arg26[%c0_206, %c0_207] : memref<2x64xf32, #tpu.memory_space<vmem>>, vector<1x64xf32>
    %534 = vector.broadcast %533 : vector<1x64xf32> to vector<16x64xf32>
    %535 = arith.addf %532, %534 : vector<16x64xf32>
    %cst_208 = arith.constant 0.000000e+00 : f32
    %536 = vector.broadcast %cst_208 : f32 to vector<16x64xf32>
    %537 = arith.maximumf %535, %536 : vector<16x64xf32>
    %538 = arith.truncf %537 : vector<16x64xf32> to vector<16x64xbf16>
    %c0_209 = arith.constant 0 : index
    %c0_210 = arith.constant 0 : index
    %c0_211 = arith.constant 0 : index
    %539 = vector.load %arg27[%c0_209, %c0_210, %c0_211] : memref<2x64x32xbf16, #tpu.memory_space<vmem>>, vector<1x64x32xbf16>
    %540 = vector.shape_cast %539 : vector<1x64x32xbf16> to vector<64x32xbf16>
    %cst_212 = arith.constant dense<0.000000e+00> : vector<16x32xf32>
    %541 = tpu.matmul %538, %540, %cst_212 {dimension_numbers = #tpu.dot_dimension_numbers<[1], [0], [0], [1], [0, 0, 1, 1], [], []>} : vector<16x64xbf16>, vector<64x32xbf16>, vector<16x32xf32> -> vector<16x32xf32>
    %c0_213 = arith.constant 0 : index
    %c0_214 = arith.constant 0 : index
    %542 = vector.load %arg28[%c0_213, %c0_214] : memref<2x32xf32, #tpu.memory_space<vmem>>, vector<1x32xf32>
    %543 = vector.broadcast %542 : vector<1x32xf32> to vector<16x32xf32>
    %544 = arith.addf %541, %543 : vector<16x32xf32>
    %545 = arith.addf %528, %544 : vector<16x32xf32>
    %c2_215 = arith.constant 2 : index
    %c0_216 = arith.constant 0 : index
    %546 = vector.load %arg29[%c2_215, %c0_216] : memref<6x32xf32, #tpu.memory_space<vmem>>, vector<1x32xf32>
    %c2_217 = arith.constant 2 : index
    %c0_218 = arith.constant 0 : index
    %547 = vector.load %arg30[%c2_217, %c0_218] : memref<6x32xf32, #tpu.memory_space<vmem>>, vector<1x32xf32>
    %cst_219 = arith.constant dense<0.000000e+00> : vector<16xf32>
    %548 = vector.multi_reduction <add>, %545, %cst_219 [1] : vector<16x32xf32> to vector<16xf32>
    %549 = vector.shape_cast %548 : vector<16xf32> to vector<16x1xf32>
    %cst_220 = arith.constant 3.200000e+01 : f32
    %550 = vector.broadcast %cst_220 : f32 to vector<16x1xf32>
    %551 = arith.divf %549, %550 : vector<16x1xf32>
    %552 = vector.broadcast %551 : vector<16x1xf32> to vector<16x32xf32>
    %553 = arith.subf %545, %552 : vector<16x32xf32>
    %554 = arith.mulf %553, %553 : vector<16x32xf32>
    %cst_221 = arith.constant dense<0.000000e+00> : vector<16xf32>
    %555 = vector.multi_reduction <add>, %554, %cst_221 [1] : vector<16x32xf32> to vector<16xf32>
    %556 = vector.shape_cast %555 : vector<16xf32> to vector<16x1xf32>
    %cst_222 = arith.constant 3.200000e+01 : f32
    %557 = vector.broadcast %cst_222 : f32 to vector<16x1xf32>
    %558 = arith.divf %556, %557 : vector<16x1xf32>
    %559 = vector.broadcast %551 : vector<16x1xf32> to vector<16x32xf32>
    %560 = arith.subf %545, %559 : vector<16x32xf32>
    %cst_223 = arith.constant 9.99999974E-6 : f32
    %561 = vector.broadcast %cst_223 : f32 to vector<16x1xf32>
    %562 = arith.addf %558, %561 : vector<16x1xf32>
    %563 = math.rsqrt %562 : vector<16x1xf32>
    %564 = vector.broadcast %563 : vector<16x1xf32> to vector<16x32xf32>
    %565 = arith.mulf %560, %564 : vector<16x32xf32>
    %566 = vector.broadcast %546 : vector<1x32xf32> to vector<16x32xf32>
    %567 = arith.mulf %565, %566 : vector<16x32xf32>
    %568 = vector.broadcast %547 : vector<1x32xf32> to vector<16x32xf32>
    %569 = arith.addf %567, %568 : vector<16x32xf32>
    %570 = arith.truncf %569 : vector<16x32xf32> to vector<16x32xbf16>
    %c1_224 = arith.constant 1 : index
    %c0_225 = arith.constant 0 : index
    %c0_226 = arith.constant 0 : index
    %571 = vector.load %arg15[%c1_224, %c0_225, %c0_226] : memref<2x32x96xbf16, #tpu.memory_space<vmem>>, vector<1x32x96xbf16>
    %572 = vector.shape_cast %571 : vector<1x32x96xbf16> to vector<32x96xbf16>
    %cst_227 = arith.constant dense<0.000000e+00> : vector<16x96xf32>
    %573 = tpu.matmul %570, %572, %cst_227 {dimension_numbers = #tpu.dot_dimension_numbers<[1], [0], [0], [1], [0, 0, 1, 1], [], []>} : vector<16x32xbf16>, vector<32x96xbf16>, vector<16x96xf32> -> vector<16x96xf32>
    %c1_228 = arith.constant 1 : index
    %c0_229 = arith.constant 0 : index
    %574 = vector.load %arg16[%c1_228, %c0_229] : memref<2x96xf32, #tpu.memory_space<vmem>>, vector<1x96xf32>
    %575 = vector.broadcast %574 : vector<1x96xf32> to vector<16x96xf32>
    %576 = arith.addf %573, %575 : vector<16x96xf32>
    %577 = vector.shape_cast %576 : vector<16x96xf32> to vector<2x8x96xf32>
    %578 = arith.truncf %577 : vector<2x8x96xf32> to vector<2x8x96xbf16>
    %579 = vector.extract_strided_slice %578 {offsets = [0, 0, 0], sizes = [2, 8, 32], strides = [1, 1, 1]} : vector<2x8x96xbf16> to vector<2x8x32xbf16>
    %580 = vector.extract_strided_slice %578 {offsets = [0, 0, 32], sizes = [2, 8, 32], strides = [1, 1, 1]} : vector<2x8x96xbf16> to vector<2x8x32xbf16>
    %581 = vector.extract_strided_slice %578 {offsets = [0, 0, 64], sizes = [2, 8, 32], strides = [1, 1, 1]} : vector<2x8x96xbf16> to vector<2x8x32xbf16>
    %582 = vector.extract_strided_slice %579 {offsets = [0, 0, 0], sizes = [2, 8, 8], strides = [1, 1, 1]} : vector<2x8x32xbf16> to vector<2x8x8xbf16>
    %583 = vector.extract_strided_slice %580 {offsets = [0, 0, 0], sizes = [2, 8, 8], strides = [1, 1, 1]} : vector<2x8x32xbf16> to vector<2x8x8xbf16>
    "tpu.trace_start"() <{level = 10 : i32, message = "bqd,bkd->bqk"}> : () -> ()
    %cst_230 = arith.constant dense<0.000000e+00> : vector<2x8x8xf32>
    %584 = tpu.matmul %582, %583, %cst_230 {dimension_numbers = #tpu.dot_dimension_numbers<[2], [2], [1], [1], [0, 0, 0, 1, 1, 1], [0], [0]>} : vector<2x8x8xbf16>, vector<2x8x8xbf16>, vector<2x8x8xf32> -> vector<2x8x8xf32>
    "tpu.trace_stop"() : () -> ()
    %585 = arith.addf %584, %314 : vector<2x8x8xf32>
    %cst_231 = arith.constant dense<0xFF800000> : vector<2x8xf32>
    %586 = vector.multi_reduction <maximumf>, %585, %cst_231 [2] : vector<2x8x8xf32> to vector<2x8xf32>
    %587 = vector.shape_cast %586 : vector<2x8xf32> to vector<2x8x1xf32>
    %588 = vector.broadcast %587 : vector<2x8x1xf32> to vector<2x8x8xf32>
    %589 = arith.subf %585, %588 : vector<2x8x8xf32>
    %590 = math.exp %589 : vector<2x8x8xf32>
    %cst_232 = arith.constant dense<0.000000e+00> : vector<2x8xf32>
    %591 = vector.multi_reduction <add>, %590, %cst_232 [2] : vector<2x8x8xf32> to vector<2x8xf32>
    %592 = vector.shape_cast %591 : vector<2x8xf32> to vector<2x8x1xf32>
    %593 = vector.broadcast %592 : vector<2x8x1xf32> to vector<2x8x8xf32>
    %594 = arith.divf %590, %593 : vector<2x8x8xf32>
    %595 = arith.truncf %594 : vector<2x8x8xf32> to vector<2x8x8xbf16>
    %596 = vector.extract_strided_slice %581 {offsets = [0, 0, 0], sizes = [2, 8, 8], strides = [1, 1, 1]} : vector<2x8x32xbf16> to vector<2x8x8xbf16>
    "tpu.trace_start"() <{level = 10 : i32, message = "bqk,bkd->bqd"}> : () -> ()
    %cst_233 = arith.constant dense<0.000000e+00> : vector<2x8x8xf32>
    %597 = tpu.matmul %595, %596, %cst_233 {dimension_numbers = #tpu.dot_dimension_numbers<[2], [1], [1], [2], [0, 0, 0, 1, 1, 2], [0], [0]>} : vector<2x8x8xbf16>, vector<2x8x8xbf16>, vector<2x8x8xf32> -> vector<2x8x8xf32>
    "tpu.trace_stop"() : () -> ()
    %598 = vector.extract_strided_slice %579 {offsets = [0, 0, 8], sizes = [2, 8, 8], strides = [1, 1, 1]} : vector<2x8x32xbf16> to vector<2x8x8xbf16>
    %599 = vector.extract_strided_slice %580 {offsets = [0, 0, 8], sizes = [2, 8, 8], strides = [1, 1, 1]} : vector<2x8x32xbf16> to vector<2x8x8xbf16>
    "tpu.trace_start"() <{level = 10 : i32, message = "bqd,bkd->bqk"}> : () -> ()
    %cst_234 = arith.constant dense<0.000000e+00> : vector<2x8x8xf32>
    %600 = tpu.matmul %598, %599, %cst_234 {dimension_numbers = #tpu.dot_dimension_numbers<[2], [2], [1], [1], [0, 0, 0, 1, 1, 1], [0], [0]>} : vector<2x8x8xbf16>, vector<2x8x8xbf16>, vector<2x8x8xf32> -> vector<2x8x8xf32>
    "tpu.trace_stop"() : () -> ()
    %601 = arith.addf %600, %314 : vector<2x8x8xf32>
    %cst_235 = arith.constant dense<0xFF800000> : vector<2x8xf32>
    %602 = vector.multi_reduction <maximumf>, %601, %cst_235 [2] : vector<2x8x8xf32> to vector<2x8xf32>
    %603 = vector.shape_cast %602 : vector<2x8xf32> to vector<2x8x1xf32>
    %604 = vector.broadcast %603 : vector<2x8x1xf32> to vector<2x8x8xf32>
    %605 = arith.subf %601, %604 : vector<2x8x8xf32>
    %606 = math.exp %605 : vector<2x8x8xf32>
    %cst_236 = arith.constant dense<0.000000e+00> : vector<2x8xf32>
    %607 = vector.multi_reduction <add>, %606, %cst_236 [2] : vector<2x8x8xf32> to vector<2x8xf32>
    %608 = vector.shape_cast %607 : vector<2x8xf32> to vector<2x8x1xf32>
    %609 = vector.broadcast %608 : vector<2x8x1xf32> to vector<2x8x8xf32>
    %610 = arith.divf %606, %609 : vector<2x8x8xf32>
    %611 = arith.truncf %610 : vector<2x8x8xf32> to vector<2x8x8xbf16>
    %612 = vector.extract_strided_slice %581 {offsets = [0, 0, 8], sizes = [2, 8, 8], strides = [1, 1, 1]} : vector<2x8x32xbf16> to vector<2x8x8xbf16>
    "tpu.trace_start"() <{level = 10 : i32, message = "bqk,bkd->bqd"}> : () -> ()
    %cst_237 = arith.constant dense<0.000000e+00> : vector<2x8x8xf32>
    %613 = tpu.matmul %611, %612, %cst_237 {dimension_numbers = #tpu.dot_dimension_numbers<[2], [1], [1], [2], [0, 0, 0, 1, 1, 2], [0], [0]>} : vector<2x8x8xbf16>, vector<2x8x8xbf16>, vector<2x8x8xf32> -> vector<2x8x8xf32>
    "tpu.trace_stop"() : () -> ()
    %614 = vector.extract_strided_slice %579 {offsets = [0, 0, 16], sizes = [2, 8, 8], strides = [1, 1, 1]} : vector<2x8x32xbf16> to vector<2x8x8xbf16>
    %615 = vector.extract_strided_slice %580 {offsets = [0, 0, 16], sizes = [2, 8, 8], strides = [1, 1, 1]} : vector<2x8x32xbf16> to vector<2x8x8xbf16>
    "tpu.trace_start"() <{level = 10 : i32, message = "bqd,bkd->bqk"}> : () -> ()
    %cst_238 = arith.constant dense<0.000000e+00> : vector<2x8x8xf32>
    %616 = tpu.matmul %614, %615, %cst_238 {dimension_numbers = #tpu.dot_dimension_numbers<[2], [2], [1], [1], [0, 0, 0, 1, 1, 1], [0], [0]>} : vector<2x8x8xbf16>, vector<2x8x8xbf16>, vector<2x8x8xf32> -> vector<2x8x8xf32>
    "tpu.trace_stop"() : () -> ()
    %617 = arith.addf %616, %314 : vector<2x8x8xf32>
    %cst_239 = arith.constant dense<0xFF800000> : vector<2x8xf32>
    %618 = vector.multi_reduction <maximumf>, %617, %cst_239 [2] : vector<2x8x8xf32> to vector<2x8xf32>
    %619 = vector.shape_cast %618 : vector<2x8xf32> to vector<2x8x1xf32>
    %620 = vector.broadcast %619 : vector<2x8x1xf32> to vector<2x8x8xf32>
    %621 = arith.subf %617, %620 : vector<2x8x8xf32>
    %622 = math.exp %621 : vector<2x8x8xf32>
    %cst_240 = arith.constant dense<0.000000e+00> : vector<2x8xf32>
    %623 = vector.multi_reduction <add>, %622, %cst_240 [2] : vector<2x8x8xf32> to vector<2x8xf32>
    %624 = vector.shape_cast %623 : vector<2x8xf32> to vector<2x8x1xf32>
    %625 = vector.broadcast %624 : vector<2x8x1xf32> to vector<2x8x8xf32>
    %626 = arith.divf %622, %625 : vector<2x8x8xf32>
    %627 = arith.truncf %626 : vector<2x8x8xf32> to vector<2x8x8xbf16>
    %628 = vector.extract_strided_slice %581 {offsets = [0, 0, 16], sizes = [2, 8, 8], strides = [1, 1, 1]} : vector<2x8x32xbf16> to vector<2x8x8xbf16>
    "tpu.trace_start"() <{level = 10 : i32, message = "bqk,bkd->bqd"}> : () -> ()
    %cst_241 = arith.constant dense<0.000000e+00> : vector<2x8x8xf32>
    %629 = tpu.matmul %627, %628, %cst_241 {dimension_numbers = #tpu.dot_dimension_numbers<[2], [1], [1], [2], [0, 0, 0, 1, 1, 2], [0], [0]>} : vector<2x8x8xbf16>, vector<2x8x8xbf16>, vector<2x8x8xf32> -> vector<2x8x8xf32>
    "tpu.trace_stop"() : () -> ()
    %630 = vector.extract_strided_slice %579 {offsets = [0, 0, 24], sizes = [2, 8, 8], strides = [1, 1, 1]} : vector<2x8x32xbf16> to vector<2x8x8xbf16>
    %631 = vector.extract_strided_slice %580 {offsets = [0, 0, 24], sizes = [2, 8, 8], strides = [1, 1, 1]} : vector<2x8x32xbf16> to vector<2x8x8xbf16>
    "tpu.trace_start"() <{level = 10 : i32, message = "bqd,bkd->bqk"}> : () -> ()
    %cst_242 = arith.constant dense<0.000000e+00> : vector<2x8x8xf32>
    %632 = tpu.matmul %630, %631, %cst_242 {dimension_numbers = #tpu.dot_dimension_numbers<[2], [2], [1], [1], [0, 0, 0, 1, 1, 1], [0], [0]>} : vector<2x8x8xbf16>, vector<2x8x8xbf16>, vector<2x8x8xf32> -> vector<2x8x8xf32>
    "tpu.trace_stop"() : () -> ()
    %633 = arith.addf %632, %314 : vector<2x8x8xf32>
    %cst_243 = arith.constant dense<0xFF800000> : vector<2x8xf32>
    %634 = vector.multi_reduction <maximumf>, %633, %cst_243 [2] : vector<2x8x8xf32> to vector<2x8xf32>
    %635 = vector.shape_cast %634 : vector<2x8xf32> to vector<2x8x1xf32>
    %636 = vector.broadcast %635 : vector<2x8x1xf32> to vector<2x8x8xf32>
    %637 = arith.subf %633, %636 : vector<2x8x8xf32>
    %638 = math.exp %637 : vector<2x8x8xf32>
    %cst_244 = arith.constant dense<0.000000e+00> : vector<2x8xf32>
    %639 = vector.multi_reduction <add>, %638, %cst_244 [2] : vector<2x8x8xf32> to vector<2x8xf32>
    %640 = vector.shape_cast %639 : vector<2x8xf32> to vector<2x8x1xf32>
    %641 = vector.broadcast %640 : vector<2x8x1xf32> to vector<2x8x8xf32>
    %642 = arith.divf %638, %641 : vector<2x8x8xf32>
    %643 = arith.truncf %642 : vector<2x8x8xf32> to vector<2x8x8xbf16>
    %644 = vector.extract_strided_slice %581 {offsets = [0, 0, 24], sizes = [2, 8, 8], strides = [1, 1, 1]} : vector<2x8x32xbf16> to vector<2x8x8xbf16>
    "tpu.trace_start"() <{level = 10 : i32, message = "bqk,bkd->bqd"}> : () -> ()
    %cst_245 = arith.constant dense<0.000000e+00> : vector<2x8x8xf32>
    %645 = tpu.matmul %643, %644, %cst_245 {dimension_numbers = #tpu.dot_dimension_numbers<[2], [1], [1], [2], [0, 0, 0, 1, 1, 2], [0], [0]>} : vector<2x8x8xbf16>, vector<2x8x8xbf16>, vector<2x8x8xf32> -> vector<2x8x8xf32>
    "tpu.trace_stop"() : () -> ()
    %646 = tpu.concatenate %597, %613, %629, %645 in 2 : vector<2x8x8xf32>, vector<2x8x8xf32>, vector<2x8x8xf32>, vector<2x8x8xf32> -> vector<2x8x32xf32>
    %647 = vector.shape_cast %646 : vector<2x8x32xf32> to vector<16x32xf32>
    %648 = arith.truncf %647 : vector<16x32xf32> to vector<16x32xbf16>
    %c1_246 = arith.constant 1 : index
    %c0_247 = arith.constant 0 : index
    %c0_248 = arith.constant 0 : index
    %649 = vector.load %arg17[%c1_246, %c0_247, %c0_248] : memref<2x32x32xbf16, #tpu.memory_space<vmem>>, vector<1x32x32xbf16>
    %650 = vector.shape_cast %649 : vector<1x32x32xbf16> to vector<32x32xbf16>
    %cst_249 = arith.constant dense<0.000000e+00> : vector<16x32xf32>
    %651 = tpu.matmul %648, %650, %cst_249 {dimension_numbers = #tpu.dot_dimension_numbers<[1], [0], [0], [1], [0, 0, 1, 1], [], []>} : vector<16x32xbf16>, vector<32x32xbf16>, vector<16x32xf32> -> vector<16x32xf32>
    %c1_250 = arith.constant 1 : index
    %c0_251 = arith.constant 0 : index
    %652 = vector.load %arg18[%c1_250, %c0_251] : memref<2x32xf32, #tpu.memory_space<vmem>>, vector<1x32xf32>
    %653 = vector.broadcast %652 : vector<1x32xf32> to vector<16x32xf32>
    %654 = arith.addf %651, %653 : vector<16x32xf32>
    %655 = arith.addf %569, %654 : vector<16x32xf32>
    %c3_252 = arith.constant 3 : index
    %c0_253 = arith.constant 0 : index
    %656 = vector.load %arg29[%c3_252, %c0_253] : memref<6x32xf32, #tpu.memory_space<vmem>>, vector<1x32xf32>
    %c3_254 = arith.constant 3 : index
    %c0_255 = arith.constant 0 : index
    %657 = vector.load %arg30[%c3_254, %c0_255] : memref<6x32xf32, #tpu.memory_space<vmem>>, vector<1x32xf32>
    %cst_256 = arith.constant dense<0.000000e+00> : vector<16xf32>
    %658 = vector.multi_reduction <add>, %655, %cst_256 [1] : vector<16x32xf32> to vector<16xf32>
    %659 = vector.shape_cast %658 : vector<16xf32> to vector<16x1xf32>
    %cst_257 = arith.constant 3.200000e+01 : f32
    %660 = vector.broadcast %cst_257 : f32 to vector<16x1xf32>
    %661 = arith.divf %659, %660 : vector<16x1xf32>
    %662 = vector.broadcast %661 : vector<16x1xf32> to vector<16x32xf32>
    %663 = arith.subf %655, %662 : vector<16x32xf32>
    %664 = arith.mulf %663, %663 : vector<16x32xf32>
    %cst_258 = arith.constant dense<0.000000e+00> : vector<16xf32>
    %665 = vector.multi_reduction <add>, %664, %cst_258 [1] : vector<16x32xf32> to vector<16xf32>
    %666 = vector.shape_cast %665 : vector<16xf32> to vector<16x1xf32>
    %cst_259 = arith.constant 3.200000e+01 : f32
    %667 = vector.broadcast %cst_259 : f32 to vector<16x1xf32>
    %668 = arith.divf %666, %667 : vector<16x1xf32>
    %669 = vector.broadcast %661 : vector<16x1xf32> to vector<16x32xf32>
    %670 = arith.subf %655, %669 : vector<16x32xf32>
    %cst_260 = arith.constant 9.99999974E-6 : f32
    %671 = vector.broadcast %cst_260 : f32 to vector<16x1xf32>
    %672 = arith.addf %668, %671 : vector<16x1xf32>
    %673 = math.rsqrt %672 : vector<16x1xf32>
    %674 = vector.broadcast %673 : vector<16x1xf32> to vector<16x32xf32>
    %675 = arith.mulf %670, %674 : vector<16x32xf32>
    %676 = vector.broadcast %656 : vector<1x32xf32> to vector<16x32xf32>
    %677 = arith.mulf %675, %676 : vector<16x32xf32>
    %678 = vector.broadcast %657 : vector<1x32xf32> to vector<16x32xf32>
    %679 = arith.addf %677, %678 : vector<16x32xf32>
    %680 = arith.truncf %679 : vector<16x32xf32> to vector<16x32xbf16>
    %c1_261 = arith.constant 1 : index
    %c0_262 = arith.constant 0 : index
    %c0_263 = arith.constant 0 : index
    %681 = vector.load %arg19[%c1_261, %c0_262, %c0_263] : memref<2x32x32xbf16, #tpu.memory_space<vmem>>, vector<1x32x32xbf16>
    %682 = vector.shape_cast %681 : vector<1x32x32xbf16> to vector<32x32xbf16>
    %cst_264 = arith.constant dense<0.000000e+00> : vector<16x32xf32>
    %683 = tpu.matmul %680, %682, %cst_264 {dimension_numbers = #tpu.dot_dimension_numbers<[1], [0], [0], [1], [0, 0, 1, 1], [], []>} : vector<16x32xbf16>, vector<32x32xbf16>, vector<16x32xf32> -> vector<16x32xf32>
    %c1_265 = arith.constant 1 : index
    %c0_266 = arith.constant 0 : index
    %684 = vector.load %arg20[%c1_265, %c0_266] : memref<2x32xf32, #tpu.memory_space<vmem>>, vector<1x32xf32>
    %685 = vector.broadcast %684 : vector<1x32xf32> to vector<16x32xf32>
    %686 = arith.addf %683, %685 : vector<16x32xf32>
    %687 = vector.shape_cast %686 : vector<16x32xf32> to vector<2x8x32xf32>
    %688 = arith.truncf %687 : vector<2x8x32xf32> to vector<2x8x32xbf16>
    %689 = vector.extract_strided_slice %311 {offsets = [0, 0, 64], sizes = [2, 8, 32], strides = [1, 1, 1]} : vector<2x8x128xbf16> to vector<2x8x32xbf16>
    %690 = vector.extract_strided_slice %311 {offsets = [0, 0, 96], sizes = [2, 8, 32], strides = [1, 1, 1]} : vector<2x8x128xbf16> to vector<2x8x32xbf16>
    %691 = vector.extract_strided_slice %688 {offsets = [0, 0, 0], sizes = [2, 8, 8], strides = [1, 1, 1]} : vector<2x8x32xbf16> to vector<2x8x8xbf16>
    %692 = vector.extract_strided_slice %689 {offsets = [0, 0, 0], sizes = [2, 8, 8], strides = [1, 1, 1]} : vector<2x8x32xbf16> to vector<2x8x8xbf16>
    "tpu.trace_start"() <{level = 10 : i32, message = "bqd,bkd->bqk"}> : () -> ()
    %cst_267 = arith.constant dense<0.000000e+00> : vector<2x8x8xf32>
    %693 = tpu.matmul %691, %692, %cst_267 {dimension_numbers = #tpu.dot_dimension_numbers<[2], [2], [1], [1], [0, 0, 0, 1, 1, 1], [0], [0]>} : vector<2x8x8xbf16>, vector<2x8x8xbf16>, vector<2x8x8xf32> -> vector<2x8x8xf32>
    "tpu.trace_stop"() : () -> ()
    %cst_268 = arith.constant dense<0xFF800000> : vector<2x8xf32>
    %694 = vector.multi_reduction <maximumf>, %693, %cst_268 [2] : vector<2x8x8xf32> to vector<2x8xf32>
    %695 = vector.shape_cast %694 : vector<2x8xf32> to vector<2x8x1xf32>
    %696 = vector.broadcast %695 : vector<2x8x1xf32> to vector<2x8x8xf32>
    %697 = arith.subf %693, %696 : vector<2x8x8xf32>
    %698 = math.exp %697 : vector<2x8x8xf32>
    %cst_269 = arith.constant dense<0.000000e+00> : vector<2x8xf32>
    %699 = vector.multi_reduction <add>, %698, %cst_269 [2] : vector<2x8x8xf32> to vector<2x8xf32>
    %700 = vector.shape_cast %699 : vector<2x8xf32> to vector<2x8x1xf32>
    %701 = vector.broadcast %700 : vector<2x8x1xf32> to vector<2x8x8xf32>
    %702 = arith.divf %698, %701 : vector<2x8x8xf32>
    %703 = arith.truncf %702 : vector<2x8x8xf32> to vector<2x8x8xbf16>
    %704 = vector.extract_strided_slice %690 {offsets = [0, 0, 0], sizes = [2, 8, 8], strides = [1, 1, 1]} : vector<2x8x32xbf16> to vector<2x8x8xbf16>
    "tpu.trace_start"() <{level = 10 : i32, message = "bqk,bkd->bqd"}> : () -> ()
    %cst_270 = arith.constant dense<0.000000e+00> : vector<2x8x8xf32>
    %705 = tpu.matmul %703, %704, %cst_270 {dimension_numbers = #tpu.dot_dimension_numbers<[2], [1], [1], [2], [0, 0, 0, 1, 1, 2], [0], [0]>} : vector<2x8x8xbf16>, vector<2x8x8xbf16>, vector<2x8x8xf32> -> vector<2x8x8xf32>
    "tpu.trace_stop"() : () -> ()
    %706 = vector.extract_strided_slice %688 {offsets = [0, 0, 8], sizes = [2, 8, 8], strides = [1, 1, 1]} : vector<2x8x32xbf16> to vector<2x8x8xbf16>
    %707 = vector.extract_strided_slice %689 {offsets = [0, 0, 8], sizes = [2, 8, 8], strides = [1, 1, 1]} : vector<2x8x32xbf16> to vector<2x8x8xbf16>
    "tpu.trace_start"() <{level = 10 : i32, message = "bqd,bkd->bqk"}> : () -> ()
    %cst_271 = arith.constant dense<0.000000e+00> : vector<2x8x8xf32>
    %708 = tpu.matmul %706, %707, %cst_271 {dimension_numbers = #tpu.dot_dimension_numbers<[2], [2], [1], [1], [0, 0, 0, 1, 1, 1], [0], [0]>} : vector<2x8x8xbf16>, vector<2x8x8xbf16>, vector<2x8x8xf32> -> vector<2x8x8xf32>
    "tpu.trace_stop"() : () -> ()
    %cst_272 = arith.constant dense<0xFF800000> : vector<2x8xf32>
    %709 = vector.multi_reduction <maximumf>, %708, %cst_272 [2] : vector<2x8x8xf32> to vector<2x8xf32>
    %710 = vector.shape_cast %709 : vector<2x8xf32> to vector<2x8x1xf32>
    %711 = vector.broadcast %710 : vector<2x8x1xf32> to vector<2x8x8xf32>
    %712 = arith.subf %708, %711 : vector<2x8x8xf32>
    %713 = math.exp %712 : vector<2x8x8xf32>
    %cst_273 = arith.constant dense<0.000000e+00> : vector<2x8xf32>
    %714 = vector.multi_reduction <add>, %713, %cst_273 [2] : vector<2x8x8xf32> to vector<2x8xf32>
    %715 = vector.shape_cast %714 : vector<2x8xf32> to vector<2x8x1xf32>
    %716 = vector.broadcast %715 : vector<2x8x1xf32> to vector<2x8x8xf32>
    %717 = arith.divf %713, %716 : vector<2x8x8xf32>
    %718 = arith.truncf %717 : vector<2x8x8xf32> to vector<2x8x8xbf16>
    %719 = vector.extract_strided_slice %690 {offsets = [0, 0, 8], sizes = [2, 8, 8], strides = [1, 1, 1]} : vector<2x8x32xbf16> to vector<2x8x8xbf16>
    "tpu.trace_start"() <{level = 10 : i32, message = "bqk,bkd->bqd"}> : () -> ()
    %cst_274 = arith.constant dense<0.000000e+00> : vector<2x8x8xf32>
    %720 = tpu.matmul %718, %719, %cst_274 {dimension_numbers = #tpu.dot_dimension_numbers<[2], [1], [1], [2], [0, 0, 0, 1, 1, 2], [0], [0]>} : vector<2x8x8xbf16>, vector<2x8x8xbf16>, vector<2x8x8xf32> -> vector<2x8x8xf32>
    "tpu.trace_stop"() : () -> ()
    %721 = vector.extract_strided_slice %688 {offsets = [0, 0, 16], sizes = [2, 8, 8], strides = [1, 1, 1]} : vector<2x8x32xbf16> to vector<2x8x8xbf16>
    %722 = vector.extract_strided_slice %689 {offsets = [0, 0, 16], sizes = [2, 8, 8], strides = [1, 1, 1]} : vector<2x8x32xbf16> to vector<2x8x8xbf16>
    "tpu.trace_start"() <{level = 10 : i32, message = "bqd,bkd->bqk"}> : () -> ()
    %cst_275 = arith.constant dense<0.000000e+00> : vector<2x8x8xf32>
    %723 = tpu.matmul %721, %722, %cst_275 {dimension_numbers = #tpu.dot_dimension_numbers<[2], [2], [1], [1], [0, 0, 0, 1, 1, 1], [0], [0]>} : vector<2x8x8xbf16>, vector<2x8x8xbf16>, vector<2x8x8xf32> -> vector<2x8x8xf32>
    "tpu.trace_stop"() : () -> ()
    %cst_276 = arith.constant dense<0xFF800000> : vector<2x8xf32>
    %724 = vector.multi_reduction <maximumf>, %723, %cst_276 [2] : vector<2x8x8xf32> to vector<2x8xf32>
    %725 = vector.shape_cast %724 : vector<2x8xf32> to vector<2x8x1xf32>
    %726 = vector.broadcast %725 : vector<2x8x1xf32> to vector<2x8x8xf32>
    %727 = arith.subf %723, %726 : vector<2x8x8xf32>
    %728 = math.exp %727 : vector<2x8x8xf32>
    %cst_277 = arith.constant dense<0.000000e+00> : vector<2x8xf32>
    %729 = vector.multi_reduction <add>, %728, %cst_277 [2] : vector<2x8x8xf32> to vector<2x8xf32>
    %730 = vector.shape_cast %729 : vector<2x8xf32> to vector<2x8x1xf32>
    %731 = vector.broadcast %730 : vector<2x8x1xf32> to vector<2x8x8xf32>
    %732 = arith.divf %728, %731 : vector<2x8x8xf32>
    %733 = arith.truncf %732 : vector<2x8x8xf32> to vector<2x8x8xbf16>
    %734 = vector.extract_strided_slice %690 {offsets = [0, 0, 16], sizes = [2, 8, 8], strides = [1, 1, 1]} : vector<2x8x32xbf16> to vector<2x8x8xbf16>
    "tpu.trace_start"() <{level = 10 : i32, message = "bqk,bkd->bqd"}> : () -> ()
    %cst_278 = arith.constant dense<0.000000e+00> : vector<2x8x8xf32>
    %735 = tpu.matmul %733, %734, %cst_278 {dimension_numbers = #tpu.dot_dimension_numbers<[2], [1], [1], [2], [0, 0, 0, 1, 1, 2], [0], [0]>} : vector<2x8x8xbf16>, vector<2x8x8xbf16>, vector<2x8x8xf32> -> vector<2x8x8xf32>
    "tpu.trace_stop"() : () -> ()
    %736 = vector.extract_strided_slice %688 {offsets = [0, 0, 24], sizes = [2, 8, 8], strides = [1, 1, 1]} : vector<2x8x32xbf16> to vector<2x8x8xbf16>
    %737 = vector.extract_strided_slice %689 {offsets = [0, 0, 24], sizes = [2, 8, 8], strides = [1, 1, 1]} : vector<2x8x32xbf16> to vector<2x8x8xbf16>
    "tpu.trace_start"() <{level = 10 : i32, message = "bqd,bkd->bqk"}> : () -> ()
    %cst_279 = arith.constant dense<0.000000e+00> : vector<2x8x8xf32>
    %738 = tpu.matmul %736, %737, %cst_279 {dimension_numbers = #tpu.dot_dimension_numbers<[2], [2], [1], [1], [0, 0, 0, 1, 1, 1], [0], [0]>} : vector<2x8x8xbf16>, vector<2x8x8xbf16>, vector<2x8x8xf32> -> vector<2x8x8xf32>
    "tpu.trace_stop"() : () -> ()
    %cst_280 = arith.constant dense<0xFF800000> : vector<2x8xf32>
    %739 = vector.multi_reduction <maximumf>, %738, %cst_280 [2] : vector<2x8x8xf32> to vector<2x8xf32>
    %740 = vector.shape_cast %739 : vector<2x8xf32> to vector<2x8x1xf32>
    %741 = vector.broadcast %740 : vector<2x8x1xf32> to vector<2x8x8xf32>
    %742 = arith.subf %738, %741 : vector<2x8x8xf32>
    %743 = math.exp %742 : vector<2x8x8xf32>
    %cst_281 = arith.constant dense<0.000000e+00> : vector<2x8xf32>
    %744 = vector.multi_reduction <add>, %743, %cst_281 [2] : vector<2x8x8xf32> to vector<2x8xf32>
    %745 = vector.shape_cast %744 : vector<2x8xf32> to vector<2x8x1xf32>
    %746 = vector.broadcast %745 : vector<2x8x1xf32> to vector<2x8x8xf32>
    %747 = arith.divf %743, %746 : vector<2x8x8xf32>
    %748 = arith.truncf %747 : vector<2x8x8xf32> to vector<2x8x8xbf16>
    %749 = vector.extract_strided_slice %690 {offsets = [0, 0, 24], sizes = [2, 8, 8], strides = [1, 1, 1]} : vector<2x8x32xbf16> to vector<2x8x8xbf16>
    "tpu.trace_start"() <{level = 10 : i32, message = "bqk,bkd->bqd"}> : () -> ()
    %cst_282 = arith.constant dense<0.000000e+00> : vector<2x8x8xf32>
    %750 = tpu.matmul %748, %749, %cst_282 {dimension_numbers = #tpu.dot_dimension_numbers<[2], [1], [1], [2], [0, 0, 0, 1, 1, 2], [0], [0]>} : vector<2x8x8xbf16>, vector<2x8x8xbf16>, vector<2x8x8xf32> -> vector<2x8x8xf32>
    "tpu.trace_stop"() : () -> ()
    %751 = tpu.concatenate %705, %720, %735, %750 in 2 : vector<2x8x8xf32>, vector<2x8x8xf32>, vector<2x8x8xf32>, vector<2x8x8xf32> -> vector<2x8x32xf32>
    %752 = vector.shape_cast %751 : vector<2x8x32xf32> to vector<16x32xf32>
    %753 = arith.truncf %752 : vector<16x32xf32> to vector<16x32xbf16>
    %c1_283 = arith.constant 1 : index
    %c0_284 = arith.constant 0 : index
    %c0_285 = arith.constant 0 : index
    %754 = vector.load %arg23[%c1_283, %c0_284, %c0_285] : memref<2x32x32xbf16, #tpu.memory_space<vmem>>, vector<1x32x32xbf16>
    %755 = vector.shape_cast %754 : vector<1x32x32xbf16> to vector<32x32xbf16>
    %cst_286 = arith.constant dense<0.000000e+00> : vector<16x32xf32>
    %756 = tpu.matmul %753, %755, %cst_286 {dimension_numbers = #tpu.dot_dimension_numbers<[1], [0], [0], [1], [0, 0, 1, 1], [], []>} : vector<16x32xbf16>, vector<32x32xbf16>, vector<16x32xf32> -> vector<16x32xf32>
    %c1_287 = arith.constant 1 : index
    %c0_288 = arith.constant 0 : index
    %757 = vector.load %arg24[%c1_287, %c0_288] : memref<2x32xf32, #tpu.memory_space<vmem>>, vector<1x32xf32>
    %758 = vector.broadcast %757 : vector<1x32xf32> to vector<16x32xf32>
    %759 = arith.addf %756, %758 : vector<16x32xf32>
    %760 = arith.addf %679, %759 : vector<16x32xf32>
    %c4 = arith.constant 4 : index
    %c0_289 = arith.constant 0 : index
    %761 = vector.load %arg29[%c4, %c0_289] : memref<6x32xf32, #tpu.memory_space<vmem>>, vector<1x32xf32>
    %c4_290 = arith.constant 4 : index
    %c0_291 = arith.constant 0 : index
    %762 = vector.load %arg30[%c4_290, %c0_291] : memref<6x32xf32, #tpu.memory_space<vmem>>, vector<1x32xf32>
    %cst_292 = arith.constant dense<0.000000e+00> : vector<16xf32>
    %763 = vector.multi_reduction <add>, %760, %cst_292 [1] : vector<16x32xf32> to vector<16xf32>
    %764 = vector.shape_cast %763 : vector<16xf32> to vector<16x1xf32>
    %cst_293 = arith.constant 3.200000e+01 : f32
    %765 = vector.broadcast %cst_293 : f32 to vector<16x1xf32>
    %766 = arith.divf %764, %765 : vector<16x1xf32>
    %767 = vector.broadcast %766 : vector<16x1xf32> to vector<16x32xf32>
    %768 = arith.subf %760, %767 : vector<16x32xf32>
    %769 = arith.mulf %768, %768 : vector<16x32xf32>
    %cst_294 = arith.constant dense<0.000000e+00> : vector<16xf32>
    %770 = vector.multi_reduction <add>, %769, %cst_294 [1] : vector<16x32xf32> to vector<16xf32>
    %771 = vector.shape_cast %770 : vector<16xf32> to vector<16x1xf32>
    %cst_295 = arith.constant 3.200000e+01 : f32
    %772 = vector.broadcast %cst_295 : f32 to vector<16x1xf32>
    %773 = arith.divf %771, %772 : vector<16x1xf32>
    %774 = vector.broadcast %766 : vector<16x1xf32> to vector<16x32xf32>
    %775 = arith.subf %760, %774 : vector<16x32xf32>
    %cst_296 = arith.constant 9.99999974E-6 : f32
    %776 = vector.broadcast %cst_296 : f32 to vector<16x1xf32>
    %777 = arith.addf %773, %776 : vector<16x1xf32>
    %778 = math.rsqrt %777 : vector<16x1xf32>
    %779 = vector.broadcast %778 : vector<16x1xf32> to vector<16x32xf32>
    %780 = arith.mulf %775, %779 : vector<16x32xf32>
    %781 = vector.broadcast %761 : vector<1x32xf32> to vector<16x32xf32>
    %782 = arith.mulf %780, %781 : vector<16x32xf32>
    %783 = vector.broadcast %762 : vector<1x32xf32> to vector<16x32xf32>
    %784 = arith.addf %782, %783 : vector<16x32xf32>
    %785 = arith.truncf %784 : vector<16x32xf32> to vector<16x32xbf16>
    %c1_297 = arith.constant 1 : index
    %c0_298 = arith.constant 0 : index
    %c0_299 = arith.constant 0 : index
    %786 = vector.load %arg25[%c1_297, %c0_298, %c0_299] : memref<2x32x64xbf16, #tpu.memory_space<vmem>>, vector<1x32x64xbf16>
    %787 = vector.shape_cast %786 : vector<1x32x64xbf16> to vector<32x64xbf16>
    %cst_300 = arith.constant dense<0.000000e+00> : vector<16x64xf32>
    %788 = tpu.matmul %785, %787, %cst_300 {dimension_numbers = #tpu.dot_dimension_numbers<[1], [0], [0], [1], [0, 0, 1, 1], [], []>} : vector<16x32xbf16>, vector<32x64xbf16>, vector<16x64xf32> -> vector<16x64xf32>
    %c1_301 = arith.constant 1 : index
    %c0_302 = arith.constant 0 : index
    %789 = vector.load %arg26[%c1_301, %c0_302] : memref<2x64xf32, #tpu.memory_space<vmem>>, vector<1x64xf32>
    %790 = vector.broadcast %789 : vector<1x64xf32> to vector<16x64xf32>
    %791 = arith.addf %788, %790 : vector<16x64xf32>
    %cst_303 = arith.constant 0.000000e+00 : f32
    %792 = vector.broadcast %cst_303 : f32 to vector<16x64xf32>
    %793 = arith.maximumf %791, %792 : vector<16x64xf32>
    %794 = arith.truncf %793 : vector<16x64xf32> to vector<16x64xbf16>
    %c1_304 = arith.constant 1 : index
    %c0_305 = arith.constant 0 : index
    %c0_306 = arith.constant 0 : index
    %795 = vector.load %arg27[%c1_304, %c0_305, %c0_306] : memref<2x64x32xbf16, #tpu.memory_space<vmem>>, vector<1x64x32xbf16>
    %796 = vector.shape_cast %795 : vector<1x64x32xbf16> to vector<64x32xbf16>
    %cst_307 = arith.constant dense<0.000000e+00> : vector<16x32xf32>
    %797 = tpu.matmul %794, %796, %cst_307 {dimension_numbers = #tpu.dot_dimension_numbers<[1], [0], [0], [1], [0, 0, 1, 1], [], []>} : vector<16x64xbf16>, vector<64x32xbf16>, vector<16x32xf32> -> vector<16x32xf32>
    %c1_308 = arith.constant 1 : index
    %c0_309 = arith.constant 0 : index
    %798 = vector.load %arg28[%c1_308, %c0_309] : memref<2x32xf32, #tpu.memory_space<vmem>>, vector<1x32xf32>
    %799 = vector.broadcast %798 : vector<1x32xf32> to vector<16x32xf32>
    %800 = arith.addf %797, %799 : vector<16x32xf32>
    %801 = arith.addf %784, %800 : vector<16x32xf32>
    %c5 = arith.constant 5 : index
    %c0_310 = arith.constant 0 : index
    %802 = vector.load %arg29[%c5, %c0_310] : memref<6x32xf32, #tpu.memory_space<vmem>>, vector<1x32xf32>
    %c5_311 = arith.constant 5 : index
    %c0_312 = arith.constant 0 : index
    %803 = vector.load %arg30[%c5_311, %c0_312] : memref<6x32xf32, #tpu.memory_space<vmem>>, vector<1x32xf32>
    %cst_313 = arith.constant dense<0.000000e+00> : vector<16xf32>
    %804 = vector.multi_reduction <add>, %801, %cst_313 [1] : vector<16x32xf32> to vector<16xf32>
    %805 = vector.shape_cast %804 : vector<16xf32> to vector<16x1xf32>
    %cst_314 = arith.constant 3.200000e+01 : f32
    %806 = vector.broadcast %cst_314 : f32 to vector<16x1xf32>
    %807 = arith.divf %805, %806 : vector<16x1xf32>
    %808 = vector.broadcast %807 : vector<16x1xf32> to vector<16x32xf32>
    %809 = arith.subf %801, %808 : vector<16x32xf32>
    %810 = arith.mulf %809, %809 : vector<16x32xf32>
    %cst_315 = arith.constant dense<0.000000e+00> : vector<16xf32>
    %811 = vector.multi_reduction <add>, %810, %cst_315 [1] : vector<16x32xf32> to vector<16xf32>
    %812 = vector.shape_cast %811 : vector<16xf32> to vector<16x1xf32>
    %cst_316 = arith.constant 3.200000e+01 : f32
    %813 = vector.broadcast %cst_316 : f32 to vector<16x1xf32>
    %814 = arith.divf %812, %813 : vector<16x1xf32>
    %815 = vector.broadcast %807 : vector<16x1xf32> to vector<16x32xf32>
    %816 = arith.subf %801, %815 : vector<16x32xf32>
    %cst_317 = arith.constant 9.99999974E-6 : f32
    %817 = vector.broadcast %cst_317 : f32 to vector<16x1xf32>
    %818 = arith.addf %814, %817 : vector<16x1xf32>
    %819 = math.rsqrt %818 : vector<16x1xf32>
    %820 = vector.broadcast %819 : vector<16x1xf32> to vector<16x32xf32>
    %821 = arith.mulf %816, %820 : vector<16x32xf32>
    %822 = vector.broadcast %802 : vector<1x32xf32> to vector<16x32xf32>
    %823 = arith.mulf %821, %822 : vector<16x32xf32>
    %824 = vector.broadcast %803 : vector<1x32xf32> to vector<16x32xf32>
    %825 = arith.addf %823, %824 : vector<16x32xf32>
    %826 = arith.truncf %825 : vector<16x32xf32> to vector<16x32xbf16>
    %c0_318 = arith.constant 0 : index
    %c0_319 = arith.constant 0 : index
    %827 = vector.load %arg31[%c0_318, %c0_319] : memref<32x32xbf16, #tpu.memory_space<vmem>>, vector<32x32xbf16>
    %cst_320 = arith.constant dense<0.000000e+00> : vector<16x32xf32>
    %828 = tpu.matmul %826, %827, %cst_320 {dimension_numbers = #tpu.dot_dimension_numbers<[1], [0], [0], [1], [0, 0, 1, 1], [], []>} : vector<16x32xbf16>, vector<32x32xbf16>, vector<16x32xf32> -> vector<16x32xf32>
    %c0_321 = arith.constant 0 : index
    %c0_322 = arith.constant 0 : index
    %829 = vector.load %arg32[%c0_321, %c0_322] : memref<1x32xf32, #tpu.memory_space<vmem>>, vector<1x32xf32>
    %830 = vector.broadcast %829 : vector<1x32xf32> to vector<16x32xf32>
    %831 = arith.addf %828, %830 : vector<16x32xf32>
    %cst_323 = arith.constant 0.000000e+00 : f32
    %832 = vector.broadcast %cst_323 : f32 to vector<16x32xf32>
    %833 = arith.maximumf %831, %832 : vector<16x32xf32>
    %834 = arith.truncf %833 : vector<16x32xf32> to vector<16x32xbf16>
    %c0_324 = arith.constant 0 : index
    %c0_325 = arith.constant 0 : index
    %835 = vector.load %arg33[%c0_324, %c0_325] : memref<32x128xbf16, #tpu.memory_space<vmem>>, vector<32x128xbf16>
    %cst_326 = arith.constant dense<0.000000e+00> : vector<16x128xf32>
    %836 = tpu.matmul %834, %835, %cst_326 {dimension_numbers = #tpu.dot_dimension_numbers<[1], [0], [0], [1], [0, 0, 1, 1], [], []>} : vector<16x32xbf16>, vector<32x128xbf16>, vector<16x128xf32> -> vector<16x128xf32>
    %c0_327 = arith.constant 0 : index
    %c0_328 = arith.constant 0 : index
    %837 = vector.load %arg34[%c0_327, %c0_328] : memref<1x128xf32, #tpu.memory_space<vmem>>, vector<1x128xf32>
    %838 = vector.broadcast %837 : vector<1x128xf32> to vector<16x128xf32>
    %839 = arith.addf %836, %838 : vector<16x128xf32>
    %cst_329 = arith.constant 0.000000e+00 : f32
    %840 = vector.broadcast %cst_329 : f32 to vector<16x128xf32>
    %841 = arith.maximumf %839, %840 : vector<16x128xf32>
    %c0_330 = arith.constant 0 : index
    %c0_331 = arith.constant 0 : index
    %842 = vector.load %arg35[%c0_330, %c0_331] : memref<16x128xf32, #tpu.memory_space<vmem>>, vector<16x128xf32>
    tpu.vector_store %arg35[%c0_330, %c0_331], %841 {strides = array<i32>} : memref<16x128xf32, #tpu.memory_space<vmem>>, vector<16x128xf32>,
    return
  }
  func.func @transform_0(%arg0: i32) -> (i32, i32) {
    %c0_i32 = arith.constant 0 : i32
    %c0_i32_0 = arith.constant 0 : i32
    return %arg0, %c0_i32 : i32, i32
  }
  func.func @transform_1(%arg0: i32) -> (i32, i32) {
    %c0_i32 = arith.constant 0 : i32
    %c0_i32_0 = arith.constant 0 : i32
    return %arg0, %c0_i32 : i32, i32
  }
  func.func @transform_2(%arg0: i32) -> (i32, i32, i32) {
    %c0_i32 = arith.constant 0 : i32
    %c0_i32_0 = arith.constant 0 : i32
    %c0_i32_1 = arith.constant 0 : i32
    return %arg0, %c0_i32, %c0_i32_0 : i32, i32, i32
  }
  func.func @transform_3(%arg0: i32) -> (i32, i32, i32) {
    %c0_i32 = arith.constant 0 : i32
    %c0_i32_0 = arith.constant 0 : i32
    %c0_i32_1 = arith.constant 0 : i32
    return %arg0, %c0_i32, %c0_i32_0 : i32, i32, i32
  }
  func.func @transform_4(%arg0: i32) -> (i32, i32, i32) {
    %c0_i32 = arith.constant 0 : i32
    %c0_i32_0 = arith.constant 0 : i32
    %c0_i32_1 = arith.constant 0 : i32
    %c0_i32_2 = arith.constant 0 : i32
    return %c0_i32, %c0_i32_0, %c0_i32_1 : i32, i32, i32
  }
  func.func @transform_5(%arg0: i32) -> (i32, i32) {
    %c0_i32 = arith.constant 0 : i32
    %c0_i32_0 = arith.constant 0 : i32
    %c0_i32_1 = arith.constant 0 : i32
    return %c0_i32, %c0_i32_0 : i32, i32
  }
  func.func @transform_6(%arg0: i32) -> (i32, i32, i32) {
    %c0_i32 = arith.constant 0 : i32
    %c0_i32_0 = arith.constant 0 : i32
    %c0_i32_1 = arith.constant 0 : i32
    %c0_i32_2 = arith.constant 0 : i32
    return %c0_i32, %c0_i32_0, %c0_i32_1 : i32, i32, i32
  }
  func.func @transform_7(%arg0: i32) -> (i32, i32) {
    %c0_i32 = arith.constant 0 : i32
    %c0_i32_0 = arith.constant 0 : i32
    %c0_i32_1 = arith.constant 0 : i32
    return %c0_i32, %c0_i32_0 : i32, i32
  }
  func.func @transform_8(%arg0: i32) -> (i32, i32, i32) {
    %c0_i32 = arith.constant 0 : i32
    %c0_i32_0 = arith.constant 0 : i32
    %c0_i32_1 = arith.constant 0 : i32
    %c0_i32_2 = arith.constant 0 : i32
    return %c0_i32, %c0_i32_0, %c0_i32_1 : i32, i32, i32
  }
  func.func @transform_9(%arg0: i32) -> (i32, i32) {
    %c0_i32 = arith.constant 0 : i32
    %c0_i32_0 = arith.constant 0 : i32
    %c0_i32_1 = arith.constant 0 : i32
    return %c0_i32, %c0_i32_0 : i32, i32
  }
  func.func @transform_10(%arg0: i32) -> (i32, i32, i32) {
    %c0_i32 = arith.constant 0 : i32
    %c0_i32_0 = arith.constant 0 : i32
    %c0_i32_1 = arith.constant 0 : i32
    %c0_i32_2 = arith.constant 0 : i32
    return %c0_i32, %c0_i32_0, %c0_i32_1 : i32, i32, i32
  }
  func.func @transform_11(%arg0: i32) -> (i32, i32) {
    %c0_i32 = arith.constant 0 : i32
    %c0_i32_0 = arith.constant 0 : i32
    %c0_i32_1 = arith.constant 0 : i32
    return %c0_i32, %c0_i32_0 : i32, i32
  }
  func.func @transform_12(%arg0: i32) -> (i32, i32) {
    %c0_i32 = arith.constant 0 : i32
    %c0_i32_0 = arith.constant 0 : i32
    %c0_i32_1 = arith.constant 0 : i32
    return %c0_i32, %c0_i32_0 : i32, i32
  }
  func.func @transform_13(%arg0: i32) -> (i32, i32) {
    %c0_i32 = arith.constant 0 : i32
    %c0_i32_0 = arith.constant 0 : i32
    %c0_i32_1 = arith.constant 0 : i32
    return %c0_i32, %c0_i32_0 : i32, i32
  }
  func.func @transform_14(%arg0: i32) -> (i32, i32, i32) {
    %c0_i32 = arith.constant 0 : i32
    %c0_i32_0 = arith.constant 0 : i32
    %c0_i32_1 = arith.constant 0 : i32
    %c0_i32_2 = arith.constant 0 : i32
    return %c0_i32, %c0_i32_0, %c0_i32_1 : i32, i32, i32
  }
  func.func @transform_15(%arg0: i32) -> (i32, i32) {
    %c0_i32 = arith.constant 0 : i32
    %c0_i32_0 = arith.constant 0 : i32
    %c0_i32_1 = arith.constant 0 : i32
    return %c0_i32, %c0_i32_0 : i32, i32
  }
  func.func @transform_16(%arg0: i32) -> (i32, i32, i32) {
    %c0_i32 = arith.constant 0 : i32
    %c0_i32_0 = arith.constant 0 : i32
    %c0_i32_1 = arith.constant 0 : i32
    %c0_i32_2 = arith.constant 0 : i32
    return %c0_i32, %c0_i32_0, %c0_i32_1 : i32, i32, i32
  }
  func.func @transform_17(%arg0: i32) -> (i32, i32) {
    %c0_i32 = arith.constant 0 : i32
    %c0_i32_0 = arith.constant 0 : i32
    %c0_i32_1 = arith.constant 0 : i32
    return %c0_i32, %c0_i32_0 : i32, i32
  }
  func.func @transform_18(%arg0: i32) -> (i32, i32, i32) {
    %c0_i32 = arith.constant 0 : i32
    %c0_i32_0 = arith.constant 0 : i32
    %c0_i32_1 = arith.constant 0 : i32
    %c0_i32_2 = arith.constant 0 : i32
    return %c0_i32, %c0_i32_0, %c0_i32_1 : i32, i32, i32
  }
  func.func @transform_19(%arg0: i32) -> (i32, i32) {
    %c0_i32 = arith.constant 0 : i32
    %c0_i32_0 = arith.constant 0 : i32
    %c0_i32_1 = arith.constant 0 : i32
    return %c0_i32, %c0_i32_0 : i32, i32
  }
  func.func @transform_20(%arg0: i32) -> (i32, i32) {
    %c0_i32 = arith.constant 0 : i32
    %c0_i32_0 = arith.constant 0 : i32
    %c0_i32_1 = arith.constant 0 : i32
    return %c0_i32, %c0_i32_0 : i32, i32
  }
  func.func @transform_21(%arg0: i32) -> (i32, i32) {
    %c0_i32 = arith.constant 0 : i32
    %c0_i32_0 = arith.constant 0 : i32
    %c0_i32_1 = arith.constant 0 : i32
    return %c0_i32, %c0_i32_0 : i32, i32
  }
  func.func @transform_22(%arg0: i32) -> (i32, i32, i32) {
    %c0_i32 = arith.constant 0 : i32
    %c0_i32_0 = arith.constant 0 : i32
    %c0_i32_1 = arith.constant 0 : i32
    %c0_i32_2 = arith.constant 0 : i32
    return %c0_i32, %c0_i32_0, %c0_i32_1 : i32, i32, i32
  }
  func.func @transform_23(%arg0: i32) -> (i32, i32) {
    %c0_i32 = arith.constant 0 : i32
    %c0_i32_0 = arith.constant 0 : i32
    %c0_i32_1 = arith.constant 0 : i32
    return %c0_i32, %c0_i32_0 : i32, i32
  }
  func.func @transform_24(%arg0: i32) -> (i32, i32, i32) {
    %c0_i32 = arith.constant 0 : i32
    %c0_i32_0 = arith.constant 0 : i32
    %c0_i32_1 = arith.constant 0 : i32
    %c0_i32_2 = arith.constant 0 : i32
    return %c0_i32, %c0_i32_0, %c0_i32_1 : i32, i32, i32
  }
  func.func @transform_25(%arg0: i32) -> (i32, i32) {
    %c0_i32 = arith.constant 0 : i32
    %c0_i32_0 = arith.constant 0 : i32
    %c0_i32_1 = arith.constant 0 : i32
    return %c0_i32, %c0_i32_0 : i32, i32
  }
  func.func @transform_26(%arg0: i32) -> (i32, i32, i32) {
    %c0_i32 = arith.constant 0 : i32
    %c0_i32_0 = arith.constant 0 : i32
    %c0_i32_1 = arith.constant 0 : i32
    %c0_i32_2 = arith.constant 0 : i32
    return %c0_i32, %c0_i32_0, %c0_i32_1 : i32, i32, i32
  }
  func.func @transform_27(%arg0: i32) -> (i32, i32) {
    %c0_i32 = arith.constant 0 : i32
    %c0_i32_0 = arith.constant 0 : i32
    %c0_i32_1 = arith.constant 0 : i32
    return %c0_i32, %c0_i32_0 : i32, i32
  }
  func.func @transform_28(%arg0: i32) -> (i32, i32) {
    %c0_i32 = arith.constant 0 : i32
    %c0_i32_0 = arith.constant 0 : i32
    %c0_i32_1 = arith.constant 0 : i32
    return %c0_i32, %c0_i32_0 : i32, i32
  }
  func.func @transform_29(%arg0: i32) -> (i32, i32) {
    %c0_i32 = arith.constant 0 : i32
    %c0_i32_0 = arith.constant 0 : i32
    %c0_i32_1 = arith.constant 0 : i32
    return %c0_i32, %c0_i32_0 : i32, i32
  }
  func.func @transform_30(%arg0: i32) -> (i32, i32) {
    %c0_i32 = arith.constant 0 : i32
    %c0_i32_0 = arith.constant 0 : i32
    %c0_i32_1 = arith.constant 0 : i32
    return %c0_i32, %c0_i32_0 : i32, i32
  }
  func.func @transform_31(%arg0: i32) -> (i32, i32) {
    %c0_i32 = arith.constant 0 : i32
    %c0_i32_0 = arith.constant 0 : i32
    %c0_i32_1 = arith.constant 0 : i32
    return %c0_i32, %c0_i32_0 : i32, i32
  }
  func.func @transform_32(%arg0: i32) -> (i32, i32) {
    %c0_i32 = arith.constant 0 : i32
    %c0_i32_0 = arith.constant 0 : i32
    %c0_i32_1 = arith.constant 0 : i32
    return %c0_i32, %c0_i32_0 : i32, i32
  }
  func.func @transform_33(%arg0: i32) -> (i32, i32) {
    %c0_i32 = arith.constant 0 : i32
    %c0_i32_0 = arith.constant 0 : i32
    %c0_i32_1 = arith.constant 0 : i32
    return %c0_i32, %c0_i32_0 : i32, i32
  }
  func.func @transform_34(%arg0: i32) -> (i32, i32) {
    %c0_i32 = arith.constant 0 : i32
    %c0_i32_0 = arith.constant 0 : i32
    return %arg0, %c0_i32 : i32, i32
  }
}

</mosaic_0001>

<bundles_post_ra>
// kernel: transformer_forward.1
= control target key start
LH: loop header
LB: loop body
LE: loop exit
PB: predicated region body
PF: predicated region fallthrough
CT: control target
= control target key end

     0   :  { %v9424_v0 = vmov 0.0   ;;  %s9425_s3 = smov 4   ;;  %vm9426_vm0 = vmmov 0   ;;  %vm169_vm1 = vcmask 261120   ;;  %s9427_s10 = smov 5   ;;  %vm219_vm2 = vcmask 64512   ;;  %s11026_s0 = inlined_call_operand.smem [shape: u32[35], index: -1, kind: input, shape index: {}] }
   0x1   :  { %8221 = vmatprep.subr.bf16.mxu0 %v9424_v0  ;;  %s9480_s6 = sld [smem:[%s11026_s0 + %s9425_s3]]   ;;  %8225 = vmatprep.mubr.msk.bf16.mxu0 %vm9426_vm0, %v9424_v0  ;;  %s9428_s14 = smov 96   ;;  %vm344_vm3 = vcmask 1043456   ;;  %vm1122_vm4 = vcmask 130048   ;;  %vm1125_vm5 = vcmask 195584   ;;  %vm1343_vm6 = vcmask 523264  }
   0x2   :  { %s1_s9 = sld [smem:[%s11026_s0]]   ;;  %8229 = vmatprep.subr.bf16.mxu1 %v9424_v0  ;;  %8231 = vmatprep.mubr.msk.bf16.mxu1 %vm9426_vm0, %v9424_v0  ;;  %s9429_s15 = smov 2  }
   0x3   :  { %s9506_s13 = sld [smem:[%s11026_s0 + %s9427_s10]]   ;;  %s9430_s19 = smov 64  }
   0x4   :  { %s9532_s18 = sld [smem:[%s11026_s0 + %s9429_s15]]   ;;  %s9431_s20 = smov 88  }
   0x5   :  { %s9432_s21 = smov 120   ;;  %s9433_s22 = smov 56  }
   0x6   :  { %s9434_s23 = smov 80   ;;  %s9435_s24 = smov 112  }
   0x7   :  { %v9134_v1 = vld [vmem:[%s9480_s6 + $0x8] sm:$0xff]   ;;  %v9135_v2 = vld [vmem:[%s9480_s6] sm:$0xff]   ;;  %s9436_s25 = smov 48   ;;  %s9437_s26 = smov 72  }
   0x8   :  { %8222 = vmatpush3.bf16.msra.mxu0 %v9134_v1  ;;  %v9492_v3 = vld [vmem:[%s1_s9] sm:$0xff]  ;;  %v9494_v4 = vld [vmem:[%s1_s9 + $0x8] sm:$0xff]  ;;  %s9438_s27 = smov 104   ;;  %s11031_s28 = smov 8  }
   0x9   :  { %8223 = vmatprep.subr.bf16.mxu0 %v9424_v0  ;;  %v145_v5 = vpack.c.bf16 %v9494_v4, %v9492_v3  ;;  %v7688_v6 = vld [vmem:[%s9506_s13] ss:$0 sm:$0xff]  ;;  %s9668_s1 = sld [smem:[%s11026_s0 + %s11031_s28]]   ;;  %s11029_s2 = smov 16  }
   0xa   :  { %v9535_v19 = vld [vmem:[%s9532_s18] sm:$0xff]  ;;  %v9539_v23 = vld [vmem:[%s9532_s18 + $0x8] sm:$0xff]  ;;  %s9674_s5 = sld [smem:[%s11026_s0 + %s11029_s2]]   ;;  %s9441_s7 = smov 40  }
   0xb   :  { %s11027_s8 = smov 24   ;;  %s9443_s12 = smov 6  }
   0xc   :  { %8224 = vmatpush3.bf16.msra.mxu0 %v9135_v2  ;;  %s9705_s11 = sld [smem:[%s11026_s0 + %s11027_s8]]   ;;  %s9444_s29 = smov 7  }
   0xd   :  { %8235 = vmatprep.subr.bf16.mxu0 %v9424_v0  ;;  %s9710_s17 = sld [smem:[%s11026_s0 + %s9443_s12]]   ;;  %s9445_s9 = smov 10  }
   0xe   :  { %s9731_s4 = sld [smem:[%s11026_s0 + %s9444_s29]]   ;;  %s9446_s16 = smov 12  }
   0xf   :  { %8226 = vmatmul.mubr.msk.bf16.vlgmr.msra.gmra.mxu0 %vm169_vm1, %v145_v5  ;;  %s9747_s15 = sld [smem:[%s11026_s0 + %s9445_s9]]   ;;  %s9447_s9 = smov 13  }
  0x10   :  { %8237 = vmatprep.mubr.msk.bf16.mxu0 %vm9426_vm0, %v9424_v0  ;;  %s9754_s3 = sld [smem:[%s11026_s0 + %s9446_s16]]   ;;  %s9448_s16 = smov 9  }
  0x11   :  { %s9449_s10 = smov 11   ;;  %s9455_s30 = smov 3  }
  0x12   :  { %s9784_s29 = sld [smem:[%s11026_s0 + %s9449_s10]]   ;;  %s9452_s10 = smov 1  }
  0xcf   :  { %v207_v7 = vpop.f32.mrf.mxu0 }
  0xd0   :  { %v208_v8 = vadd.f32 %v7688_v6, %v207_v7 }
  0xd1   :  { %v8227_v9 = vpop.f32.mrf.mxu0 }
  0xd2   :  { %v9509_v10 = vpack.c.bf16 %v208_v8, %v208_v8 }
  0xd3   :  { %v210_v11 = vpop.f32.mrf.mxu0 }
  0xd4   :  { %v211_v12 = vadd.f32 %v7688_v6, %v210_v11  ;;  %217 = vrot.lane.b32.xlu0 %v9509_v10, %s9428_s14 }
  0xd5   :  { %v8228_v13 = vpop.f32.mrf.mxu0 }
  0xd6   :  { %v9513_v14 = vpack.c.bf16 %v211_v12, %v211_v12 }
  0xd8   :  { %267 = vrot.lane.b32.xlu0 %v9513_v14, %s9428_s14 }
 0x146   :  { %v218_v15 = vpop.permute.xlu0 %217 }
 0x147   :  { %v224_v16 = vsel %vm219_vm2, %v218_v15, 0 }
 0x148   :  { %8230 = vmatpush3.bf16.xpose.msra.mxu1 %v224_v16 }
 0x149   :  { %8241 = vmatprep.subr.bf16.mxu1 %v9424_v0 }
 0x14a   :  { %v268_v17 = vpop.permute.xlu0 %267 }
 0x14b   :  { %v273_v18 = vsel %vm219_vm2, %v268_v17, 0 }
 0x14c   :  { %8236 = vmatpush3.bf16.xpose.msra.mxu0 %v273_v18 }
 0x14d   :  { %8247 = vmatprep.subr.bf16.mxu0 %v9424_v0 }
 0x14f   :  { %8232 = vmatmul.mubr.msk.bf16.vlgmr.msra.gmra.mxu1 %vm219_vm2, %v9509_v10 }
 0x150   :  { %8243 = vmatprep.mubr.msk.bf16.mxu1 %vm9426_vm0, %v9424_v0 }
 0x153   :  { %8238 = vmatmul.mubr.msk.bf16.vlgmr.msra.gmra.mxu0 %vm219_vm2, %v9513_v14 }
 0x154   :  { %8249 = vmatprep.mubr.msk.bf16.mxu0 %vm9426_vm0, %v9424_v0 }
 0x20f   :  { %v260_v20 = vpop.f32.mrf.mxu1 }
 0x210   :  { %v261_v21 = vadd.f32 %v260_v20, %v9535_v19 }
 0x211   :  { %v8233_v22 = vpop.f32.mrf.mxu1 }
 0x212   :  { %v315_v24 = vsel %vm219_vm2, %v261_v21, -inf }
 0x213   :  { %316 = vmax.xlane.f32.xlu1 %v315_v24  ;;  %v263_v25 = vpop.f32.mrf.mxu1  ;;  %v309_v26 = vpop.f32.mrf.mxu0 }
 0x214   :  { %v310_v27 = vadd.f32 %v309_v26, %v9539_v23 }
 0x215   :  { %v8234_v28 = vpop.f32.mrf.mxu1  ;;  %v8239_v29 = vpop.f32.mrf.mxu0 }
 0x216   :  { %v318_v30 = vsel %vm219_vm2, %v310_v27, -inf }
 0x217   :  { %319 = vmax.xlane.f32.xlu1 %v318_v30  ;;  %v312_v31 = vpop.f32.mrf.mxu0 }
 0x219   :  { %v8240_v32 = vpop.f32.mrf.mxu0 }
 0x228   :  { %339 = vrot.lane.b32.xlu1 %v9509_v10, %s9430_s19 }
 0x22c   :  { %388 = vrot.lane.b32.xlu1 %v9513_v14, %s9430_s19 }
 0x230   :  { %438 = vrot.lane.b32.xlu1 %v9509_v10, %s9431_s20 }
 0x29c   :  { %v317_v33 = vpop.xlane.xlu1 %316 }
 0x29d   :  { %v321_v34 = vsub.f32 %v261_v21, %v317_v33 }
 0x29f   :  { %v323_v35 = vmul.f32 1.442695, %v321_v34 }
 0x2a0   :  { %v320_v36 = vpop.xlane.xlu1 %319 }
 0x2a1   :  { %9188 = vpow2.f32 %v323_v35  ;;  %v322_v37 = vsub.f32 %v310_v27, %v320_v36 }
 0x2a3   :  { %v325_v38 = vmul.f32 1.442695, %v322_v37 }
 0x2a4   :  { %v340_v39 = vpop.permute.xlu1 %339 }
 0x2a5   :  { %9190 = vpow2.f32 %v325_v38  ;;  %v346_v40 = vsel %vm344_vm3, %v340_v39, 0 }
 0x2a6   :  { %8242 = vmatpush3.bf16.msra.mxu1 %v346_v40 }
 0x2a7   :  { %8253 = vmatprep.subr.bf16.mxu1 %v9424_v0 }
 0x2a8   :  { %v389_v41 = vpop.permute.xlu1 %388 }
 0x2a9   :  { %v394_v42 = vsel %vm344_vm3, %v389_v41, 0 }
 0x2aa   :  { %8248 = vmatpush3.bf16.msra.mxu0 %v394_v42 }
 0x2ab   :  { %8259 = vmatprep.subr.bf16.mxu0 %v9424_v0 }
 0x2ac   :  { %v439_v47 = vpop.permute.xlu1 %438 }
 0x2ad   :  { %v444_v54 = vsel %vm219_vm2, %v439_v47, 0 }
 0x2ae   :  { %v9189_v43 = vpop.eup %9188 }
 0x2af   :  { %v327_v44 = vsel %vm219_vm2, %v9189_v43, 0.0 }
 0x2b0   :  { %328 = vadd.xlane.f32.xlu0 %v327_v44 }
 0x2b2   :  { %v9191_v45 = vpop.eup %9190 }
 0x2b3   :  { %v330_v46 = vsel %vm219_vm2, %v9191_v45, 0.0 }
 0x2b4   :  { %331 = vadd.xlane.f32.xlu1 %v330_v46 }
 0x2c5   :  { %488 = vrot.lane.b32.xlu1 %v9513_v14, %s9431_s20 }
 0x2c6   :  { %436 = vrot.lane.b32.xlu0 %v9509_v10, %s9432_s21 }
 0x2c9   :  { %486 = vrot.lane.b32.xlu1 %v9513_v14, %s9432_s21 }
 0x339   :  { %v329_v48 = vpop.xlane.xlu0 %328 }
 0x33a   :  { %9192 = vrcp.f32 %v329_v48 }
 0x33d   :  { %v332_v49 = vpop.xlane.xlu1 %331  ;;  %v437_v59 = vpop.permute.xlu0 %436 }
 0x33e   :  { %9194 = vrcp.f32 %v332_v49 }
 0x341   :  { %v489_v56 = vpop.permute.xlu1 %488 }
 0x342   :  { %v494_v58 = vsel %vm219_vm2, %v489_v56, 0 }
 0x345   :  { %v487_v60 = vpop.permute.xlu1 %486 }
 0x347   :  { %v9193_v50 = vpop.eup %9192 }
 0x348   :  { %v334_v51 = vmul.f32 %v9193_v50, %v9189_v43 }
 0x34a   :  { %v337_v52 = vpack.c.bf16 %v334_v51, %v334_v51 }
 0x34b   :  { %v9195_v53 = vpop.eup %9194 }
 0x34c   :  { %8244 = vmatmul.mubr.msk.bf16.vlgmr.msra.gmra.mxu1 %vm219_vm2, %v337_v52  ;;  %v336_v55 = vmul.f32 %v9195_v53, %v9191_v45 }
 0x34d   :  { %8254 = vmatpush3.bf16.xpose.msra.mxu1 %v444_v54  ;;  %8255 = vmatprep.mubr.msk.bf16.mxu1 %vm9426_vm0, %v9424_v0 }
 0x34e   :  { %v338_v57 = vpack.c.bf16 %v336_v55, %v336_v55  ;;  %8265 = vmatprep.subr.bf16.mxu1 %v9424_v0 }
 0x350   :  { %8250 = vmatmul.mubr.msk.bf16.vlgmr.msra.gmra.mxu0 %vm219_vm2, %v338_v57 }
 0x351   :  { %8260 = vmatpush3.bf16.xpose.msra.mxu0 %v494_v58  ;;  %8261 = vmatprep.mubr.msk.bf16.mxu0 %vm9426_vm0, %v9424_v0 }
 0x352   :  { %8271 = vmatprep.subr.bf16.mxu0 %v9424_v0 }
 0x354   :  { %8256 = vmatmul.mubr.msk.bf16.vlgmr.msra.gmra.mxu1 %vm219_vm2, %v437_v59 }
 0x355   :  { %8267 = vmatprep.mubr.msk.bf16.mxu1 %vm9426_vm0, %v9424_v0 }
 0x358   :  { %8262 = vmatmul.mubr.msk.bf16.vlgmr.msra.gmra.mxu0 %vm219_vm2, %v487_v60 }
 0x359   :  { %8273 = vmatprep.mubr.msk.bf16.mxu0 %vm9426_vm0, %v9424_v0 }
 0x40c   :  { %v9578_v61 = vpop.f32.mrf.mxu1 }
 0x40e   :  { %v8245_v62 = vpop.f32.mrf.mxu1 }
 0x410   :  { %v385_v63 = vpop.f32.mrf.mxu1  ;;  %v9580_v1 = vpop.f32.mrf.mxu0 }
 0x412   :  { %v8246_v2 = vpop.f32.mrf.mxu1  ;;  %v8251_v5 = vpop.f32.mrf.mxu0 }
 0x414   :  { %v433_v6 = vpop.f32.mrf.mxu0  ;;  %v480_v7 = vpop.f32.mrf.mxu1 }
 0x415   :  { %v481_v8 = vadd.f32 %v480_v7, %v9535_v19 }
 0x416   :  { %v8252_v9 = vpop.f32.mrf.mxu0  ;;  %v8257_v11 = vpop.f32.mrf.mxu1 }
 0x417   :  { %v536_v12 = vsel %vm219_vm2, %v481_v8, -inf }
 0x418   :  { %537 = vmax.xlane.f32.xlu1 %v536_v12  ;;  %v483_v13 = vpop.f32.mrf.mxu1  ;;  %v530_v15 = vpop.f32.mrf.mxu0 }
 0x419   :  { %v531_v16 = vadd.f32 %v530_v15, %v9539_v23 }
 0x41a   :  { %v8258_v17 = vpop.f32.mrf.mxu1  ;;  %v8263_v18 = vpop.f32.mrf.mxu0 }
 0x41b   :  { %v539_v20 = vsel %vm219_vm2, %v531_v16, -inf }
 0x41c   :  { %540 = vmax.xlane.f32.xlu0 %v539_v20  ;;  %v533_v21 = vpop.f32.mrf.mxu0 }
 0x41e   :  { %v8264_v22 = vpop.f32.mrf.mxu0 }
 0x429   :  { %560 = vrot.lane.b32.xlu1 %v9509_v10, %s9433_s22 }
 0x42d   :  { %658 = vrot.lane.b32.xlu1 %v9509_v10, %s9434_s23 }
 0x432   :  { %608 = vrot.lane.b32.xlu0 %v9513_v14, %s9433_s22 }
 0x436   :  { %656 = vrot.lane.b32.xlu0 %v9509_v10, %s9435_s24 }
 0x4a1   :  { %v538_v24 = vpop.xlane.xlu1 %537 }
 0x4a2   :  { %v542_v25 = vsub.f32 %v481_v8, %v538_v24 }
 0x4a4   :  { %v544_v26 = vmul.f32 1.442695, %v542_v25 }
 0x4a5   :  { %v561_v27 = vpop.permute.xlu1 %560  ;;  %v541_v28 = vpop.xlane.xlu0 %540 }
 0x4a6   :  { %9196 = vpow2.f32 %v544_v26  ;;  %v566_v29 = vsel %vm344_vm3, %v561_v27, 0  ;;  %v543_v30 = vsub.f32 %v531_v16, %v541_v28 }
 0x4a7   :  { %8266 = vmatpush3.bf16.msra.mxu1 %v566_v29 }
 0x4a8   :  { %v546_v31 = vmul.f32 1.442695, %v543_v30  ;;  %8277 = vmatprep.subr.bf16.mxu1 %v9424_v0 }
 0x4a9   :  { %v609_v32 = vpop.permute.xlu0 %608  ;;  %v659_v38 = vpop.permute.xlu1 %658 }
 0x4aa   :  { %9198 = vpow2.f32 %v546_v31  ;;  %v614_v33 = vsel %vm344_vm3, %v609_v32, 0  ;;  %v664_v45 = vsel %vm219_vm2, %v659_v38, 0 }
 0x4ab   :  { %8272 = vmatpush3.bf16.msra.mxu0 %v614_v33 }
 0x4ac   :  { %8283 = vmatprep.subr.bf16.mxu0 %v9424_v0 }
 0x4ad   :  { %v657_v50 = vpop.permute.xlu0 %656 }
 0x4b3   :  { %v9197_v34 = vpop.eup %9196 }
 0x4b4   :  { %v548_v35 = vsel %vm219_vm2, %v9197_v34, 0.0 }
 0x4b5   :  { %549 = vadd.xlane.f32.xlu1 %v548_v35 }
 0x4b7   :  { %v9199_v36 = vpop.eup %9198 }
 0x4b8   :  { %v551_v37 = vsel %vm219_vm2, %v9199_v36, 0.0 }
 0x4b9   :  { %552 = vadd.xlane.f32.xlu1 %v551_v37 }
 0x4ca   :  { %708 = vrot.lane.b32.xlu1 %v9513_v14, %s9434_s23 }
 0x4ce   :  { %706 = vrot.lane.b32.xlu1 %v9513_v14, %s9435_s24 }
 0x53e   :  { %v550_v39 = vpop.xlane.xlu1 %549 }
 0x53f   :  { %9200 = vrcp.f32 %v550_v39 }
 0x542   :  { %v553_v40 = vpop.xlane.xlu1 %552 }
 0x543   :  { %9202 = vrcp.f32 %v553_v40 }
 0x546   :  { %v709_v47 = vpop.permute.xlu1 %708 }
 0x547   :  { %v714_v49 = vsel %vm219_vm2, %v709_v47, 0 }
 0x54a   :  { %v707_v51 = vpop.permute.xlu1 %706 }
 0x54c   :  { %v9201_v41 = vpop.eup %9200 }
 0x54d   :  { %v555_v42 = vmul.f32 %v9201_v41, %v9197_v34 }
 0x54f   :  { %v558_v43 = vpack.c.bf16 %v555_v42, %v555_v42 }
 0x550   :  { %v9203_v44 = vpop.eup %9202 }
 0x551   :  { %8268 = vmatmul.mubr.msk.bf16.vlgmr.msra.gmra.mxu1 %vm219_vm2, %v558_v43  ;;  %v557_v46 = vmul.f32 %v9203_v44, %v9199_v36 }
 0x552   :  { %8278 = vmatpush3.bf16.xpose.msra.mxu1 %v664_v45  ;;  %8279 = vmatprep.mubr.msk.bf16.mxu1 %vm9426_vm0, %v9424_v0 }
 0x553   :  { %v559_v48 = vpack.c.bf16 %v557_v46, %v557_v46  ;;  %8289 = vmatprep.subr.bf16.mxu1 %v9424_v0 }
 0x555   :  { %8274 = vmatmul.mubr.msk.bf16.vlgmr.msra.gmra.mxu0 %vm219_vm2, %v559_v48 }
 0x556   :  { %8284 = vmatpush3.bf16.xpose.msra.mxu0 %v714_v49  ;;  %8285 = vmatprep.mubr.msk.bf16.mxu0 %vm9426_vm0, %v9424_v0 }
 0x557   :  { %8295 = vmatprep.subr.bf16.mxu0 %v9424_v0 }
 0x559   :  { %8280 = vmatmul.mubr.msk.bf16.vlgmr.msra.gmra.mxu1 %vm219_vm2, %v657_v50 }
 0x55a   :  { %8291 = vmatprep.mubr.msk.bf16.mxu1 %vm9426_vm0, %v9424_v0 }
 0x55d   :  { %8286 = vmatmul.mubr.msk.bf16.vlgmr.msra.gmra.mxu0 %vm219_vm2, %v707_v51 }
 0x55e   :  { %8297 = vmatprep.mubr.msk.bf16.mxu0 %vm9426_vm0, %v9424_v0 }
 0x611   :  { %v9620_v52 = vpop.f32.mrf.mxu1 }
 0x613   :  { %v8269_v53 = vpop.f32.mrf.mxu1 }
 0x615   :  { %v605_v54 = vpop.f32.mrf.mxu1  ;;  %v9622_v55 = vpop.f32.mrf.mxu0 }
 0x616   :  { %v9044_v56 = vpack.i.bf16 %v9622_v55, %v9620_v52 }
 0x617   :  { %v8270_v57 = vpop.f32.mrf.mxu1  ;;  %v8275_v58 = vpop.f32.mrf.mxu0 }
 0x619   :  { %v653_v59 = vpop.f32.mrf.mxu0  ;;  %v700_v60 = vpop.f32.mrf.mxu1 }
 0x61a   :  { %v701_v62 = vadd.f32 %v700_v60, %v9535_v19 }
 0x61b   :  { %v8276_v63 = vpop.f32.mrf.mxu0  ;;  %v8281_v2 = vpop.f32.mrf.mxu1 }
 0x61c   :  { %v756_v5 = vsel %vm219_vm2, %v701_v62, -inf }
 0x61d   :  { %757 = vmax.xlane.f32.xlu0 %v756_v5  ;;  %v703_v6 = vpop.f32.mrf.mxu1  ;;  %v750_v7 = vpop.f32.mrf.mxu0 }
 0x61e   :  { %v751_v8 = vadd.f32 %v750_v7, %v9539_v23 }
 0x61f   :  { %v8282_v9 = vpop.f32.mrf.mxu1  ;;  %v8287_v11 = vpop.f32.mrf.mxu0 }
 0x620   :  { %v759_v12 = vsel %vm219_vm2, %v751_v8, -inf }
 0x621   :  { %760 = vmax.xlane.f32.xlu1 %v759_v12  ;;  %v753_v13 = vpop.f32.mrf.mxu0 }
 0x623   :  { %v8288_v15 = vpop.f32.mrf.mxu0 }
 0x632   :  { %780 = vrot.lane.b32.xlu1 %v9509_v10, %s9436_s25 }
 0x636   :  { %878 = vrot.lane.b32.xlu1 %v9509_v10, %s9437_s26 }
 0x63a   :  { %928 = vrot.lane.b32.xlu1 %v9513_v14, %s9437_s26 }
 0x63e   :  { %926 = vrot.lane.b32.xlu1 %v9513_v14, %s9438_s27 }
 0x6a6   :  { %v758_v16 = vpop.xlane.xlu0 %757 }
 0x6a7   :  { %v762_v17 = vsub.f32 %v701_v62, %v758_v16 }
 0x6a9   :  { %v764_v18 = vmul.f32 1.442695, %v762_v17 }
 0x6aa   :  { %v761_v20 = vpop.xlane.xlu1 %760 }
 0x6ab   :  { %9204 = vpow2.f32 %v764_v18  ;;  %v763_v21 = vsub.f32 %v751_v8, %v761_v20 }
 0x6ad   :  { %v766_v22 = vmul.f32 1.442695, %v763_v21 }
 0x6ae   :  { %v781_v24 = vpop.permute.xlu1 %780 }
 0x6af   :  { %9206 = vpow2.f32 %v766_v22  ;;  %v786_v25 = vsel %vm344_vm3, %v781_v24, 0 }
 0x6b0   :  { %8290 = vmatpush3.bf16.msra.mxu1 %v786_v25 }
 0x6b1   :  { %8301 = vmatprep.subr.bf16.mxu1 %v9424_v0 }
 0x6b2   :  { %v879_v35 = vpop.permute.xlu1 %878 }
 0x6b3   :  { %v884_v39 = vsel %vm219_vm2, %v879_v35, 0 }
 0x6b6   :  { %v929_v41 = vpop.permute.xlu1 %928 }
 0x6b7   :  { %v934_v43 = vsel %vm219_vm2, %v929_v41, 0 }
 0x6b8   :  { %v9205_v26 = vpop.eup %9204 }
 0x6b9   :  { %v768_v27 = vsel %vm219_vm2, %v9205_v26, 0.0 }
 0x6ba   :  { %769 = vadd.xlane.f32.xlu0 %v768_v27  ;;  %v927_v45 = vpop.permute.xlu1 %926 }
 0x6bc   :  { %v9207_v28 = vpop.eup %9206 }
 0x6bd   :  { %v771_v29 = vsel %vm219_vm2, %v9207_v28, 0.0 }
 0x6be   :  { %772 = vadd.xlane.f32.xlu0 %v771_v29 }
 0x6d4   :  { %828 = vrot.lane.b32.xlu0 %v9513_v14, %s9436_s25 }
 0x6d8   :  { %876 = vrot.lane.b32.xlu0 %v9509_v10, %s9438_s27 }
 0x743   :  { %v770_v30 = vpop.xlane.xlu0 %769 }
 0x744   :  { %9208 = vrcp.f32 %v770_v30  ;;  %v9136_v30 = vld [vmem:[%s9710_s17 + $0x8] sm:$0xff]  }
 0x747   :  { %v773_v31 = vpop.xlane.xlu0 %772 }
 0x748   :  { %9210 = vrcp.f32 %v773_v31  ;;  %v9137_v31 = vld [vmem:[%s9710_s17] sm:$0xff]  }
 0x74b   :  { %v829_v32 = vpop.permute.xlu0 %828 }
 0x74c   :  { %v834_v33 = vsel %vm344_vm3, %v829_v32, 0 }
 0x74d   :  { %8296 = vmatpush3.bf16.msra.mxu0 %v834_v33 }
 0x74e   :  { %8307 = vmatprep.subr.bf16.mxu0 %v9424_v0 }
 0x74f   :  { %v877_v44 = vpop.permute.xlu0 %876 }
 0x751   :  { %v9209_v34 = vpop.eup %9208 }
 0x752   :  { %v775_v36 = vmul.f32 %v9209_v34, %v9205_v26 }
 0x754   :  { %v778_v37 = vpack.c.bf16 %v775_v36, %v775_v36 }
 0x755   :  { %v9211_v38 = vpop.eup %9210 }
 0x756   :  { %8292 = vmatmul.mubr.msk.bf16.vlgmr.msra.gmra.mxu1 %vm219_vm2, %v778_v37  ;;  %v777_v40 = vmul.f32 %v9211_v38, %v9207_v28 }
 0x757   :  { %8302 = vmatpush3.bf16.xpose.msra.mxu1 %v884_v39  ;;  %8303 = vmatprep.mubr.msk.bf16.mxu1 %vm9426_vm0, %v9424_v0 }
 0x758   :  { %v779_v42 = vpack.c.bf16 %v777_v40, %v777_v40  ;;  %8313 = vmatprep.subr.bf16.mxu1 %v9424_v0 }
 0x75a   :  { %8298 = vmatmul.mubr.msk.bf16.vlgmr.msra.gmra.mxu0 %vm219_vm2, %v779_v42 }
 0x75b   :  { %8308 = vmatpush3.bf16.xpose.msra.mxu0 %v934_v43  ;;  %8309 = vmatprep.mubr.msk.bf16.mxu0 %vm9426_vm0, %v9424_v0 }
 0x75c   :  { %8319 = vmatprep.subr.bf16.mxu0 %v9424_v0 }
 0x75e   :  { %8304 = vmatmul.mubr.msk.bf16.vlgmr.msra.gmra.mxu1 %vm219_vm2, %v877_v44 }
 0x75f   :  { %8315 = vmatprep.mubr.msk.bf16.mxu1 %vm9426_vm0, %v9424_v0 }
 0x762   :  { %8310 = vmatmul.mubr.msk.bf16.vlgmr.msra.gmra.mxu0 %vm219_vm2, %v927_v45 }
 0x763   :  { %8321 = vmatprep.mubr.msk.bf16.mxu0 %vm9426_vm0, %v9424_v0 }
 0x816   :  { %v822_v46 = vpop.f32.mrf.mxu1 }
 0x818   :  { %v8293_v47 = vpop.f32.mrf.mxu1 }
 0x81a   :  { %v825_v48 = vpop.f32.mrf.mxu1  ;;  %v870_v49 = vpop.f32.mrf.mxu0 }
 0x81c   :  { %v8294_v50 = vpop.f32.mrf.mxu1  ;;  %v8299_v51 = vpop.f32.mrf.mxu0 }
 0x81e   :  { %v873_v53 = vpop.f32.mrf.mxu0  ;;  %v920_v54 = vpop.f32.mrf.mxu1 }
 0x81f   :  { %v921_v57 = vadd.f32 %v920_v54, %v9535_v19  ;;  %v9049_v19 = vpack.i.bf16 %v870_v49, %v822_v46 }
 0x820   :  { %v8300_v58 = vpop.f32.mrf.mxu0  ;;  %v8305_v59 = vpop.f32.mrf.mxu1 }
 0x821   :  { %v976_v60 = vsel %vm219_vm2, %v921_v57, -inf }
 0x822   :  { %977 = vmax.xlane.f32.xlu0 %v976_v60  ;;  %v923_v62 = vpop.f32.mrf.mxu1  ;;  %v970_v63 = vpop.f32.mrf.mxu0 }
 0x823   :  { %v971_v2 = vadd.f32 %v970_v63, %v9539_v23 }
 0x824   :  { %v8306_v5 = vpop.f32.mrf.mxu1  ;;  %v8311_v6 = vpop.f32.mrf.mxu0 }
 0x825   :  { %v979_v7 = vsel %vm219_vm2, %v971_v2, -inf }
 0x826   :  { %980 = vmax.xlane.f32.xlu1 %v979_v7  ;;  %v973_v8 = vpop.f32.mrf.mxu0 }
 0x828   :  { %v8312_v9 = vpop.f32.mrf.mxu0 }
 0x837   :  { %1000 = vrot.lane.b32.xlu1 %v9509_v10, %s9441_s7 }
 0x83b   :  { %9045 = vrot.lane.b32.xlu1 %v9044_v56, %s11031_s28 }
 0x83f   :  { %9050 = vrot.lane.b32.xlu1 %v9049_v19, %s11029_s2 }
 0x8ab   :  { %v978_v23 = vpop.xlane.xlu0 %977 }
 0x8ac   :  { %v982_v11 = vsub.f32 %v921_v57, %v978_v23 }
 0x8ae   :  { %v984_v12 = vmul.f32 1.442695, %v982_v11 }
 0x8af   :  { %v981_v13 = vpop.xlane.xlu1 %980 }
 0x8b0   :  { %9212 = vpow2.f32 %v984_v12  ;;  %v983_v15 = vsub.f32 %v971_v2, %v981_v13 }
 0x8b2   :  { %v986_v16 = vmul.f32 1.442695, %v983_v15 }
 0x8b3   :  { %v1001_v17 = vpop.permute.xlu1 %1000 }
 0x8b4   :  { %9214 = vpow2.f32 %v986_v16  ;;  %v1006_v18 = vsel %vm344_vm3, %v1001_v17, 0 }
 0x8b5   :  { %8314 = vmatpush3.bf16.msra.mxu1 %v1006_v18 }
 0x8b6   :  { %8325 = vmatprep.subr.bf16.mxu1 %v9424_v0 }
 0x8b7   :  { %v9046_v41 = vpop.permute.xlu1 %9045 }
 0x8b8   :  { %v9048_v43 = vunpack.i.h.bf16 %v9046_v41  ;;  %v9047_v44 = vunpack.i.l.bf16 %v9046_v41 }
 0x8ba   :  { %v1121_v48 = vsel %vm219_vm2, %v9580_v1, %v9048_v43  ;;  %v1120_v49 = vsel %vm219_vm2, %v9578_v61, %v9047_v44  ;;  %v7708_v61 = vld [vmem:[%s9731_s4] ss:$0 sm:$0xff] }
 0x8bb   :  { %v9051_v42 = vpop.permute.xlu1 %9050 }
 0x8bc   :  { %v9053_v45 = vunpack.i.h.bf16 %v9051_v42  ;;  %v9052_v46 = vunpack.i.l.bf16 %v9051_v42 }
 0x8bd   :  { %v9213_v10 = vpop.eup %9212 }
 0x8be   :  { %v988_v52 = vsel %vm219_vm2, %v9213_v10, 0.0  ;;  %v1123_v53 = vsel %vm1122_vm4, %v1120_v49, %v9052_v46  ;;  %v1124_v54 = vsel %vm1122_vm4, %v1121_v48, %v9053_v45  ;;  %v7718_v48 = vld [vmem:[%s9784_s29] ss:$0 sm:$0xff] }
 0x8bf   :  { %989 = vadd.xlane.f32.xlu0 %v988_v52  ;;  %v9140_v52 = vld [vmem:[%s9747_s15 + $0x18] sm:$0xff]  }
 0x8c1   :  { %v9215_v55 = vpop.eup %9214 }
 0x8c2   :  { %v991_v56 = vsel %vm219_vm2, %v9215_v55, 0.0 }
 0x8c3   :  { %992 = vadd.xlane.f32.xlu0 %v991_v56 }
 0x8d9   :  { %1048 = vrot.lane.b32.xlu0 %v9513_v14, %s9441_s7 }
 0x948   :  { %v990_v20 = vpop.xlane.xlu0 %989 }
 0x949   :  { %9216 = vrcp.f32 %v990_v20 }
 0x94c   :  { %v993_v21 = vpop.xlane.xlu0 %992 }
 0x94d   :  { %9218 = vrcp.f32 %v993_v21 }
 0x950   :  { %v1049_v22 = vpop.permute.xlu0 %1048 }
 0x951   :  { %v1054_v24 = vsel %vm344_vm3, %v1049_v22, 0 }
 0x952   :  { %8320 = vmatpush3.bf16.msra.mxu0 %v1054_v24 }
 0x953   :  { %8333 = vmatprep.subr.bf16.mxu0 %v9424_v0 }
 0x956   :  { %v9217_v25 = vpop.eup %9216 }
 0x957   :  { %v995_v26 = vmul.f32 %v9217_v25, %v9213_v10  ;;  %v9138_v10 = vld [vmem:[%s9668_s1 + $0x8] sm:$0xff]  }
 0x959   :  { %v998_v27 = vpack.c.bf16 %v995_v26, %v995_v26 }
 0x95a   :  { %v9219_v28 = vpop.eup %9218 }
 0x95b   :  { %8316 = vmatmul.mubr.msk.bf16.vlgmr.msra.gmra.mxu1 %vm219_vm2, %v998_v27  ;;  %v997_v29 = vmul.f32 %v9219_v28, %v9215_v55  ;;  %v7712_v27 = vld [vmem:[%s9754_s3] ss:$0 sm:$0xff] }
 0x95c   :  { %8329 = vmatprep.mubr.msk.bf16.mxu1 %vm9426_vm0, %v9424_v0  ;;  %8326 = vmatpush3.bf16.msra.mxu1 %v9136_v30 }
 0x95d   :  { %v999_v14 = vpack.c.bf16 %v997_v29, %v997_v29  ;;  %8327 = vmatprep.subr.bf16.mxu1 %v9424_v0 }
 0x95f   :  { %8322 = vmatmul.mubr.msk.bf16.vlgmr.msra.gmra.mxu0 %vm219_vm2, %v999_v14 }
 0x960   :  { %8337 = vmatprep.mubr.msk.bf16.mxu0 %vm9426_vm0, %v9424_v0  ;;  %8328 = vmatpush3.bf16.msra.mxu1 %v9137_v31 }
 0x961   :  { %8341 = vmatprep.subr.bf16.mxu1 %v9424_v0  ;;  %8334 = vmatpush3.bf16.msra.mxu0 %v9138_v10 }
 0x962   :  { %8335 = vmatprep.subr.bf16.mxu0 %v9424_v0 }
 0xa1b   :  { %v1042_v32 = vpop.f32.mrf.mxu1 }
 0xa1d   :  { %v8317_v33 = vpop.f32.mrf.mxu1 }
 0xa1f   :  { %v1045_v34 = vpop.f32.mrf.mxu1  ;;  %v1090_v35 = vpop.f32.mrf.mxu0 }
 0xa20   :  { %v9054_v36 = vpack.i.bf16 %v1090_v35, %v1042_v32  ;;  %v9141_v35 = vld [vmem:[%s9747_s15 + $0x10] sm:$0xff]  }
 0xa21   :  { %v8318_v37 = vpop.f32.mrf.mxu1  ;;  %v8323_v38 = vpop.f32.mrf.mxu0 }
 0xa22   :  { %9055 = vrot.lane.b32.xlu0 %v9054_v36, %s11027_s8  ;;  %s9759_s8 = sld [smem:[%s11026_s0 + %s9447_s9]]   ;;  %v9142_v36 = vld [vmem:[%s9747_s15 + $0x8] sm:$0xff]   ;;  %v9143_v37 = vld [vmem:[%s9747_s15] sm:$0xff]  }
 0xa23   :  { %v1093_v39 = vpop.f32.mrf.mxu0  ;;  %s9775_s9 = sld [smem:[%s11026_s0 + %s9448_s16]]  }
 0xa24   :  { %s10101_s16 = sld [smem:[%s11026_s0 + %s9455_s30]]   ;;  %s9458_s30 = smov 28  }
 0xa25   :  { %v8324_v40 = vpop.f32.mrf.mxu0 }
 0xa28   :  { %v7713_v30 = vld [vmem:[%s9759_s8] ss:$0 sm:$0xff] }
 0xa29   :  { %v7714_v38 = vld [vmem:[%s9775_s9] ss:$0 sm:$0xff] }
 0xa94   :  { %v9056_v47 = vpop.permute.xlu0 %9055 }
 0xa95   :  { %v9058_v50 = vunpack.i.h.bf16 %v9056_v47  ;;  %v9057_v51 = vunpack.i.l.bf16 %v9056_v47 }
 0xa97   :  { %v1127_v57 = vsel %vm1125_vm5, %v1124_v54, %v9058_v50  ;;  %v1126_v58 = vsel %vm1125_vm5, %v1123_v53, %v9057_v51 }
 0xa98   :  { %v1128_v59 = vpack.c.bf16 %v1127_v57, %v1126_v58 }
 0xa9a   :  { %8330 = vmatmul.mubr.msk.bf16.vlgmr.msra.gmra.mxu1 %vm169_vm1, %v1128_v59 }
 0xa9b   :  { %8349 = vmatprep.mubr.msk.bf16.mxu1 %vm9426_vm0, %v9424_v0  ;;  %8342 = vmatpush3.bf16.msra.mxu1 %v9140_v52 }
 0xa9c   :  { %8343 = vmatprep.subr.bf16.mxu1 %v9424_v0 }
 0xa9f   :  { %8344 = vmatpush3.bf16.msra.mxu1 %v9141_v35 }
 0xaa0   :  { %8345 = vmatprep.subr.bf16.mxu1 %v9424_v0 }
 0xaa3   :  { %8346 = vmatpush3.bf16.msra.mxu1 %v9142_v36 }
 0xaa4   :  { %8347 = vmatprep.subr.bf16.mxu1 %v9424_v0 }
 0xaa7   :  { %8348 = vmatpush3.bf16.msra.mxu1 %v9143_v37 }
 0xaa8   :  { %8367 = vmatprep.subr.bf16.mxu1 %v9424_v0 }
 0xb5a   :  { %v1187_v1 = vpop.f32.mrf.mxu1 }
 0xb5b   :  { %v1188_v60 = vadd.f32 %v7708_v61, %v1187_v1 }
 0xb5c   :  { %v8331_v62 = vpop.f32.mrf.mxu1 }
 0xb5d   :  { %v1194_v63 = vadd.f32 %v1188_v60, %v9492_v3 }
 0xb5e   :  { %v1190_v2 = vpop.f32.mrf.mxu1 }
 0xb5f   :  { %v1191_v5 = vadd.f32 %v7708_v61, %v1190_v2  ;;  %v1198_v6 = vsel %vm169_vm1, %v1194_v63, 0.0 }
 0xb60   :  { %1199 = vadd.xlane.f32.xlu1 %v1198_v6  ;;  %v8332_v7 = vpop.f32.mrf.mxu1 }
 0xb61   :  { %v1195_v8 = vadd.f32 %v1191_v5, %v9494_v4  ;;  %v9139_v4 = vld [vmem:[%s9668_s1] sm:$0xff]  }
 0xb62   :  { %8336 = vmatpush3.bf16.msra.mxu0 %v9139_v4  ;;  %v7724_v4 = vld [vmem:[%s9754_s3 + $0x1] ss:$0 sm:$0xff] }
 0xb63   :  { %v1201_v9 = vsel %vm169_vm1, %v1195_v8, 0.0  ;;  %8353 = vmatprep.subr.bf16.mxu0 %v9424_v0 }
 0xb64   :  { %1202 = vadd.xlane.f32.xlu0 %v1201_v9 }
 0xbe9   :  { %v1200_v19 = vpop.xlane.xlu1 %1199 }
 0xbea   :  { %v1205_v23 = vmul.f32 0.03125, %v1200_v19 }
 0xbec   :  { %v1207_v11 = vsub.f32 %v1194_v63, %v1205_v23  ;;  %v9144_v23 = vld [vmem:[%s9480_s6 + $0x18] sm:$0xff]  }
 0xbed   :  { %v1203_v12 = vpop.xlane.xlu0 %1202 }
 0xbee   :  { %v1206_v13 = vmul.f32 0.03125, %v1203_v12  ;;  %v1209_v15 = vmul.f32 %v1207_v11, %v1207_v11 }
 0xbf0   :  { %v1208_v3 = vsub.f32 %v1195_v8, %v1206_v13  ;;  %v1211_v16 = vsel %vm169_vm1, %v1209_v15, 0.0 }
 0xbf1   :  { %1212 = vadd.xlane.f32.xlu0 %v1211_v16 }
 0xbf2   :  { %v1210_v17 = vmul.f32 %v1208_v3, %v1208_v3 }
 0xbf4   :  { %v1214_v18 = vsel %vm169_vm1, %v1210_v17, 0.0 }
 0xbf5   :  { %1215 = vadd.xlane.f32.xlu1 %v1214_v18 }
 0xc7a   :  { %v1213_v55 = vpop.xlane.xlu0 %1212 }
 0xc7b   :  { %v1217_v56 = vmul.f32 0.03125, %v1213_v55 }
 0xc7d   :  { %v1219_v20 = vadd.f32 1e-05, %v1217_v56 }
 0xc7e   :  { %v1216_v21 = vpop.xlane.xlu1 %1215 }
 0xc7f   :  { %9220 = vrsqrt.f32 %v1219_v20  ;;  %v1218_v22 = vmul.f32 0.03125, %v1216_v21  ;;  %v7725_v20 = vld [vmem:[%s9759_s8 + $0x1] ss:$0 sm:$0xff] }
 0xc81   :  { %v1220_v24 = vadd.f32 1e-05, %v1218_v22 }
 0xc83   :  { %9222 = vrsqrt.f32 %v1220_v24 }
 0xc8c   :  { %v9221_v25 = vpop.eup %9220 }
 0xc8d   :  { %v1223_v26 = vmul.f32 %v9221_v25, %v1207_v11  ;;  %v9145_v11 = vld [vmem:[%s9480_s6 + $0x10] sm:$0xff]   ;;  %s11033_s6 = smov 24  }
 0xc8f   :  { %v1229_v14 = vmul.f32 %v7712_v27, %v1223_v26  ;;  %v7730_v26 = vld [vmem:[%s9506_s13 + $0x1] ss:$0 sm:$0xff]  ;;  %s9450_s13 = smov 20  }
 0xc90   :  { %v9223_v28 = vpop.eup %9222 }
 0xc91   :  { %v1224_v29 = vmul.f32 %v9223_v28, %v1208_v3  ;;  %v1235_v32 = vadd.f32 %v7713_v30, %v1229_v14 }
 0xc93   :  { %v1230_v31 = vmul.f32 %v7712_v27, %v1224_v29 }
 0xc95   :  { %v1236_v33 = vadd.f32 %v7713_v30, %v1230_v31 }
 0xc97   :  { %v1237_v34 = vpack.c.bf16 %v1236_v33, %v1235_v32 }
 0xc99   :  { %8338 = vmatmul.mubr.msk.bf16.vlgmr.msra.gmra.mxu0 %vm169_vm1, %v1237_v34 }
 0xc9a   :  { %8357 = vmatprep.mubr.msk.bf16.mxu0 %vm9426_vm0, %v9424_v0  ;;  %8354 = vmatpush3.bf16.msra.mxu0 %v9144_v23 }
 0xc9b   :  { %8355 = vmatprep.subr.bf16.mxu0 %v9424_v0 }
 0xc9e   :  { %8356 = vmatpush3.bf16.msra.mxu0 %v9145_v11 }
 0xc9f   :  { %8361 = vmatprep.subr.bf16.mxu0 %v9424_v0 }
 0xd59   :  { %v1296_v39 = vpop.f32.mrf.mxu0 }
 0xd5a   :  { %v1297_v41 = vadd.f32 %v7714_v38, %v1296_v39  ;;  %v9828_v39 = vld [vmem:[%s9532_s18] sm:$0xff] }
 0xd5b   :  { %v8339_v40 = vpop.f32.mrf.mxu0 }
 0xd5c   :  { %v1303_v45 = vmax.f32 %v1297_v41, 0.0 }
 0xd5d   :  { %v1299_v42 = vpop.f32.mrf.mxu0 }
 0xd5e   :  { %v1300_v43 = vadd.f32 %v7714_v38, %v1299_v42 }
 0xd5f   :  { %v8340_v44 = vpop.f32.mrf.mxu0 }
 0xd60   :  { %v1304_v46 = vmax.f32 %v1300_v43, 0.0 }
 0xd62   :  { %v1305_v47 = vpack.c.bf16 %v1304_v46, %v1303_v45  ;;  %v9833_v45 = vld [vmem:[%s9532_s18 + $0x8] sm:$0xff] }
 0xd64   :  { %8350 = vmatmul.mubr.msk.bf16.vlgmr.msra.gmra.mxu1 %vm1343_vm6, %v1305_v47 }
 0xd65   :  { %8369 = vmatprep.mubr.msk.bf16.mxu1 %vm9426_vm0, %v9424_v0 }
 0xe24   :  { %v1381_v49 = vpop.f32.mrf.mxu1 }
 0xe25   :  { %v1382_v50 = vadd.f32 %v7718_v48, %v1381_v49 }
 0xe26   :  { %v8351_v51 = vpop.f32.mrf.mxu1 }
 0xe27   :  { %v1388_v53 = vadd.f32 %v1382_v50, %v1235_v32 }
 0xe28   :  { %v1384_v54 = vpop.f32.mrf.mxu1 }
 0xe29   :  { %v1385_v57 = vadd.f32 %v7718_v48, %v1384_v54  ;;  %v1392_v58 = vsel %vm169_vm1, %v1388_v53, 0.0 }
 0xe2a   :  { %1393 = vadd.xlane.f32.xlu0 %v1392_v58  ;;  %v8352_v59 = vpop.f32.mrf.mxu1 }
 0xe2b   :  { %v1389_v61 = vadd.f32 %v1385_v57, %v1236_v33 }
 0xe2d   :  { %v1395_v1 = vsel %vm169_vm1, %v1389_v61, 0.0 }
 0xe2e   :  { %1396 = vadd.xlane.f32.xlu1 %v1395_v1 }
 0xeb3   :  { %v1394_v60 = vpop.xlane.xlu0 %1393 }
 0xeb4   :  { %v1398_v62 = vmul.f32 0.03125, %v1394_v60 }
 0xeb6   :  { %v1400_v63 = vsub.f32 %v1388_v53, %v1398_v62 }
 0xeb7   :  { %v1397_v2 = vpop.xlane.xlu1 %1396 }
 0xeb8   :  { %v1399_v5 = vmul.f32 0.03125, %v1397_v2  ;;  %v1402_v6 = vmul.f32 %v1400_v63, %v1400_v63 }
 0xeba   :  { %v1401_v7 = vsub.f32 %v1389_v61, %v1399_v5  ;;  %v1404_v8 = vsel %vm169_vm1, %v1402_v6, 0.0 }
 0xebb   :  { %1405 = vadd.xlane.f32.xlu0 %v1404_v8 }
 0xebc   :  { %v1403_v9 = vmul.f32 %v1401_v7, %v1401_v7 }
 0xebe   :  { %v1407_v19 = vsel %vm169_vm1, %v1403_v9, 0.0 }
 0xebf   :  { %1408 = vadd.xlane.f32.xlu1 %v1407_v19 }
 0xf44   :  { %v1406_v12 = vpop.xlane.xlu0 %1405 }
 0xf45   :  { %v1410_v13 = vmul.f32 0.03125, %v1406_v12 }
 0xf47   :  { %v1412_v15 = vadd.f32 1e-05, %v1410_v13 }
 0xf48   :  { %v1409_v3 = vpop.xlane.xlu1 %1408 }
 0xf49   :  { %9224 = vrsqrt.f32 %v1412_v15  ;;  %v1411_v16 = vmul.f32 0.03125, %v1409_v3 }
 0xf4b   :  { %v1413_v17 = vadd.f32 1e-05, %v1411_v16 }
 0xf4d   :  { %9226 = vrsqrt.f32 %v1413_v17 }
 0xf56   :  { %v9225_v18 = vpop.eup %9224 }
 0xf57   :  { %v1416_v10 = vmul.f32 %v9225_v18, %v1400_v63 }
 0xf59   :  { %v1422_v56 = vmul.f32 %v7724_v4, %v1416_v10 }
 0xf5a   :  { %v9227_v52 = vpop.eup %9226 }
 0xf5b   :  { %v1417_v55 = vmul.f32 %v9227_v52, %v1401_v7  ;;  %v9797_v22 = vadd.f32 %v7725_v20, %v1422_v56 }
 0xf5d   :  { %v1423_v21 = vmul.f32 %v7724_v4, %v1417_v55 }
 0xf5f   :  { %v9799_v24 = vadd.f32 %v7725_v20, %v1423_v21 }
 0xf61   :  { %v1430_v25 = vpack.c.bf16 %v9799_v24, %v9797_v22 }
 0xf63   :  { %8358 = vmatmul.mubr.msk.bf16.vlgmr.msra.gmra.mxu0 %vm169_vm1, %v1430_v25 }
 0xf64   :  { %8363 = vmatprep.mubr.msk.bf16.mxu0 %vm9426_vm0, %v9424_v0 }
0x1023   :  { %v1490_v27 = vpop.f32.mrf.mxu0 }
0x1024   :  { %v1491_v28 = vadd.f32 %v7730_v26, %v1490_v27 }
0x1025   :  { %v8359_v29 = vpop.f32.mrf.mxu0 }
0x1026   :  { %v9807_v14 = vpack.c.bf16 %v1491_v28, %v1491_v28 }
0x1027   :  { %v1493_v30 = vpop.f32.mrf.mxu0 }
0x1028   :  { %v1494_v31 = vadd.f32 %v7730_v26, %v1493_v30  ;;  %1500 = vrot.lane.b32.xlu0 %v9807_v14, %s9428_s14 }
0x1029   :  { %v8360_v32 = vpop.f32.mrf.mxu0 }
0x102a   :  { %v9811_v33 = vpack.c.bf16 %v1494_v31, %v1494_v31 }
0x102c   :  { %1549 = vrot.lane.b32.xlu1 %v9811_v33, %s9428_s14 }
0x109a   :  { %v1501_v34 = vpop.permute.xlu0 %1500 }
0x109b   :  { %v1506_v35 = vsel %vm219_vm2, %v1501_v34, 0 }
0x109c   :  { %8362 = vmatpush3.bf16.xpose.msra.mxu0 %v1506_v35 }
0x109d   :  { %8373 = vmatprep.subr.bf16.mxu0 %v9424_v0 }
0x109e   :  { %v1550_v36 = vpop.permute.xlu1 %1549 }
0x109f   :  { %v1555_v37 = vsel %vm219_vm2, %v1550_v36, 0 }
0x10a0   :  { %8368 = vmatpush3.bf16.xpose.msra.mxu1 %v1555_v37 }
0x10a1   :  { %8379 = vmatprep.subr.bf16.mxu1 %v9424_v0 }
0x10a3   :  { %8364 = vmatmul.mubr.msk.bf16.vlgmr.msra.gmra.mxu0 %vm219_vm2, %v9807_v14 }
0x10a4   :  { %8375 = vmatprep.mubr.msk.bf16.mxu0 %vm9426_vm0, %v9424_v0 }
0x10a7   :  { %8370 = vmatmul.mubr.msk.bf16.vlgmr.msra.gmra.mxu1 %vm219_vm2, %v9811_v33 }
0x10a8   :  { %8381 = vmatprep.mubr.msk.bf16.mxu1 %vm9426_vm0, %v9424_v0 }
0x1163   :  { %v1542_v38 = vpop.f32.mrf.mxu0 }
0x1164   :  { %v1543_v40 = vadd.f32 %v9828_v39, %v1542_v38 }
0x1165   :  { %v8365_v41 = vpop.f32.mrf.mxu0 }
0x1166   :  { %v1597_v42 = vsel %vm219_vm2, %v1543_v40, -inf }
0x1167   :  { %v1591_v43 = vpop.f32.mrf.mxu1  ;;  %1598 = vmax.xlane.f32.xlu1 %v1597_v42  ;;  %v1545_v44 = vpop.f32.mrf.mxu0 }
0x1168   :  { %v1592_v46 = vadd.f32 %v9833_v45, %v1591_v43 }
0x1169   :  { %v8366_v47 = vpop.f32.mrf.mxu0  ;;  %v8371_v48 = vpop.f32.mrf.mxu1 }
0x116a   :  { %v1600_v49 = vsel %vm219_vm2, %v1592_v46, -inf }
0x116b   :  { %1601 = vmax.xlane.f32.xlu0 %v1600_v49  ;;  %v1594_v50 = vpop.f32.mrf.mxu1 }
0x116d   :  { %v8372_v51 = vpop.f32.mrf.mxu1 }
0x1178   :  { %1669 = vrot.lane.b32.xlu1 %v9811_v33, %s9430_s19 }
0x1181   :  { %1621 = vrot.lane.b32.xlu0 %v9807_v14, %s9430_s19 }
0x11f0   :  { %v1599_v53 = vpop.xlane.xlu1 %1598 }
0x11f1   :  { %v1603_v54 = vsub.f32 %v1543_v40, %v1599_v53 }
0x11f3   :  { %v1605_v57 = vmul.f32 1.442695, %v1603_v54 }
0x11f4   :  { %v1602_v58 = vpop.xlane.xlu0 %1601  ;;  %v1670_v59 = vpop.permute.xlu1 %1669 }
0x11f5   :  { %9228 = vpow2.f32 %v1605_v57  ;;  %v1604_v61 = vsub.f32 %v1592_v46, %v1602_v58  ;;  %v1675_v1 = vsel %vm344_vm3, %v1670_v59, 0 }
0x11f6   :  { %8380 = vmatpush3.bf16.msra.mxu1 %v1675_v1 }
0x11f7   :  { %v1607_v60 = vmul.f32 1.442695, %v1604_v61  ;;  %8391 = vmatprep.subr.bf16.mxu1 %v9424_v0 }
0x11f8   :  { %v1622_v62 = vpop.permute.xlu0 %1621 }
0x11f9   :  { %9230 = vpow2.f32 %v1607_v60  ;;  %v1627_v63 = vsel %vm344_vm3, %v1622_v62, 0 }
0x11fa   :  { %8374 = vmatpush3.bf16.msra.mxu0 %v1627_v63 }
0x11fb   :  { %8385 = vmatprep.subr.bf16.mxu0 %v9424_v0 }
0x1202   :  { %v9229_v2 = vpop.eup %9228 }
0x1203   :  { %v1609_v5 = vsel %vm219_vm2, %v9229_v2, 0.0 }
0x1204   :  { %1610 = vadd.xlane.f32.xlu0 %v1609_v5 }
0x1206   :  { %v9231_v6 = vpop.eup %9230 }
0x1207   :  { %v1612_v7 = vsel %vm219_vm2, %v9231_v6, 0.0 }
0x1208   :  { %1613 = vadd.xlane.f32.xlu1 %v1612_v7 }
0x1219   :  { %1719 = vrot.lane.b32.xlu1 %v9807_v14, %s9431_s20 }
0x121a   :  { %1769 = vrot.lane.b32.xlu0 %v9811_v33, %s9431_s20 }
0x121d   :  { %1717 = vrot.lane.b32.xlu1 %v9807_v14, %s9432_s21 }
0x121e   :  { %1767 = vrot.lane.b32.xlu0 %v9811_v33, %s9432_s21 }
0x128d   :  { %v1611_v8 = vpop.xlane.xlu0 %1610 }
0x128e   :  { %9232 = vrcp.f32 %v1611_v8 }
0x1291   :  { %v1614_v9 = vpop.xlane.xlu1 %1613  ;;  %v1770_v16 = vpop.permute.xlu0 %1769 }
0x1292   :  { %9234 = vrcp.f32 %v1614_v9  ;;  %v1775_v18 = vsel %vm219_vm2, %v1770_v16, 0 }
0x1295   :  { %v1720_v11 = vpop.permute.xlu1 %1719  ;;  %v1768_v4 = vpop.permute.xlu0 %1767 }
0x1296   :  { %v1725_v15 = vsel %vm219_vm2, %v1720_v11, 0 }
0x1299   :  { %v1718_v10 = vpop.permute.xlu1 %1717 }
0x129b   :  { %v9233_v19 = vpop.eup %9232 }
0x129c   :  { %v1616_v23 = vmul.f32 %v9233_v19, %v9229_v2 }
0x129e   :  { %v1619_v12 = vpack.c.bf16 %v1616_v23, %v1616_v23 }
0x129f   :  { %v9235_v13 = vpop.eup %9234 }
0x12a0   :  { %8376 = vmatmul.mubr.msk.bf16.vlgmr.msra.gmra.mxu0 %vm219_vm2, %v1619_v12  ;;  %v1618_v3 = vmul.f32 %v9235_v13, %v9231_v6 }
0x12a1   :  { %8386 = vmatpush3.bf16.xpose.msra.mxu0 %v1725_v15  ;;  %8387 = vmatprep.mubr.msk.bf16.mxu0 %vm9426_vm0, %v9424_v0 }
0x12a2   :  { %v1620_v17 = vpack.c.bf16 %v1618_v3, %v1618_v3  ;;  %8397 = vmatprep.subr.bf16.mxu0 %v9424_v0 }
0x12a4   :  { %8382 = vmatmul.mubr.msk.bf16.vlgmr.msra.gmra.mxu1 %vm219_vm2, %v1620_v17 }
0x12a5   :  { %8392 = vmatpush3.bf16.xpose.msra.mxu1 %v1775_v18  ;;  %8393 = vmatprep.mubr.msk.bf16.mxu1 %vm9426_vm0, %v9424_v0 }
0x12a6   :  { %8403 = vmatprep.subr.bf16.mxu1 %v9424_v0 }
0x12a8   :  { %8388 = vmatmul.mubr.msk.bf16.vlgmr.msra.gmra.mxu0 %vm219_vm2, %v1718_v10 }
0x12a9   :  { %8399 = vmatprep.mubr.msk.bf16.mxu0 %vm9426_vm0, %v9424_v0 }
0x12ac   :  { %8394 = vmatmul.mubr.msk.bf16.vlgmr.msra.gmra.mxu1 %vm219_vm2, %v1768_v4 }
0x12ad   :  { %8405 = vmatprep.mubr.msk.bf16.mxu1 %vm9426_vm0, %v9424_v0 }
0x1360   :  { %v9871_v52 = vpop.f32.mrf.mxu0 }
0x1362   :  { %v8377_v55 = vpop.f32.mrf.mxu0 }
0x1364   :  { %v1666_v56 = vpop.f32.mrf.mxu0  ;;  %v9873_v20 = vpop.f32.mrf.mxu1 }
0x1366   :  { %v8378_v21 = vpop.f32.mrf.mxu0  ;;  %v8383_v25 = vpop.f32.mrf.mxu1 }
0x1368   :  { %v1714_v26 = vpop.f32.mrf.mxu1  ;;  %v1761_v27 = vpop.f32.mrf.mxu0 }
0x1369   :  { %v1762_v28 = vadd.f32 %v9828_v39, %v1761_v27 }
0x136a   :  { %v8384_v29 = vpop.f32.mrf.mxu1  ;;  %v8389_v30 = vpop.f32.mrf.mxu0 }
0x136b   :  { %v1817_v31 = vsel %vm219_vm2, %v1762_v28, -inf }
0x136c   :  { %v1811_v32 = vpop.f32.mrf.mxu1  ;;  %1818 = vmax.xlane.f32.xlu1 %v1817_v31  ;;  %v1764_v34 = vpop.f32.mrf.mxu0 }
0x136d   :  { %v1812_v35 = vadd.f32 %v9833_v45, %v1811_v32 }
0x136e   :  { %v8390_v36 = vpop.f32.mrf.mxu0  ;;  %v8395_v37 = vpop.f32.mrf.mxu1 }
0x136f   :  { %v1820_v38 = vsel %vm219_vm2, %v1812_v35, -inf }
0x1370   :  { %1821 = vmax.xlane.f32.xlu0 %v1820_v38  ;;  %v1814_v40 = vpop.f32.mrf.mxu1 }
0x1372   :  { %v8396_v41 = vpop.f32.mrf.mxu1 }
0x137d   :  { %1889 = vrot.lane.b32.xlu1 %v9811_v33, %s9433_s22 }
0x1386   :  { %1841 = vrot.lane.b32.xlu0 %v9807_v14, %s9433_s22 }
0x13f5   :  { %v1819_v42 = vpop.xlane.xlu1 %1818 }
0x13f6   :  { %v1823_v43 = vsub.f32 %v1762_v28, %v1819_v42 }
0x13f8   :  { %v1825_v44 = vmul.f32 1.442695, %v1823_v43 }
0x13f9   :  { %v1822_v46 = vpop.xlane.xlu0 %1821  ;;  %v1890_v47 = vpop.permute.xlu1 %1889 }
0x13fa   :  { %9236 = vpow2.f32 %v1825_v44  ;;  %v1824_v48 = vsub.f32 %v1812_v35, %v1822_v46  ;;  %v1895_v49 = vsel %vm344_vm3, %v1890_v47, 0 }
0x13fb   :  { %8404 = vmatpush3.bf16.msra.mxu1 %v1895_v49 }
0x13fc   :  { %v1827_v50 = vmul.f32 1.442695, %v1824_v48  ;;  %8415 = vmatprep.subr.bf16.mxu1 %v9424_v0 }
0x13fd   :  { %v1842_v51 = vpop.permute.xlu0 %1841 }
0x13fe   :  { %9238 = vpow2.f32 %v1827_v50  ;;  %v1847_v53 = vsel %vm344_vm3, %v1842_v51, 0 }
0x13ff   :  { %8398 = vmatpush3.bf16.msra.mxu0 %v1847_v53 }
0x1400   :  { %8409 = vmatprep.subr.bf16.mxu0 %v9424_v0 }
0x1407   :  { %v9237_v54 = vpop.eup %9236 }
0x1408   :  { %v1829_v57 = vsel %vm219_vm2, %v9237_v54, 0.0 }
0x1409   :  { %1830 = vadd.xlane.f32.xlu0 %v1829_v57 }
0x140b   :  { %v9239_v58 = vpop.eup %9238 }
0x140c   :  { %v1832_v59 = vsel %vm219_vm2, %v9239_v58, 0.0 }
0x140d   :  { %1833 = vadd.xlane.f32.xlu1 %v1832_v59 }
0x141e   :  { %1939 = vrot.lane.b32.xlu1 %v9807_v14, %s9434_s23 }
0x141f   :  { %1989 = vrot.lane.b32.xlu0 %v9811_v33, %s9434_s23 }
0x1422   :  { %1937 = vrot.lane.b32.xlu1 %v9807_v14, %s9435_s24 }
0x1423   :  { %1987 = vrot.lane.b32.xlu0 %v9811_v33, %s9435_s24 }
0x1492   :  { %v1831_v61 = vpop.xlane.xlu0 %1830 }
0x1493   :  { %9240 = vrcp.f32 %v1831_v61 }
0x1496   :  { %v1834_v1 = vpop.xlane.xlu1 %1833  ;;  %v1990_v8 = vpop.permute.xlu0 %1989 }
0x1497   :  { %9242 = vrcp.f32 %v1834_v1  ;;  %v1995_v19 = vsel %vm219_vm2, %v1990_v8, 0 }
0x149a   :  { %v1940_v63 = vpop.permute.xlu1 %1939  ;;  %v1988_v11 = vpop.permute.xlu0 %1987 }
0x149b   :  { %v1945_v6 = vsel %vm219_vm2, %v1940_v63, 0 }
0x149e   :  { %v1938_v23 = vpop.permute.xlu1 %1937 }
0x14a0   :  { %v9241_v60 = vpop.eup %9240 }
0x14a1   :  { %v1836_v62 = vmul.f32 %v9241_v60, %v9237_v54 }
0x14a3   :  { %v1839_v2 = vpack.c.bf16 %v1836_v62, %v1836_v62 }
0x14a4   :  { %v9243_v5 = vpop.eup %9242 }
0x14a5   :  { %8400 = vmatmul.mubr.msk.bf16.vlgmr.msra.gmra.mxu0 %vm219_vm2, %v1839_v2  ;;  %v1838_v7 = vmul.f32 %v9243_v5, %v9239_v58 }
0x14a6   :  { %8410 = vmatpush3.bf16.xpose.msra.mxu0 %v1945_v6  ;;  %8411 = vmatprep.mubr.msk.bf16.mxu0 %vm9426_vm0, %v9424_v0 }
0x14a7   :  { %v1840_v9 = vpack.c.bf16 %v1838_v7, %v1838_v7  ;;  %8421 = vmatprep.subr.bf16.mxu0 %v9424_v0 }
0x14a9   :  { %8406 = vmatmul.mubr.msk.bf16.vlgmr.msra.gmra.mxu1 %vm219_vm2, %v1840_v9 }
0x14aa   :  { %8416 = vmatpush3.bf16.xpose.msra.mxu1 %v1995_v19  ;;  %8417 = vmatprep.mubr.msk.bf16.mxu1 %vm9426_vm0, %v9424_v0 }
0x14ab   :  { %8427 = vmatprep.subr.bf16.mxu1 %v9424_v0 }
0x14ad   :  { %8412 = vmatmul.mubr.msk.bf16.vlgmr.msra.gmra.mxu0 %vm219_vm2, %v1938_v23 }
0x14ae   :  { %8423 = vmatprep.mubr.msk.bf16.mxu0 %vm9426_vm0, %v9424_v0 }
0x14b1   :  { %8418 = vmatmul.mubr.msk.bf16.vlgmr.msra.gmra.mxu1 %vm219_vm2, %v1988_v11 }
0x14b2   :  { %8429 = vmatprep.mubr.msk.bf16.mxu1 %vm9426_vm0, %v9424_v0 }
0x1565   :  { %v9913_v12 = vpop.f32.mrf.mxu0 }
0x1567   :  { %v8401_v13 = vpop.f32.mrf.mxu0 }
0x1569   :  { %v1886_v15 = vpop.f32.mrf.mxu0  ;;  %v9915_v3 = vpop.f32.mrf.mxu1 }
0x156a   :  { %v9059_v16 = vpack.i.bf16 %v9915_v3, %v9913_v12 }
0x156b   :  { %v8402_v17 = vpop.f32.mrf.mxu0  ;;  %v8407_v18 = vpop.f32.mrf.mxu1 }
0x156d   :  { %v1934_v10 = vpop.f32.mrf.mxu1  ;;  %v1981_v4 = vpop.f32.mrf.mxu0 }
0x156e   :  { %v1982_v55 = vadd.f32 %v9828_v39, %v1981_v4 }
0x156f   :  { %v8408_v56 = vpop.f32.mrf.mxu1  ;;  %v8413_v21 = vpop.f32.mrf.mxu0 }
0x1570   :  { %v2037_v25 = vsel %vm219_vm2, %v1982_v55, -inf }
0x1571   :  { %v2031_v26 = vpop.f32.mrf.mxu1  ;;  %2038 = vmax.xlane.f32.xlu1 %v2037_v25  ;;  %v1984_v27 = vpop.f32.mrf.mxu0 }
0x1572   :  { %v2032_v28 = vadd.f32 %v9833_v45, %v2031_v26 }
0x1573   :  { %v8414_v29 = vpop.f32.mrf.mxu0  ;;  %v8419_v30 = vpop.f32.mrf.mxu1 }
0x1574   :  { %v2040_v31 = vsel %vm219_vm2, %v2032_v28, -inf }
0x1575   :  { %2041 = vmax.xlane.f32.xlu0 %v2040_v31  ;;  %v2034_v32 = vpop.f32.mrf.mxu1 }
0x1577   :  { %v8420_v34 = vpop.f32.mrf.mxu1 }
0x1582   :  { %2109 = vrot.lane.b32.xlu1 %v9811_v33, %s9436_s25 }
0x158b   :  { %2061 = vrot.lane.b32.xlu0 %v9807_v14, %s9436_s25 }
0x15fa   :  { %v2039_v35 = vpop.xlane.xlu1 %2038 }
0x15fb   :  { %v2043_v36 = vsub.f32 %v1982_v55, %v2039_v35 }
0x15fd   :  { %v2045_v37 = vmul.f32 1.442695, %v2043_v36 }
0x15fe   :  { %v2042_v38 = vpop.xlane.xlu0 %2041  ;;  %v2110_v40 = vpop.permute.xlu1 %2109 }
0x15ff   :  { %9244 = vpow2.f32 %v2045_v37  ;;  %v2044_v41 = vsub.f32 %v2032_v28, %v2042_v38  ;;  %v2115_v42 = vsel %vm344_vm3, %v2110_v40, 0 }
0x1600   :  { %8428 = vmatpush3.bf16.msra.mxu1 %v2115_v42 }
0x1601   :  { %v2047_v43 = vmul.f32 1.442695, %v2044_v41  ;;  %8439 = vmatprep.subr.bf16.mxu1 %v9424_v0 }
0x1602   :  { %v2062_v44 = vpop.permute.xlu0 %2061 }
0x1603   :  { %9246 = vpow2.f32 %v2047_v43  ;;  %v2067_v46 = vsel %vm344_vm3, %v2062_v44, 0 }
0x1604   :  { %8422 = vmatpush3.bf16.msra.mxu0 %v2067_v46 }
0x1605   :  { %8433 = vmatprep.subr.bf16.mxu0 %v9424_v0 }
0x160c   :  { %v9245_v47 = vpop.eup %9244 }
0x160d   :  { %v2049_v48 = vsel %vm219_vm2, %v9245_v47, 0.0 }
0x160e   :  { %2050 = vadd.xlane.f32.xlu0 %v2049_v48 }
0x1610   :  { %v9247_v49 = vpop.eup %9246 }
0x1611   :  { %v2052_v50 = vsel %vm219_vm2, %v9247_v49, 0.0 }
0x1612   :  { %2053 = vadd.xlane.f32.xlu1 %v2052_v50  ;;  %v9147_v50 = vld [vmem:[%s9710_s17 + $0x10] sm:$0xff]  }
0x1623   :  { %2159 = vrot.lane.b32.xlu1 %v9807_v14, %s9437_s26 }
0x1624   :  { %2209 = vrot.lane.b32.xlu0 %v9811_v33, %s9437_s26 }
0x1627   :  { %2157 = vrot.lane.b32.xlu1 %v9807_v14, %s9438_s27 }
0x1628   :  { %2207 = vrot.lane.b32.xlu0 %v9811_v33, %s9438_s27 }
0x1697   :  { %v2051_v51 = vpop.xlane.xlu0 %2050 }
0x1698   :  { %9248 = vrcp.f32 %v2051_v51 }
0x169b   :  { %v2054_v53 = vpop.xlane.xlu1 %2053  ;;  %v2210_v62 = vpop.permute.xlu0 %2209 }
0x169c   :  { %9250 = vrcp.f32 %v2054_v53  ;;  %v2215_v2 = vsel %vm219_vm2, %v2210_v62, 0 }
0x169f   :  { %v2160_v58 = vpop.permute.xlu1 %2159  ;;  %v2208_v6 = vpop.permute.xlu0 %2207 }
0x16a0   :  { %v2165_v1 = vsel %vm219_vm2, %v2160_v58, 0 }
0x16a3   :  { %v2158_v5 = vpop.permute.xlu1 %2157 }
0x16a5   :  { %v9249_v54 = vpop.eup %9248 }
0x16a6   :  { %v2056_v57 = vmul.f32 %v9249_v54, %v9245_v47 }
0x16a8   :  { %v2059_v59 = vpack.c.bf16 %v2056_v57, %v2056_v57 }
0x16a9   :  { %v9251_v61 = vpop.eup %9250 }
0x16aa   :  { %8424 = vmatmul.mubr.msk.bf16.vlgmr.msra.gmra.mxu0 %vm219_vm2, %v2059_v59  ;;  %v2058_v60 = vmul.f32 %v9251_v61, %v9247_v49  ;;  %v9146_v49 = vld [vmem:[%s9710_s17 + $0x18] sm:$0xff]   ;;  %s7673_s17 = sld [smem:[%s11026_s0 + %s9450_s13]]  }
0x16ab   :  { %8434 = vmatpush3.bf16.xpose.msra.mxu0 %v2165_v1  ;;  %8435 = vmatprep.mubr.msk.bf16.mxu0 %vm9426_vm0, %v9424_v0 }
0x16ac   :  { %v2060_v63 = vpack.c.bf16 %v2058_v60, %v2058_v60  ;;  %8445 = vmatprep.subr.bf16.mxu0 %v9424_v0 }
0x16ae   :  { %8430 = vmatmul.mubr.msk.bf16.vlgmr.msra.gmra.mxu1 %vm219_vm2, %v2060_v63 }
0x16af   :  { %8440 = vmatpush3.bf16.xpose.msra.mxu1 %v2215_v2  ;;  %8441 = vmatprep.mubr.msk.bf16.mxu1 %vm9426_vm0, %v9424_v0 }
0x16b0   :  { %8451 = vmatprep.subr.bf16.mxu1 %v9424_v0 }
0x16b2   :  { %8436 = vmatmul.mubr.msk.bf16.vlgmr.msra.gmra.mxu0 %vm219_vm2, %v2158_v5 }
0x16b3   :  { %8447 = vmatprep.mubr.msk.bf16.mxu0 %vm9426_vm0, %v9424_v0 }
0x16b6   :  { %8442 = vmatmul.mubr.msk.bf16.vlgmr.msra.gmra.mxu1 %vm219_vm2, %v2208_v6 }
0x16b7   :  { %8453 = vmatprep.mubr.msk.bf16.mxu1 %vm9426_vm0, %v9424_v0 }
0x176a   :  { %v2103_v7 = vpop.f32.mrf.mxu0 }
0x176c   :  { %v8425_v8 = vpop.f32.mrf.mxu0 }
0x176e   :  { %v2106_v9 = vpop.f32.mrf.mxu0  ;;  %v2151_v19 = vpop.f32.mrf.mxu1 }
0x176f   :  { %v9064_v23 = vpack.i.bf16 %v2151_v19, %v2103_v7 }
0x1770   :  { %v8426_v11 = vpop.f32.mrf.mxu0  ;;  %v8431_v13 = vpop.f32.mrf.mxu1 }
0x1772   :  { %v2154_v15 = vpop.f32.mrf.mxu1  ;;  %v2201_v17 = vpop.f32.mrf.mxu0 }
0x1773   :  { %v2202_v18 = vadd.f32 %v9828_v39, %v2201_v17 }
0x1774   :  { %v8432_v10 = vpop.f32.mrf.mxu1  ;;  %v8437_v4 = vpop.f32.mrf.mxu0 }
0x1775   :  { %v2257_v55 = vsel %vm219_vm2, %v2202_v18, -inf }
0x1776   :  { %v2251_v56 = vpop.f32.mrf.mxu1  ;;  %2258 = vmax.xlane.f32.xlu1 %v2257_v55  ;;  %v2204_v21 = vpop.f32.mrf.mxu0 }
0x1777   :  { %v2252_v25 = vadd.f32 %v9833_v45, %v2251_v56 }
0x1778   :  { %v8438_v26 = vpop.f32.mrf.mxu0  ;;  %v8443_v27 = vpop.f32.mrf.mxu1 }
0x1779   :  { %v2260_v28 = vsel %vm219_vm2, %v2252_v25, -inf }
0x177a   :  { %2261 = vmax.xlane.f32.xlu0 %v2260_v28  ;;  %v2254_v29 = vpop.f32.mrf.mxu1 }
0x177c   :  { %v8444_v30 = vpop.f32.mrf.mxu1 }
0x17ff   :  { %v2259_v31 = vpop.xlane.xlu1 %2258 }
0x1800   :  { %v2263_v32 = vsub.f32 %v2202_v18, %v2259_v31 }
0x1802   :  { %v2265_v34 = vmul.f32 1.442695, %v2263_v32 }
0x1803   :  { %v2262_v39 = vpop.xlane.xlu0 %2261 }
0x1804   :  { %9252 = vpow2.f32 %v2265_v34  ;;  %v2264_v35 = vsub.f32 %v2252_v25, %v2262_v39 }
0x1806   :  { %v2267_v36 = vmul.f32 1.442695, %v2264_v35 }
0x1808   :  { %9254 = vpow2.f32 %v2267_v36 }
0x1811   :  { %v9253_v37 = vpop.eup %9252 }
0x1812   :  { %v2269_v38 = vsel %vm219_vm2, %v9253_v37, 0.0 }
0x1813   :  { %2270 = vadd.xlane.f32.xlu0 %v2269_v38 }
0x1815   :  { %v9255_v45 = vpop.eup %9254 }
0x1816   :  { %v2272_v40 = vsel %vm219_vm2, %v9255_v45, 0.0 }
0x1817   :  { %2273 = vadd.xlane.f32.xlu1 %v2272_v40  ;;  %v9150_v40 = vld [vmem:[%s9747_s15 + $0x38] sm:$0xff]  }
0x1828   :  { %2329 = vrot.lane.b32.xlu1 %v9811_v33, %s9441_s7 }
0x1829   :  { %2281 = vrot.lane.b32.xlu0 %v9807_v14, %s9441_s7 }
0x182c   :  { %9060 = vrot.lane.b32.xlu1 %v9059_v16, %s11031_s28 }
0x182d   :  { %9065 = vrot.lane.b32.xlu0 %v9064_v23, %s11029_s2 }
0x189c   :  { %v2271_v41 = vpop.xlane.xlu0 %2270 }
0x189d   :  { %9256 = vrcp.f32 %v2271_v41 }
0x18a0   :  { %v2282_v42 = vpop.permute.xlu0 %2281  ;;  %v2274_v43 = vpop.xlane.xlu1 %2273 }
0x18a1   :  { %v2287_v44 = vsel %vm344_vm3, %v2282_v42, 0  ;;  %9258 = vrcp.f32 %v2274_v43 }
0x18a2   :  { %8446 = vmatpush3.bf16.msra.mxu0 %v2287_v44 }
0x18a3   :  { %8457 = vmatprep.subr.bf16.mxu0 %v9424_v0 }
0x18a4   :  { %v2330_v33 = vpop.permute.xlu1 %2329  ;;  %v9066_v5 = vpop.permute.xlu0 %9065 }
0x18a5   :  { %v2335_v14 = vsel %vm344_vm3, %v2330_v33, 0  ;;  %v9068_v8 = vunpack.i.h.bf16 %v9066_v5  ;;  %v9067_v9 = vunpack.i.l.bf16 %v9066_v5 }
0x18a6   :  { %8452 = vmatpush3.bf16.msra.mxu1 %v2335_v14 }
0x18a7   :  { %8465 = vmatprep.subr.bf16.mxu1 %v9424_v0 }
0x18a8   :  { %v9061_v62 = vpop.permute.xlu1 %9060 }
0x18a9   :  { %v9063_v63 = vunpack.i.h.bf16 %v9061_v62  ;;  %v9062_v2 = vunpack.i.l.bf16 %v9061_v62 }
0x18aa   :  { %v9257_v12 = vpop.eup %9256 }
0x18ab   :  { %v2276_v3 = vmul.f32 %v9257_v12, %v9253_v37  ;;  %v2402_v6 = vsel %vm219_vm2, %v9873_v20, %v9063_v63  ;;  %v2401_v7 = vsel %vm219_vm2, %v9871_v52, %v9062_v2  ;;  %v7754_v52 = vld [vmem:[%s9731_s4 + $0x1] ss:$0 sm:$0xff]  ;;  %s9451_s4 = smov 14  }
0x18ac   :  { %v2403_v13 = vsel %vm1122_vm4, %v2401_v7, %v9067_v9  ;;  %v2404_v15 = vsel %vm1122_vm4, %v2402_v6, %v9068_v8  ;;  %v7776_v9 = vld [vmem:[%s9784_s29 + $0x1] ss:$0 sm:$0xff]  ;;  %s7654_s29 = sld [smem:[%s11026_s0 + %s9452_s10]]  }
0x18ad   :  { %v2279_v16 = vpack.c.bf16 %v2276_v3, %v2276_v3 }
0x18ae   :  { %v9259_v46 = vpop.eup %9258 }
0x18af   :  { %8448 = vmatmul.mubr.msk.bf16.vlgmr.msra.gmra.mxu0 %vm219_vm2, %v2279_v16  ;;  %v2278_v47 = vmul.f32 %v9259_v46, %v9255_v45  ;;  %v9149_v45 = vld [vmem:[%s9668_s1 + $0x10] sm:$0xff]   ;;  %v7758_v16 = vld [vmem:[%s9754_s3 + $0x2] ss:$0 sm:$0xff] }
0x18b0   :  { %8461 = vmatprep.mubr.msk.bf16.mxu0 %vm9426_vm0, %v9424_v0  ;;  %8458 = vmatpush3.bf16.msra.mxu0 %v9146_v49  ;;  %v7759_v49 = vld [vmem:[%s9759_s8 + $0x2] ss:$0 sm:$0xff] }
0x18b1   :  { %v2280_v48 = vpack.c.bf16 %v2278_v47, %v2278_v47  ;;  %8459 = vmatprep.subr.bf16.mxu0 %v9424_v0 }
0x18b3   :  { %8454 = vmatmul.mubr.msk.bf16.vlgmr.msra.gmra.mxu1 %vm219_vm2, %v2280_v48 }
0x18b4   :  { %8469 = vmatprep.mubr.msk.bf16.mxu1 %vm9426_vm0, %v9424_v0  ;;  %8460 = vmatpush3.bf16.msra.mxu0 %v9147_v50 }
0x18b5   :  { %8473 = vmatprep.subr.bf16.mxu0 %v9424_v0 }
0x196f   :  { %v2323_v51 = vpop.f32.mrf.mxu0 }
0x1971   :  { %v8449_v53 = vpop.f32.mrf.mxu0 }
0x1973   :  { %v2326_v54 = vpop.f32.mrf.mxu0  ;;  %v2371_v57 = vpop.f32.mrf.mxu1 }
0x1974   :  { %v9069_v58 = vpack.i.bf16 %v2371_v57, %v2323_v51  ;;  %v9151_v57 = vld [vmem:[%s9747_s15 + $0x30] sm:$0xff]  }
0x1975   :  { %v8450_v59 = vpop.f32.mrf.mxu0  ;;  %v8455_v61 = vpop.f32.mrf.mxu1 }
0x1976   :  { %9070 = vrot.lane.b32.xlu1 %v9069_v58, %s11033_s6  ;;  %v9152_v58 = vld [vmem:[%s9747_s15 + $0x28] sm:$0xff]   ;;  %v9153_v59 = vld [vmem:[%s9747_s15 + $0x20] sm:$0xff]  }
0x1977   :  { %v2374_v1 = vpop.f32.mrf.mxu1  ;;  %v7764_v61 = vld [vmem:[%s9775_s9 + $0x1] ss:$0 sm:$0xff]  ;;  %s10037_s9 = sld [smem:[%s11026_s0 + %s9451_s4]]  }
0x1979   :  { %v8456_v60 = vpop.f32.mrf.mxu1 }
0x19e8   :  { %v9071_v19 = vpop.permute.xlu1 %9070 }
0x19e9   :  { %v9073_v23 = vunpack.i.h.bf16 %v9071_v19  ;;  %v9072_v11 = vunpack.i.l.bf16 %v9071_v19 }
0x19eb   :  { %v2406_v17 = vsel %vm1125_vm5, %v2404_v15, %v9073_v23  ;;  %v2405_v18 = vsel %vm1125_vm5, %v2403_v13, %v9072_v11 }
0x19ec   :  { %v2407_v10 = vpack.c.bf16 %v2406_v17, %v2405_v18 }
0x19ee   :  { %8462 = vmatmul.mubr.msk.bf16.vlgmr.msra.gmra.mxu0 %vm169_vm1, %v2407_v10 }
0x19ef   :  { %8481 = vmatprep.mubr.msk.bf16.mxu0 %vm9426_vm0, %v9424_v0  ;;  %8474 = vmatpush3.bf16.msra.mxu0 %v9150_v40 }
0x19f0   :  { %8475 = vmatprep.subr.bf16.mxu0 %v9424_v0 }
0x19f3   :  { %8476 = vmatpush3.bf16.msra.mxu0 %v9151_v57 }
0x19f4   :  { %8477 = vmatprep.subr.bf16.mxu0 %v9424_v0 }
0x19f7   :  { %8478 = vmatpush3.bf16.msra.mxu0 %v9152_v58 }
0x19f8   :  { %8479 = vmatprep.subr.bf16.mxu0 %v9424_v0 }
0x19fb   :  { %8480 = vmatpush3.bf16.msra.mxu0 %v9153_v59 }
0x19fc   :  { %8501 = vmatprep.subr.bf16.mxu0 %v9424_v0 }
0x1aae   :  { %v2467_v20 = vpop.f32.mrf.mxu0 }
0x1aaf   :  { %v2468_v4 = vadd.f32 %v7754_v52, %v2467_v20 }
0x1ab0   :  { %v8463_v55 = vpop.f32.mrf.mxu0 }
0x1ab1   :  { %v2474_v56 = vadd.f32 %v2468_v4, %v9797_v22 }
0x1ab2   :  { %v2470_v21 = vpop.f32.mrf.mxu0 }
0x1ab3   :  { %v2471_v25 = vadd.f32 %v7754_v52, %v2470_v21  ;;  %v2478_v26 = vsel %vm169_vm1, %v2474_v56, 0.0 }
0x1ab4   :  { %2479 = vadd.xlane.f32.xlu0 %v2478_v26  ;;  %v8464_v27 = vpop.f32.mrf.mxu0 }
0x1ab5   :  { %v2475_v28 = vadd.f32 %v2471_v25, %v9799_v24  ;;  %v9148_v24 = vld [vmem:[%s9668_s1 + $0x18] sm:$0xff]   ;;  %s9454_s1 = smov 15  }
0x1ab6   :  { %8466 = vmatpush3.bf16.msra.mxu1 %v9148_v24  ;;  %s10068_s15 = sld [smem:[%s11026_s0 + %s9454_s1]]  }
0x1ab7   :  { %v2481_v29 = vsel %vm169_vm1, %v2475_v28, 0.0  ;;  %8467 = vmatprep.subr.bf16.mxu1 %v9424_v0 }
0x1ab8   :  { %2482 = vadd.xlane.f32.xlu1 %v2481_v29 }
0x1aba   :  { %8468 = vmatpush3.bf16.msra.mxu1 %v9149_v45  ;;  %v7782_v45 = vld [vmem:[%s9754_s3 + $0x3] ss:$0 sm:$0xff] }
0x1abb   :  { %8485 = vmatprep.subr.bf16.mxu1 %v9424_v0 }
0x1abc   :  { %v7788_v58 = vld [vmem:[%s10068_s15] ss:$0 sm:$0xff] }
0x1b3d   :  { %v2480_v30 = vpop.xlane.xlu0 %2479 }
0x1b3e   :  { %v2484_v31 = vmul.f32 0.03125, %v2480_v30 }
0x1b40   :  { %v2486_v32 = vsub.f32 %v2474_v56, %v2484_v31  ;;  %v9154_v31 = vld [vmem:[%s7673_s17 + $0x8] sm:$0xff]  }
0x1b41   :  { %v2483_v34 = vpop.xlane.xlu1 %2482 }
0x1b42   :  { %v2485_v39 = vmul.f32 0.03125, %v2483_v34  ;;  %v2488_v22 = vmul.f32 %v2486_v32, %v2486_v32 }
0x1b44   :  { %v2487_v35 = vsub.f32 %v2475_v28, %v2485_v39  ;;  %v2490_v36 = vsel %vm169_vm1, %v2488_v22, 0.0 }
0x1b45   :  { %2491 = vadd.xlane.f32.xlu0 %v2490_v36 }
0x1b46   :  { %v2489_v37 = vmul.f32 %v2487_v35, %v2487_v35 }
0x1b48   :  { %v2493_v38 = vsel %vm169_vm1, %v2489_v37, 0.0 }
0x1b49   :  { %2494 = vadd.xlane.f32.xlu0 %v2493_v38 }
0x1bce   :  { %v2492_v41 = vpop.xlane.xlu0 %2491 }
0x1bcf   :  { %v2496_v42 = vmul.f32 0.03125, %v2492_v41 }
0x1bd1   :  { %v2498_v43 = vadd.f32 1e-05, %v2496_v42 }
0x1bd2   :  { %v2495_v44 = vpop.xlane.xlu0 %2494 }
0x1bd3   :  { %9260 = vrsqrt.f32 %v2498_v43  ;;  %v2497_v33 = vmul.f32 0.03125, %v2495_v44  ;;  %v7783_v43 = vld [vmem:[%s9759_s8 + $0x3] ss:$0 sm:$0xff]  ;;  %s9453_s8 = smov 21  }
0x1bd4   :  { %s7674_s18 = sld [smem:[%s11026_s0 + %s9453_s8]]   ;;  %s9459_s8 = smov 29  }
0x1bd5   :  { %v2499_v14 = vadd.f32 1e-05, %v2497_v33  ;;  %s10310_s1 = sld [smem:[%s11026_s0 + %s9459_s8]]   ;;  %s9461_s8 = smov 22  }
0x1bd7   :  { %9262 = vrsqrt.f32 %v2499_v14 }
0x1be0   :  { %v9261_v12 = vpop.eup %9260 }
0x1be1   :  { %v2502_v3 = vmul.f32 %v9261_v12, %v2486_v32  ;;  %v9155_v32 = vld [vmem:[%s7673_s17] sm:$0xff]   ;;  %v9156_v12 = vld [vmem:[%s10037_s9 + $0x8] sm:$0xff]   ;;  %s9460_s17 = smov 19  }
0x1be2   :  { %s10333_s12 = sld [smem:[%s11026_s0 + %s9460_s17]]  }
0x1be3   :  { %v2508_v48 = vmul.f32 %v7758_v16, %v2502_v3  ;;  %s10492_s17 = sld [smem:[%s11026_s0 + %s9461_s8]]  }
0x1be4   :  { %v9263_v46 = vpop.eup %9262 }
0x1be5   :  { %v2503_v47 = vmul.f32 %v9263_v46, %v2487_v35  ;;  %v2514_v51 = vadd.f32 %v7759_v49, %v2508_v48  ;;  %v10051_v46 = vld [vmem:[%s7654_s29] sm:$0xff] }
0x1be7   :  { %v2509_v50 = vmul.f32 %v7758_v16, %v2503_v47  ;;  %v9157_v16 = vld [vmem:[%s10037_s9] sm:$0xff]   ;;  %v10053_v47 = vld [vmem:[%s7654_s29 + $0x8] sm:$0xff]  ;;  %s9456_s29 = smov 17  }
0x1be8   :  { %v2782_v48 = vpack.c.bf16 %v10053_v47, %v10051_v46  ;;  %s10284_s13 = sld [smem:[%s11026_s0 + %s9456_s29]]  }
0x1be9   :  { %v2515_v53 = vadd.f32 %v7759_v49, %v2509_v50  ;;  %s10305_s29 = sld [smem:[%s11026_s0 + %s9458_s30]]   ;;  %s9462_s30 = smov 23  }
0x1bea   :  { %s10513_s3 = sld [smem:[%s11026_s0 + %s9462_s30]]  }
0x1beb   :  { %v2516_v54 = vpack.c.bf16 %v2515_v53, %v2514_v51 }
0x1bed   :  { %8470 = vmatmul.mubr.msk.bf16.vlgmr.msra.gmra.mxu1 %vm169_vm1, %v2516_v54 }
0x1bee   :  { %8489 = vmatprep.mubr.msk.bf16.mxu1 %vm9426_vm0, %v9424_v0  ;;  %8486 = vmatpush3.bf16.msra.mxu1 %v9154_v31 }
0x1bef   :  { %8487 = vmatprep.subr.bf16.mxu1 %v9424_v0 }
0x1bf2   :  { %8488 = vmatpush3.bf16.msra.mxu1 %v9155_v32 }
0x1bf3   :  { %8493 = vmatprep.subr.bf16.mxu1 %v9424_v0 }
0x1cad   :  { %v2576_v1 = vpop.f32.mrf.mxu1 }
0x1cae   :  { %v2577_v62 = vadd.f32 %v7764_v61, %v2576_v1 }
0x1caf   :  { %v8471_v60 = vpop.f32.mrf.mxu1 }
0x1cb0   :  { %v2583_v6 = vmax.f32 %v2577_v62, 0.0 }
0x1cb1   :  { %v2579_v63 = vpop.f32.mrf.mxu1 }
0x1cb2   :  { %v2580_v2 = vadd.f32 %v7764_v61, %v2579_v63 }
0x1cb3   :  { %v8472_v5 = vpop.f32.mrf.mxu1 }
0x1cb4   :  { %v2584_v7 = vmax.f32 %v2580_v2, 0.0 }
0x1cb6   :  { %v2585_v8 = vpack.c.bf16 %v2584_v7, %v2583_v6 }
0x1cb8   :  { %8482 = vmatmul.mubr.msk.bf16.vlgmr.msra.gmra.mxu0 %vm1343_vm6, %v2585_v8 }
0x1cb9   :  { %8503 = vmatprep.mubr.msk.bf16.mxu0 %vm9426_vm0, %v9424_v0 }
0x1d78   :  { %v2661_v19 = vpop.f32.mrf.mxu0 }
0x1d79   :  { %v2662_v23 = vadd.f32 %v7776_v9, %v2661_v19  ;;  %v10104_v19 = vld [vmem:[%s10101_s16] sm:$0xff] }
0x1d7a   :  { %v8483_v11 = vpop.f32.mrf.mxu0 }
0x1d7b   :  { %v2668_v13 = vadd.f32 %v2662_v23, %v2514_v51  ;;  %v10072_v51 = vld [vmem:[%s7674_s18] ss:$0 sm:$0xff]  ;;  %s9457_s18 = smov 18  }
0x1d7c   :  { %v2664_v15 = vpop.f32.mrf.mxu0  ;;  %s10296_s4 = sld [smem:[%s11026_s0 + %s9457_s18]]   ;;  %s9463_s18 = smov 26  }
0x1d7d   :  { %v2665_v17 = vadd.f32 %v7776_v9, %v2664_v15  ;;  %v2672_v18 = vsel %vm169_vm1, %v2668_v13, 0.0  ;;  %v10108_v15 = vld [vmem:[%s10101_s16 + $0x8] sm:$0xff]  ;;  %s10529_s8 = sld [smem:[%s11026_s0 + %s9463_s18]]   ;;  %s9464_s18 = smov 25  }
0x1d7e   :  { %2673 = vadd.xlane.f32.xlu1 %v2672_v18  ;;  %v8484_v10 = vpop.f32.mrf.mxu0 }
0x1d7f   :  { %v2669_v52 = vadd.f32 %v2665_v17, %v2515_v53 }
0x1d81   :  { %v2675_v20 = vsel %vm169_vm1, %v2669_v52, 0.0 }
0x1d82   :  { %2676 = vadd.xlane.f32.xlu0 %v2675_v20 }
0x1e07   :  { %v2674_v4 = vpop.xlane.xlu1 %2673 }
0x1e08   :  { %v2678_v55 = vmul.f32 0.03125, %v2674_v4 }
0x1e0a   :  { %v2680_v56 = vsub.f32 %v2668_v13, %v2678_v55 }
0x1e0b   :  { %v2677_v21 = vpop.xlane.xlu0 %2676 }
0x1e0c   :  { %v2679_v25 = vmul.f32 0.03125, %v2677_v21  ;;  %v2682_v26 = vmul.f32 %v2680_v56, %v2680_v56 }
0x1e0e   :  { %v2681_v27 = vsub.f32 %v2669_v52, %v2679_v25  ;;  %v2684_v28 = vsel %vm169_vm1, %v2682_v26, 0.0 }
0x1e0f   :  { %2685 = vadd.xlane.f32.xlu1 %v2684_v28 }
0x1e10   :  { %v2683_v29 = vmul.f32 %v2681_v27, %v2681_v27 }
0x1e12   :  { %v2687_v30 = vsel %vm169_vm1, %v2683_v29, 0.0 }
0x1e13   :  { %2688 = vadd.xlane.f32.xlu0 %v2687_v30 }
0x1e98   :  { %v2686_v34 = vpop.xlane.xlu1 %2685 }
0x1e99   :  { %v2690_v39 = vmul.f32 0.03125, %v2686_v34 }
0x1e9b   :  { %v2692_v22 = vadd.f32 1e-05, %v2690_v39 }
0x1e9c   :  { %v2689_v35 = vpop.xlane.xlu0 %2688 }
0x1e9d   :  { %9264 = vrsqrt.f32 %v2692_v22  ;;  %v2691_v36 = vmul.f32 0.03125, %v2689_v35 }
0x1e9f   :  { %v2693_v37 = vadd.f32 1e-05, %v2691_v36 }
0x1ea1   :  { %9266 = vrsqrt.f32 %v2693_v37 }
0x1eaa   :  { %v9265_v38 = vpop.eup %9264 }
0x1eab   :  { %v2696_v24 = vmul.f32 %v9265_v38, %v2680_v56 }
0x1ead   :  { %v2702_v42 = vmul.f32 %v7782_v45, %v2696_v24 }
0x1eae   :  { %v9267_v40 = vpop.eup %9266 }
0x1eaf   :  { %v2697_v41 = vmul.f32 %v9267_v40, %v2681_v27  ;;  %v2708_v33 = vadd.f32 %v7783_v43, %v2702_v42 }
0x1eb1   :  { %v2703_v44 = vmul.f32 %v7782_v45, %v2697_v41 }
0x1eb3   :  { %v2709_v14 = vadd.f32 %v7783_v43, %v2703_v44 }
0x1eb5   :  { %v2710_v3 = vpack.c.bf16 %v2709_v14, %v2708_v33 }
0x1eb7   :  { %8490 = vmatmul.mubr.msk.bf16.vlgmr.msra.gmra.mxu1 %vm169_vm1, %v2710_v3 }
0x1eb8   :  { %8494 = vmatpush3.bf16.msra.mxu1 %v9156_v12  ;;  %8497 = vmatprep.mubr.msk.bf16.mxu1 %vm9426_vm0, %v9424_v0 }
0x1eb9   :  { %8495 = vmatprep.subr.bf16.mxu1 %v9424_v0 }
0x1ebc   :  { %8496 = vmatpush3.bf16.msra.mxu1 %v9157_v16 }
0x1ebd   :  { %8507 = vmatprep.subr.bf16.mxu1 %v9424_v0 }
0x1ebf   :  { %8498 = vmatmul.mubr.msk.bf16.vlgmr.msra.gmra.mxu1 %vm169_vm1, %v2782_v48 }
0x1ec0   :  { %8509 = vmatprep.mubr.msk.bf16.mxu1 %vm9426_vm0, %v9424_v0 }
0x1f77   :  { %v10070_v49 = vpop.f32.mrf.mxu1 }
0x1f79   :  { %v8491_v50 = vpop.f32.mrf.mxu1 }
0x1f7b   :  { %v2774_v53 = vpop.f32.mrf.mxu1 }
0x1f7c   :  { %v10075_v54 = vadd.f32 %v10072_v51, %v2774_v53 }
0x1f7d   :  { %v8492_v57 = vpop.f32.mrf.mxu1 }
0x1f7f   :  { %v2843_v59 = vpop.f32.mrf.mxu1 }
0x1f80   :  { %v2844_v61 = vadd.f32 %v7788_v58, %v2843_v59 }
0x1f81   :  { %v8499_v1 = vpop.f32.mrf.mxu1 }
0x1f82   :  { %v10078_v60 = vpack.c.bf16 %v2844_v61, %v2844_v61 }
0x1f83   :  { %v2846_v62 = vpop.f32.mrf.mxu1 }
0x1f84   :  { %v2847_v63 = vadd.f32 %v7788_v58, %v2846_v62  ;;  %2853 = vrot.lane.b32.xlu1 %v10078_v60, %s9428_s14 }
0x1f85   :  { %v8500_v2 = vpop.f32.mrf.mxu1 }
0x1f86   :  { %v10082_v5 = vpack.c.bf16 %v2847_v63, %v2847_v63 }
0x1f88   :  { %2902 = vrot.lane.b32.xlu0 %v10082_v5, %s9428_s14 }
0x1ff6   :  { %v2854_v6 = vpop.permute.xlu1 %2853 }
0x1ff7   :  { %v2859_v7 = vsel %vm219_vm2, %v2854_v6, 0 }
0x1ff8   :  { %8502 = vmatpush3.bf16.xpose.msra.mxu0 %v2859_v7 }
0x1ff9   :  { %8513 = vmatprep.subr.bf16.mxu0 %v9424_v0 }
0x1ffa   :  { %v2903_v8 = vpop.permute.xlu0 %2902 }
0x1ffb   :  { %v2908_v9 = vsel %vm219_vm2, %v2903_v8, 0 }
0x1ffc   :  { %8508 = vmatpush3.bf16.xpose.msra.mxu1 %v2908_v9 }
0x1ffd   :  { %8519 = vmatprep.subr.bf16.mxu1 %v9424_v0 }
0x1fff   :  { %8504 = vmatmul.mubr.msk.bf16.vlgmr.msra.gmra.mxu0 %vm219_vm2, %v10078_v60 }
0x2000   :  { %8515 = vmatprep.mubr.msk.bf16.mxu0 %vm9426_vm0, %v9424_v0 }
0x2003   :  { %8510 = vmatmul.mubr.msk.bf16.vlgmr.msra.gmra.mxu1 %vm219_vm2, %v10082_v5 }
0x2004   :  { %8521 = vmatprep.mubr.msk.bf16.mxu1 %vm9426_vm0, %v9424_v0 }
0x20bf   :  { %v2895_v23 = vpop.f32.mrf.mxu0 }
0x20c0   :  { %v2896_v11 = vadd.f32 %v2895_v23, %v10104_v19 }
0x20c1   :  { %v8505_v13 = vpop.f32.mrf.mxu0 }
0x20c2   :  { %v2950_v17 = vsel %vm219_vm2, %v2896_v11, -inf }
0x20c3   :  { %v2944_v18 = vpop.f32.mrf.mxu1  ;;  %2951 = vmax.xlane.f32.xlu1 %v2950_v17  ;;  %v2898_v10 = vpop.f32.mrf.mxu0 }
0x20c4   :  { %v2945_v52 = vadd.f32 %v2944_v18, %v10108_v15 }
0x20c5   :  { %v8506_v20 = vpop.f32.mrf.mxu0  ;;  %v8511_v4 = vpop.f32.mrf.mxu1 }
0x20c6   :  { %v2953_v55 = vsel %vm219_vm2, %v2945_v52, -inf }
0x20c7   :  { %2954 = vmax.xlane.f32.xlu0 %v2953_v55  ;;  %v2947_v56 = vpop.f32.mrf.mxu1 }
0x20c9   :  { %v8512_v21 = vpop.f32.mrf.mxu1 }
0x20d4   :  { %2974 = vrot.lane.b32.xlu1 %v10078_v60, %s9430_s19 }
0x214c   :  { %v2952_v25 = vpop.xlane.xlu1 %2951 }
0x214d   :  { %v2956_v26 = vsub.f32 %v2896_v11, %v2952_v25 }
0x214f   :  { %v2958_v27 = vmul.f32 1.442695, %v2956_v26 }
0x2150   :  { %v2955_v28 = vpop.xlane.xlu0 %2954  ;;  %v2975_v29 = vpop.permute.xlu1 %2974 }
0x2151   :  { %9268 = vpow2.f32 %v2958_v27  ;;  %v2957_v30 = vsub.f32 %v2945_v52, %v2955_v28  ;;  %v2980_v31 = vsel %vm344_vm3, %v2975_v29, 0 }
0x2152   :  { %8514 = vmatpush3.bf16.msra.mxu0 %v2980_v31 }
0x2153   :  { %v2960_v32 = vmul.f32 1.442695, %v2957_v30  ;;  %8525 = vmatprep.subr.bf16.mxu0 %v9424_v0 }
0x2155   :  { %9270 = vpow2.f32 %v2960_v32 }
0x215e   :  { %v9269_v34 = vpop.eup %9268 }
0x215f   :  { %v2962_v39 = vsel %vm219_vm2, %v9269_v34, 0.0 }
0x2160   :  { %2963 = vadd.xlane.f32.xlu1 %v2962_v39 }
0x2162   :  { %v9271_v22 = vpop.eup %9270 }
0x2163   :  { %v2965_v35 = vsel %vm219_vm2, %v9271_v22, 0.0 }
0x2164   :  { %2966 = vadd.xlane.f32.xlu0 %v2965_v35 }
0x2171   :  { %3072 = vrot.lane.b32.xlu1 %v10078_v60, %s9431_s20 }
0x2175   :  { %3122 = vrot.lane.b32.xlu1 %v10082_v5, %s9431_s20 }
0x2179   :  { %3120 = vrot.lane.b32.xlu1 %v10082_v5, %s9432_s21 }
0x217a   :  { %3022 = vrot.lane.b32.xlu0 %v10082_v5, %s9430_s19 }
0x217e   :  { %3070 = vrot.lane.b32.xlu0 %v10078_v60, %s9432_s21 }
0x21e9   :  { %v2964_v36 = vpop.xlane.xlu1 %2963 }
0x21ea   :  { %9272 = vrcp.f32 %v2964_v36 }
0x21ed   :  { %v2967_v37 = vpop.xlane.xlu0 %2966  ;;  %v3073_v40 = vpop.permute.xlu1 %3072 }
0x21ee   :  { %9274 = vrcp.f32 %v2967_v37  ;;  %v3078_v44 = vsel %vm219_vm2, %v3073_v40, 0 }
0x21f1   :  { %v3023_v38 = vpop.permute.xlu0 %3022  ;;  %v3123_v14 = vpop.permute.xlu1 %3122 }
0x21f2   :  { %v3028_v24 = vsel %vm344_vm3, %v3023_v38, 0  ;;  %v3128_v3 = vsel %vm219_vm2, %v3123_v14, 0 }
0x21f3   :  { %8520 = vmatpush3.bf16.msra.mxu1 %v3028_v24 }
0x21f4   :  { %8531 = vmatprep.subr.bf16.mxu1 %v9424_v0 }
0x21f5   :  { %v3071_v16 = vpop.permute.xlu0 %3070  ;;  %v3121_v48 = vpop.permute.xlu1 %3120 }
0x21f7   :  { %v9273_v45 = vpop.eup %9272 }
0x21f8   :  { %v2969_v41 = vmul.f32 %v9273_v45, %v9269_v34 }
0x21fa   :  { %v2972_v42 = vpack.c.bf16 %v2969_v41, %v2969_v41 }
0x21fb   :  { %v9275_v43 = vpop.eup %9274 }
0x21fc   :  { %8516 = vmatmul.mubr.msk.bf16.vlgmr.msra.gmra.mxu0 %vm219_vm2, %v2972_v42  ;;  %v2971_v33 = vmul.f32 %v9275_v43, %v9271_v22 }
0x21fd   :  { %8526 = vmatpush3.bf16.xpose.msra.mxu0 %v3078_v44  ;;  %8527 = vmatprep.mubr.msk.bf16.mxu0 %vm9426_vm0, %v9424_v0 }
0x21fe   :  { %v2973_v12 = vpack.c.bf16 %v2971_v33, %v2971_v33  ;;  %8537 = vmatprep.subr.bf16.mxu0 %v9424_v0 }
0x2200   :  { %8522 = vmatmul.mubr.msk.bf16.vlgmr.msra.gmra.mxu1 %vm219_vm2, %v2973_v12 }
0x2201   :  { %8532 = vmatpush3.bf16.xpose.msra.mxu1 %v3128_v3  ;;  %8533 = vmatprep.mubr.msk.bf16.mxu1 %vm9426_vm0, %v9424_v0 }
0x2202   :  { %8543 = vmatprep.subr.bf16.mxu1 %v9424_v0 }
0x2204   :  { %8528 = vmatmul.mubr.msk.bf16.vlgmr.msra.gmra.mxu0 %vm219_vm2, %v3071_v16 }
0x2205   :  { %8539 = vmatprep.mubr.msk.bf16.mxu0 %vm9426_vm0, %v9424_v0 }
0x2208   :  { %8534 = vmatmul.mubr.msk.bf16.vlgmr.msra.gmra.mxu1 %vm219_vm2, %v3121_v48 }
0x2209   :  { %8545 = vmatprep.mubr.msk.bf16.mxu1 %vm9426_vm0, %v9424_v0 }
0x22bc   :  { %v10147_v50 = vpop.f32.mrf.mxu0 }
0x22be   :  { %v8517_v53 = vpop.f32.mrf.mxu0 }
0x22c0   :  { %v3019_v57 = vpop.f32.mrf.mxu0  ;;  %v10149_v58 = vpop.f32.mrf.mxu1 }
0x22c2   :  { %v8518_v59 = vpop.f32.mrf.mxu0  ;;  %v8523_v61 = vpop.f32.mrf.mxu1 }
0x22c4   :  { %v3067_v1 = vpop.f32.mrf.mxu1  ;;  %v3114_v62 = vpop.f32.mrf.mxu0 }
0x22c5   :  { %v3115_v63 = vadd.f32 %v3114_v62, %v10104_v19 }
0x22c6   :  { %v8524_v2 = vpop.f32.mrf.mxu1  ;;  %v8529_v6 = vpop.f32.mrf.mxu0 }
0x22c7   :  { %v3170_v7 = vsel %vm219_vm2, %v3115_v63, -inf }
0x22c8   :  { %v3164_v8 = vpop.f32.mrf.mxu1  ;;  %3171 = vmax.xlane.f32.xlu0 %v3170_v7  ;;  %v3117_v9 = vpop.f32.mrf.mxu0 }
0x22c9   :  { %v3165_v23 = vadd.f32 %v3164_v8, %v10108_v15 }
0x22ca   :  { %v8530_v11 = vpop.f32.mrf.mxu0  ;;  %v8535_v13 = vpop.f32.mrf.mxu1 }
0x22cb   :  { %v3173_v17 = vsel %vm219_vm2, %v3165_v23, -inf }
0x22cc   :  { %3174 = vmax.xlane.f32.xlu1 %v3173_v17  ;;  %v3167_v18 = vpop.f32.mrf.mxu1 }
0x22ce   :  { %v8536_v10 = vpop.f32.mrf.mxu1 }
0x22dd   :  { %3194 = vrot.lane.b32.xlu1 %v10078_v60, %s9433_s22 }
0x22e1   :  { %3292 = vrot.lane.b32.xlu1 %v10078_v60, %s9434_s23 }
0x22e5   :  { %3342 = vrot.lane.b32.xlu1 %v10082_v5, %s9434_s23 }
0x22e9   :  { %3340 = vrot.lane.b32.xlu1 %v10082_v5, %s9435_s24 }
0x2351   :  { %v3172_v52 = vpop.xlane.xlu0 %3171 }
0x2352   :  { %v3176_v20 = vsub.f32 %v3115_v63, %v3172_v52 }
0x2354   :  { %v3178_v4 = vmul.f32 1.442695, %v3176_v20 }
0x2355   :  { %v3175_v55 = vpop.xlane.xlu1 %3174 }
0x2356   :  { %9276 = vpow2.f32 %v3178_v4  ;;  %v3177_v56 = vsub.f32 %v3165_v23, %v3175_v55 }
0x2358   :  { %v3180_v21 = vmul.f32 1.442695, %v3177_v56 }
0x2359   :  { %v3195_v25 = vpop.permute.xlu1 %3194 }
0x235a   :  { %9278 = vpow2.f32 %v3180_v21  ;;  %v3200_v26 = vsel %vm344_vm3, %v3195_v25, 0 }
0x235b   :  { %8538 = vmatpush3.bf16.msra.mxu0 %v3200_v26 }
0x235c   :  { %8549 = vmatprep.subr.bf16.mxu0 %v9424_v0 }
0x235d   :  { %v3293_v35 = vpop.permute.xlu1 %3292 }
0x235e   :  { %v3298_v24 = vsel %vm219_vm2, %v3293_v35, 0 }
0x2361   :  { %v3343_v40 = vpop.permute.xlu1 %3342 }
0x2362   :  { %v3348_v42 = vsel %vm219_vm2, %v3343_v40, 0 }
0x2363   :  { %v9277_v27 = vpop.eup %9276 }
0x2364   :  { %v3182_v28 = vsel %vm219_vm2, %v9277_v27, 0.0 }
0x2365   :  { %3183 = vadd.xlane.f32.xlu0 %v3182_v28  ;;  %v3341_v44 = vpop.permute.xlu1 %3340 }
0x2367   :  { %v9279_v29 = vpop.eup %9278 }
0x2368   :  { %v3185_v30 = vsel %vm219_vm2, %v9279_v29, 0.0 }
0x2369   :  { %3186 = vadd.xlane.f32.xlu0 %v3185_v30 }
0x237f   :  { %3242 = vrot.lane.b32.xlu0 %v10082_v5, %s9433_s22 }
0x2383   :  { %3290 = vrot.lane.b32.xlu0 %v10078_v60, %s9435_s24 }
0x23ee   :  { %v3184_v31 = vpop.xlane.xlu0 %3183 }
0x23ef   :  { %9280 = vrcp.f32 %v3184_v31 }
0x23f2   :  { %v3187_v32 = vpop.xlane.xlu0 %3186 }
0x23f3   :  { %9282 = vrcp.f32 %v3187_v32 }
0x23f6   :  { %v3243_v34 = vpop.permute.xlu0 %3242 }
0x23f7   :  { %v3248_v39 = vsel %vm344_vm3, %v3243_v34, 0 }
0x23f8   :  { %8544 = vmatpush3.bf16.msra.mxu1 %v3248_v39 }
0x23f9   :  { %8555 = vmatprep.subr.bf16.mxu1 %v9424_v0 }
0x23fa   :  { %v3291_v43 = vpop.permute.xlu0 %3290 }
0x23fc   :  { %v9281_v22 = vpop.eup %9280 }
0x23fd   :  { %v3189_v36 = vmul.f32 %v9281_v22, %v9277_v27 }
0x23ff   :  { %v3192_v37 = vpack.c.bf16 %v3189_v36, %v3189_v36 }
0x2400   :  { %v9283_v38 = vpop.eup %9282 }
0x2401   :  { %8540 = vmatmul.mubr.msk.bf16.vlgmr.msra.gmra.mxu0 %vm219_vm2, %v3192_v37  ;;  %v3191_v45 = vmul.f32 %v9283_v38, %v9279_v29 }
0x2402   :  { %8550 = vmatpush3.bf16.xpose.msra.mxu0 %v3298_v24  ;;  %8551 = vmatprep.mubr.msk.bf16.mxu0 %vm9426_vm0, %v9424_v0 }
0x2403   :  { %v3193_v41 = vpack.c.bf16 %v3191_v45, %v3191_v45  ;;  %8561 = vmatprep.subr.bf16.mxu0 %v9424_v0 }
0x2405   :  { %8546 = vmatmul.mubr.msk.bf16.vlgmr.msra.gmra.mxu1 %vm219_vm2, %v3193_v41 }
0x2406   :  { %8556 = vmatpush3.bf16.xpose.msra.mxu1 %v3348_v42  ;;  %8557 = vmatprep.mubr.msk.bf16.mxu1 %vm9426_vm0, %v9424_v0 }
0x2407   :  { %8567 = vmatprep.subr.bf16.mxu1 %v9424_v0 }
0x2409   :  { %8552 = vmatmul.mubr.msk.bf16.vlgmr.msra.gmra.mxu0 %vm219_vm2, %v3291_v43 }
0x240a   :  { %8563 = vmatprep.mubr.msk.bf16.mxu0 %vm9426_vm0, %v9424_v0 }
0x240d   :  { %8558 = vmatmul.mubr.msk.bf16.vlgmr.msra.gmra.mxu1 %vm219_vm2, %v3341_v44 }
0x240e   :  { %8569 = vmatprep.mubr.msk.bf16.mxu1 %vm9426_vm0, %v9424_v0 }
0x24c1   :  { %v10189_v33 = vpop.f32.mrf.mxu0 }
0x24c3   :  { %v8541_v14 = vpop.f32.mrf.mxu0 }
0x24c5   :  { %v3239_v12 = vpop.f32.mrf.mxu0  ;;  %v10191_v3 = vpop.f32.mrf.mxu1 }
0x24c6   :  { %v9074_v16 = vpack.i.bf16 %v10191_v3, %v10189_v33 }
0x24c7   :  { %v8542_v48 = vpop.f32.mrf.mxu0  ;;  %v8547_v53 = vpop.f32.mrf.mxu1 }
0x24c9   :  { %v3287_v57 = vpop.f32.mrf.mxu1  ;;  %v3334_v59 = vpop.f32.mrf.mxu0 }
0x24ca   :  { %v3335_v61 = vadd.f32 %v3334_v59, %v10104_v19 }
0x24cb   :  { %v8548_v1 = vpop.f32.mrf.mxu1  ;;  %v8553_v62 = vpop.f32.mrf.mxu0 }
0x24cc   :  { %v3390_v63 = vsel %vm219_vm2, %v3335_v61, -inf }
0x24cd   :  { %v3384_v2 = vpop.f32.mrf.mxu1  ;;  %3391 = vmax.xlane.f32.xlu0 %v3390_v63  ;;  %v3337_v6 = vpop.f32.mrf.mxu0 }
0x24ce   :  { %v3385_v7 = vadd.f32 %v3384_v2, %v10108_v15 }
0x24cf   :  { %v8554_v8 = vpop.f32.mrf.mxu0  ;;  %v8559_v9 = vpop.f32.mrf.mxu1 }
0x24d0   :  { %v3393_v23 = vsel %vm219_vm2, %v3385_v7, -inf }
0x24d1   :  { %3394 = vmax.xlane.f32.xlu1 %v3393_v23  ;;  %v3387_v11 = vpop.f32.mrf.mxu1 }
0x24d3   :  { %v8560_v13 = vpop.f32.mrf.mxu1 }
0x24e2   :  { %3414 = vrot.lane.b32.xlu1 %v10078_v60, %s9436_s25 }
0x24e6   :  { %3512 = vrot.lane.b32.xlu1 %v10078_v60, %s9437_s26 }
0x24ea   :  { %3562 = vrot.lane.b32.xlu1 %v10082_v5, %s9437_s26 }
0x24ee   :  { %3560 = vrot.lane.b32.xlu1 %v10082_v5, %s9438_s27 }
0x2556   :  { %v3392_v17 = vpop.xlane.xlu0 %3391 }
0x2557   :  { %v3396_v18 = vsub.f32 %v3335_v61, %v3392_v17 }
0x2559   :  { %v3398_v10 = vmul.f32 1.442695, %v3396_v18 }
0x255a   :  { %v3395_v52 = vpop.xlane.xlu1 %3394 }
0x255b   :  { %9284 = vpow2.f32 %v3398_v10  ;;  %v3397_v20 = vsub.f32 %v3385_v7, %v3395_v52 }
0x255d   :  { %v3400_v4 = vmul.f32 1.442695, %v3397_v20 }
0x255e   :  { %v3415_v55 = vpop.permute.xlu1 %3414 }
0x255f   :  { %9286 = vpow2.f32 %v3400_v4  ;;  %v3420_v56 = vsel %vm344_vm3, %v3415_v55, 0 }
0x2560   :  { %8562 = vmatpush3.bf16.msra.mxu0 %v3420_v56 }
0x2561   :  { %8573 = vmatprep.subr.bf16.mxu0 %v9424_v0 }
0x2562   :  { %v3513_v34 = vpop.permute.xlu1 %3512 }
0x2563   :  { %v3518_v36 = vsel %vm219_vm2, %v3513_v34, 0 }
0x2566   :  { %v3563_v38 = vpop.permute.xlu1 %3562 }
0x2567   :  { %v3568_v45 = vsel %vm219_vm2, %v3563_v38, 0 }
0x2568   :  { %v9285_v21 = vpop.eup %9284 }
0x2569   :  { %v3402_v25 = vsel %vm219_vm2, %v9285_v21, 0.0 }
0x256a   :  { %3403 = vadd.xlane.f32.xlu0 %v3402_v25  ;;  %v3561_v41 = vpop.permute.xlu1 %3560 }
0x256c   :  { %v9287_v26 = vpop.eup %9286 }
0x256d   :  { %v3405_v27 = vsel %vm219_vm2, %v9287_v26, 0.0 }
0x256e   :  { %3406 = vadd.xlane.f32.xlu0 %v3405_v27 }
0x2584   :  { %3462 = vrot.lane.b32.xlu0 %v10082_v5, %s9436_s25 }
0x2588   :  { %3510 = vrot.lane.b32.xlu0 %v10078_v60, %s9438_s27 }
0x25f3   :  { %v3404_v28 = vpop.xlane.xlu0 %3403 }
0x25f4   :  { %9288 = vrcp.f32 %v3404_v28 }
0x25f7   :  { %v3407_v29 = vpop.xlane.xlu0 %3406 }
0x25f8   :  { %9290 = vrcp.f32 %v3407_v29 }
0x25fb   :  { %v3463_v30 = vpop.permute.xlu0 %3462 }
0x25fc   :  { %v3468_v31 = vsel %vm344_vm3, %v3463_v30, 0 }
0x25fd   :  { %8568 = vmatpush3.bf16.msra.mxu1 %v3468_v31  ;;  %v9158_v31 = vld [vmem:[%s9674_s5 + $0x8] sm:$0xff]  }
0x25fe   :  { %8579 = vmatprep.subr.bf16.mxu1 %v9424_v0 }
0x25ff   :  { %v3511_v40 = vpop.permute.xlu0 %3510 }
0x2601   :  { %v9289_v32 = vpop.eup %9288 }
0x2602   :  { %v3409_v39 = vmul.f32 %v9289_v32, %v9285_v21  ;;  %v9159_v32 = vld [vmem:[%s9674_s5] sm:$0xff]  }
0x2604   :  { %v3412_v22 = vpack.c.bf16 %v3409_v39, %v3409_v39 }
0x2605   :  { %v9291_v35 = vpop.eup %9290 }
0x2606   :  { %8564 = vmatmul.mubr.msk.bf16.vlgmr.msra.gmra.mxu0 %vm219_vm2, %v3412_v22  ;;  %v3411_v37 = vmul.f32 %v9291_v35, %v9287_v26 }
0x2607   :  { %8574 = vmatpush3.bf16.xpose.msra.mxu0 %v3518_v36  ;;  %8575 = vmatprep.mubr.msk.bf16.mxu0 %vm9426_vm0, %v9424_v0 }
0x2608   :  { %v3413_v24 = vpack.c.bf16 %v3411_v37, %v3411_v37  ;;  %8585 = vmatprep.subr.bf16.mxu0 %v9424_v0 }
0x260a   :  { %8570 = vmatmul.mubr.msk.bf16.vlgmr.msra.gmra.mxu1 %vm219_vm2, %v3413_v24 }
0x260b   :  { %8580 = vmatpush3.bf16.xpose.msra.mxu1 %v3568_v45  ;;  %8581 = vmatprep.mubr.msk.bf16.mxu1 %vm9426_vm0, %v9424_v0 }
0x260c   :  { %8591 = vmatprep.subr.bf16.mxu1 %v9424_v0 }
0x260e   :  { %8576 = vmatmul.mubr.msk.bf16.vlgmr.msra.gmra.mxu0 %vm219_vm2, %v3511_v40 }
0x260f   :  { %8587 = vmatprep.mubr.msk.bf16.mxu0 %vm9426_vm0, %v9424_v0 }
0x2612   :  { %8582 = vmatmul.mubr.msk.bf16.vlgmr.msra.gmra.mxu1 %vm219_vm2, %v3561_v41 }
0x2613   :  { %8593 = vmatprep.mubr.msk.bf16.mxu1 %vm9426_vm0, %v9424_v0 }
0x26c6   :  { %v3456_v42 = vpop.f32.mrf.mxu0 }
0x26c8   :  { %v8565_v43 = vpop.f32.mrf.mxu0 }
0x26ca   :  { %v3459_v44 = vpop.f32.mrf.mxu0  ;;  %v3504_v14 = vpop.f32.mrf.mxu1 }
0x26cb   :  { %v2772_v44 = vadd.f32 %v10072_v51, %v10070_v49 }
0x26cc   :  { %v8566_v12 = vpop.f32.mrf.mxu0  ;;  %v8571_v48 = vpop.f32.mrf.mxu1 }
0x26ce   :  { %v3507_v53 = vpop.f32.mrf.mxu1  ;;  %v3554_v57 = vpop.f32.mrf.mxu0 }
0x26cf   :  { %v3555_v59 = vadd.f32 %v3554_v57, %v10104_v19  ;;  %v9079_v19 = vpack.i.bf16 %v3504_v14, %v3456_v42 }
0x26d0   :  { %v8572_v61 = vpop.f32.mrf.mxu1  ;;  %v8577_v1 = vpop.f32.mrf.mxu0 }
0x26d1   :  { %v3610_v62 = vsel %vm219_vm2, %v3555_v59, -inf  ;;  %v10269_v1 = vpack.c.bf16 %v2772_v44, %v2772_v44 }
0x26d2   :  { %v3604_v63 = vpop.f32.mrf.mxu1  ;;  %3611 = vmax.xlane.f32.xlu0 %v3610_v62  ;;  %v3557_v2 = vpop.f32.mrf.mxu0 }
0x26d3   :  { %v3605_v6 = vadd.f32 %v3604_v63, %v10108_v15 }
0x26d4   :  { %v8578_v7 = vpop.f32.mrf.mxu0  ;;  %v8583_v8 = vpop.f32.mrf.mxu1 }
0x26d5   :  { %v3613_v9 = vsel %vm219_vm2, %v3605_v6, -inf }
0x26d6   :  { %3614 = vmax.xlane.f32.xlu1 %v3613_v9  ;;  %v3607_v23 = vpop.f32.mrf.mxu1 }
0x26d8   :  { %v8584_v11 = vpop.f32.mrf.mxu1 }
0x26e7   :  { %3634 = vrot.lane.b32.xlu1 %v10078_v60, %s9441_s7 }
0x26eb   :  { %9075 = vrot.lane.b32.xlu1 %v9074_v16, %s11031_s28 }
0x26ef   :  { %9080 = vrot.lane.b32.xlu1 %v9079_v19, %s11029_s2 }
0x275b   :  { %v3612_v13 = vpop.xlane.xlu0 %3611 }
0x275c   :  { %v3616_v15 = vsub.f32 %v3555_v59, %v3612_v13 }
0x275e   :  { %v3618_v17 = vmul.f32 1.442695, %v3616_v15 }
0x275f   :  { %v3615_v18 = vpop.xlane.xlu1 %3614 }
0x2760   :  { %9292 = vpow2.f32 %v3618_v17  ;;  %v3617_v10 = vsub.f32 %v3605_v6, %v3615_v18 }
0x2762   :  { %v3620_v52 = vmul.f32 1.442695, %v3617_v10 }
0x2763   :  { %v3635_v20 = vpop.permute.xlu1 %3634 }
0x2764   :  { %9294 = vpow2.f32 %v3620_v52  ;;  %v3640_v4 = vsel %vm344_vm3, %v3635_v20, 0 }
0x2765   :  { %8586 = vmatpush3.bf16.msra.mxu0 %v3640_v4 }
0x2766   :  { %8597 = vmatprep.subr.bf16.mxu0 %v9424_v0 }
0x2767   :  { %v9076_v40 = vpop.permute.xlu1 %9075 }
0x2768   :  { %v9078_v42 = vunpack.i.h.bf16 %v9076_v40  ;;  %v9077_v43 = vunpack.i.l.bf16 %v9076_v40 }
0x276a   :  { %v3755_v53 = vsel %vm219_vm2, %v10149_v58, %v9078_v42  ;;  %v3754_v57 = vsel %vm219_vm2, %v10147_v50, %v9077_v43  ;;  %v3940_v58 = vsel %vm219_vm2, %v10269_v1, 0  ;;  %v7808_v50 = vld [vmem:[%s10284_s13] ss:$0 sm:$0xff] }
0x276b   :  { %v9081_v41 = vpop.permute.xlu1 %9080 }
0x276c   :  { %v9083_v14 = vunpack.i.h.bf16 %v9081_v41  ;;  %v9082_v12 = vunpack.i.l.bf16 %v9081_v41 }
0x276d   :  { %v9293_v60 = vpop.eup %9292 }
0x276e   :  { %v3622_v33 = vsel %vm219_vm2, %v9293_v60, 0.0  ;;  %v3757_v62 = vsel %vm1122_vm4, %v3755_v53, %v9083_v14  ;;  %v3756_v63 = vsel %vm1122_vm4, %v3754_v57, %v9082_v12 }
0x276f   :  { %3623 = vadd.xlane.f32.xlu0 %v3622_v33 }
0x2771   :  { %v9295_v3 = vpop.eup %9294 }
0x2772   :  { %v3625_v16 = vsel %vm219_vm2, %v9295_v3, 0.0 }
0x2773   :  { %3626 = vadd.xlane.f32.xlu0 %v3625_v16 }
0x2789   :  { %3682 = vrot.lane.b32.xlu0 %v10082_v5, %s9441_s7 }
0x27f8   :  { %v3624_v55 = vpop.xlane.xlu0 %3623 }
0x27f9   :  { %9296 = vrcp.f32 %v3624_v55  ;;  %v9161_v55 = vld [vmem:[%s10296_s4] sm:$0xff]  }
0x27fc   :  { %v3627_v56 = vpop.xlane.xlu0 %3626 }
0x27fd   :  { %9298 = vrcp.f32 %v3627_v56 }
0x2800   :  { %v3683_v21 = vpop.permute.xlu0 %3682 }
0x2801   :  { %v3688_v25 = vsel %vm344_vm3, %v3683_v21, 0 }
0x2802   :  { %8592 = vmatpush3.bf16.msra.mxu1 %v3688_v25 }
0x2803   :  { %8605 = vmatprep.subr.bf16.mxu1 %v9424_v0 }
0x2806   :  { %v9297_v26 = vpop.eup %9296 }
0x2807   :  { %v3629_v27 = vmul.f32 %v9297_v26, %v9293_v60 }
0x2809   :  { %v3632_v28 = vpack.c.bf16 %v3629_v27, %v3629_v27 }
0x280a   :  { %v9299_v29 = vpop.eup %9298 }
0x280b   :  { %v3631_v30 = vmul.f32 %v9299_v29, %v9295_v3  ;;  %8588 = vmatmul.mubr.msk.bf16.vlgmr.msra.gmra.mxu0 %vm219_vm2, %v3632_v28 }
0x280c   :  { %8601 = vmatprep.mubr.msk.bf16.mxu0 %vm9426_vm0, %v9424_v0  ;;  %8598 = vmatpush3.bf16.msra.mxu0 %v9158_v31 }
0x280d   :  { %v3633_v5 = vpack.c.bf16 %v3631_v30, %v3631_v30  ;;  %8599 = vmatprep.subr.bf16.mxu0 %v9424_v0 }
0x280f   :  { %8594 = vmatmul.mubr.msk.bf16.vlgmr.msra.gmra.mxu1 %vm219_vm2, %v3633_v5  ;;  %v7812_v5 = vld [vmem:[%s10305_s29] ss:$0 sm:$0xff] }
0x2810   :  { %8609 = vmatprep.mubr.msk.bf16.mxu1 %vm9426_vm0, %v9424_v0  ;;  %8600 = vmatpush3.bf16.msra.mxu0 %v9159_v32 }
0x2811   :  { %8613 = vmatprep.subr.bf16.mxu0 %v9424_v0 }
0x28cb   :  { %v3676_v34 = vpop.f32.mrf.mxu0 }
0x28cd   :  { %v8589_v39 = vpop.f32.mrf.mxu0 }
0x28ce   :  { %v7813_v39 = vld [vmem:[%s10310_s1] ss:$0 sm:$0xff] }
0x28cf   :  { %v3679_v22 = vpop.f32.mrf.mxu0  ;;  %v3724_v35 = vpop.f32.mrf.mxu1 }
0x28d0   :  { %v9084_v36 = vpack.i.bf16 %v3724_v35, %v3676_v34  ;;  %v10316_v35 = vpack.c.bf16 %v10075_v54, %v10075_v54  ;;  %v7814_v54 = vld [vmem:[%s10333_s12] ss:$0 sm:$0xff] }
0x28d1   :  { %v8590_v37 = vpop.f32.mrf.mxu0  ;;  %v8595_v38 = vpop.f32.mrf.mxu1 }
0x28d2   :  { %9085 = vrot.lane.b32.xlu0 %v9084_v36, %s11033_s6 }
0x28d3   :  { %v3727_v24 = vpop.f32.mrf.mxu1 }
0x28d4   :  { %v3986_v24 = vsel %vm219_vm2, %v10316_v35, 0 }
0x28d5   :  { %v8596_v45 = vpop.f32.mrf.mxu1 }
0x2944   :  { %v9086_v48 = vpop.permute.xlu0 %9085 }
0x2945   :  { %v9088_v59 = vunpack.i.h.bf16 %v9086_v48  ;;  %v9087_v61 = vunpack.i.l.bf16 %v9086_v48 }
0x2947   :  { %v3759_v2 = vsel %vm1125_vm5, %v3757_v62, %v9088_v59  ;;  %v3758_v49 = vsel %vm1125_vm5, %v3756_v63, %v9087_v61 }
0x2948   :  { %v3760_v51 = vpack.c.bf16 %v3759_v2, %v3758_v49 }
0x294a   :  { %8602 = vmatmul.mubr.msk.bf16.vlgmr.msra.gmra.mxu0 %vm169_vm1, %v3760_v51 }
0x294b   :  { %8614 = vmatpush3.bf16.xpose.msra.mxu0 %v3940_v58  ;;  %8615 = vmatprep.mubr.msk.bf16.mxu0 %vm9426_vm0, %v9424_v0 }
0x294c   :  { %8625 = vmatprep.subr.bf16.mxu0 %v9424_v0 }
0x2a0a   :  { %v3819_v6 = vpop.f32.mrf.mxu0 }
0x2a0b   :  { %v3820_v7 = vadd.f32 %v7808_v50, %v3819_v6 }
0x2a0c   :  { %v8603_v8 = vpop.f32.mrf.mxu0 }
0x2a0d   :  { %v3826_v9 = vadd.f32 %v3820_v7, %v10051_v46 }
0x2a0e   :  { %v3822_v23 = vpop.f32.mrf.mxu0 }
0x2a0f   :  { %v3823_v11 = vadd.f32 %v7808_v50, %v3822_v23  ;;  %v3830_v19 = vsel %vm169_vm1, %v3826_v9, 0.0 }
0x2a10   :  { %3831 = vadd.xlane.f32.xlu1 %v3830_v19  ;;  %v8604_v13 = vpop.f32.mrf.mxu0 }
0x2a11   :  { %v3827_v15 = vadd.f32 %v3823_v11, %v10053_v47  ;;  %v9160_v47 = vld [vmem:[%s10296_s4 + $0x8] sm:$0xff]  }
0x2a12   :  { %8606 = vmatpush3.bf16.msra.mxu1 %v9160_v47 }
0x2a13   :  { %v3833_v17 = vsel %vm169_vm1, %v3827_v15, 0.0  ;;  %8607 = vmatprep.subr.bf16.mxu1 %v9424_v0 }
0x2a14   :  { %3834 = vadd.xlane.f32.xlu0 %v3833_v17 }
0x2a16   :  { %8608 = vmatpush3.bf16.msra.mxu1 %v9161_v55 }
0x2a17   :  { %8619 = vmatprep.subr.bf16.mxu1 %v9424_v0 }
0x2a99   :  { %v3832_v18 = vpop.xlane.xlu1 %3831 }
0x2a9a   :  { %v3836_v10 = vmul.f32 0.03125, %v3832_v18 }
0x2a9c   :  { %v3838_v52 = vsub.f32 %v3826_v9, %v3836_v10 }
0x2a9d   :  { %v3835_v20 = vpop.xlane.xlu0 %3834 }
0x2a9e   :  { %v3837_v4 = vmul.f32 0.03125, %v3835_v20  ;;  %v3840_v60 = vmul.f32 %v3838_v52, %v3838_v52 }
0x2aa0   :  { %v3839_v33 = vsub.f32 %v3827_v15, %v3837_v4  ;;  %v3842_v46 = vsel %vm169_vm1, %v3840_v60, 0.0 }
0x2aa1   :  { %3843 = vadd.xlane.f32.xlu0 %v3842_v46 }
0x2aa2   :  { %v3841_v3 = vmul.f32 %v3839_v33, %v3839_v33 }
0x2aa4   :  { %v3845_v16 = vsel %vm169_vm1, %v3841_v3, 0.0 }
0x2aa5   :  { %3846 = vadd.xlane.f32.xlu1 %v3845_v16 }
0x2b2a   :  { %v3844_v56 = vpop.xlane.xlu0 %3843 }
0x2b2b   :  { %v3848_v21 = vmul.f32 0.03125, %v3844_v56 }
0x2b2d   :  { %v3850_v25 = vadd.f32 1e-05, %v3848_v21 }
0x2b2e   :  { %v3847_v26 = vpop.xlane.xlu1 %3846 }
0x2b2f   :  { %9300 = vrsqrt.f32 %v3850_v25  ;;  %v3849_v27 = vmul.f32 0.03125, %v3847_v26 }
0x2b31   :  { %v3851_v28 = vadd.f32 1e-05, %v3849_v27 }
0x2b33   :  { %9302 = vrsqrt.f32 %v3851_v28 }
0x2b3c   :  { %v9301_v29 = vpop.eup %9300 }
0x2b3d   :  { %v3854_v30 = vmul.f32 %v9301_v29, %v3838_v52 }
0x2b3f   :  { %v3860_v32 = vmul.f32 %v7812_v5, %v3854_v30 }
0x2b40   :  { %v9303_v31 = vpop.eup %9302 }
0x2b41   :  { %v3855_v34 = vmul.f32 %v9303_v31, %v3839_v33  ;;  %v10318_v36 = vadd.f32 %v7813_v39, %v3860_v32 }
0x2b43   :  { %v3861_v22 = vmul.f32 %v7812_v5, %v3855_v34 }
0x2b45   :  { %v10320_v37 = vadd.f32 %v7813_v39, %v3861_v22 }
0x2b47   :  { %v3868_v38 = vpack.c.bf16 %v10320_v37, %v10318_v36 }
0x2b49   :  { %8610 = vmatmul.mubr.msk.bf16.vlgmr.msra.gmra.mxu1 %vm169_vm1, %v3868_v38 }
0x2b4a   :  { %8620 = vmatpush3.bf16.xpose.msra.mxu1 %v3986_v24  ;;  %8621 = vmatprep.mubr.msk.bf16.mxu1 %vm9426_vm0, %v9424_v0 }
0x2b4b   :  { %8631 = vmatprep.subr.bf16.mxu1 %v9424_v0 }
0x2c09   :  { %v3927_v45 = vpop.f32.mrf.mxu1 }
0x2c0a   :  { %v3928_v40 = vadd.f32 %v7814_v54, %v3927_v45 }
0x2c0b   :  { %v8611_v41 = vpop.f32.mrf.mxu1 }
0x2c0c   :  { %v10336_v42 = vpack.c.bf16 %v3928_v40, %v3928_v40 }
0x2c0d   :  { %v3930_v43 = vpop.f32.mrf.mxu1 }
0x2c0e   :  { %v3931_v44 = vadd.f32 %v7814_v54, %v3930_v43  ;;  %8616 = vmatmul.mubr.msk.bf16.vlgmr.msra.gmra.mxu0 %vm219_vm2, %v10336_v42 }
0x2c0f   :  { %v8612_v14 = vpop.f32.mrf.mxu1  ;;  %8627 = vmatprep.mubr.msk.bf16.mxu0 %vm9426_vm0, %v9424_v0 }
0x2c10   :  { %v10342_v12 = vpack.c.bf16 %v3931_v44, %v3931_v44 }
0x2c12   :  { %8622 = vmatmul.mubr.msk.bf16.vlgmr.msra.gmra.mxu1 %vm219_vm2, %v10342_v12 }
0x2c13   :  { %8633 = vmatprep.mubr.msk.bf16.mxu1 %vm9426_vm0, %v9424_v0 }
0x2cce   :  { %v3976_v48 = vpop.f32.mrf.mxu0 }
0x2ccf   :  { %v4028_v53 = vsel %vm219_vm2, %v3976_v48, -inf }
0x2cd0   :  { %4029 = vmax.xlane.f32.xlu0 %v4028_v53  ;;  %v8617_v57 = vpop.f32.mrf.mxu0 }
0x2cd2   :  { %v3979_v59 = vpop.f32.mrf.mxu0  ;;  %v4022_v61 = vpop.f32.mrf.mxu1 }
0x2cd3   :  { %v4031_v62 = vsel %vm219_vm2, %v4022_v61, -inf }
0x2cd4   :  { %4032 = vmax.xlane.f32.xlu1 %v4031_v62  ;;  %v8618_v63 = vpop.f32.mrf.mxu0  ;;  %v8623_v2 = vpop.f32.mrf.mxu1 }
0x2cd6   :  { %v4025_v49 = vpop.f32.mrf.mxu1 }
0x2cd8   :  { %v8624_v51 = vpop.f32.mrf.mxu1 }
0x2ce5   :  { %4102 = vrot.lane.b32.xlu1 %v10316_v35, %s9428_s14 }
0x2ce6   :  { %4053 = vrot.lane.b32.xlu0 %v10269_v1, %s9428_s14 }
0x2d59   :  { %v4030_v58 = vpop.xlane.xlu0 %4029 }
0x2d5a   :  { %v4034_v50 = vsub.f32 %v3976_v48, %v4030_v58 }
0x2d5c   :  { %v4036_v6 = vmul.f32 1.442695, %v4034_v50 }
0x2d5d   :  { %v4033_v7 = vpop.xlane.xlu1 %4032  ;;  %v4054_v8 = vpop.permute.xlu0 %4053 }
0x2d5e   :  { %9304 = vpow2.f32 %v4036_v6  ;;  %v4035_v9 = vsub.f32 %v4022_v61, %v4033_v7  ;;  %v4059_v23 = vsel %vm344_vm3, %v4054_v8, 0 }
0x2d5f   :  { %8626 = vmatpush3.bf16.msra.mxu0 %v4059_v23 }
0x2d60   :  { %v4038_v11 = vmul.f32 1.442695, %v4035_v9  ;;  %8637 = vmatprep.subr.bf16.mxu0 %v9424_v0 }
0x2d61   :  { %v4103_v19 = vpop.permute.xlu1 %4102 }
0x2d62   :  { %9306 = vpow2.f32 %v4038_v11  ;;  %v4108_v13 = vsel %vm344_vm3, %v4103_v19, 0 }
0x2d63   :  { %8632 = vmatpush3.bf16.msra.mxu1 %v4108_v13 }
0x2d64   :  { %8643 = vmatprep.subr.bf16.mxu1 %v9424_v0 }
0x2d6b   :  { %v9305_v15 = vpop.eup %9304 }
0x2d6c   :  { %v4040_v17 = vsel %vm219_vm2, %v9305_v15, 0.0 }
0x2d6d   :  { %4041 = vadd.xlane.f32.xlu0 %v4040_v17 }
0x2d6f   :  { %v9307_v18 = vpop.eup %9306 }
0x2d70   :  { %v4043_v10 = vsel %vm219_vm2, %v9307_v18, 0.0 }
0x2d71   :  { %4044 = vadd.xlane.f32.xlu1 %v4043_v10 }
0x2d82   :  { %4153 = vrot.lane.b32.xlu1 %v10269_v1, %s9432_s21 }
0x2d83   :  { %4204 = vrot.lane.b32.xlu0 %v10316_v35, %s9432_s21 }
0x2d86   :  { %4151 = vrot.lane.b32.xlu1 %v10336_v42, %s9432_s21 }
0x2d87   :  { %4202 = vrot.lane.b32.xlu0 %v10342_v12, %s9432_s21 }
0x2df6   :  { %v4042_v52 = vpop.xlane.xlu0 %4041 }
0x2df7   :  { %9308 = vrcp.f32 %v4042_v52 }
0x2dfa   :  { %v4045_v20 = vpop.xlane.xlu1 %4044  ;;  %v4205_v55 = vpop.permute.xlu0 %4204 }
0x2dfb   :  { %9310 = vrcp.f32 %v4045_v20  ;;  %v4210_v21 = vsel %vm219_vm2, %v4205_v55, 0 }
0x2dfe   :  { %v4154_v33 = vpop.permute.xlu1 %4153  ;;  %v4203_v26 = vpop.permute.xlu0 %4202 }
0x2dff   :  { %v4159_v47 = vsel %vm219_vm2, %v4154_v33, 0 }
0x2e02   :  { %v4152_v25 = vpop.permute.xlu1 %4151 }
0x2e04   :  { %v9309_v4 = vpop.eup %9308 }
0x2e05   :  { %v4047_v60 = vmul.f32 %v9309_v4, %v9305_v15 }
0x2e07   :  { %v4050_v46 = vpack.c.bf16 %v4047_v60, %v4047_v60 }
0x2e08   :  { %v9311_v3 = vpop.eup %9310 }
0x2e09   :  { %v4049_v16 = vmul.f32 %v9311_v3, %v9307_v18  ;;  %8628 = vmatmul.mubr.msk.bf16.vlgmr.msra.gmra.mxu0 %vm219_vm2, %v4050_v46 }
0x2e0a   :  { %8638 = vmatpush3.bf16.xpose.msra.mxu0 %v4159_v47  ;;  %8639 = vmatprep.mubr.msk.bf16.mxu0 %vm9426_vm0, %v9424_v0 }
0x2e0b   :  { %v4051_v56 = vpack.c.bf16 %v4049_v16, %v4049_v16  ;;  %8649 = vmatprep.subr.bf16.mxu0 %v9424_v0 }
0x2e0d   :  { %8634 = vmatmul.mubr.msk.bf16.vlgmr.msra.gmra.mxu1 %vm219_vm2, %v4051_v56 }
0x2e0e   :  { %8644 = vmatpush3.bf16.xpose.msra.mxu1 %v4210_v21  ;;  %8645 = vmatprep.mubr.msk.bf16.mxu1 %vm9426_vm0, %v9424_v0 }
0x2e0f   :  { %8655 = vmatprep.subr.bf16.mxu1 %v9424_v0 }
0x2e11   :  { %8640 = vmatmul.mubr.msk.bf16.vlgmr.msra.gmra.mxu0 %vm219_vm2, %v4152_v25 }
0x2e12   :  { %8651 = vmatprep.mubr.msk.bf16.mxu0 %vm9426_vm0, %v9424_v0 }
0x2e15   :  { %8646 = vmatmul.mubr.msk.bf16.vlgmr.msra.gmra.mxu1 %vm219_vm2, %v4203_v26 }
0x2e16   :  { %8657 = vmatprep.mubr.msk.bf16.mxu1 %vm9426_vm0, %v9424_v0 }
0x2ec9   :  { %v10384_v27 = vpop.f32.mrf.mxu0 }
0x2ecb   :  { %v8629_v28 = vpop.f32.mrf.mxu0 }
0x2ecd   :  { %v4098_v29 = vpop.f32.mrf.mxu0  ;;  %v10386_v30 = vpop.f32.mrf.mxu1 }
0x2ecf   :  { %v8630_v5 = vpop.f32.mrf.mxu0  ;;  %v8635_v31 = vpop.f32.mrf.mxu1 }
0x2ed1   :  { %v4147_v32 = vpop.f32.mrf.mxu1  ;;  %v4195_v34 = vpop.f32.mrf.mxu0 }
0x2ed2   :  { %v4252_v39 = vsel %vm219_vm2, %v4195_v34, -inf }
0x2ed3   :  { %v8636_v22 = vpop.f32.mrf.mxu1  ;;  %4253 = vmax.xlane.f32.xlu1 %v4252_v39  ;;  %v8641_v38 = vpop.f32.mrf.mxu0 }
0x2ed5   :  { %v4198_v24 = vpop.f32.mrf.mxu0  ;;  %v4246_v54 = vpop.f32.mrf.mxu1 }
0x2ed6   :  { %v4255_v45 = vsel %vm219_vm2, %v4246_v54, -inf }
0x2ed7   :  { %4256 = vmax.xlane.f32.xlu0 %v4255_v45  ;;  %v8642_v40 = vpop.f32.mrf.mxu0  ;;  %v8647_v41 = vpop.f32.mrf.mxu1 }
0x2ed9   :  { %v4249_v43 = vpop.f32.mrf.mxu1 }
0x2edb   :  { %v8648_v44 = vpop.f32.mrf.mxu1 }
0x2ee4   :  { %4324 = vrot.lane.b32.xlu1 %v10316_v35, %s9431_s20 }
0x2eed   :  { %4276 = vrot.lane.b32.xlu0 %v10269_v1, %s9431_s20 }
0x2f5c   :  { %v4254_v14 = vpop.xlane.xlu1 %4253 }
0x2f5d   :  { %v4258_v48 = vsub.f32 %v4195_v34, %v4254_v14 }
0x2f5f   :  { %v4260_v53 = vmul.f32 1.442695, %v4258_v48 }
0x2f60   :  { %v4257_v57 = vpop.xlane.xlu0 %4256  ;;  %v4325_v59 = vpop.permute.xlu1 %4324 }
0x2f61   :  { %9312 = vpow2.f32 %v4260_v53  ;;  %v4259_v61 = vsub.f32 %v4246_v54, %v4257_v57  ;;  %v4330_v62 = vsel %vm344_vm3, %v4325_v59, 0 }
0x2f62   :  { %8656 = vmatpush3.bf16.msra.mxu1 %v4330_v62 }
0x2f63   :  { %v4262_v63 = vmul.f32 1.442695, %v4259_v61  ;;  %8667 = vmatprep.subr.bf16.mxu1 %v9424_v0 }
0x2f64   :  { %v4277_v2 = vpop.permute.xlu0 %4276 }
0x2f65   :  { %9314 = vpow2.f32 %v4262_v63  ;;  %v4282_v49 = vsel %vm344_vm3, %v4277_v2, 0 }
0x2f66   :  { %8650 = vmatpush3.bf16.msra.mxu0 %v4282_v49 }
0x2f67   :  { %8661 = vmatprep.subr.bf16.mxu0 %v9424_v0 }
0x2f6e   :  { %v9313_v51 = vpop.eup %9312 }
0x2f6f   :  { %v4264_v58 = vsel %vm219_vm2, %v9313_v51, 0.0 }
0x2f70   :  { %4265 = vadd.xlane.f32.xlu0 %v4264_v58 }
0x2f72   :  { %v9315_v50 = vpop.eup %9314 }
0x2f73   :  { %v4267_v6 = vsel %vm219_vm2, %v9315_v50, 0.0 }
0x2f74   :  { %4268 = vadd.xlane.f32.xlu1 %v4267_v6 }
0x2f85   :  { %4374 = vrot.lane.b32.xlu1 %v10269_v1, %s9435_s24 }
0x2f86   :  { %4424 = vrot.lane.b32.xlu0 %v10316_v35, %s9435_s24 }
0x2f89   :  { %4372 = vrot.lane.b32.xlu1 %v10336_v42, %s9435_s24 }
0x2f8a   :  { %4422 = vrot.lane.b32.xlu0 %v10342_v12, %s9435_s24 }
0x2ff9   :  { %v4266_v7 = vpop.xlane.xlu0 %4265 }
0x2ffa   :  { %9316 = vrcp.f32 %v4266_v7 }
0x2ffd   :  { %v4269_v8 = vpop.xlane.xlu1 %4268  ;;  %v4425_v18 = vpop.permute.xlu0 %4424 }
0x2ffe   :  { %9318 = vrcp.f32 %v4269_v8  ;;  %v4430_v52 = vsel %vm219_vm2, %v4425_v18, 0 }
0x3001   :  { %v4375_v11 = vpop.permute.xlu1 %4374  ;;  %v4423_v4 = vpop.permute.xlu0 %4422 }
0x3002   :  { %v4380_v17 = vsel %vm219_vm2, %v4375_v11, 0 }
0x3005   :  { %v4373_v20 = vpop.permute.xlu1 %4372 }
0x3007   :  { %v9317_v9 = vpop.eup %9316 }
0x3008   :  { %v4271_v23 = vmul.f32 %v9317_v9, %v9313_v51 }
0x300a   :  { %v4274_v19 = vpack.c.bf16 %v4271_v23, %v4271_v23 }
0x300b   :  { %v9319_v13 = vpop.eup %9318 }
0x300c   :  { %v4273_v15 = vmul.f32 %v9319_v13, %v9315_v50  ;;  %8652 = vmatmul.mubr.msk.bf16.vlgmr.msra.gmra.mxu0 %vm219_vm2, %v4274_v19 }
0x300d   :  { %8662 = vmatpush3.bf16.xpose.msra.mxu0 %v4380_v17  ;;  %8663 = vmatprep.mubr.msk.bf16.mxu0 %vm9426_vm0, %v9424_v0 }
0x300e   :  { %v4275_v10 = vpack.c.bf16 %v4273_v15, %v4273_v15  ;;  %8673 = vmatprep.subr.bf16.mxu0 %v9424_v0 }
0x3010   :  { %8658 = vmatmul.mubr.msk.bf16.vlgmr.msra.gmra.mxu1 %vm219_vm2, %v4275_v10 }
0x3011   :  { %8668 = vmatpush3.bf16.xpose.msra.mxu1 %v4430_v52  ;;  %8669 = vmatprep.mubr.msk.bf16.mxu1 %vm9426_vm0, %v9424_v0 }
0x3012   :  { %8679 = vmatprep.subr.bf16.mxu1 %v9424_v0 }
0x3014   :  { %8664 = vmatmul.mubr.msk.bf16.vlgmr.msra.gmra.mxu0 %vm219_vm2, %v4373_v20 }
0x3015   :  { %8675 = vmatprep.mubr.msk.bf16.mxu0 %vm9426_vm0, %v9424_v0 }
0x3018   :  { %8670 = vmatmul.mubr.msk.bf16.vlgmr.msra.gmra.mxu1 %vm219_vm2, %v4423_v4 }
0x3019   :  { %8681 = vmatprep.mubr.msk.bf16.mxu1 %vm9426_vm0, %v9424_v0 }
0x30cc   :  { %v10424_v60 = vpop.f32.mrf.mxu0 }
0x30ce   :  { %v8653_v33 = vpop.f32.mrf.mxu0 }
0x30d0   :  { %v4321_v46 = vpop.f32.mrf.mxu0  ;;  %v10426_v3 = vpop.f32.mrf.mxu1 }
0x30d1   :  { %v9089_v16 = vpack.i.bf16 %v10426_v3, %v10424_v60 }
0x30d2   :  { %v8654_v47 = vpop.f32.mrf.mxu0  ;;  %v8659_v55 = vpop.f32.mrf.mxu1 }
0x30d4   :  { %v4369_v56 = vpop.f32.mrf.mxu1  ;;  %v4416_v21 = vpop.f32.mrf.mxu0 }
0x30d5   :  { %v4472_v25 = vsel %vm219_vm2, %v4416_v21, -inf }
0x30d6   :  { %v8660_v26 = vpop.f32.mrf.mxu1  ;;  %4473 = vmax.xlane.f32.xlu1 %v4472_v25  ;;  %v8665_v28 = vpop.f32.mrf.mxu0 }
0x30d8   :  { %v4419_v29 = vpop.f32.mrf.mxu0  ;;  %v4466_v5 = vpop.f32.mrf.mxu1 }
0x30d9   :  { %v4475_v31 = vsel %vm219_vm2, %v4466_v5, -inf }
0x30da   :  { %4476 = vmax.xlane.f32.xlu0 %v4475_v31  ;;  %v8666_v32 = vpop.f32.mrf.mxu0  ;;  %v8671_v34 = vpop.f32.mrf.mxu1 }
0x30dc   :  { %v4469_v39 = vpop.f32.mrf.mxu1 }
0x30de   :  { %v8672_v22 = vpop.f32.mrf.mxu1 }
0x30e7   :  { %4544 = vrot.lane.b32.xlu1 %v10316_v35, %s9434_s23 }
0x30f0   :  { %4496 = vrot.lane.b32.xlu0 %v10269_v1, %s9434_s23 }
0x315f   :  { %v4474_v38 = vpop.xlane.xlu1 %4473 }
0x3160   :  { %v4478_v24 = vsub.f32 %v4416_v21, %v4474_v38 }
0x3162   :  { %v4480_v54 = vmul.f32 1.442695, %v4478_v24 }
0x3163   :  { %v4477_v45 = vpop.xlane.xlu0 %4476  ;;  %v4545_v40 = vpop.permute.xlu1 %4544 }
0x3164   :  { %9320 = vpow2.f32 %v4480_v54  ;;  %v4479_v41 = vsub.f32 %v4466_v5, %v4477_v45  ;;  %v4550_v43 = vsel %vm344_vm3, %v4545_v40, 0 }
0x3165   :  { %8680 = vmatpush3.bf16.msra.mxu1 %v4550_v43 }
0x3166   :  { %v4482_v44 = vmul.f32 1.442695, %v4479_v41  ;;  %8691 = vmatprep.subr.bf16.mxu1 %v9424_v0 }
0x3167   :  { %v4497_v14 = vpop.permute.xlu0 %4496 }
0x3168   :  { %9322 = vpow2.f32 %v4482_v44  ;;  %v4502_v48 = vsel %vm344_vm3, %v4497_v14, 0 }
0x3169   :  { %8674 = vmatpush3.bf16.msra.mxu0 %v4502_v48 }
0x316a   :  { %8685 = vmatprep.subr.bf16.mxu0 %v9424_v0 }
0x3171   :  { %v9321_v53 = vpop.eup %9320 }
0x3172   :  { %v4484_v57 = vsel %vm219_vm2, %v9321_v53, 0.0 }
0x3173   :  { %4485 = vadd.xlane.f32.xlu0 %v4484_v57 }
0x3175   :  { %v9323_v59 = vpop.eup %9322 }
0x3176   :  { %v4487_v61 = vsel %vm219_vm2, %v9323_v59, 0.0 }
0x3177   :  { %4488 = vadd.xlane.f32.xlu1 %v4487_v61  ;;  %v9163_v61 = vld [vmem:[%s10492_s17] sm:$0xff]  }
0x3188   :  { %4594 = vrot.lane.b32.xlu1 %v10269_v1, %s9438_s27 }
0x3189   :  { %4644 = vrot.lane.b32.xlu0 %v10316_v35, %s9438_s27 }
0x318c   :  { %4592 = vrot.lane.b32.xlu1 %v10336_v42, %s9438_s27 }
0x318d   :  { %4642 = vrot.lane.b32.xlu0 %v10342_v12, %s9438_s27 }
0x31fc   :  { %v4486_v62 = vpop.xlane.xlu0 %4485 }
0x31fd   :  { %9324 = vrcp.f32 %v4486_v62 }
0x3200   :  { %v4489_v63 = vpop.xlane.xlu1 %4488  ;;  %v4645_v8 = vpop.permute.xlu0 %4644 }
0x3201   :  { %9326 = vrcp.f32 %v4489_v63  ;;  %v4650_v12 = vsel %vm219_vm2, %v4645_v8, 0 }
0x3204   :  { %v4595_v51 = vpop.permute.xlu1 %4594  ;;  %v4643_v23 = vpop.permute.xlu0 %4642 }
0x3205   :  { %v4600_v7 = vsel %vm219_vm2, %v4595_v51, 0 }
0x3208   :  { %v4593_v9 = vpop.permute.xlu1 %4592 }
0x320a   :  { %v9325_v2 = vpop.eup %9324 }
0x320b   :  { %v4491_v49 = vmul.f32 %v9325_v2, %v9321_v53 }
0x320d   :  { %v4494_v58 = vpack.c.bf16 %v4491_v49, %v4491_v49 }
0x320e   :  { %v9327_v50 = vpop.eup %9326 }
0x320f   :  { %v4493_v6 = vmul.f32 %v9327_v50, %v9323_v59  ;;  %8676 = vmatmul.mubr.msk.bf16.vlgmr.msra.gmra.mxu0 %vm219_vm2, %v4494_v58  ;;  %v9162_v59 = vld [vmem:[%s10492_s17 + $0x8] sm:$0xff]  }
0x3210   :  { %8686 = vmatpush3.bf16.xpose.msra.mxu0 %v4600_v7  ;;  %8687 = vmatprep.mubr.msk.bf16.mxu0 %vm9426_vm0, %v9424_v0 }
0x3211   :  { %v4495_v42 = vpack.c.bf16 %v4493_v6, %v4493_v6  ;;  %8697 = vmatprep.subr.bf16.mxu0 %v9424_v0 }
0x3213   :  { %8682 = vmatmul.mubr.msk.bf16.vlgmr.msra.gmra.mxu1 %vm219_vm2, %v4495_v42 }
0x3214   :  { %8692 = vmatpush3.bf16.xpose.msra.mxu1 %v4650_v12  ;;  %8693 = vmatprep.mubr.msk.bf16.mxu1 %vm9426_vm0, %v9424_v0 }
0x3215   :  { %8703 = vmatprep.subr.bf16.mxu1 %v9424_v0 }
0x3217   :  { %8688 = vmatmul.mubr.msk.bf16.vlgmr.msra.gmra.mxu0 %vm219_vm2, %v4593_v9 }
0x3218   :  { %8699 = vmatprep.mubr.msk.bf16.mxu0 %vm9426_vm0, %v9424_v0 }
0x321b   :  { %8694 = vmatmul.mubr.msk.bf16.vlgmr.msra.gmra.mxu1 %vm219_vm2, %v4643_v23 }
0x321c   :  { %8705 = vmatprep.mubr.msk.bf16.mxu1 %vm9426_vm0, %v9424_v0 }
0x32cf   :  { %v4538_v11 = vpop.f32.mrf.mxu0 }
0x32d1   :  { %v8677_v19 = vpop.f32.mrf.mxu0 }
0x32d3   :  { %v4541_v13 = vpop.f32.mrf.mxu0  ;;  %v4586_v15 = vpop.f32.mrf.mxu1 }
0x32d4   :  { %v9094_v17 = vpack.i.bf16 %v4586_v15, %v4538_v11 }
0x32d5   :  { %v8678_v18 = vpop.f32.mrf.mxu0  ;;  %v8683_v10 = vpop.f32.mrf.mxu1 }
0x32d7   :  { %v4589_v52 = vpop.f32.mrf.mxu1  ;;  %v4636_v20 = vpop.f32.mrf.mxu0 }
0x32d8   :  { %v4692_v4 = vsel %vm219_vm2, %v4636_v20, -inf }
0x32d9   :  { %v8684_v33 = vpop.f32.mrf.mxu1  ;;  %4693 = vmax.xlane.f32.xlu1 %v4692_v4  ;;  %v8689_v46 = vpop.f32.mrf.mxu0 }
0x32db   :  { %v4639_v47 = vpop.f32.mrf.mxu0  ;;  %v4686_v55 = vpop.f32.mrf.mxu1 }
0x32dc   :  { %v4695_v56 = vsel %vm219_vm2, %v4686_v55, -inf }
0x32dd   :  { %4696 = vmax.xlane.f32.xlu0 %v4695_v56  ;;  %v8690_v21 = vpop.f32.mrf.mxu0  ;;  %v8695_v25 = vpop.f32.mrf.mxu1 }
0x32df   :  { %v4689_v26 = vpop.f32.mrf.mxu1 }
0x32e1   :  { %v8696_v28 = vpop.f32.mrf.mxu1 }
0x3362   :  { %v4694_v29 = vpop.xlane.xlu1 %4693 }
0x3363   :  { %v4698_v5 = vsub.f32 %v4636_v20, %v4694_v29 }
0x3365   :  { %v4700_v31 = vmul.f32 1.442695, %v4698_v5 }
0x3366   :  { %v4697_v32 = vpop.xlane.xlu0 %4696 }
0x3367   :  { %9328 = vpow2.f32 %v4700_v31  ;;  %v4699_v34 = vsub.f32 %v4686_v55, %v4697_v32 }
0x3369   :  { %v4702_v39 = vmul.f32 1.442695, %v4699_v34 }
0x336b   :  { %9330 = vpow2.f32 %v4702_v39 }
0x3374   :  { %v9329_v22 = vpop.eup %9328 }
0x3375   :  { %v4704_v38 = vsel %vm219_vm2, %v9329_v22, 0.0 }
0x3376   :  { %4705 = vadd.xlane.f32.xlu0 %v4704_v38 }
0x3378   :  { %v9331_v24 = vpop.eup %9330 }
0x3379   :  { %v4707_v54 = vsel %vm219_vm2, %v9331_v24, 0.0 }
0x337a   :  { %4708 = vadd.xlane.f32.xlu1 %v4707_v54 }
0x338b   :  { %4764 = vrot.lane.b32.xlu1 %v10316_v35, %s9437_s26 }
0x338c   :  { %4716 = vrot.lane.b32.xlu0 %v10269_v1, %s9437_s26 }
0x338f   :  { %9090 = vrot.lane.b32.xlu1 %v9089_v16, %s11031_s28  ;;  %s9465_s28 = smov 27  }
0x3390   :  { %9095 = vrot.lane.b32.xlu0 %v9094_v17, %s11029_s2  ;;  %s10547_s2 = sld [smem:[%s11026_s0 + %s9464_s18]]  }
0x3391   :  { %s10556_s10 = sld [smem:[%s11026_s0 + %s9465_s28]]  }
0x33ff   :  { %v4706_v45 = vpop.xlane.xlu0 %4705 }
0x3400   :  { %9332 = vrcp.f32 %v4706_v45  ;;  %v9164_v45 = vld [vmem:[%s9705_s11 + $0x8] sm:$0xff]  }
0x3403   :  { %v4717_v40 = vpop.permute.xlu0 %4716  ;;  %v4709_v41 = vpop.xlane.xlu1 %4708 }
0x3404   :  { %v4722_v43 = vsel %vm344_vm3, %v4717_v40, 0  ;;  %9334 = vrcp.f32 %v4709_v41  ;;  %v9166_v40 = vld [vmem:[%s10529_s8 + $0x18] sm:$0xff]  }
0x3405   :  { %8698 = vmatpush3.bf16.msra.mxu0 %v4722_v43 }
0x3406   :  { %8709 = vmatprep.subr.bf16.mxu0 %v9424_v0 }
0x3407   :  { %v4765_v44 = vpop.permute.xlu1 %4764  ;;  %v9096_v9 = vpop.permute.xlu0 %9095 }
0x3408   :  { %v4770_v14 = vsel %vm344_vm3, %v4765_v44, 0  ;;  %v9098_v19 = vunpack.i.h.bf16 %v9096_v9  ;;  %v9097_v13 = vunpack.i.l.bf16 %v9096_v9 }
0x3409   :  { %8704 = vmatpush3.bf16.msra.mxu1 %v4770_v14 }
0x340a   :  { %8717 = vmatprep.subr.bf16.mxu1 %v9424_v0 }
0x340b   :  { %v9091_v8 = vpop.permute.xlu1 %9090 }
0x340c   :  { %v9093_v42 = vunpack.i.h.bf16 %v9091_v8  ;;  %v9092_v12 = vunpack.i.l.bf16 %v9091_v8 }
0x340d   :  { %v9333_v60 = vpop.eup %9332 }
0x340e   :  { %v4711_v3 = vmul.f32 %v9333_v60, %v9329_v22  ;;  %v4837_v23 = vsel %vm219_vm2, %v10386_v30, %v9093_v42  ;;  %v4836_v11 = vsel %vm219_vm2, %v10384_v27, %v9092_v12  ;;  %v7834_v27 = vld [vmem:[%s10513_s3] ss:$0 sm:$0xff] }
0x340f   :  { %v4838_v10 = vsel %vm1122_vm4, %v4836_v11, %v9097_v13  ;;  %v4839_v52 = vsel %vm1122_vm4, %v4837_v23, %v9098_v19 }
0x3410   :  { %v4714_v16 = vpack.c.bf16 %v4711_v3, %v4711_v3 }
0x3411   :  { %v9335_v48 = vpop.eup %9334 }
0x3412   :  { %v4713_v53 = vmul.f32 %v9335_v48, %v9331_v24  ;;  %8700 = vmatmul.mubr.msk.bf16.vlgmr.msra.gmra.mxu0 %vm219_vm2, %v4714_v16 }
0x3413   :  { %8713 = vmatprep.mubr.msk.bf16.mxu0 %vm9426_vm0, %v9424_v0  ;;  %8710 = vmatpush3.bf16.msra.mxu0 %v9162_v59 }
0x3414   :  { %v4715_v57 = vpack.c.bf16 %v4713_v53, %v4713_v53  ;;  %8711 = vmatprep.subr.bf16.mxu0 %v9424_v0  ;;  %v7838_v53 = vld [vmem:[%s10305_s29 + $0x1] ss:$0 sm:$0xff] }
0x3416   :  { %8706 = vmatmul.mubr.msk.bf16.vlgmr.msra.gmra.mxu1 %vm219_vm2, %v4715_v57 }
0x3417   :  { %8721 = vmatprep.mubr.msk.bf16.mxu1 %vm9426_vm0, %v9424_v0  ;;  %8712 = vmatpush3.bf16.msra.mxu0 %v9163_v61 }
0x3418   :  { %8725 = vmatprep.subr.bf16.mxu0 %v9424_v0  ;;  %8718 = vmatpush3.bf16.msra.mxu1 %v9164_v45 }
0x3419   :  { %8719 = vmatprep.subr.bf16.mxu1 %v9424_v0 }
0x34d2   :  { %v4758_v62 = vpop.f32.mrf.mxu0 }
0x34d4   :  { %v8701_v63 = vpop.f32.mrf.mxu0 }
0x34d6   :  { %v4761_v2 = vpop.f32.mrf.mxu0  ;;  %v4806_v49 = vpop.f32.mrf.mxu1 }
0x34d7   :  { %v9099_v51 = vpack.i.bf16 %v4806_v49, %v4758_v62  ;;  %v7839_v62 = vld [vmem:[%s10310_s1 + $0x1] ss:$0 sm:$0xff] }
0x34d8   :  { %v8702_v58 = vpop.f32.mrf.mxu0  ;;  %v8707_v50 = vpop.f32.mrf.mxu1 }
0x34d9   :  { %9100 = vrot.lane.b32.xlu1 %v9099_v51, %s11033_s6  ;;  %v9167_v58 = vld [vmem:[%s10529_s8 + $0x10] sm:$0xff]   ;;  %v9168_v50 = vld [vmem:[%s10529_s8 + $0x8] sm:$0xff]  }
0x34da   :  { %v4809_v6 = vpop.f32.mrf.mxu1 }
0x34db   :  { %v9169_v6 = vld [vmem:[%s10529_s8] sm:$0xff]  }
0x34dc   :  { %v8708_v7 = vpop.f32.mrf.mxu1 }
0x34dd   :  { %v7840_v7 = vld [vmem:[%s10547_s2] ss:$0 sm:$0xff] }
0x354b   :  { %v9101_v15 = vpop.permute.xlu1 %9100 }
0x354c   :  { %v9103_v17 = vunpack.i.h.bf16 %v9101_v15  ;;  %v9102_v18 = vunpack.i.l.bf16 %v9101_v15 }
0x354e   :  { %v4841_v20 = vsel %vm1125_vm5, %v4839_v52, %v9103_v17  ;;  %v4840_v4 = vsel %vm1125_vm5, %v4838_v10, %v9102_v18  ;;  %v7844_v17 = vld [vmem:[%s10556_s10] ss:$0 sm:$0xff] }
0x354f   :  { %v4842_v33 = vpack.c.bf16 %v4841_v20, %v4840_v4 }
0x3551   :  { %8714 = vmatmul.mubr.msk.bf16.vlgmr.msra.gmra.mxu0 %vm169_vm1, %v4842_v33 }
0x3552   :  { %8733 = vmatprep.mubr.msk.bf16.mxu0 %vm9426_vm0, %v9424_v0  ;;  %8726 = vmatpush3.bf16.msra.mxu0 %v9166_v40 }
0x3553   :  { %8727 = vmatprep.subr.bf16.mxu0 %v9424_v0 }
0x3556   :  { %8728 = vmatpush3.bf16.msra.mxu0 %v9167_v58 }
0x3557   :  { %8729 = vmatprep.subr.bf16.mxu0 %v9424_v0 }
0x355a   :  { %8730 = vmatpush3.bf16.msra.mxu0 %v9168_v50 }
0x355b   :  { %8731 = vmatprep.subr.bf16.mxu0 %v9424_v0 }
0x355e   :  { %8732 = vmatpush3.bf16.msra.mxu0 %v9169_v6 }
0x355f   :  { %8751 = vmatprep.subr.bf16.mxu0 %v9424_v0 }
0x3611   :  { %v4901_v30 = vpop.f32.mrf.mxu0 }
0x3612   :  { %v4902_v46 = vadd.f32 %v7834_v27, %v4901_v30 }
0x3613   :  { %v8715_v47 = vpop.f32.mrf.mxu0 }
0x3614   :  { %v4908_v55 = vadd.f32 %v4902_v46, %v10318_v36 }
0x3615   :  { %v4904_v56 = vpop.f32.mrf.mxu0 }
0x3616   :  { %v4905_v21 = vadd.f32 %v7834_v27, %v4904_v56  ;;  %v4912_v25 = vsel %vm169_vm1, %v4908_v55, 0.0 }
0x3617   :  { %4913 = vadd.xlane.f32.xlu0 %v4912_v25  ;;  %v8716_v26 = vpop.f32.mrf.mxu0 }
0x3618   :  { %v4909_v28 = vadd.f32 %v4905_v21, %v10320_v37  ;;  %v9165_v37 = vld [vmem:[%s9705_s11] sm:$0xff]  }
0x3619   :  { %8720 = vmatpush3.bf16.msra.mxu1 %v9165_v37 }
0x361a   :  { %v4915_v29 = vsel %vm169_vm1, %v4909_v28, 0.0  ;;  %8737 = vmatprep.subr.bf16.mxu1 %v9424_v0 }
0x361b   :  { %4916 = vadd.xlane.f32.xlu1 %v4915_v29 }
0x36a0   :  { %v4914_v5 = vpop.xlane.xlu0 %4913 }
0x36a1   :  { %v4918_v31 = vmul.f32 0.03125, %v4914_v5 }
0x36a3   :  { %v4920_v32 = vsub.f32 %v4908_v55, %v4918_v31 }
0x36a4   :  { %v4917_v34 = vpop.xlane.xlu1 %4916 }
0x36a5   :  { %v4919_v39 = vmul.f32 0.03125, %v4917_v34  ;;  %v4922_v22 = vmul.f32 %v4920_v32, %v4920_v32  ;;  %v9170_v34 = vld [vmem:[%s10037_s9 + $0x18] sm:$0xff]  }
0x36a7   :  { %v4921_v36 = vsub.f32 %v4909_v28, %v4919_v39  ;;  %v4924_v38 = vsel %vm169_vm1, %v4922_v22, 0.0  ;;  %v9171_v39 = vld [vmem:[%s10037_s9 + $0x10] sm:$0xff]  }
0x36a8   :  { %4925 = vadd.xlane.f32.xlu0 %v4924_v38 }
0x36a9   :  { %v4923_v24 = vmul.f32 %v4921_v36, %v4921_v36 }
0x36ab   :  { %v4927_v54 = vsel %vm169_vm1, %v4923_v24, 0.0 }
0x36ac   :  { %4928 = vadd.xlane.f32.xlu0 %v4927_v54 }
0x3731   :  { %v4926_v41 = vpop.xlane.xlu0 %4925 }
0x3732   :  { %v4930_v43 = vmul.f32 0.03125, %v4926_v41  ;;  %v7850_v41 = vld [vmem:[%s10305_s29 + $0x2] ss:$0 sm:$0xff] }
0x3734   :  { %v4932_v44 = vadd.f32 1e-05, %v4930_v43 }
0x3735   :  { %v4929_v14 = vpop.xlane.xlu0 %4928 }
0x3736   :  { %9336 = vrsqrt.f32 %v4932_v44  ;;  %v4931_v60 = vmul.f32 0.03125, %v4929_v14 }
0x3738   :  { %v4933_v3 = vadd.f32 1e-05, %v4931_v60  ;;  %v7851_v60 = vld [vmem:[%s10310_s1 + $0x2] ss:$0 sm:$0xff] }
0x373a   :  { %9338 = vrsqrt.f32 %v4933_v3 }
0x3743   :  { %v9337_v16 = vpop.eup %9336 }
0x3744   :  { %v4936_v48 = vmul.f32 %v9337_v16, %v4920_v32 }
0x3746   :  { %v4942_v59 = vmul.f32 %v7838_v53, %v4936_v48 }
0x3747   :  { %v9339_v57 = vpop.eup %9338 }
0x3748   :  { %v4937_v61 = vmul.f32 %v9339_v57, %v4921_v36  ;;  %v4948_v2 = vadd.f32 %v7839_v62, %v4942_v59  ;;  %v7856_v57 = vld [vmem:[%s10068_s15 + $0x1] ss:$0 sm:$0xff] }
0x374a   :  { %v4943_v63 = vmul.f32 %v7838_v53, %v4937_v61 }
0x374c   :  { %v4949_v49 = vadd.f32 %v7839_v62, %v4943_v63 }
0x374e   :  { %v4950_v51 = vpack.c.bf16 %v4949_v49, %v4948_v2 }
0x3750   :  { %8722 = vmatmul.mubr.msk.bf16.vlgmr.msra.gmra.mxu1 %vm169_vm1, %v4950_v51 }
0x3751   :  { %8741 = vmatprep.mubr.msk.bf16.mxu1 %vm9426_vm0, %v9424_v0  ;;  %8738 = vmatpush3.bf16.msra.mxu1 %v9170_v34 }
0x3752   :  { %8739 = vmatprep.subr.bf16.mxu1 %v9424_v0 }
0x3755   :  { %8740 = vmatpush3.bf16.msra.mxu1 %v9171_v39 }
0x3756   :  { %8745 = vmatprep.subr.bf16.mxu1 %v9424_v0 }
0x3810   :  { %v5009_v8 = vpop.f32.mrf.mxu1 }
0x3811   :  { %v5010_v12 = vadd.f32 %v7840_v7, %v5009_v8 }
0x3812   :  { %v8723_v42 = vpop.f32.mrf.mxu1 }
0x3813   :  { %v5016_v19 = vmax.f32 %v5010_v12, 0.0  ;;  %v10600_v12 = vld [vmem:[%s10101_s16] sm:$0xff] }
0x3814   :  { %v5012_v9 = vpop.f32.mrf.mxu1 }
0x3815   :  { %v5013_v23 = vadd.f32 %v7840_v7, %v5012_v9 }
0x3816   :  { %v8724_v11 = vpop.f32.mrf.mxu1 }
0x3817   :  { %v5017_v13 = vmax.f32 %v5013_v23, 0.0 }
0x3819   :  { %v5018_v15 = vpack.c.bf16 %v5017_v13, %v5016_v19 }
0x381b   :  { %8734 = vmatmul.mubr.msk.bf16.vlgmr.msra.gmra.mxu0 %vm1343_vm6, %v5018_v15  ;;  %v10605_v15 = vld [vmem:[%s10101_s16 + $0x8] sm:$0xff]  ;;  %s9470_s16 = smov 34  }
0x381c   :  { %8753 = vmatprep.mubr.msk.bf16.mxu0 %vm9426_vm0, %v9424_v0 }
0x38db   :  { %v5093_v18 = vpop.f32.mrf.mxu0 }
0x38dc   :  { %v5094_v10 = vadd.f32 %v7844_v17, %v5093_v18 }
0x38dd   :  { %v8735_v52 = vpop.f32.mrf.mxu0 }
0x38de   :  { %v5100_v20 = vadd.f32 %v5094_v10, %v4948_v2 }
0x38df   :  { %v5096_v4 = vpop.f32.mrf.mxu0 }
0x38e0   :  { %v5097_v33 = vadd.f32 %v7844_v17, %v5096_v4  ;;  %v5104_v27 = vsel %vm169_vm1, %v5100_v20, 0.0 }
0x38e1   :  { %5105 = vadd.xlane.f32.xlu1 %v5104_v27  ;;  %v8736_v30 = vpop.f32.mrf.mxu0 }
0x38e2   :  { %v5101_v46 = vadd.f32 %v5097_v33, %v4949_v49 }
0x38e4   :  { %v5107_v47 = vsel %vm169_vm1, %v5101_v46, 0.0 }
0x38e5   :  { %5108 = vadd.xlane.f32.xlu0 %v5107_v47 }
0x396a   :  { %v5106_v55 = vpop.xlane.xlu1 %5105 }
0x396b   :  { %v5110_v56 = vmul.f32 0.03125, %v5106_v55 }
0x396d   :  { %v5112_v21 = vsub.f32 %v5100_v20, %v5110_v56 }
0x396e   :  { %v5109_v25 = vpop.xlane.xlu0 %5108 }
0x396f   :  { %v5111_v26 = vmul.f32 0.03125, %v5109_v25  ;;  %v5114_v28 = vmul.f32 %v5112_v21, %v5112_v21 }
0x3971   :  { %v5113_v29 = vsub.f32 %v5101_v46, %v5111_v26  ;;  %v5116_v5 = vsel %vm169_vm1, %v5114_v28, 0.0 }
0x3972   :  { %5117 = vadd.xlane.f32.xlu1 %v5116_v5 }
0x3973   :  { %v5115_v31 = vmul.f32 %v5113_v29, %v5113_v29 }
0x3975   :  { %v5119_v32 = vsel %vm169_vm1, %v5115_v31, 0.0 }
0x3976   :  { %5120 = vadd.xlane.f32.xlu0 %v5119_v32 }
0x39fb   :  { %v5118_v22 = vpop.xlane.xlu1 %5117 }
0x39fc   :  { %v5122_v36 = vmul.f32 0.03125, %v5118_v22 }
0x39fe   :  { %v5124_v38 = vadd.f32 1e-05, %v5122_v36 }
0x39ff   :  { %v5121_v24 = vpop.xlane.xlu0 %5120 }
0x3a00   :  { %9340 = vrsqrt.f32 %v5124_v38  ;;  %v5123_v54 = vmul.f32 0.03125, %v5121_v24 }
0x3a02   :  { %v5125_v45 = vadd.f32 1e-05, %v5123_v54 }
0x3a04   :  { %9342 = vrsqrt.f32 %v5125_v45 }
0x3a0d   :  { %v9341_v37 = vpop.eup %9340 }
0x3a0e   :  { %v5128_v40 = vmul.f32 %v9341_v37, %v5112_v21 }
0x3a10   :  { %v5134_v44 = vmul.f32 %v7850_v41, %v5128_v40 }
0x3a11   :  { %v9343_v43 = vpop.eup %9342 }
0x3a12   :  { %v5129_v14 = vmul.f32 %v9343_v43, %v5113_v29  ;;  %v10569_v16 = vadd.f32 %v7851_v60, %v5134_v44 }
0x3a14   :  { %v5135_v3 = vmul.f32 %v7850_v41, %v5129_v14 }
0x3a16   :  { %v10571_v48 = vadd.f32 %v7851_v60, %v5135_v3 }
0x3a18   :  { %v5142_v53 = vpack.c.bf16 %v10571_v48, %v10569_v16 }
0x3a1a   :  { %8742 = vmatmul.mubr.msk.bf16.vlgmr.msra.gmra.mxu1 %vm169_vm1, %v5142_v53 }
0x3a1b   :  { %8747 = vmatprep.mubr.msk.bf16.mxu1 %vm9426_vm0, %v9424_v0 }
0x3ada   :  { %v5202_v59 = vpop.f32.mrf.mxu1 }
0x3adb   :  { %v5203_v61 = vadd.f32 %v7856_v57, %v5202_v59 }
0x3adc   :  { %v8743_v62 = vpop.f32.mrf.mxu1 }
0x3add   :  { %v10579_v63 = vpack.c.bf16 %v5203_v61, %v5203_v61 }
0x3ade   :  { %v5205_v2 = vpop.f32.mrf.mxu1 }
0x3adf   :  { %v5206_v49 = vadd.f32 %v7856_v57, %v5205_v2  ;;  %5212 = vrot.lane.b32.xlu1 %v10579_v63, %s9428_s14 }
0x3ae0   :  { %v8744_v51 = vpop.f32.mrf.mxu1 }
0x3ae1   :  { %v10583_v58 = vpack.c.bf16 %v5206_v49, %v5206_v49 }
0x3ae3   :  { %5261 = vrot.lane.b32.xlu0 %v10583_v58, %s9428_s14  ;;  %s11034_s14 = smov 8  }
0x3b51   :  { %v5213_v50 = vpop.permute.xlu1 %5212 }
0x3b52   :  { %v5218_v6 = vsel %vm219_vm2, %v5213_v50, 0 }
0x3b53   :  { %8746 = vmatpush3.bf16.xpose.msra.mxu1 %v5218_v6 }
0x3b54   :  { %8757 = vmatprep.subr.bf16.mxu1 %v9424_v0 }
0x3b55   :  { %v5262_v7 = vpop.permute.xlu0 %5261 }
0x3b56   :  { %v5267_v8 = vsel %vm219_vm2, %v5262_v7, 0 }
0x3b57   :  { %8752 = vmatpush3.bf16.xpose.msra.mxu0 %v5267_v8 }
0x3b58   :  { %8763 = vmatprep.subr.bf16.mxu0 %v9424_v0 }
0x3b5a   :  { %8748 = vmatmul.mubr.msk.bf16.vlgmr.msra.gmra.mxu1 %vm219_vm2, %v10579_v63 }
0x3b5b   :  { %8759 = vmatprep.mubr.msk.bf16.mxu1 %vm9426_vm0, %v9424_v0 }
0x3b5e   :  { %8754 = vmatmul.mubr.msk.bf16.vlgmr.msra.gmra.mxu0 %vm219_vm2, %v10583_v58 }
0x3b5f   :  { %8765 = vmatprep.mubr.msk.bf16.mxu0 %vm9426_vm0, %v9424_v0 }
0x3c1a   :  { %v5254_v42 = vpop.f32.mrf.mxu1 }
0x3c1b   :  { %v5255_v9 = vadd.f32 %v10600_v12, %v5254_v42 }
0x3c1c   :  { %v8749_v23 = vpop.f32.mrf.mxu1 }
0x3c1d   :  { %v5309_v11 = vsel %vm219_vm2, %v5255_v9, -inf }
0x3c1e   :  { %5310 = vmax.xlane.f32.xlu1 %v5309_v11  ;;  %v5257_v19 = vpop.f32.mrf.mxu1  ;;  %v5303_v13 = vpop.f32.mrf.mxu0 }
0x3c1f   :  { %v5304_v17 = vadd.f32 %v10605_v15, %v5303_v13 }
0x3c20   :  { %v8750_v18 = vpop.f32.mrf.mxu1  ;;  %v8755_v10 = vpop.f32.mrf.mxu0 }
0x3c21   :  { %v5312_v52 = vsel %vm219_vm2, %v5304_v17, -inf }
0x3c22   :  { %5313 = vmax.xlane.f32.xlu0 %v5312_v52  ;;  %v5306_v20 = vpop.f32.mrf.mxu0 }
0x3c24   :  { %v8756_v4 = vpop.f32.mrf.mxu0 }
0x3c2f   :  { %5333 = vrot.lane.b32.xlu1 %v10579_v63, %s9430_s19 }
0x3ca7   :  { %v5311_v33 = vpop.xlane.xlu1 %5310 }
0x3ca8   :  { %v5315_v27 = vsub.f32 %v5255_v9, %v5311_v33 }
0x3caa   :  { %v5317_v30 = vmul.f32 1.442695, %v5315_v27 }
0x3cab   :  { %v5334_v46 = vpop.permute.xlu1 %5333  ;;  %v5314_v47 = vpop.xlane.xlu0 %5313 }
0x3cac   :  { %9344 = vpow2.f32 %v5317_v30  ;;  %v5339_v55 = vsel %vm344_vm3, %v5334_v46, 0  ;;  %v5316_v56 = vsub.f32 %v5304_v17, %v5314_v47 }
0x3cad   :  { %8758 = vmatpush3.bf16.msra.mxu1 %v5339_v55 }
0x3cae   :  { %v5319_v21 = vmul.f32 1.442695, %v5316_v56  ;;  %8769 = vmatprep.subr.bf16.mxu1 %v9424_v0 }
0x3cb0   :  { %9346 = vpow2.f32 %v5319_v21 }
0x3cb9   :  { %v9345_v25 = vpop.eup %9344 }
0x3cba   :  { %v5321_v26 = vsel %vm219_vm2, %v9345_v25, 0.0 }
0x3cbb   :  { %5322 = vadd.xlane.f32.xlu1 %v5321_v26 }
0x3cbd   :  { %v9347_v28 = vpop.eup %9346 }
0x3cbe   :  { %v5324_v29 = vsel %vm219_vm2, %v9347_v28, 0.0 }
0x3cbf   :  { %5325 = vadd.xlane.f32.xlu0 %v5324_v29 }
0x3ccc   :  { %5431 = vrot.lane.b32.xlu1 %v10579_v63, %s9431_s20 }
0x3cd0   :  { %5481 = vrot.lane.b32.xlu1 %v10583_v58, %s9431_s20  ;;  %s11035_s20 = smov 16  }
0x3cd4   :  { %5479 = vrot.lane.b32.xlu1 %v10583_v58, %s9432_s21 }
0x3cd5   :  { %5381 = vrot.lane.b32.xlu0 %v10583_v58, %s9430_s19 }
0x3cd9   :  { %5429 = vrot.lane.b32.xlu0 %v10579_v63, %s9432_s21 }
0x3d44   :  { %v5323_v5 = vpop.xlane.xlu1 %5322 }
0x3d45   :  { %9348 = vrcp.f32 %v5323_v5 }
0x3d48   :  { %v5326_v31 = vpop.xlane.xlu0 %5325  ;;  %v5432_v22 = vpop.permute.xlu1 %5431 }
0x3d49   :  { %9350 = vrcp.f32 %v5326_v31  ;;  %v5437_v54 = vsel %vm219_vm2, %v5432_v22, 0 }
0x3d4c   :  { %v5382_v32 = vpop.permute.xlu0 %5381  ;;  %v5482_v37 = vpop.permute.xlu1 %5481 }
0x3d4d   :  { %v5387_v34 = vsel %vm344_vm3, %v5382_v32, 0  ;;  %v5487_v41 = vsel %vm219_vm2, %v5482_v37, 0 }
0x3d4e   :  { %8764 = vmatpush3.bf16.msra.mxu0 %v5387_v34 }
0x3d4f   :  { %8775 = vmatprep.subr.bf16.mxu0 %v9424_v0 }
0x3d50   :  { %v5430_v43 = vpop.permute.xlu0 %5429  ;;  %v5480_v44 = vpop.permute.xlu1 %5479 }
0x3d52   :  { %v9349_v39 = vpop.eup %9348 }
0x3d53   :  { %v5328_v36 = vmul.f32 %v9349_v39, %v9345_v25 }
0x3d55   :  { %v5331_v38 = vpack.c.bf16 %v5328_v36, %v5328_v36 }
0x3d56   :  { %v9351_v24 = vpop.eup %9350 }
0x3d57   :  { %v5330_v45 = vmul.f32 %v9351_v24, %v9347_v28  ;;  %8760 = vmatmul.mubr.msk.bf16.vlgmr.msra.gmra.mxu1 %vm219_vm2, %v5331_v38 }
0x3d58   :  { %8770 = vmatpush3.bf16.xpose.msra.mxu1 %v5437_v54  ;;  %8771 = vmatprep.mubr.msk.bf16.mxu1 %vm9426_vm0, %v9424_v0 }
0x3d59   :  { %v5332_v40 = vpack.c.bf16 %v5330_v45, %v5330_v45  ;;  %8781 = vmatprep.subr.bf16.mxu1 %v9424_v0 }
0x3d5b   :  { %8766 = vmatmul.mubr.msk.bf16.vlgmr.msra.gmra.mxu0 %vm219_vm2, %v5332_v40 }
0x3d5c   :  { %8776 = vmatpush3.bf16.xpose.msra.mxu0 %v5487_v41  ;;  %8777 = vmatprep.mubr.msk.bf16.mxu0 %vm9426_vm0, %v9424_v0 }
0x3d5d   :  { %8787 = vmatprep.subr.bf16.mxu0 %v9424_v0 }
0x3d5f   :  { %8772 = vmatmul.mubr.msk.bf16.vlgmr.msra.gmra.mxu1 %vm219_vm2, %v5430_v43 }
0x3d60   :  { %8783 = vmatprep.mubr.msk.bf16.mxu1 %vm9426_vm0, %v9424_v0 }
0x3d63   :  { %8778 = vmatmul.mubr.msk.bf16.vlgmr.msra.gmra.mxu0 %vm219_vm2, %v5480_v44 }
0x3d64   :  { %8789 = vmatprep.mubr.msk.bf16.mxu0 %vm9426_vm0, %v9424_v0 }
0x3e17   :  { %v10643_v14 = vpop.f32.mrf.mxu1 }
0x3e19   :  { %v8761_v60 = vpop.f32.mrf.mxu1 }
0x3e1b   :  { %v5378_v3 = vpop.f32.mrf.mxu1  ;;  %v10645_v53 = vpop.f32.mrf.mxu0 }
0x3e1d   :  { %v8762_v57 = vpop.f32.mrf.mxu1  ;;  %v8767_v59 = vpop.f32.mrf.mxu0 }
0x3e1f   :  { %v5426_v61 = vpop.f32.mrf.mxu0  ;;  %v5473_v62 = vpop.f32.mrf.mxu1 }
0x3e20   :  { %v5474_v2 = vadd.f32 %v10600_v12, %v5473_v62 }
0x3e21   :  { %v8768_v49 = vpop.f32.mrf.mxu0  ;;  %v8773_v51 = vpop.f32.mrf.mxu1 }
0x3e22   :  { %v5529_v50 = vsel %vm219_vm2, %v5474_v2, -inf }
0x3e23   :  { %5530 = vmax.xlane.f32.xlu0 %v5529_v50  ;;  %v5476_v6 = vpop.f32.mrf.mxu1  ;;  %v5523_v7 = vpop.f32.mrf.mxu0 }
0x3e24   :  { %v5524_v8 = vadd.f32 %v10605_v15, %v5523_v7 }
0x3e25   :  { %v8774_v42 = vpop.f32.mrf.mxu1  ;;  %v8779_v9 = vpop.f32.mrf.mxu0 }
0x3e26   :  { %v5532_v23 = vsel %vm219_vm2, %v5524_v8, -inf }
0x3e27   :  { %5533 = vmax.xlane.f32.xlu1 %v5532_v23  ;;  %v5526_v11 = vpop.f32.mrf.mxu0 }
0x3e29   :  { %v8780_v19 = vpop.f32.mrf.mxu0 }
0x3e38   :  { %5553 = vrot.lane.b32.xlu1 %v10579_v63, %s9433_s22 }
0x3e3c   :  { %5651 = vrot.lane.b32.xlu1 %v10579_v63, %s9434_s23 }
0x3e40   :  { %5701 = vrot.lane.b32.xlu1 %v10583_v58, %s9434_s23 }
0x3e44   :  { %5699 = vrot.lane.b32.xlu1 %v10583_v58, %s9435_s24 }
0x3eac   :  { %v5531_v13 = vpop.xlane.xlu0 %5530 }
0x3ead   :  { %v5535_v17 = vsub.f32 %v5474_v2, %v5531_v13 }
0x3eaf   :  { %v5537_v18 = vmul.f32 1.442695, %v5535_v17 }
0x3eb0   :  { %v5534_v10 = vpop.xlane.xlu1 %5533 }
0x3eb1   :  { %9352 = vpow2.f32 %v5537_v18  ;;  %v5536_v52 = vsub.f32 %v5524_v8, %v5534_v10 }
0x3eb3   :  { %v5539_v20 = vmul.f32 1.442695, %v5536_v52 }
0x3eb4   :  { %v5554_v4 = vpop.permute.xlu1 %5553 }
0x3eb5   :  { %9354 = vpow2.f32 %v5539_v20  ;;  %v5559_v33 = vsel %vm344_vm3, %v5554_v4, 0 }
0x3eb6   :  { %8782 = vmatpush3.bf16.msra.mxu1 %v5559_v33 }
0x3eb7   :  { %8793 = vmatprep.subr.bf16.mxu1 %v9424_v0 }
0x3eb8   :  { %v5652_v28 = vpop.permute.xlu1 %5651 }
0x3eb9   :  { %v5657_v32 = vsel %vm219_vm2, %v5652_v28, 0 }
0x3ebc   :  { %v5702_v39 = vpop.permute.xlu1 %5701 }
0x3ebd   :  { %v5707_v36 = vsel %vm219_vm2, %v5702_v39, 0 }
0x3ebe   :  { %v9353_v27 = vpop.eup %9352 }
0x3ebf   :  { %v5541_v30 = vsel %vm219_vm2, %v9353_v27, 0.0 }
0x3ec0   :  { %5542 = vadd.xlane.f32.xlu0 %v5541_v30  ;;  %v5700_v24 = vpop.permute.xlu1 %5699 }
0x3ec2   :  { %v9355_v46 = vpop.eup %9354 }
0x3ec3   :  { %v5544_v47 = vsel %vm219_vm2, %v9355_v46, 0.0 }
0x3ec4   :  { %5545 = vadd.xlane.f32.xlu0 %v5544_v47 }
0x3eda   :  { %5601 = vrot.lane.b32.xlu0 %v10583_v58, %s9433_s22 }
0x3ede   :  { %5649 = vrot.lane.b32.xlu0 %v10579_v63, %s9435_s24 }
0x3f49   :  { %v5543_v55 = vpop.xlane.xlu0 %5542 }
0x3f4a   :  { %9356 = vrcp.f32 %v5543_v55 }
0x3f4d   :  { %v5546_v56 = vpop.xlane.xlu0 %5545 }
0x3f4e   :  { %9358 = vrcp.f32 %v5546_v56 }
0x3f51   :  { %v5602_v21 = vpop.permute.xlu0 %5601 }
0x3f52   :  { %v5607_v25 = vsel %vm344_vm3, %v5602_v21, 0 }
0x3f53   :  { %8788 = vmatpush3.bf16.msra.mxu0 %v5607_v25 }
0x3f54   :  { %8799 = vmatprep.subr.bf16.mxu0 %v9424_v0 }
0x3f55   :  { %v5650_v38 = vpop.permute.xlu0 %5649 }
0x3f57   :  { %v9357_v26 = vpop.eup %9356 }
0x3f58   :  { %v5548_v29 = vmul.f32 %v9357_v26, %v9353_v27 }
0x3f5a   :  { %v5551_v5 = vpack.c.bf16 %v5548_v29, %v5548_v29 }
0x3f5b   :  { %v9359_v31 = vpop.eup %9358 }
0x3f5c   :  { %v5550_v34 = vmul.f32 %v9359_v31, %v9355_v46  ;;  %8784 = vmatmul.mubr.msk.bf16.vlgmr.msra.gmra.mxu1 %vm219_vm2, %v5551_v5 }
0x3f5d   :  { %8794 = vmatpush3.bf16.xpose.msra.mxu1 %v5657_v32  ;;  %8795 = vmatprep.mubr.msk.bf16.mxu1 %vm9426_vm0, %v9424_v0 }
0x3f5e   :  { %v5552_v22 = vpack.c.bf16 %v5550_v34, %v5550_v34  ;;  %8805 = vmatprep.subr.bf16.mxu1 %v9424_v0 }
0x3f60   :  { %8790 = vmatmul.mubr.msk.bf16.vlgmr.msra.gmra.mxu0 %vm219_vm2, %v5552_v22 }
0x3f61   :  { %8800 = vmatpush3.bf16.xpose.msra.mxu0 %v5707_v36  ;;  %8801 = vmatprep.mubr.msk.bf16.mxu0 %vm9426_vm0, %v9424_v0 }
0x3f62   :  { %8811 = vmatprep.subr.bf16.mxu0 %v9424_v0 }
0x3f64   :  { %8796 = vmatmul.mubr.msk.bf16.vlgmr.msra.gmra.mxu1 %vm219_vm2, %v5650_v38 }
0x3f65   :  { %8807 = vmatprep.mubr.msk.bf16.mxu1 %vm9426_vm0, %v9424_v0 }
0x3f68   :  { %8802 = vmatmul.mubr.msk.bf16.vlgmr.msra.gmra.mxu0 %vm219_vm2, %v5700_v24 }
0x3f69   :  { %8813 = vmatprep.mubr.msk.bf16.mxu0 %vm9426_vm0, %v9424_v0 }
0x401c   :  { %v10685_v54 = vpop.f32.mrf.mxu1 }
0x401e   :  { %v8785_v45 = vpop.f32.mrf.mxu1 }
0x4020   :  { %v5598_v37 = vpop.f32.mrf.mxu1  ;;  %v10687_v40 = vpop.f32.mrf.mxu0 }
0x4021   :  { %v9104_v41 = vpack.i.bf16 %v10687_v40, %v10685_v54 }
0x4022   :  { %v8786_v43 = vpop.f32.mrf.mxu1  ;;  %v8791_v44 = vpop.f32.mrf.mxu0 }
0x4024   :  { %v5646_v60 = vpop.f32.mrf.mxu0  ;;  %v5693_v3 = vpop.f32.mrf.mxu1 }
0x4025   :  { %v5694_v57 = vadd.f32 %v10600_v12, %v5693_v3 }
0x4026   :  { %v8792_v59 = vpop.f32.mrf.mxu0  ;;  %v8797_v61 = vpop.f32.mrf.mxu1 }
0x4027   :  { %v5749_v62 = vsel %vm219_vm2, %v5694_v57, -inf }
0x4028   :  { %5750 = vmax.xlane.f32.xlu0 %v5749_v62  ;;  %v5696_v2 = vpop.f32.mrf.mxu1  ;;  %v5743_v49 = vpop.f32.mrf.mxu0 }
0x4029   :  { %v5744_v51 = vadd.f32 %v10605_v15, %v5743_v49 }
0x402a   :  { %v8798_v50 = vpop.f32.mrf.mxu1  ;;  %v8803_v6 = vpop.f32.mrf.mxu0 }
0x402b   :  { %v5752_v7 = vsel %vm219_vm2, %v5744_v51, -inf }
0x402c   :  { %5753 = vmax.xlane.f32.xlu1 %v5752_v7  ;;  %v5746_v8 = vpop.f32.mrf.mxu0 }
0x402e   :  { %v8804_v42 = vpop.f32.mrf.mxu0 }
0x403d   :  { %5773 = vrot.lane.b32.xlu1 %v10579_v63, %s9436_s25 }
0x4041   :  { %5871 = vrot.lane.b32.xlu1 %v10579_v63, %s9437_s26 }
0x4045   :  { %5921 = vrot.lane.b32.xlu1 %v10583_v58, %s9437_s26 }
0x4049   :  { %5919 = vrot.lane.b32.xlu1 %v10583_v58, %s9438_s27 }
0x40b1   :  { %v5751_v9 = vpop.xlane.xlu0 %5750 }
0x40b2   :  { %v5755_v23 = vsub.f32 %v5694_v57, %v5751_v9 }
0x40b4   :  { %v5757_v11 = vmul.f32 1.442695, %v5755_v23 }
0x40b5   :  { %v5754_v19 = vpop.xlane.xlu1 %5753 }
0x40b6   :  { %9360 = vpow2.f32 %v5757_v11  ;;  %v5756_v13 = vsub.f32 %v5744_v51, %v5754_v19 }
0x40b8   :  { %v5759_v17 = vmul.f32 1.442695, %v5756_v13 }
0x40b9   :  { %v5774_v18 = vpop.permute.xlu1 %5773 }
0x40ba   :  { %9362 = vpow2.f32 %v5759_v17  ;;  %v5779_v10 = vsel %vm344_vm3, %v5774_v18, 0 }
0x40bb   :  { %8806 = vmatpush3.bf16.msra.mxu1 %v5779_v10 }
0x40bc   :  { %8817 = vmatprep.subr.bf16.mxu1 %v9424_v0 }
0x40bd   :  { %v5872_v56 = vpop.permute.xlu1 %5871 }
0x40be   :  { %v5877_v28 = vsel %vm219_vm2, %v5872_v56, 0 }
0x40c1   :  { %v5922_v5 = vpop.permute.xlu1 %5921 }
0x40c2   :  { %v5927_v32 = vsel %vm219_vm2, %v5922_v5, 0 }
0x40c3   :  { %v9361_v52 = vpop.eup %9360 }
0x40c4   :  { %v5761_v20 = vsel %vm219_vm2, %v9361_v52, 0.0 }
0x40c5   :  { %5762 = vadd.xlane.f32.xlu0 %v5761_v20  ;;  %v5920_v39 = vpop.permute.xlu1 %5919 }
0x40c7   :  { %v9363_v4 = vpop.eup %9362 }
0x40c8   :  { %v5764_v33 = vsel %vm219_vm2, %v9363_v4, 0.0 }
0x40c9   :  { %5765 = vadd.xlane.f32.xlu0 %v5764_v33 }
0x40df   :  { %5821 = vrot.lane.b32.xlu0 %v10583_v58, %s9436_s25 }
0x40e3   :  { %5869 = vrot.lane.b32.xlu0 %v10579_v63, %s9438_s27 }
0x414e   :  { %v5763_v27 = vpop.xlane.xlu0 %5762 }
0x414f   :  { %9364 = vrcp.f32 %v5763_v27 }
0x4152   :  { %v5766_v30 = vpop.xlane.xlu0 %5765 }
0x4153   :  { %9366 = vrcp.f32 %v5766_v30 }
0x4156   :  { %v5822_v46 = vpop.permute.xlu0 %5821 }
0x4157   :  { %v5827_v47 = vsel %vm344_vm3, %v5822_v46, 0  ;;  %v9172_v46 = vld [vmem:[%s9674_s5 + $0x18] sm:$0xff]  }
0x4158   :  { %8812 = vmatpush3.bf16.msra.mxu0 %v5827_v47  ;;  %v9173_v47 = vld [vmem:[%s9674_s5 + $0x10] sm:$0xff]  }
0x4159   :  { %8823 = vmatprep.subr.bf16.mxu0 %v9424_v0 }
0x415a   :  { %v5870_v34 = vpop.permute.xlu0 %5869 }
0x415c   :  { %v9365_v55 = vpop.eup %9364 }
0x415d   :  { %v5768_v21 = vmul.f32 %v9365_v55, %v9361_v52 }
0x415f   :  { %v5771_v25 = vpack.c.bf16 %v5768_v21, %v5768_v21 }
0x4160   :  { %v9367_v26 = vpop.eup %9366 }
0x4161   :  { %v5770_v29 = vmul.f32 %v9367_v26, %v9363_v4  ;;  %8808 = vmatmul.mubr.msk.bf16.vlgmr.msra.gmra.mxu1 %vm219_vm2, %v5771_v25 }
0x4162   :  { %8818 = vmatpush3.bf16.xpose.msra.mxu1 %v5877_v28  ;;  %8819 = vmatprep.mubr.msk.bf16.mxu1 %vm9426_vm0, %v9424_v0 }
0x4163   :  { %v5772_v31 = vpack.c.bf16 %v5770_v29, %v5770_v29  ;;  %8829 = vmatprep.subr.bf16.mxu1 %v9424_v0 }
0x4165   :  { %8814 = vmatmul.mubr.msk.bf16.vlgmr.msra.gmra.mxu0 %vm219_vm2, %v5772_v31 }
0x4166   :  { %8824 = vmatpush3.bf16.xpose.msra.mxu0 %v5927_v32  ;;  %8825 = vmatprep.mubr.msk.bf16.mxu0 %vm9426_vm0, %v9424_v0 }
0x4167   :  { %8835 = vmatprep.subr.bf16.mxu0 %v9424_v0 }
0x4169   :  { %8820 = vmatmul.mubr.msk.bf16.vlgmr.msra.gmra.mxu1 %vm219_vm2, %v5870_v34 }
0x416a   :  { %8831 = vmatprep.mubr.msk.bf16.mxu1 %vm9426_vm0, %v9424_v0 }
0x416d   :  { %8826 = vmatmul.mubr.msk.bf16.vlgmr.msra.gmra.mxu0 %vm219_vm2, %v5920_v39 }
0x416e   :  { %8837 = vmatprep.mubr.msk.bf16.mxu0 %vm9426_vm0, %v9424_v0 }
0x4221   :  { %v5815_v22 = vpop.f32.mrf.mxu1 }
0x4223   :  { %v8809_v36 = vpop.f32.mrf.mxu1 }
0x4225   :  { %v5818_v38 = vpop.f32.mrf.mxu1  ;;  %v5863_v24 = vpop.f32.mrf.mxu0 }
0x4227   :  { %v8810_v45 = vpop.f32.mrf.mxu1  ;;  %v8815_v37 = vpop.f32.mrf.mxu0 }
0x4229   :  { %v5866_v43 = vpop.f32.mrf.mxu0  ;;  %v5913_v44 = vpop.f32.mrf.mxu1 }
0x422a   :  { %v5914_v60 = vadd.f32 %v10600_v12, %v5913_v44  ;;  %v9109_v12 = vpack.i.bf16 %v5863_v24, %v5815_v22 }
0x422b   :  { %v8816_v3 = vpop.f32.mrf.mxu0  ;;  %v8821_v57 = vpop.f32.mrf.mxu1 }
0x422c   :  { %v5969_v59 = vsel %vm219_vm2, %v5914_v60, -inf }
0x422d   :  { %5970 = vmax.xlane.f32.xlu0 %v5969_v59  ;;  %v5916_v61 = vpop.f32.mrf.mxu1  ;;  %v5963_v62 = vpop.f32.mrf.mxu0 }
0x422e   :  { %v5964_v2 = vadd.f32 %v10605_v15, %v5963_v62 }
0x422f   :  { %v8822_v49 = vpop.f32.mrf.mxu1  ;;  %v8827_v51 = vpop.f32.mrf.mxu0 }
0x4230   :  { %v5972_v50 = vsel %vm219_vm2, %v5964_v2, -inf }
0x4231   :  { %5973 = vmax.xlane.f32.xlu1 %v5972_v50  ;;  %v5966_v6 = vpop.f32.mrf.mxu0 }
0x4233   :  { %v8828_v7 = vpop.f32.mrf.mxu0 }
0x4242   :  { %5993 = vrot.lane.b32.xlu1 %v10579_v63, %s9441_s7 }
0x4246   :  { %9105 = vrot.lane.b32.xlu1 %v9104_v41, %s11034_s14 }
0x424a   :  { %9110 = vrot.lane.b32.xlu1 %v9109_v12, %s11035_s20 }
0x42b6   :  { %v5971_v8 = vpop.xlane.xlu0 %5970 }
0x42b7   :  { %v5975_v15 = vsub.f32 %v5914_v60, %v5971_v8 }
0x42b9   :  { %v5977_v42 = vmul.f32 1.442695, %v5975_v15 }
0x42ba   :  { %v5974_v9 = vpop.xlane.xlu1 %5973 }
0x42bb   :  { %9368 = vpow2.f32 %v5977_v42  ;;  %v5976_v23 = vsub.f32 %v5964_v2, %v5974_v9 }
0x42bd   :  { %v5979_v11 = vmul.f32 1.442695, %v5976_v23 }
0x42be   :  { %v5994_v19 = vpop.permute.xlu1 %5993 }
0x42bf   :  { %9370 = vpow2.f32 %v5979_v11  ;;  %v5999_v13 = vsel %vm344_vm3, %v5994_v19, 0 }
0x42c0   :  { %8830 = vmatpush3.bf16.msra.mxu1 %v5999_v13 }
0x42c1   :  { %8841 = vmatprep.subr.bf16.mxu1 %v9424_v0 }
0x42c2   :  { %v9106_v32 = vpop.permute.xlu1 %9105 }
0x42c3   :  { %v9108_v39 = vunpack.i.h.bf16 %v9106_v32  ;;  %v9107_v22 = vunpack.i.l.bf16 %v9106_v32 }
0x42c5   :  { %v6114_v45 = vsel %vm219_vm2, %v10645_v53, %v9108_v39  ;;  %v6113_v37 = vsel %vm219_vm2, %v10643_v14, %v9107_v22  ;;  %v7880_v53 = vld [vmem:[%s10284_s13 + $0x1] ss:$0 sm:$0xff] }
0x42c6   :  { %v9111_v34 = vpop.permute.xlu1 %9110 }
0x42c7   :  { %v9113_v36 = vunpack.i.h.bf16 %v9111_v34  ;;  %v9112_v38 = vunpack.i.l.bf16 %v9111_v34 }
0x42c8   :  { %v9369_v63 = vpop.eup %9368 }
0x42c9   :  { %v5981_v54 = vsel %vm219_vm2, %v9369_v63, 0.0  ;;  %v6115_v60 = vsel %vm1122_vm4, %v6113_v37, %v9112_v38  ;;  %v6116_v3 = vsel %vm1122_vm4, %v6114_v45, %v9113_v36 }
0x42ca   :  { %5982 = vadd.xlane.f32.xlu0 %v5981_v54 }
0x42cc   :  { %v9371_v40 = vpop.eup %9370 }
0x42cd   :  { %v5984_v41 = vsel %vm219_vm2, %v9371_v40, 0.0 }
0x42ce   :  { %5985 = vadd.xlane.f32.xlu0 %v5984_v41 }
0x42e4   :  { %6041 = vrot.lane.b32.xlu0 %v10583_v58, %s9441_s7 }
0x4353   :  { %v5983_v17 = vpop.xlane.xlu0 %5982 }
0x4354   :  { %9372 = vrcp.f32 %v5983_v17 }
0x4357   :  { %v5986_v18 = vpop.xlane.xlu0 %5985 }
0x4358   :  { %9374 = vrcp.f32 %v5986_v18 }
0x435b   :  { %v6042_v10 = vpop.permute.xlu0 %6041 }
0x435c   :  { %v6047_v52 = vsel %vm344_vm3, %v6042_v10, 0 }
0x435d   :  { %8836 = vmatpush3.bf16.msra.mxu0 %v6047_v52 }
0x435e   :  { %8849 = vmatprep.subr.bf16.mxu0 %v9424_v0 }
0x4361   :  { %v9373_v20 = vpop.eup %9372 }
0x4362   :  { %v5988_v4 = vmul.f32 %v9373_v20, %v9369_v63 }
0x4364   :  { %v5991_v33 = vpack.c.bf16 %v5988_v4, %v5988_v4 }
0x4365   :  { %v9375_v27 = vpop.eup %9374 }
0x4366   :  { %v5990_v30 = vmul.f32 %v9375_v27, %v9371_v40  ;;  %8832 = vmatmul.mubr.msk.bf16.vlgmr.msra.gmra.mxu1 %vm219_vm2, %v5991_v33  ;;  %v9175_v40 = vld [vmem:[%s10296_s4 + $0x10] sm:$0xff]  }
0x4367   :  { %8845 = vmatprep.mubr.msk.bf16.mxu1 %vm9426_vm0, %v9424_v0  ;;  %8842 = vmatpush3.bf16.msra.mxu1 %v9172_v46 }
0x4368   :  { %v5992_v58 = vpack.c.bf16 %v5990_v30, %v5990_v30  ;;  %8843 = vmatprep.subr.bf16.mxu1 %v9424_v0 }
0x436a   :  { %8838 = vmatmul.mubr.msk.bf16.vlgmr.msra.gmra.mxu0 %vm219_vm2, %v5992_v58  ;;  %v7884_v58 = vld [vmem:[%s10305_s29 + $0x3] ss:$0 sm:$0xff] }
0x436b   :  { %8853 = vmatprep.mubr.msk.bf16.mxu0 %vm9426_vm0, %v9424_v0  ;;  %8844 = vmatpush3.bf16.msra.mxu1 %v9173_v47 }
0x436c   :  { %8857 = vmatprep.subr.bf16.mxu1 %v9424_v0 }
0x4426   :  { %v6035_v55 = vpop.f32.mrf.mxu1 }
0x4428   :  { %v8833_v56 = vpop.f32.mrf.mxu1 }
0x4429   :  { %v7885_v56 = vld [vmem:[%s10310_s1 + $0x3] ss:$0 sm:$0xff] }
0x442a   :  { %v6038_v21 = vpop.f32.mrf.mxu1  ;;  %v6083_v25 = vpop.f32.mrf.mxu0 }
0x442b   :  { %v9114_v26 = vpack.i.bf16 %v6083_v25, %v6035_v55 }
0x442c   :  { %v8834_v28 = vpop.f32.mrf.mxu1  ;;  %v8839_v29 = vpop.f32.mrf.mxu0 }
0x442d   :  { %9115 = vrot.lane.b32.xlu0 %v9114_v26, %s11033_s6 }
0x442e   :  { %v6086_v5 = vpop.f32.mrf.mxu0 }
0x4430   :  { %v8840_v31 = vpop.f32.mrf.mxu0 }
0x4431   :  { %v7890_v31 = vld [vmem:[%s10333_s12 + $0x1] ss:$0 sm:$0xff] }
0x449f   :  { %v9116_v24 = vpop.permute.xlu0 %9115 }
0x44a0   :  { %v9118_v43 = vunpack.i.h.bf16 %v9116_v24  ;;  %v9117_v44 = vunpack.i.l.bf16 %v9116_v24 }
0x44a2   :  { %v6118_v57 = vsel %vm1125_vm5, %v6116_v3, %v9118_v43  ;;  %v6117_v59 = vsel %vm1125_vm5, %v6115_v60, %v9117_v44 }
0x44a3   :  { %v6119_v61 = vpack.c.bf16 %v6118_v57, %v6117_v59 }
0x44a5   :  { %8846 = vmatmul.mubr.msk.bf16.vlgmr.msra.gmra.mxu1 %vm169_vm1, %v6119_v61 }
0x44a6   :  { %8859 = vmatprep.mubr.msk.bf16.mxu1 %vm9426_vm0, %v9424_v0 }
0x4565   :  { %v6179_v62 = vpop.f32.mrf.mxu1 }
0x4566   :  { %v6180_v2 = vadd.f32 %v7880_v53, %v6179_v62 }
0x4567   :  { %v8847_v14 = vpop.f32.mrf.mxu1 }
0x4568   :  { %v6186_v49 = vadd.f32 %v6180_v2, %v10569_v16 }
0x4569   :  { %v6182_v51 = vpop.f32.mrf.mxu1 }
0x456a   :  { %v6183_v50 = vadd.f32 %v7880_v53, %v6182_v51  ;;  %v6190_v6 = vsel %vm169_vm1, %v6186_v49, 0.0 }
0x456b   :  { %6191 = vadd.xlane.f32.xlu1 %v6190_v6  ;;  %v8848_v7 = vpop.f32.mrf.mxu1 }
0x456c   :  { %v6187_v12 = vadd.f32 %v6183_v50, %v10571_v48  ;;  %v9174_v48 = vld [vmem:[%s10296_s4 + $0x18] sm:$0xff]  }
0x456d   :  { %8850 = vmatpush3.bf16.msra.mxu0 %v9174_v48 }
0x456e   :  { %v6193_v8 = vsel %vm169_vm1, %v6187_v12, 0.0  ;;  %8851 = vmatprep.subr.bf16.mxu0 %v9424_v0 }
0x456f   :  { %6194 = vadd.xlane.f32.xlu0 %v6193_v8 }
0x4571   :  { %8852 = vmatpush3.bf16.msra.mxu0 %v9175_v40 }
0x4572   :  { %8863 = vmatprep.subr.bf16.mxu0 %v9424_v0 }
0x45f4   :  { %v6192_v15 = vpop.xlane.xlu1 %6191 }
0x45f5   :  { %v6196_v42 = vmul.f32 0.03125, %v6192_v15 }
0x45f7   :  { %v6198_v9 = vsub.f32 %v6186_v49, %v6196_v42 }
0x45f8   :  { %v6195_v23 = vpop.xlane.xlu0 %6194 }
0x45f9   :  { %v6197_v11 = vmul.f32 0.03125, %v6195_v23  ;;  %v6200_v19 = vmul.f32 %v6198_v9, %v6198_v9 }
0x45fb   :  { %v6199_v16 = vsub.f32 %v6187_v12, %v6197_v11  ;;  %v6202_v13 = vsel %vm169_vm1, %v6200_v19, 0.0 }
0x45fc   :  { %6203 = vadd.xlane.f32.xlu0 %v6202_v13 }
0x45fd   :  { %v6201_v63 = vmul.f32 %v6199_v16, %v6199_v16 }
0x45ff   :  { %v6205_v54 = vsel %vm169_vm1, %v6201_v63, 0.0 }
0x4600   :  { %6206 = vadd.xlane.f32.xlu1 %v6205_v54 }
0x4611   :  { %6345 = vrot.lane.b32.xlu1 %v10316_v35, %s9430_s19 }
0x4612   :  { %6297 = vrot.lane.b32.xlu0 %v10269_v1, %s9430_s19  ;;  %s9466_s19 = smov 32  }
0x4613   :  { %s10816_s28 = sld [smem:[%s11026_s0 + %s9466_s19]]  }
0x4685   :  { %v6204_v41 = vpop.xlane.xlu0 %6203 }
0x4686   :  { %v6208_v17 = vmul.f32 0.03125, %v6204_v41 }
0x4688   :  { %v6210_v18 = vadd.f32 1e-05, %v6208_v17 }
0x4689   :  { %v6207_v10 = vpop.xlane.xlu1 %6206  ;;  %v6298_v52 = vpop.permute.xlu0 %6297 }
0x468a   :  { %9376 = vrsqrt.f32 %v6210_v18  ;;  %v6209_v20 = vmul.f32 0.03125, %v6207_v10  ;;  %v6303_v4 = vsel %vm219_vm2, %v6298_v52, 0 }
0x468b   :  { %8858 = vmatpush3.bf16.xpose.msra.mxu1 %v6303_v4 }
0x468c   :  { %v6211_v33 = vadd.f32 1e-05, %v6209_v20  ;;  %8869 = vmatprep.subr.bf16.mxu1 %v9424_v0 }
0x468d   :  { %v6346_v28 = vpop.permute.xlu1 %6345 }
0x468e   :  { %9378 = vrsqrt.f32 %v6211_v33  ;;  %v6351_v5 = vsel %vm219_vm2, %v6346_v28, 0 }
0x4697   :  { %v9377_v27 = vpop.eup %9376 }
0x4698   :  { %v6214_v30 = vmul.f32 %v9377_v27, %v6198_v9 }
0x469a   :  { %v6220_v47 = vmul.f32 %v7884_v58, %v6214_v30 }
0x469b   :  { %v9379_v46 = vpop.eup %9378 }
0x469c   :  { %v6215_v55 = vmul.f32 %v9379_v46, %v6199_v16  ;;  %v10789_v25 = vadd.f32 %v7885_v56, %v6220_v47 }
0x469e   :  { %v6221_v21 = vmul.f32 %v7884_v58, %v6215_v55 }
0x46a0   :  { %v10791_v26 = vadd.f32 %v7885_v56, %v6221_v21 }
0x46a2   :  { %v6228_v29 = vpack.c.bf16 %v10791_v26, %v10789_v25 }
0x46a4   :  { %8854 = vmatmul.mubr.msk.bf16.vlgmr.msra.gmra.mxu0 %vm169_vm1, %v6228_v29 }
0x46a5   :  { %8864 = vmatpush3.bf16.xpose.msra.mxu0 %v6351_v5  ;;  %8865 = vmatprep.mubr.msk.bf16.mxu0 %vm9426_vm0, %v9424_v0 }
0x46a6   :  { %8875 = vmatprep.subr.bf16.mxu0 %v9424_v0 }
0x4764   :  { %v6288_v32 = vpop.f32.mrf.mxu0 }
0x4765   :  { %v6289_v34 = vadd.f32 %v7890_v31, %v6288_v32 }
0x4766   :  { %v8855_v39 = vpop.f32.mrf.mxu0 }
0x4767   :  { %v10801_v22 = vpack.c.bf16 %v6289_v34, %v6289_v34 }
0x4768   :  { %v6291_v36 = vpop.f32.mrf.mxu0 }
0x4769   :  { %v6292_v38 = vadd.f32 %v7890_v31, %v6291_v36  ;;  %8860 = vmatmul.mubr.msk.bf16.vlgmr.msra.gmra.mxu1 %vm219_vm2, %v10801_v22 }
0x476a   :  { %v8856_v24 = vpop.f32.mrf.mxu0  ;;  %8871 = vmatprep.mubr.msk.bf16.mxu1 %vm9426_vm0, %v9424_v0 }
0x476b   :  { %v10807_v45 = vpack.c.bf16 %v6292_v38, %v6292_v38 }
0x476d   :  { %8866 = vmatmul.mubr.msk.bf16.vlgmr.msra.gmra.mxu0 %vm219_vm2, %v10807_v45 }
0x476e   :  { %8877 = vmatprep.mubr.msk.bf16.mxu0 %vm9426_vm0, %v9424_v0 }
0x4829   :  { %v6339_v37 = vpop.f32.mrf.mxu1 }
0x482a   :  { %v6393_v43 = vsel %vm219_vm2, %v6339_v37, -inf }
0x482b   :  { %6394 = vmax.xlane.f32.xlu1 %v6393_v43  ;;  %v8861_v44 = vpop.f32.mrf.mxu1 }
0x482d   :  { %v6342_v60 = vpop.f32.mrf.mxu1  ;;  %v6387_v3 = vpop.f32.mrf.mxu0 }
0x482e   :  { %v6396_v57 = vsel %vm219_vm2, %v6387_v3, -inf }
0x482f   :  { %v8862_v59 = vpop.f32.mrf.mxu1  ;;  %6397 = vmax.xlane.f32.xlu0 %v6396_v57  ;;  %v8867_v61 = vpop.f32.mrf.mxu0 }
0x4831   :  { %v6390_v53 = vpop.f32.mrf.mxu0 }
0x4833   :  { %v8868_v62 = vpop.f32.mrf.mxu0 }
0x483c   :  { %6465 = vrot.lane.b32.xlu1 %v10316_v35, %s9466_s19 }
0x4845   :  { %6417 = vrot.lane.b32.xlu0 %v10269_v1, %s9466_s19 }
0x48b4   :  { %v6395_v2 = vpop.xlane.xlu1 %6394 }
0x48b5   :  { %v6399_v14 = vsub.f32 %v6339_v37, %v6395_v2 }
0x48b7   :  { %v6401_v49 = vmul.f32 1.442695, %v6399_v14 }
0x48b8   :  { %v6466_v51 = vpop.permute.xlu1 %6465  ;;  %v6398_v50 = vpop.xlane.xlu0 %6397 }
0x48b9   :  { %9380 = vpow2.f32 %v6401_v49  ;;  %v6471_v6 = vsel %vm344_vm3, %v6466_v51, 0  ;;  %v6400_v7 = vsub.f32 %v6387_v3, %v6398_v50 }
0x48ba   :  { %8876 = vmatpush3.bf16.msra.mxu0 %v6471_v6 }
0x48bb   :  { %v6403_v12 = vmul.f32 1.442695, %v6400_v7  ;;  %8887 = vmatprep.subr.bf16.mxu0 %v9424_v0 }
0x48bc   :  { %v6418_v8 = vpop.permute.xlu0 %6417 }
0x48bd   :  { %9382 = vpow2.f32 %v6403_v12  ;;  %v6423_v15 = vsel %vm344_vm3, %v6418_v8, 0 }
0x48be   :  { %8870 = vmatpush3.bf16.msra.mxu1 %v6423_v15 }
0x48bf   :  { %8881 = vmatprep.subr.bf16.mxu1 %v9424_v0 }
0x48c6   :  { %v9381_v42 = vpop.eup %9380 }
0x48c7   :  { %v6405_v9 = vsel %vm219_vm2, %v9381_v42, 0.0 }
0x48c8   :  { %6406 = vadd.xlane.f32.xlu0 %v6405_v9 }
0x48ca   :  { %v9383_v23 = vpop.eup %9382 }
0x48cb   :  { %v6408_v11 = vsel %vm219_vm2, %v9383_v23, 0.0 }
0x48cc   :  { %6409 = vadd.xlane.f32.xlu1 %v6408_v11 }
0x48dd   :  { %6516 = vrot.lane.b32.xlu1 %v10269_v1, %s9433_s22 }
0x48de   :  { %6567 = vrot.lane.b32.xlu0 %v10316_v35, %s9433_s22 }
0x48e1   :  { %6514 = vrot.lane.b32.xlu1 %v10801_v22, %s9432_s21 }
0x48e2   :  { %6565 = vrot.lane.b32.xlu0 %v10807_v45, %s9432_s21  ;;  %s9467_s21 = smov 30  }
0x4951   :  { %v6407_v19 = vpop.xlane.xlu0 %6406 }
0x4952   :  { %9384 = vrcp.f32 %v6407_v19 }
0x4955   :  { %v6410_v16 = vpop.xlane.xlu1 %6409  ;;  %v6568_v18 = vpop.permute.xlu0 %6567 }
0x4956   :  { %9386 = vrcp.f32 %v6410_v16  ;;  %v6573_v52 = vsel %vm219_vm2, %v6568_v18, 0 }
0x4959   :  { %v6517_v54 = vpop.permute.xlu1 %6516  ;;  %v6566_v4 = vpop.permute.xlu0 %6565 }
0x495a   :  { %v6522_v17 = vsel %vm219_vm2, %v6517_v54, 0 }
0x495d   :  { %v6515_v20 = vpop.permute.xlu1 %6514 }
0x495f   :  { %v9385_v13 = vpop.eup %9384 }
0x4960   :  { %v6412_v63 = vmul.f32 %v9385_v13, %v9381_v42 }
0x4962   :  { %v6415_v48 = vpack.c.bf16 %v6412_v63, %v6412_v63 }
0x4963   :  { %v9387_v40 = vpop.eup %9386 }
0x4964   :  { %v6414_v41 = vmul.f32 %v9387_v40, %v9383_v23  ;;  %8872 = vmatmul.mubr.msk.bf16.vlgmr.msra.gmra.mxu1 %vm219_vm2, %v6415_v48 }
0x4965   :  { %8882 = vmatpush3.bf16.xpose.msra.mxu1 %v6522_v17  ;;  %8883 = vmatprep.mubr.msk.bf16.mxu1 %vm9426_vm0, %v9424_v0 }
0x4966   :  { %v6416_v10 = vpack.c.bf16 %v6414_v41, %v6414_v41  ;;  %8893 = vmatprep.subr.bf16.mxu1 %v9424_v0 }
0x4968   :  { %8878 = vmatmul.mubr.msk.bf16.vlgmr.msra.gmra.mxu0 %vm219_vm2, %v6416_v10 }
0x4969   :  { %8888 = vmatpush3.bf16.xpose.msra.mxu0 %v6573_v52  ;;  %8889 = vmatprep.mubr.msk.bf16.mxu0 %vm9426_vm0, %v9424_v0 }
0x496a   :  { %8899 = vmatprep.subr.bf16.mxu0 %v9424_v0 }
0x496c   :  { %8884 = vmatmul.mubr.msk.bf16.vlgmr.msra.gmra.mxu1 %vm219_vm2, %v6515_v20 }
0x496d   :  { %8895 = vmatprep.mubr.msk.bf16.mxu1 %vm9426_vm0, %v9424_v0 }
0x4970   :  { %8890 = vmatmul.mubr.msk.bf16.vlgmr.msra.gmra.mxu0 %vm219_vm2, %v6566_v4 }
0x4971   :  { %8901 = vmatprep.mubr.msk.bf16.mxu0 %vm9426_vm0, %v9424_v0 }
0x4a24   :  { %v10852_v33 = vpop.f32.mrf.mxu1 }
0x4a26   :  { %v8873_v27 = vpop.f32.mrf.mxu1 }
0x4a28   :  { %v6462_v30 = vpop.f32.mrf.mxu1  ;;  %v10854_v58 = vpop.f32.mrf.mxu0 }
0x4a2a   :  { %v8874_v46 = vpop.f32.mrf.mxu1  ;;  %v8879_v47 = vpop.f32.mrf.mxu0 }
0x4a2c   :  { %v6510_v55 = vpop.f32.mrf.mxu0  ;;  %v6558_v56 = vpop.f32.mrf.mxu1 }
0x4a2d   :  { %v6615_v21 = vsel %vm219_vm2, %v6558_v56, -inf }
0x4a2e   :  { %6616 = vmax.xlane.f32.xlu1 %v6615_v21  ;;  %v8880_v28 = vpop.f32.mrf.mxu0  ;;  %v8885_v29 = vpop.f32.mrf.mxu1 }
0x4a30   :  { %v6561_v5 = vpop.f32.mrf.mxu1  ;;  %v6609_v31 = vpop.f32.mrf.mxu0 }
0x4a31   :  { %v6618_v32 = vsel %vm219_vm2, %v6609_v31, -inf }
0x4a32   :  { %v8886_v34 = vpop.f32.mrf.mxu1  ;;  %6619 = vmax.xlane.f32.xlu0 %v6618_v32  ;;  %v8891_v39 = vpop.f32.mrf.mxu0 }
0x4a34   :  { %v6612_v36 = vpop.f32.mrf.mxu0 }
0x4a36   :  { %v8892_v38 = vpop.f32.mrf.mxu0 }
0x4a3f   :  { %6687 = vrot.lane.b32.xlu1 %v10316_v35, %s11033_s6 }
0x4a48   :  { %6639 = vrot.lane.b32.xlu0 %v10269_v1, %s11033_s6 }
0x4ab7   :  { %v6617_v24 = vpop.xlane.xlu1 %6616 }
0x4ab8   :  { %v6621_v37 = vsub.f32 %v6558_v56, %v6617_v24 }
0x4aba   :  { %v6623_v43 = vmul.f32 1.442695, %v6621_v37 }
0x4abb   :  { %v6688_v44 = vpop.permute.xlu1 %6687  ;;  %v6620_v60 = vpop.xlane.xlu0 %6619 }
0x4abc   :  { %9388 = vpow2.f32 %v6623_v43  ;;  %v6693_v3 = vsel %vm344_vm3, %v6688_v44, 0  ;;  %v6622_v57 = vsub.f32 %v6609_v31, %v6620_v60 }
0x4abd   :  { %8900 = vmatpush3.bf16.msra.mxu0 %v6693_v3 }
0x4abe   :  { %v6625_v59 = vmul.f32 1.442695, %v6622_v57  ;;  %8911 = vmatprep.subr.bf16.mxu0 %v9424_v0 }
0x4abf   :  { %v6640_v61 = vpop.permute.xlu0 %6639 }
0x4ac0   :  { %9390 = vpow2.f32 %v6625_v59  ;;  %v6645_v53 = vsel %vm344_vm3, %v6640_v61, 0 }
0x4ac1   :  { %8894 = vmatpush3.bf16.msra.mxu1 %v6645_v53 }
0x4ac2   :  { %8905 = vmatprep.subr.bf16.mxu1 %v9424_v0 }
0x4ac9   :  { %v9389_v62 = vpop.eup %9388 }
0x4aca   :  { %v6627_v2 = vsel %vm219_vm2, %v9389_v62, 0.0 }
0x4acb   :  { %6628 = vadd.xlane.f32.xlu0 %v6627_v2 }
0x4acd   :  { %v9391_v14 = vpop.eup %9390 }
0x4ace   :  { %v6630_v49 = vsel %vm219_vm2, %v9391_v14, 0.0 }
0x4acf   :  { %6631 = vadd.xlane.f32.xlu1 %v6630_v49 }
0x4ae0   :  { %6737 = vrot.lane.b32.xlu1 %v10269_v1, %s9436_s25 }
0x4ae1   :  { %6787 = vrot.lane.b32.xlu0 %v10316_v35, %s9436_s25  ;;  %s7683_s25 = sld [smem:[%s11026_s0 + %s9467_s21]]  }
0x4ae4   :  { %6735 = vrot.lane.b32.xlu1 %v10801_v22, %s9435_s24 }
0x4ae5   :  { %6785 = vrot.lane.b32.xlu0 %v10807_v45, %s9435_s24 }
0x4b54   :  { %v6629_v51 = vpop.xlane.xlu0 %6628 }
0x4b55   :  { %9392 = vrcp.f32 %v6629_v51 }
0x4b58   :  { %v6632_v50 = vpop.xlane.xlu1 %6631  ;;  %v6788_v23 = vpop.permute.xlu0 %6787 }
0x4b59   :  { %9394 = vrcp.f32 %v6632_v50  ;;  %v6793_v19 = vsel %vm219_vm2, %v6788_v23, 0 }
0x4b5c   :  { %v6738_v12 = vpop.permute.xlu1 %6737  ;;  %v6786_v13 = vpop.permute.xlu0 %6785 }
0x4b5d   :  { %v6743_v9 = vsel %vm219_vm2, %v6738_v12, 0 }
0x4b60   :  { %v6736_v16 = vpop.permute.xlu1 %6735 }
0x4b62   :  { %v9393_v6 = vpop.eup %9392 }
0x4b63   :  { %v6634_v7 = vmul.f32 %v9393_v6, %v9389_v62 }
0x4b65   :  { %v6637_v8 = vpack.c.bf16 %v6634_v7, %v6634_v7 }
0x4b66   :  { %v9395_v15 = vpop.eup %9394 }
0x4b67   :  { %v6636_v42 = vmul.f32 %v9395_v15, %v9391_v14  ;;  %8896 = vmatmul.mubr.msk.bf16.vlgmr.msra.gmra.mxu1 %vm219_vm2, %v6637_v8 }
0x4b68   :  { %8906 = vmatpush3.bf16.xpose.msra.mxu1 %v6743_v9  ;;  %8907 = vmatprep.mubr.msk.bf16.mxu1 %vm9426_vm0, %v9424_v0 }
0x4b69   :  { %v6638_v11 = vpack.c.bf16 %v6636_v42, %v6636_v42  ;;  %8917 = vmatprep.subr.bf16.mxu1 %v9424_v0 }
0x4b6b   :  { %8902 = vmatmul.mubr.msk.bf16.vlgmr.msra.gmra.mxu0 %vm219_vm2, %v6638_v11 }
0x4b6c   :  { %8912 = vmatpush3.bf16.xpose.msra.mxu0 %v6793_v19  ;;  %8913 = vmatprep.mubr.msk.bf16.mxu0 %vm9426_vm0, %v9424_v0 }
0x4b6d   :  { %8923 = vmatprep.subr.bf16.mxu0 %v9424_v0 }
0x4b6f   :  { %8908 = vmatmul.mubr.msk.bf16.vlgmr.msra.gmra.mxu1 %vm219_vm2, %v6736_v16 }
0x4b70   :  { %8919 = vmatprep.mubr.msk.bf16.mxu1 %vm9426_vm0, %v9424_v0 }
0x4b73   :  { %8914 = vmatmul.mubr.msk.bf16.vlgmr.msra.gmra.mxu0 %vm219_vm2, %v6786_v13 }
0x4b74   :  { %8925 = vmatprep.mubr.msk.bf16.mxu0 %vm9426_vm0, %v9424_v0 }
0x4c27   :  { %v10892_v63 = vpop.f32.mrf.mxu1 }
0x4c29   :  { %v8897_v54 = vpop.f32.mrf.mxu1 }
0x4c2b   :  { %v6684_v48 = vpop.f32.mrf.mxu1  ;;  %v10894_v40 = vpop.f32.mrf.mxu0 }
0x4c2c   :  { %v9119_v41 = vpack.i.bf16 %v10894_v40, %v10892_v63 }
0x4c2d   :  { %v8898_v17 = vpop.f32.mrf.mxu1  ;;  %v8903_v18 = vpop.f32.mrf.mxu0 }
0x4c2f   :  { %v6732_v10 = vpop.f32.mrf.mxu0  ;;  %v6779_v52 = vpop.f32.mrf.mxu1 }
0x4c30   :  { %v6835_v20 = vsel %vm219_vm2, %v6779_v52, -inf }
0x4c31   :  { %6836 = vmax.xlane.f32.xlu1 %v6835_v20  ;;  %v8904_v4 = vpop.f32.mrf.mxu0  ;;  %v8909_v27 = vpop.f32.mrf.mxu1 }
0x4c33   :  { %v6782_v30 = vpop.f32.mrf.mxu1  ;;  %v6829_v46 = vpop.f32.mrf.mxu0 }
0x4c34   :  { %v6838_v47 = vsel %vm219_vm2, %v6829_v46, -inf }
0x4c35   :  { %v8910_v55 = vpop.f32.mrf.mxu1  ;;  %6839 = vmax.xlane.f32.xlu0 %v6838_v47  ;;  %v8915_v56 = vpop.f32.mrf.mxu0 }
0x4c37   :  { %v6832_v21 = vpop.f32.mrf.mxu0 }
0x4c39   :  { %v8916_v28 = vpop.f32.mrf.mxu0 }
0x4c42   :  { %6907 = vrot.lane.b32.xlu1 %v10316_v35, %s11035_s20 }
0x4c4b   :  { %6859 = vrot.lane.b32.xlu0 %v10269_v1, %s11035_s20 }
0x4cba   :  { %v6837_v29 = vpop.xlane.xlu1 %6836 }
0x4cbb   :  { %v6841_v5 = vsub.f32 %v6779_v52, %v6837_v29 }
0x4cbd   :  { %v6843_v31 = vmul.f32 1.442695, %v6841_v5 }
0x4cbe   :  { %v6908_v32 = vpop.permute.xlu1 %6907  ;;  %v6840_v34 = vpop.xlane.xlu0 %6839 }
0x4cbf   :  { %9396 = vpow2.f32 %v6843_v31  ;;  %v6913_v39 = vsel %vm344_vm3, %v6908_v32, 0  ;;  %v6842_v36 = vsub.f32 %v6829_v46, %v6840_v34 }
0x4cc0   :  { %8924 = vmatpush3.bf16.msra.mxu0 %v6913_v39 }
0x4cc1   :  { %v6845_v38 = vmul.f32 1.442695, %v6842_v36  ;;  %8935 = vmatprep.subr.bf16.mxu0 %v9424_v0 }
0x4cc2   :  { %v6860_v24 = vpop.permute.xlu0 %6859 }
0x4cc3   :  { %9398 = vpow2.f32 %v6845_v38  ;;  %v6865_v37 = vsel %vm344_vm3, %v6860_v24, 0 }
0x4cc4   :  { %8918 = vmatpush3.bf16.msra.mxu1 %v6865_v37 }
0x4cc5   :  { %8929 = vmatprep.subr.bf16.mxu1 %v9424_v0 }
0x4ccc   :  { %v9397_v43 = vpop.eup %9396 }
0x4ccd   :  { %v6847_v44 = vsel %vm219_vm2, %v9397_v43, 0.0 }
0x4cce   :  { %6848 = vadd.xlane.f32.xlu0 %v6847_v44  ;;  %v9177_v44 = vld [vmem:[%s10492_s17 + $0x10] sm:$0xff]  }
0x4cd0   :  { %v9399_v60 = vpop.eup %9398 }
0x4cd1   :  { %v6850_v3 = vsel %vm219_vm2, %v9399_v60, 0.0 }
0x4cd2   :  { %6851 = vadd.xlane.f32.xlu1 %v6850_v3 }
0x4ce3   :  { %6957 = vrot.lane.b32.xlu1 %v10269_v1, %s9441_s7 }
0x4ce4   :  { %7007 = vrot.lane.b32.xlu0 %v10316_v35, %s9441_s7 }
0x4ce7   :  { %6955 = vrot.lane.b32.xlu1 %v10801_v22, %s9438_s27 }
0x4ce8   :  { %7005 = vrot.lane.b32.xlu0 %v10807_v45, %s9438_s27  ;;  %s9468_s27 = smov 31  }
0x4ce9   :  { %s7684_s7 = sld [smem:[%s11026_s0 + %s9468_s27]]  }
0x4d57   :  { %v6849_v57 = vpop.xlane.xlu0 %6848 }
0x4d58   :  { %9400 = vrcp.f32 %v6849_v57 }
0x4d5b   :  { %v6852_v59 = vpop.xlane.xlu1 %6851  ;;  %v7008_v50 = vpop.permute.xlu0 %7007 }
0x4d5c   :  { %9402 = vrcp.f32 %v6852_v59  ;;  %v7013_v45 = vsel %vm219_vm2, %v7008_v50, 0 }
0x4d5f   :  { %v6958_v62 = vpop.permute.xlu1 %6957  ;;  %v7006_v7 = vpop.permute.xlu0 %7005 }
0x4d60   :  { %v6963_v51 = vsel %vm219_vm2, %v6958_v62, 0 }
0x4d63   :  { %v6956_v6 = vpop.permute.xlu1 %6955 }
0x4d65   :  { %v9401_v61 = vpop.eup %9400 }
0x4d66   :  { %v6854_v53 = vmul.f32 %v9401_v61, %v9397_v43  ;;  %v9176_v43 = vld [vmem:[%s10492_s17 + $0x18] sm:$0xff]  }
0x4d68   :  { %v6857_v2 = vpack.c.bf16 %v6854_v53, %v6854_v53 }
0x4d69   :  { %v9403_v14 = vpop.eup %9402 }
0x4d6a   :  { %v6856_v49 = vmul.f32 %v9403_v14, %v9399_v60  ;;  %8920 = vmatmul.mubr.msk.bf16.vlgmr.msra.gmra.mxu1 %vm219_vm2, %v6857_v2 }
0x4d6b   :  { %8930 = vmatpush3.bf16.xpose.msra.mxu1 %v6963_v51  ;;  %8931 = vmatprep.mubr.msk.bf16.mxu1 %vm9426_vm0, %v9424_v0 }
0x4d6c   :  { %v6858_v22 = vpack.c.bf16 %v6856_v49, %v6856_v49  ;;  %8941 = vmatprep.subr.bf16.mxu1 %v9424_v0 }
0x4d6e   :  { %8926 = vmatmul.mubr.msk.bf16.vlgmr.msra.gmra.mxu0 %vm219_vm2, %v6858_v22 }
0x4d6f   :  { %8936 = vmatpush3.bf16.xpose.msra.mxu0 %v7013_v45  ;;  %8937 = vmatprep.mubr.msk.bf16.mxu0 %vm9426_vm0, %v9424_v0 }
0x4d70   :  { %8947 = vmatprep.subr.bf16.mxu0 %v9424_v0 }
0x4d72   :  { %8932 = vmatmul.mubr.msk.bf16.vlgmr.msra.gmra.mxu1 %vm219_vm2, %v6956_v6 }
0x4d73   :  { %8943 = vmatprep.mubr.msk.bf16.mxu1 %vm9426_vm0, %v9424_v0 }
0x4d76   :  { %8938 = vmatmul.mubr.msk.bf16.vlgmr.msra.gmra.mxu0 %vm219_vm2, %v7006_v7 }
0x4d77   :  { %8949 = vmatprep.mubr.msk.bf16.mxu0 %vm9426_vm0, %v9424_v0 }
0x4e2a   :  { %v6901_v12 = vpop.f32.mrf.mxu1 }
0x4e2c   :  { %v8921_v8 = vpop.f32.mrf.mxu1 }
0x4e2e   :  { %v6904_v15 = vpop.f32.mrf.mxu1  ;;  %v6949_v42 = vpop.f32.mrf.mxu0 }
0x4e2f   :  { %v9124_v9 = vpack.i.bf16 %v6949_v42, %v6901_v12 }
0x4e30   :  { %v8922_v23 = vpop.f32.mrf.mxu1  ;;  %v8927_v11 = vpop.f32.mrf.mxu0 }
0x4e32   :  { %v6952_v19 = vpop.f32.mrf.mxu0  ;;  %v6999_v16 = vpop.f32.mrf.mxu1 }
0x4e33   :  { %v7055_v13 = vsel %vm219_vm2, %v6999_v16, -inf }
0x4e34   :  { %7056 = vmax.xlane.f32.xlu1 %v7055_v13  ;;  %v8928_v54 = vpop.f32.mrf.mxu0  ;;  %v8933_v48 = vpop.f32.mrf.mxu1 }
0x4e36   :  { %v7002_v17 = vpop.f32.mrf.mxu1  ;;  %v7049_v18 = vpop.f32.mrf.mxu0 }
0x4e37   :  { %v7058_v10 = vsel %vm219_vm2, %v7049_v18, -inf }
0x4e38   :  { %v8934_v52 = vpop.f32.mrf.mxu1  ;;  %7059 = vmax.xlane.f32.xlu0 %v7058_v10  ;;  %v8939_v20 = vpop.f32.mrf.mxu0 }
0x4e3a   :  { %v7052_v4 = vpop.f32.mrf.mxu0 }
0x4e3c   :  { %v8940_v27 = vpop.f32.mrf.mxu0 }
0x4ebd   :  { %v7057_v30 = vpop.xlane.xlu1 %7056 }
0x4ebe   :  { %v7061_v46 = vsub.f32 %v6999_v16, %v7057_v30 }
0x4ec0   :  { %v7063_v47 = vmul.f32 1.442695, %v7061_v46 }
0x4ec1   :  { %v7060_v55 = vpop.xlane.xlu0 %7059 }
0x4ec2   :  { %9404 = vpow2.f32 %v7063_v47  ;;  %v7062_v56 = vsub.f32 %v7049_v18, %v7060_v55 }
0x4ec4   :  { %v7065_v21 = vmul.f32 1.442695, %v7062_v56 }
0x4ec6   :  { %9406 = vpow2.f32 %v7065_v21 }
0x4ecf   :  { %v9405_v28 = vpop.eup %9404 }
0x4ed0   :  { %v7067_v29 = vsel %vm219_vm2, %v9405_v28, 0.0 }
0x4ed1   :  { %7068 = vadd.xlane.f32.xlu0 %v7067_v29 }
0x4ed3   :  { %v9407_v5 = vpop.eup %9406 }
0x4ed4   :  { %v7070_v31 = vsel %vm219_vm2, %v9407_v5, 0.0 }
0x4ed5   :  { %7071 = vadd.xlane.f32.xlu1 %v7070_v31  ;;  %v9180_v31 = vld [vmem:[%s10529_s8 + $0x38] sm:$0xff]  }
0x4ee6   :  { %7127 = vrot.lane.b32.xlu1 %v10316_v35, %s11034_s14 }
0x4ee7   :  { %7079 = vrot.lane.b32.xlu0 %v10269_v1, %s11034_s14 }
0x4eea   :  { %9120 = vrot.lane.b32.xlu1 %v9119_v41, %s11034_s14 }
0x4eeb   :  { %9125 = vrot.lane.b32.xlu0 %v9124_v9, %s11035_s20 }
0x4f5a   :  { %v7069_v32 = vpop.xlane.xlu0 %7068 }
0x4f5b   :  { %9408 = vrcp.f32 %v7069_v32 }
0x4f5e   :  { %v7072_v34 = vpop.xlane.xlu1 %7071  ;;  %v7080_v39 = vpop.permute.xlu0 %7079 }
0x4f5f   :  { %9410 = vrcp.f32 %v7072_v34  ;;  %v7085_v36 = vsel %vm344_vm3, %v7080_v39, 0 }
0x4f60   :  { %8942 = vmatpush3.bf16.msra.mxu1 %v7085_v36 }
0x4f61   :  { %8953 = vmatprep.subr.bf16.mxu1 %v9424_v0 }
0x4f62   :  { %v7128_v35 = vpop.permute.xlu1 %7127  ;;  %v9126_v22 = vpop.permute.xlu0 %9125 }
0x4f63   :  { %v7133_v1 = vsel %vm344_vm3, %v7128_v35, 0  ;;  %v9128_v7 = vunpack.i.h.bf16 %v9126_v22  ;;  %v9127_v12 = vunpack.i.l.bf16 %v9126_v22 }
0x4f64   :  { %8948 = vmatpush3.bf16.msra.mxu0 %v7133_v1 }
0x4f65   :  { %8961 = vmatprep.subr.bf16.mxu0 %v9424_v0 }
0x4f66   :  { %v9121_v49 = vpop.permute.xlu1 %9120 }
0x4f67   :  { %v9123_v51 = vunpack.i.h.bf16 %v9121_v49  ;;  %v9122_v50 = vunpack.i.l.bf16 %v9121_v49 }
0x4f68   :  { %v9409_v63 = vpop.eup %9408 }
0x4f69   :  { %v7074_v40 = vmul.f32 %v9409_v63, %v9405_v28  ;;  %v7200_v45 = vsel %vm219_vm2, %v10854_v58, %v9123_v51  ;;  %v7199_v6 = vsel %vm219_vm2, %v10852_v33, %v9122_v50  ;;  %v7914_v33 = vld [vmem:[%s10513_s3 + $0x1] ss:$0 sm:$0xff] }
0x4f6a   :  { %v7201_v9 = vsel %vm1122_vm4, %v7199_v6, %v9127_v12  ;;  %v7202_v23 = vsel %vm1122_vm4, %v7200_v45, %v9128_v7  ;;  %v7936_v12 = vld [vmem:[%s10556_s10 + $0x1] ss:$0 sm:$0xff] }
0x4f6b   :  { %v7077_v41 = vpack.c.bf16 %v7074_v40, %v7074_v40 }
0x4f6c   :  { %v9411_v38 = vpop.eup %9410 }
0x4f6d   :  { %v7076_v24 = vmul.f32 %v9411_v38, %v9407_v5  ;;  %8944 = vmatmul.mubr.msk.bf16.vlgmr.msra.gmra.mxu1 %vm219_vm2, %v7077_v41  ;;  %v9179_v5 = vld [vmem:[%s9705_s11 + $0x10] sm:$0xff]   ;;  %v7918_v41 = vld [vmem:[%s10305_s29 + $0x4] ss:$0 sm:$0xff] }
0x4f6e   :  { %8957 = vmatprep.mubr.msk.bf16.mxu1 %vm9426_vm0, %v9424_v0  ;;  %8954 = vmatpush3.bf16.msra.mxu1 %v9176_v43  ;;  %v7919_v43 = vld [vmem:[%s10310_s1 + $0x4] ss:$0 sm:$0xff] }
0x4f6f   :  { %v7078_v37 = vpack.c.bf16 %v7076_v24, %v7076_v24  ;;  %8955 = vmatprep.subr.bf16.mxu1 %v9424_v0 }
0x4f71   :  { %8950 = vmatmul.mubr.msk.bf16.vlgmr.msra.gmra.mxu0 %vm219_vm2, %v7078_v37 }
0x4f72   :  { %8965 = vmatprep.mubr.msk.bf16.mxu0 %vm9426_vm0, %v9424_v0  ;;  %8956 = vmatpush3.bf16.msra.mxu1 %v9177_v44 }
0x4f73   :  { %8969 = vmatprep.subr.bf16.mxu1 %v9424_v0 }
0x502d   :  { %v7121_v60 = vpop.f32.mrf.mxu1 }
0x502f   :  { %v8945_v3 = vpop.f32.mrf.mxu1 }
0x5031   :  { %v7124_v57 = vpop.f32.mrf.mxu1  ;;  %v7169_v59 = vpop.f32.mrf.mxu0 }
0x5032   :  { %v9129_v61 = vpack.i.bf16 %v7169_v59, %v7121_v60  ;;  %v9181_v59 = vld [vmem:[%s10529_s8 + $0x30] sm:$0xff]  }
0x5033   :  { %v8946_v53 = vpop.f32.mrf.mxu1  ;;  %v8951_v62 = vpop.f32.mrf.mxu0 }
0x5034   :  { %9130 = vrot.lane.b32.xlu1 %v9129_v61, %s11033_s6  ;;  %v9182_v61 = vld [vmem:[%s10529_s8 + $0x28] sm:$0xff]   ;;  %v9183_v53 = vld [vmem:[%s10529_s8 + $0x20] sm:$0xff]  }
0x5035   :  { %v7172_v2 = vpop.f32.mrf.mxu0  ;;  %v7924_v62 = vld [vmem:[%s10547_s2 + $0x1] ss:$0 sm:$0xff] }
0x5037   :  { %v8952_v14 = vpop.f32.mrf.mxu0 }
0x50a6   :  { %v9131_v8 = vpop.permute.xlu1 %9130 }
0x50a7   :  { %v9133_v15 = vunpack.i.h.bf16 %v9131_v8  ;;  %v9132_v42 = vunpack.i.l.bf16 %v9131_v8 }
0x50a9   :  { %v7204_v11 = vsel %vm1125_vm5, %v7202_v23, %v9133_v15  ;;  %v7203_v19 = vsel %vm1125_vm5, %v7201_v9, %v9132_v42 }
0x50aa   :  { %v7205_v16 = vpack.c.bf16 %v7204_v11, %v7203_v19 }
0x50ac   :  { %8958 = vmatmul.mubr.msk.bf16.vlgmr.msra.gmra.mxu1 %vm169_vm1, %v7205_v16 }
0x50ad   :  { %8977 = vmatprep.mubr.msk.bf16.mxu1 %vm9426_vm0, %v9424_v0  ;;  %8970 = vmatpush3.bf16.msra.mxu1 %v9180_v31 }
0x50ae   :  { %8971 = vmatprep.subr.bf16.mxu1 %v9424_v0 }
0x50b1   :  { %8972 = vmatpush3.bf16.msra.mxu1 %v9181_v59 }
0x50b2   :  { %8973 = vmatprep.subr.bf16.mxu1 %v9424_v0 }
0x50b5   :  { %8974 = vmatpush3.bf16.msra.mxu1 %v9182_v61 }
0x50b6   :  { %8975 = vmatprep.subr.bf16.mxu1 %v9424_v0 }
0x50b9   :  { %8976 = vmatpush3.bf16.msra.mxu1 %v9183_v53 }
0x516c   :  { %v7265_v58 = vpop.f32.mrf.mxu1 }
0x516d   :  { %v7266_v13 = vadd.f32 %v7914_v33, %v7265_v58 }
0x516e   :  { %v8959_v54 = vpop.f32.mrf.mxu1 }
0x516f   :  { %v7272_v48 = vadd.f32 %v7266_v13, %v10789_v25 }
0x5170   :  { %v7268_v17 = vpop.f32.mrf.mxu1 }
0x5171   :  { %v7269_v18 = vadd.f32 %v7914_v33, %v7268_v17  ;;  %v7276_v10 = vsel %vm169_vm1, %v7272_v48, 0.0 }
0x5172   :  { %7277 = vadd.xlane.f32.xlu0 %v7276_v10  ;;  %v8960_v52 = vpop.f32.mrf.mxu1 }
0x5173   :  { %v7273_v20 = vadd.f32 %v7269_v18, %v10791_v26  ;;  %v9178_v26 = vld [vmem:[%s9705_s11 + $0x18] sm:$0xff]   ;;  %s9469_s11 = smov 33  }
0x5174   :  { %8962 = vmatpush3.bf16.msra.mxu0 %v9178_v26  ;;  %s7686_s15 = sld [smem:[%s11026_s0 + %s9469_s11]]  }
0x5175   :  { %v7279_v4 = vsel %vm169_vm1, %v7273_v20, 0.0  ;;  %8963 = vmatprep.subr.bf16.mxu0 %v9424_v0 }
0x5176   :  { %7280 = vadd.xlane.f32.xlu1 %v7279_v4 }
0x5178   :  { %8964 = vmatpush3.bf16.msra.mxu0 %v9179_v5  ;;  %v7942_v5 = vld [vmem:[%s10305_s29 + $0x5] ss:$0 sm:$0xff]  ;;  %s7687_s29 = sld [smem:[%s11026_s0 + %s9470_s16]]  }
0x5179   :  { %8981 = vmatprep.subr.bf16.mxu0 %v9424_v0 }
0x51fb   :  { %v7278_v27 = vpop.xlane.xlu0 %7277 }
0x51fc   :  { %v7282_v30 = vmul.f32 0.03125, %v7278_v27 }
0x51fe   :  { %v7284_v46 = vsub.f32 %v7272_v48, %v7282_v30  ;;  %v9184_v30 = vld [vmem:[%s7683_s25 + $0x8] sm:$0xff]  }
0x51ff   :  { %v7281_v47 = vpop.xlane.xlu1 %7280 }
0x5200   :  { %v7283_v55 = vmul.f32 0.03125, %v7281_v47  ;;  %v7286_v25 = vmul.f32 %v7284_v46, %v7284_v46 }
0x5202   :  { %v7285_v56 = vsub.f32 %v7273_v20, %v7283_v55  ;;  %v7288_v21 = vsel %vm169_vm1, %v7286_v25, 0.0 }
0x5203   :  { %7289 = vadd.xlane.f32.xlu0 %v7288_v21 }
0x5204   :  { %v7287_v28 = vmul.f32 %v7285_v56, %v7285_v56 }
0x5206   :  { %v7291_v29 = vsel %vm169_vm1, %v7287_v28, 0.0 }
0x5207   :  { %7292 = vadd.xlane.f32.xlu0 %v7291_v29 }
0x528c   :  { %v7290_v32 = vpop.xlane.xlu0 %7289 }
0x528d   :  { %v7294_v34 = vmul.f32 0.03125, %v7290_v32 }
0x528f   :  { %v7296_v39 = vadd.f32 1e-05, %v7294_v34 }
0x5290   :  { %v7293_v36 = vpop.xlane.xlu0 %7292 }
0x5291   :  { %9412 = vrsqrt.f32 %v7296_v39  ;;  %v7295_v35 = vmul.f32 0.03125, %v7293_v36  ;;  %v7943_v39 = vld [vmem:[%s10310_s1 + $0x5] ss:$0 sm:$0xff] }
0x5293   :  { %v7297_v1 = vadd.f32 1e-05, %v7295_v35 }
0x5295   :  { %9414 = vrsqrt.f32 %v7297_v1 }
0x529e   :  { %v9413_v63 = vpop.eup %9412 }
0x529f   :  { %v7300_v40 = vmul.f32 %v9413_v63, %v7284_v46  ;;  %v9185_v46 = vld [vmem:[%s7683_s25] sm:$0xff]  }
0x52a1   :  { %v7306_v24 = vmul.f32 %v7918_v41, %v7300_v40  ;;  %v9186_v40 = vld [vmem:[%s10816_s28 + $0x8] sm:$0xff]  }
0x52a2   :  { %v9415_v38 = vpop.eup %9414 }
0x52a3   :  { %v7301_v37 = vmul.f32 %v9415_v38, %v7285_v56  ;;  %v7312_v60 = vadd.f32 %v7919_v43, %v7306_v24  ;;  %v7944_v38 = vld [vmem:[%s7684_s7] ss:$0 sm:$0xff] }
0x52a5   :  { %v7307_v44 = vmul.f32 %v7918_v41, %v7301_v37  ;;  %v9187_v41 = vld [vmem:[%s10816_s28] sm:$0xff]  }
0x52a7   :  { %v7313_v3 = vadd.f32 %v7919_v43, %v7307_v44 }
0x52a9   :  { %v7314_v57 = vpack.c.bf16 %v7313_v3, %v7312_v60 }
0x52ab   :  { %8966 = vmatmul.mubr.msk.bf16.vlgmr.msra.gmra.mxu0 %vm169_vm1, %v7314_v57 }
0x52ac   :  { %8985 = vmatprep.mubr.msk.bf16.mxu0 %vm9426_vm0, %v9424_v0  ;;  %8982 = vmatpush3.bf16.msra.mxu0 %v9184_v30 }
0x52ad   :  { %8983 = vmatprep.subr.bf16.mxu0 %v9424_v0 }
0x52b0   :  { %8984 = vmatpush3.bf16.msra.mxu0 %v9185_v46 }
0x52b1   :  { %8989 = vmatprep.subr.bf16.mxu0 %v9424_v0 }
0x536b   :  { %v7374_v2 = vpop.f32.mrf.mxu0 }
0x536c   :  { %v7375_v49 = vadd.f32 %v7924_v62, %v7374_v2 }
0x536d   :  { %v8967_v14 = vpop.f32.mrf.mxu0 }
0x536e   :  { %v7381_v45 = vmax.f32 %v7375_v49, 0.0 }
0x536f   :  { %v7377_v51 = vpop.f32.mrf.mxu0 }
0x5370   :  { %v7378_v50 = vadd.f32 %v7924_v62, %v7377_v51 }
0x5371   :  { %v8968_v22 = vpop.f32.mrf.mxu0 }
0x5372   :  { %v7382_v6 = vmax.f32 %v7378_v50, 0.0 }
0x5374   :  { %v7383_v7 = vpack.c.bf16 %v7382_v6, %v7381_v45 }
0x5376   :  { %8978 = vmatmul.mubr.msk.bf16.vlgmr.msra.gmra.mxu1 %vm1343_vm6, %v7383_v7 }
0x5436   :  { %v7459_v8 = vpop.f32.mrf.mxu1 }
0x5437   :  { %v7460_v15 = vadd.f32 %v7936_v12, %v7459_v8 }
0x5438   :  { %v8979_v42 = vpop.f32.mrf.mxu1 }
0x5439   :  { %v7466_v9 = vadd.f32 %v7460_v15, %v7312_v60 }
0x543a   :  { %v7462_v23 = vpop.f32.mrf.mxu1 }
0x543b   :  { %v7463_v11 = vadd.f32 %v7936_v12, %v7462_v23  ;;  %v7470_v19 = vsel %vm169_vm1, %v7466_v9, 0.0 }
0x543c   :  { %7471 = vadd.xlane.f32.xlu1 %v7470_v19  ;;  %v8980_v16 = vpop.f32.mrf.mxu1 }
0x543d   :  { %v7467_v33 = vadd.f32 %v7463_v11, %v7313_v3 }
0x543f   :  { %v7473_v58 = vsel %vm169_vm1, %v7467_v33, 0.0 }
0x5440   :  { %7474 = vadd.xlane.f32.xlu0 %v7473_v58 }
0x54c5   :  { %v7472_v13 = vpop.xlane.xlu1 %7471 }
0x54c6   :  { %v7476_v54 = vmul.f32 0.03125, %v7472_v13 }
0x54c8   :  { %v7478_v48 = vsub.f32 %v7466_v9, %v7476_v54 }
0x54c9   :  { %v7475_v17 = vpop.xlane.xlu0 %7474 }
0x54ca   :  { %v7477_v18 = vmul.f32 0.03125, %v7475_v17  ;;  %v7480_v10 = vmul.f32 %v7478_v48, %v7478_v48 }
0x54cc   :  { %v7479_v52 = vsub.f32 %v7467_v33, %v7477_v18  ;;  %v7482_v20 = vsel %vm169_vm1, %v7480_v10, 0.0 }
0x54cd   :  { %7483 = vadd.xlane.f32.xlu1 %v7482_v20 }
0x54ce   :  { %v7481_v4 = vmul.f32 %v7479_v52, %v7479_v52 }
0x54d0   :  { %v7485_v27 = vsel %vm169_vm1, %v7481_v4, 0.0 }
0x54d1   :  { %7486 = vadd.xlane.f32.xlu0 %v7485_v27 }
0x5556   :  { %v7484_v47 = vpop.xlane.xlu1 %7483 }
0x5557   :  { %v7488_v55 = vmul.f32 0.03125, %v7484_v47 }
0x5559   :  { %v7490_v25 = vadd.f32 1e-05, %v7488_v55 }
0x555a   :  { %v7487_v56 = vpop.xlane.xlu0 %7486 }
0x555b   :  { %9416 = vrsqrt.f32 %v7490_v25  ;;  %v7489_v21 = vmul.f32 0.03125, %v7487_v56 }
0x555d   :  { %v7491_v28 = vadd.f32 1e-05, %v7489_v21 }
0x555f   :  { %9418 = vrsqrt.f32 %v7491_v28 }
0x5568   :  { %v9417_v29 = vpop.eup %9416 }
0x5569   :  { %v7494_v26 = vmul.f32 %v9417_v29, %v7478_v48 }
0x556b   :  { %v7500_v32 = vmul.f32 %v7942_v5, %v7494_v26 }
0x556c   :  { %v9419_v31 = vpop.eup %9418 }
0x556d   :  { %v7495_v34 = vmul.f32 %v9419_v31, %v7479_v52  ;;  %v7506_v35 = vadd.f32 %v7943_v39, %v7500_v32 }
0x556f   :  { %v7501_v36 = vmul.f32 %v7942_v5, %v7495_v34 }
0x5571   :  { %v7507_v1 = vadd.f32 %v7943_v39, %v7501_v36 }
0x5573   :  { %v7508_v63 = vpack.c.bf16 %v7507_v1, %v7506_v35 }
0x5575   :  { %8986 = vmatmul.mubr.msk.bf16.vlgmr.msra.gmra.mxu0 %vm169_vm1, %v7508_v63 }
0x5576   :  { %8993 = vmatprep.mubr.msk.bf16.mxu0 %vm9426_vm0, %v9424_v0  ;;  %8990 = vmatpush3.bf16.msra.mxu0 %v9186_v40 }
0x5577   :  { %8991 = vmatprep.subr.bf16.mxu0 %v9424_v0  ;;  %v7948_v0 = vld [vmem:[%s7686_s15] ss:$0 sm:$0xff] }
0x557a   :  { %8992 = vmatpush3.bf16.msra.mxu0 %v9187_v41 }
0x5635   :  { %v7569_v24 = vpop.f32.mrf.mxu0 }
0x5636   :  { %v7570_v43 = vadd.f32 %v7944_v38, %v7569_v24 }
0x5637   :  { %v8987_v37 = vpop.f32.mrf.mxu0 }
0x5638   :  { %v7576_v57 = vmax.f32 %v7570_v43, 0.0 }
0x5639   :  { %v7572_v44 = vpop.f32.mrf.mxu0 }
0x563a   :  { %v7573_v60 = vadd.f32 %v7944_v38, %v7572_v44 }
0x563b   :  { %v8988_v3 = vpop.f32.mrf.mxu0 }
0x563c   :  { %v7577_v59 = vmax.f32 %v7573_v60, 0.0 }
0x563e   :  { %v7578_v61 = vpack.c.bf16 %v7577_v59, %v7576_v57 }
0x5640   :  { %8994 = vmatmul.mubr.msk.bf16.vlgmr.msra.gmra.mxu0 %vm169_vm1, %v7578_v61 }
0x5700   :  { %v7639_v53 = vpop.f32.mrf.mxu0 }
0x5701   :  { %v7640_v62 = vadd.f32 %v7948_v0, %v7639_v53 }
0x5702   :  { %v8995_v2 = vpop.f32.mrf.mxu0 }
0x5703   :  { %v7646_v14 = vmax.f32 %v7640_v62, 0.0 }
0x5704   :  { %v7642_v49 = vpop.f32.mrf.mxu0 }
0x5705   :  { %7648 = vst [vmem:[%s7687_s29] sm:$0xff] %v7646_v14  ;;  %v7643_v51 = vadd.f32 %v7948_v0, %v7642_v49 }
0x5706   :  { %v8996_v50 = vpop.f32.mrf.mxu0 }
0x5707   :  { %v7647_v22 = vmax.f32 %v7643_v51, 0.0 }
0x5709   :  { %7649 = vst [vmem:[%s7687_s29 + $0x8] sm:$0xff] %v7647_v22 }

</bundles_post_ra>
